<compile_context>
chip_gen: v5e
topology: v5e:2x2
jax: 0.10.0
libtpu: 0.0.40
codegen_flags: <defaults>
</compile_context>

<pallas_src>
import jax
import jax.numpy as jnp
from jax import lax
from jax.experimental import pallas as pl
from jax.experimental.pallas import tpu as pltpu

EPS = 1e-5

# MXU operand dtype. bf16 gives ~2x MXU throughput and halves weight / im2col VMEM
# traffic on v6e/v7x (and feeds the v5e MXU efficiently while BN/ReLU stay f32).
# Set to jnp.float32 for bit-tight numerics (test tolerance then becomes 1e-3).
MXU_DTYPE = jnp.bfloat16
_MXU_BYTES = jnp.dtype(MXU_DTYPE).itemsize


def _bn_fold(gamma, beta, mean, var, eps=EPS):
    scale = gamma / jnp.sqrt(var + eps)
    shift = beta - mean * scale
    return scale, shift


# ----------------------------------------------------------------------------
# Kernel 1: fused BN + ReLU + ConvTranspose2d(kernel=2, stride=2).
# Grid = (N, kh).  For each kh the matmul produces columns ordered (kw, o), and the
# output block index places them at [n, :, kh, :, :] of a [N, H2, 2, W2, 2*Co]
# array, so  reshape -> [N, 2*H2, 2*W2, Co]  is the exact depth-to-space result.
# ----------------------------------------------------------------------------
def _up_kernel(x2_ref, s0_ref, t0_ref, w_ref, b_ref, o_ref):
    H2, W2, C2 = x2_ref.shape
    y = jnp.maximum(x2_ref[...] * s0_ref[...] + t0_ref[...], 0.0)      # f32 BN+ReLU
    z = jnp.dot(y.reshape(H2 * W2, C2).astype(w_ref.dtype), w_ref[...],
                preferred_element_type=jnp.float32)                     # [H2*W2, 2*Co]
    z = z + b_ref[...]
    o_ref[...] = z.reshape(H2, W2, -1).astype(o_ref.dtype)


# ----------------------------------------------------------------------------
# Kernel 2: fused  BN1+ReLU -> conv3x3 (on the *virtual* concat) -> BN2+ReLU
#           -> conv3x3, one batch element per grid step.
#   pada/padb : zero-bordered padded activations (f32; only the border is zeroed,
#               the interior is fully overwritten every step).
#   col       : im2col buffer (MXU dtype), reused by both convs.  The concat is
#               realized only inside this buffer (inputs1 channels then up channels).
# ----------------------------------------------------------------------------
def _conv_block_kernel(x1_ref, up_ref, s1_ref, t1_ref, w1_ref, s2_ref, t2_ref,
                       w2_ref, o_ref, pada_ref, padb_ref, col_ref):
    H, W, C1 = x1_ref.shape
    Co = o_ref.shape[-1]
    Cin = C1 + Co
    cdt = col_ref.dtype

    # ---- zero only the 1-px borders (perimeter, not the whole (H+2)x(W+2) buffer).
    zrow_a = jnp.zeros((1, W + 2, C1), pada_ref.dtype)
    zcol_a = jnp.zeros((H + 2, 1, C1), pada_ref.dtype)
    pada_ref[0:1, :, :] = zrow_a
    pada_ref[H + 1:H + 2, :, :] = zrow_a
    pada_ref[:, 0:1, :] = zcol_a
    pada_ref[:, W + 1:W + 2, :] = zcol_a
    zrow_b = jnp.zeros((1, W + 2, Co), padb_ref.dtype)
    zcol_b = jnp.zeros((H + 2, 1, Co), padb_ref.dtype)
    padb_ref[0:1, :, :] = zrow_b
    padb_ref[H + 1:H + 2, :, :] = zrow_b
    padb_ref[:, 0:1, :] = zcol_b
    padb_ref[:, W + 1:W + 2, :] = zcol_b

    # ---- BN1 + ReLU on both halves of the (virtual) concat; fill padded interiors.
    a = jnp.maximum(x1_ref[...] * s1_ref[:, 0:C1] + t1_ref[:, 0:C1], 0.0)
    pada_ref[1:H + 1, 1:W + 1, :] = a
    up = up_ref[0:H, 0:W, :]                     # crop == F.pad with negative pad
    b = jnp.maximum(up * s1_ref[:, C1:C1 + Co] + t1_ref[:, C1:C1 + Co], 0.0)
    padb_ref[1:H + 1, 1:W + 1, :] = b

    # ---- conv1: single im2col matmul, K = 9*Cin (concat built directly in `col`).
    for k in range(9):
        kh, kw = k // 3, k % 3
        col_ref[:, k * Cin:k * Cin + C1] = (
            pada_ref[kh:kh + H, kw:kw + W, :].reshape(H * W, C1).astype(cdt))
        col_ref[:, k * Cin + C1:(k + 1) * Cin] = (
            padb_ref[kh:kh + H, kw:kw + W, :].reshape(H * W, Co).astype(cdt))
    h = jnp.dot(col_ref[:, :9 * Cin], w1_ref[...],
                preferred_element_type=jnp.float32)                     # [H*W, Co]

    # ---- BN2 + ReLU; reuse padb (borders already zero) as the padded conv2 input.
    hb = jnp.maximum(h * s2_ref[...] + t2_ref[...], 0.0)
    padb_ref[1:H + 1, 1:W + 1, :] = hb.reshape(H, W, Co)

    # ---- conv2: single im2col matmul, K = 9*Co (reuses the leading lanes of `col`).
    for k in range(9):
        kh, kw = k // 3, k % 3
        col_ref[:, k * Co:(k + 1) * Co] = (
            padb_ref[kh:kh + H, kw:kw + W, :].reshape(H * W, Co).astype(cdt))
    out = jnp.dot(col_ref[:, :9 * Co], w2_ref[...],
                  preferred_element_type=jnp.float32)                   # [H*W, Co]
    o_ref[...] = out.reshape(H, W, Co).astype(o_ref.dtype)


# ----------------------------------------------------------------------------
# Full unetUp forward (wrapper glue around the two kernels).
# ----------------------------------------------------------------------------
def unet_up_forward(inputs1_nchw, inputs2_nchw, params):
    # NCHW -> NHWC at the boundary (channels on the TPU lane axis).
    # TODO(synk): drop these transposes if the surrounding model runs in NHWC.
    x1 = jnp.transpose(inputs1_nchw, (0, 2, 3, 1))
    x2 = jnp.transpose(inputs2_nchw, (0, 2, 3, 1))

    N, H1, W1, C1 = x1.shape
    _, H2, W2, C2 = x2.shape
    Co = params["up_w"].shape[1]
    Cin = C1 + Co
    assert 2 * H2 - (H1 % 2) == H1 and 2 * W2 - (W1 % 2) == W1
    assert params["conv1_w"].shape[1] == Cin

    s0, t0 = _bn_fold(params["bn0_gamma"], params["bn0_beta"],
                      params["bn0_mean"], params["bn0_var"])
    s1, t1 = _bn_fold(params["bn1_gamma"], params["bn1_beta"],
                      params["bn1_mean"], params["bn1_var"])
    s2, t2 = _bn_fold(params["bn2_gamma"], params["bn2_beta"],
                      params["bn2_mean"], params["bn2_var"])

    # ---- kernel 1: BN0 + ReLU + deconv(k=2, s=2) ---------------------------------
    # torch ConvTranspose2d weight [Cin, Co, kh, kw] -> [kh, Cin, (kw, o)]
    w_up = (jnp.transpose(params["up_w"], (2, 0, 3, 1))
            .reshape(2, C2, 2 * Co).astype(MXU_DTYPE))
    b_up = jnp.tile(params["up_b"].reshape(1, 1, Co), (2, 1, 2))         # [kh, 1, 2*Co]

    up_flops = 2 * N * H2 * W2 * C2 * 4 * Co
    up_bytes = (x2.size * 4 + w_up.size * _MXU_BYTES + b_up.size * 4
                + 4 * C2 * 4 + N * H2 * W2 * 4 * Co * 4)

    up_blocked = pl.pallas_call(
        _up_kernel,
        out_shape=jax.ShapeDtypeStruct((N, H2, 2, W2, 2 * Co), jnp.float32),
        grid=(N, 2),
        in_specs=[
            pl.BlockSpec((None, H2, W2, C2), lambda n, kh: (n, 0, 0, 0)),
            pl.BlockSpec((1, C2), lambda n, kh: (0, 0)),
            pl.BlockSpec((1, C2), lambda n, kh: (0, 0)),
            pl.BlockSpec((None, C2, 2 * Co), lambda n, kh: (kh, 0, 0)),
            pl.BlockSpec((None, 1, 2 * Co), lambda n, kh: (kh, 0, 0)),
        ],
        out_specs=pl.BlockSpec((None, H2, None, W2, 2 * Co),
                               lambda n, kh: (n, 0, kh, 0, 0)),
        compiler_params=pltpu.CompilerParams(
            dimension_semantics=("parallel", "parallel")),
        cost_estimate=pl.CostEstimate(flops=up_flops, transcendentals=0,
                                      bytes_accessed=up_bytes),
    )(x2, s0.reshape(1, C2), t0.reshape(1, C2), w_up, b_up)

    # Depth-to-space is a pure row-major reshape of the blocked output (free).
    up_full = up_blocked.reshape(N, 2 * H2, 2 * W2, Co)

    # ---- kernel 2: BN1+ReLU -> conv3x3 -> BN2+ReLU -> conv3x3 ---------------------
    w1 = (jnp.transpose(params["conv1_w"], (2, 3, 1, 0))
          .reshape(9 * Cin, Co).astype(MXU_DTYPE))                       # rows (kh,kw,c)
    w2 = (jnp.transpose(params["conv2_w"], (2, 3, 1, 0))
          .reshape(9 * Co, Co).astype(MXU_DTYPE))

    conv_flops = 2 * N * H1 * W1 * 9 * Co * (Cin + Co)
    conv_bytes = (x1.size * 4 + up_full.size * 4
                  + (w1.size + w2.size) * _MXU_BYTES
                  + (2 * Cin + 2 * Co) * 4 + N * H1 * W1 * Co * 4)

    out_nhwc = pl.pallas_call(
        _conv_block_kernel,
        out_shape=jax.ShapeDtypeStruct((N, H1, W1, Co), jnp.float32),
        grid=(N,),
        in_specs=[
            pl.BlockSpec((None, H1, W1, C1), lambda n: (n, 0, 0, 0)),
            pl.BlockSpec((None, 2 * H2, 2 * W2, Co), lambda n: (n, 0, 0, 0)),
            pl.BlockSpec((1, Cin), lambda n: (0, 0)),
            pl.BlockSpec((1, Cin), lambda n: (0, 0)),
            pl.BlockSpec((9 * Cin, Co), lambda n: (0, 0)),
            pl.BlockSpec((1, Co), lambda n: (0, 0)),
            pl.BlockSpec((1, Co), lambda n: (0, 0)),
            pl.BlockSpec((9 * Co, Co), lambda n: (0, 0)),
        ],
        out_specs=pl.BlockSpec((None, H1, W1, Co), lambda n: (n, 0, 0, 0)),
        scratch_shapes=[
            pltpu.VMEM((H1 + 2, W1 + 2, C1), jnp.float32),   # padded BN1+ReLU(inputs1)
            pltpu.VMEM((H1 + 2, W1 + 2, Co), jnp.float32),   # padded BN+ReLU (reused)
            pltpu.VMEM((H1 * W1, 9 * Cin), MXU_DTYPE),       # im2col buffer (reused)
        ],
        compiler_params=pltpu.CompilerParams(dimension_semantics=("parallel",)),
        cost_estimate=pl.CostEstimate(flops=conv_flops, transcendentals=0,
                                      bytes_accessed=conv_bytes),
    )(x1, up_full, s1.reshape(1, Cin), t1.reshape(1, Cin), w1,
      s2.reshape(1, Co), t2.reshape(1, Co), w2)

    return jnp.transpose(out_nhwc, (0, 3, 1, 2))             # NHWC -> NCHW


# ----------------------------------------------------------------------------
# Pure-JAX reference (NCHW, mirrors the PyTorch ops directly, f32 everywhere).
# ----------------------------------------------------------------------------
def reference_forward(inputs1, inputs2, params):
    def bn_relu(x, g, b, m, v):
        s = g / jnp.sqrt(v + EPS)
        t = b - m * s
        return jnp.maximum(x * s[None, :, None, None] + t[None, :, None, None], 0.0)

    # up
    y2 = bn_relu(inputs2, params["bn0_gamma"], params["bn0_beta"],
                 params["bn0_mean"], params["bn0_var"])
    N, Cin, H2, W2 = y2.shape
    Wt = params["up_w"]                                        # [Cin, Cout, 2, 2]
    Cout = Wt.shape[1]
    z = jnp.einsum("ncij,cokl->noijkl", y2, Wt)                # [N,Cout,H2,W2,2,2]
    z = jnp.transpose(z, (0, 1, 2, 4, 3, 5)).reshape(N, Cout, 2 * H2, 2 * W2)
    out2 = z + params["up_b"][None, :, None, None]

    H1, W1 = inputs1.shape[2], inputs1.shape[3]
    bottom, right = H1 % 2, W1 % 2
    out2 = out2[:, :, :out2.shape[2] - bottom, :out2.shape[3] - right]

    x = jnp.concatenate([inputs1, out2], axis=1)

    def preconv(x, g, b, m, v, w):
        y = bn_relu(x, g, b, m, v)
        return lax.conv_general_dilated(
            y, w, window_strides=(1, 1), padding=((1, 1), (1, 1)),
            dimension_numbers=("NCHW", "OIHW", "NCHW"))

    x = preconv(x, params["bn1_gamma"], params["bn1_beta"],
                params["bn1_mean"], params["bn1_var"], params["conv1_w"])
    x = preconv(x, params["bn2_gamma"], params["bn2_beta"],
                params["bn2_mean"], params["bn2_var"], params["conv2_w"])
    return x


if __name__ == "__main__":
    in_size, out_size = 8, 4              # unetUp(in_size=8, out_size=4, is_deconv=True)
    N, H1, W1 = 2, 16, 16
    H2, W2 = H1 // 2, W1 // 2
    c1 = in_size - out_size               # skip channels so concat has in_size channels

    key = jax.random.PRNGKey(0)
    ks = jax.random.split(key, 20)

    inputs1 = jax.random.normal(ks[0], (N, c1, H1, W1), jnp.float32)
    inputs2 = jax.random.normal(ks[1], (N, in_size, H2, W2), jnp.float32)

    params = {
        "bn0_gamma": 1.0 + 0.1 * jax.random.normal(ks[2], (in_size,), jnp.float32),
        "bn0_beta": 0.1 * jax.random.normal(ks[3], (in_size,), jnp.float32),
        "bn0_mean": 0.1 * jax.random.normal(ks[4], (in_size,), jnp.float32),
        "bn0_var": 0.5 + jax.random.uniform(ks[5], (in_size,), jnp.float32),
        "up_w": 0.2 * jax.random.normal(ks[6], (in_size, out_size, 2, 2), jnp.float32),
        "up_b": 0.1 * jax.random.normal(ks[7], (out_size,), jnp.float32),
        "bn1_gamma": 1.0 + 0.1 * jax.random.normal(ks[8], (in_size,), jnp.float32),
        "bn1_beta": 0.1 * jax.random.normal(ks[9], (in_size,), jnp.float32),
        "bn1_mean": 0.1 * jax.random.normal(ks[10], (in_size,), jnp.float32),
        "bn1_var": 0.5 + jax.random.uniform(ks[11], (in_size,), jnp.float32),
        "conv1_w": 0.2 * jax.random.normal(ks[12], (out_size, in_size, 3, 3), jnp.float32),
        "bn2_gamma": 1.0 + 0.1 * jax.random.normal(ks[13], (out_size,), jnp.float32),
        "bn2_beta": 0.1 * jax.random.normal(ks[14], (out_size,), jnp.float32),
        "bn2_mean": 0.1 * jax.random.normal(ks[15], (out_size,), jnp.float32),
        "bn2_var": 0.5 + jax.random.uniform(ks[16], (out_size,), jnp.float32),
        "conv2_w": 0.2 * jax.random.normal(ks[17], (out_size, out_size, 3, 3), jnp.float32),
    }

    fwd = jax.jit(unet_up_forward)
    out = jax.block_until_ready(fwd(inputs1, inputs2, params))

    assert out.shape == (N, out_size, H1, W1), out.shape

    ref = reference_forward(inputs1, inputs2, params)
    max_err = float(jnp.max(jnp.abs(out - ref)))
    # bf16 MXU operands (f32 accumulation) vs. the all-f32 XLA reference: allow the
    # documented bf16 rounding budget.  With MXU_DTYPE = float32 this tightens to 1e-3.
    tol = 1e-3 if MXU_DTYPE == jnp.float32 else 7.5e-2
    assert max_err < tol, f"max abs error {max_err} (tol {tol})"

    print("KERNEL_OK")
</pallas_src>

<mosaic_0001>
module attributes {stable_mosaic.version = 11 : i64} {
  func.func @_conv_block_kernel(%arg0: i32, %arg1: memref<1x16x16x4xf32, #tpu.memory_space<vmem>>, %arg2: memref<1x16x16x4xf32, #tpu.memory_space<vmem>>, %arg3: memref<1x8xf32, #tpu.memory_space<vmem>>, %arg4: memref<1x8xf32, #tpu.memory_space<vmem>>, %arg5: memref<72x4xbf16, #tpu.memory_space<vmem>>, %arg6: memref<1x4xf32, #tpu.memory_space<vmem>>, %arg7: memref<1x4xf32, #tpu.memory_space<vmem>>, %arg8: memref<36x4xbf16, #tpu.memory_space<vmem>>, %arg9: memref<1x16x16x4xf32, #tpu.memory_space<vmem>>, %arg10: memref<18x18x4xf32, #tpu.memory_space<vmem>>, %arg11: memref<18x18x4xf32, #tpu.memory_space<vmem>>, %arg12: memref<256x72xbf16, #tpu.memory_space<vmem>>) attributes {dimension_semantics = [#tpu.dimension_semantics<parallel>], iteration_bounds = array<i64: 2>, scalar_prefetch = 0 : i64, scratch_operands = 3 : i64, tpu.core_type = #tpu.core_type<tc>, window_params = [{transform_indices = @transform_0, window_bounds = array<i64: 1, 16, 16, 4>}, {transform_indices = @transform_1, window_bounds = array<i64: 1, 16, 16, 4>}, {pipeline_mode = #tpu.pipeline_mode<synchronous>, transform_indices = @transform_2, window_bounds = array<i64: 1, 8>}, {pipeline_mode = #tpu.pipeline_mode<synchronous>, transform_indices = @transform_3, window_bounds = array<i64: 1, 8>}, {pipeline_mode = #tpu.pipeline_mode<synchronous>, transform_indices = @transform_4, window_bounds = array<i64: 72, 4>}, {pipeline_mode = #tpu.pipeline_mode<synchronous>, transform_indices = @transform_5, window_bounds = array<i64: 1, 4>}, {pipeline_mode = #tpu.pipeline_mode<synchronous>, transform_indices = @transform_6, window_bounds = array<i64: 1, 4>}, {pipeline_mode = #tpu.pipeline_mode<synchronous>, transform_indices = @transform_7, window_bounds = array<i64: 36, 4>}, {transform_indices = @transform_8, window_bounds = array<i64: 1, 16, 16, 4>}]} {
    %cst = arith.constant 0.000000e+00 : f32
    %0 = vector.broadcast %cst : f32 to vector<1x18x4xf32>
    %cst_0 = arith.constant 0.000000e+00 : f32
    %1 = vector.broadcast %cst_0 : f32 to vector<18x1x4xf32>
    %c0 = arith.constant 0 : index
    %c0_1 = arith.constant 0 : index
    %c0_2 = arith.constant 0 : index
    %2 = vector.load %arg10[%c0, %c0_1, %c0_2] : memref<18x18x4xf32, #tpu.memory_space<vmem>>, vector<1x18x4xf32>
    tpu.vector_store %arg10[%c0, %c0_1, %c0_2], %0 {strides = array<i32>} : memref<18x18x4xf32, #tpu.memory_space<vmem>>, vector<1x18x4xf32>,
    %c17 = arith.constant 17 : index
    %c0_3 = arith.constant 0 : index
    %c0_4 = arith.constant 0 : index
    %3 = vector.load %arg10[%c17, %c0_3, %c0_4] : memref<18x18x4xf32, #tpu.memory_space<vmem>>, vector<1x18x4xf32>
    tpu.vector_store %arg10[%c17, %c0_3, %c0_4], %0 {strides = array<i32>} : memref<18x18x4xf32, #tpu.memory_space<vmem>>, vector<1x18x4xf32>,
    %c0_5 = arith.constant 0 : index
    %c0_6 = arith.constant 0 : index
    %c0_7 = arith.constant 0 : index
    %4 = vector.load %arg10[%c0_5, %c0_6, %c0_7] : memref<18x18x4xf32, #tpu.memory_space<vmem>>, vector<18x1x4xf32>
    tpu.vector_store %arg10[%c0_5, %c0_6, %c0_7], %1 {strides = array<i32>} : memref<18x18x4xf32, #tpu.memory_space<vmem>>, vector<18x1x4xf32>,
    %c0_8 = arith.constant 0 : index
    %c17_9 = arith.constant 17 : index
    %c0_10 = arith.constant 0 : index
    %5 = vector.load %arg10[%c0_8, %c17_9, %c0_10] : memref<18x18x4xf32, #tpu.memory_space<vmem>>, vector<18x1x4xf32>
    tpu.vector_store %arg10[%c0_8, %c17_9, %c0_10], %1 {strides = array<i32>} : memref<18x18x4xf32, #tpu.memory_space<vmem>>, vector<18x1x4xf32>,
    %cst_11 = arith.constant 0.000000e+00 : f32
    %6 = vector.broadcast %cst_11 : f32 to vector<1x18x4xf32>
    %cst_12 = arith.constant 0.000000e+00 : f32
    %7 = vector.broadcast %cst_12 : f32 to vector<18x1x4xf32>
    %c0_13 = arith.constant 0 : index
    %c0_14 = arith.constant 0 : index
    %c0_15 = arith.constant 0 : index
    %8 = vector.load %arg11[%c0_13, %c0_14, %c0_15] : memref<18x18x4xf32, #tpu.memory_space<vmem>>, vector<1x18x4xf32>
    tpu.vector_store %arg11[%c0_13, %c0_14, %c0_15], %6 {strides = array<i32>} : memref<18x18x4xf32, #tpu.memory_space<vmem>>, vector<1x18x4xf32>,
    %c17_16 = arith.constant 17 : index
    %c0_17 = arith.constant 0 : index
    %c0_18 = arith.constant 0 : index
    %9 = vector.load %arg11[%c17_16, %c0_17, %c0_18] : memref<18x18x4xf32, #tpu.memory_space<vmem>>, vector<1x18x4xf32>
    tpu.vector_store %arg11[%c17_16, %c0_17, %c0_18], %6 {strides = array<i32>} : memref<18x18x4xf32, #tpu.memory_space<vmem>>, vector<1x18x4xf32>,
    %c0_19 = arith.constant 0 : index
    %c0_20 = arith.constant 0 : index
    %c0_21 = arith.constant 0 : index
    %10 = vector.load %arg11[%c0_19, %c0_20, %c0_21] : memref<18x18x4xf32, #tpu.memory_space<vmem>>, vector<18x1x4xf32>
    tpu.vector_store %arg11[%c0_19, %c0_20, %c0_21], %7 {strides = array<i32>} : memref<18x18x4xf32, #tpu.memory_space<vmem>>, vector<18x1x4xf32>,
    %c0_22 = arith.constant 0 : index
    %c17_23 = arith.constant 17 : index
    %c0_24 = arith.constant 0 : index
    %11 = vector.load %arg11[%c0_22, %c17_23, %c0_24] : memref<18x18x4xf32, #tpu.memory_space<vmem>>, vector<18x1x4xf32>
    tpu.vector_store %arg11[%c0_22, %c17_23, %c0_24], %7 {strides = array<i32>} : memref<18x18x4xf32, #tpu.memory_space<vmem>>, vector<18x1x4xf32>,
    %c0_25 = arith.constant 0 : index
    %c0_26 = arith.constant 0 : index
    %c0_27 = arith.constant 0 : index
    %c0_28 = arith.constant 0 : index
    %12 = vector.load %arg1[%c0_25, %c0_26, %c0_27, %c0_28] : memref<1x16x16x4xf32, #tpu.memory_space<vmem>>, vector<1x16x16x4xf32>
    %13 = vector.shape_cast %12 : vector<1x16x16x4xf32> to vector<16x16x4xf32>
    %c0_29 = arith.constant 0 : index
    %c0_30 = arith.constant 0 : index
    %14 = vector.load %arg3[%c0_29, %c0_30] : memref<1x8xf32, #tpu.memory_space<vmem>>, vector<1x4xf32>
    %15 = vector.shape_cast %14 : vector<1x4xf32> to vector<1x1x4xf32>
    %16 = vector.broadcast %15 : vector<1x1x4xf32> to vector<16x16x4xf32>
    %17 = arith.mulf %13, %16 : vector<16x16x4xf32>
    %c0_31 = arith.constant 0 : index
    %c0_32 = arith.constant 0 : index
    %18 = vector.load %arg4[%c0_31, %c0_32] : memref<1x8xf32, #tpu.memory_space<vmem>>, vector<1x4xf32>
    %19 = vector.shape_cast %18 : vector<1x4xf32> to vector<1x1x4xf32>
    %20 = vector.broadcast %19 : vector<1x1x4xf32> to vector<16x16x4xf32>
    %21 = arith.addf %17, %20 : vector<16x16x4xf32>
    %cst_33 = arith.constant 0.000000e+00 : f32
    %22 = vector.broadcast %cst_33 : f32 to vector<16x16x4xf32>
    %23 = arith.maximumf %21, %22 : vector<16x16x4xf32>
    %c1 = arith.constant 1 : index
    %c1_34 = arith.constant 1 : index
    %c0_35 = arith.constant 0 : index
    %24 = vector.load %arg10[%c1, %c1_34, %c0_35] : memref<18x18x4xf32, #tpu.memory_space<vmem>>, vector<16x16x4xf32>
    tpu.vector_store %arg10[%c1, %c1_34, %c0_35], %23 {strides = array<i32>} : memref<18x18x4xf32, #tpu.memory_space<vmem>>, vector<16x16x4xf32>,
    %c0_36 = arith.constant 0 : index
    %c0_37 = arith.constant 0 : index
    %c0_38 = arith.constant 0 : index
    %c0_39 = arith.constant 0 : index
    %25 = vector.load %arg2[%c0_36, %c0_37, %c0_38, %c0_39] : memref<1x16x16x4xf32, #tpu.memory_space<vmem>>, vector<1x16x16x4xf32>
    %26 = vector.shape_cast %25 : vector<1x16x16x4xf32> to vector<16x16x4xf32>
    %c0_40 = arith.constant 0 : index
    %c4 = arith.constant 4 : index
    %27 = vector.load %arg3[%c0_40, %c4] : memref<1x8xf32, #tpu.memory_space<vmem>>, vector<1x4xf32>
    %28 = vector.shape_cast %27 : vector<1x4xf32> to vector<1x1x4xf32>
    %29 = vector.broadcast %28 : vector<1x1x4xf32> to vector<16x16x4xf32>
    %30 = arith.mulf %26, %29 : vector<16x16x4xf32>
    %c0_41 = arith.constant 0 : index
    %c4_42 = arith.constant 4 : index
    %31 = vector.load %arg4[%c0_41, %c4_42] : memref<1x8xf32, #tpu.memory_space<vmem>>, vector<1x4xf32>
    %32 = vector.shape_cast %31 : vector<1x4xf32> to vector<1x1x4xf32>
    %33 = vector.broadcast %32 : vector<1x1x4xf32> to vector<16x16x4xf32>
    %34 = arith.addf %30, %33 : vector<16x16x4xf32>
    %cst_43 = arith.constant 0.000000e+00 : f32
    %35 = vector.broadcast %cst_43 : f32 to vector<16x16x4xf32>
    %36 = arith.maximumf %34, %35 : vector<16x16x4xf32>
    %c1_44 = arith.constant 1 : index
    %c1_45 = arith.constant 1 : index
    %c0_46 = arith.constant 0 : index
    %37 = vector.load %arg11[%c1_44, %c1_45, %c0_46] : memref<18x18x4xf32, #tpu.memory_space<vmem>>, vector<16x16x4xf32>
    tpu.vector_store %arg11[%c1_44, %c1_45, %c0_46], %36 {strides = array<i32>} : memref<18x18x4xf32, #tpu.memory_space<vmem>>, vector<16x16x4xf32>,
    %c0_47 = arith.constant 0 : index
    %c0_48 = arith.constant 0 : index
    %c0_49 = arith.constant 0 : index
    %38 = vector.load %arg10[%c0_47, %c0_48, %c0_49] : memref<18x18x4xf32, #tpu.memory_space<vmem>>, vector<16x16x4xf32>
    %39 = vector.shape_cast %38 : vector<16x16x4xf32> to vector<256x4xf32>
    %40 = arith.truncf %39 : vector<256x4xf32> to vector<256x4xbf16>
    %c0_50 = arith.constant 0 : index
    %c0_51 = arith.constant 0 : index
    %41 = vector.load %arg12[%c0_50, %c0_51] : memref<256x72xbf16, #tpu.memory_space<vmem>>, vector<256x4xbf16>
    tpu.vector_store %arg12[%c0_50, %c0_51], %40 {strides = array<i32>} : memref<256x72xbf16, #tpu.memory_space<vmem>>, vector<256x4xbf16>,
    %c0_52 = arith.constant 0 : index
    %c0_53 = arith.constant 0 : index
    %c0_54 = arith.constant 0 : index
    %42 = vector.load %arg11[%c0_52, %c0_53, %c0_54] : memref<18x18x4xf32, #tpu.memory_space<vmem>>, vector<16x16x4xf32>
    %43 = vector.shape_cast %42 : vector<16x16x4xf32> to vector<256x4xf32>
    %44 = arith.truncf %43 : vector<256x4xf32> to vector<256x4xbf16>
    %c0_55 = arith.constant 0 : index
    %c4_56 = arith.constant 4 : index
    %45 = vector.load %arg12[%c0_55, %c4_56] : memref<256x72xbf16, #tpu.memory_space<vmem>>, vector<256x4xbf16>
    tpu.vector_store %arg12[%c0_55, %c4_56], %44 {strides = array<i32>} : memref<256x72xbf16, #tpu.memory_space<vmem>>, vector<256x4xbf16>,
    %c0_57 = arith.constant 0 : index
    %c1_58 = arith.constant 1 : index
    %c0_59 = arith.constant 0 : index
    %46 = vector.load %arg10[%c0_57, %c1_58, %c0_59] : memref<18x18x4xf32, #tpu.memory_space<vmem>>, vector<16x16x4xf32>
    %47 = vector.shape_cast %46 : vector<16x16x4xf32> to vector<256x4xf32>
    %48 = arith.truncf %47 : vector<256x4xf32> to vector<256x4xbf16>
    %c0_60 = arith.constant 0 : index
    %c8 = arith.constant 8 : index
    %49 = vector.load %arg12[%c0_60, %c8] : memref<256x72xbf16, #tpu.memory_space<vmem>>, vector<256x4xbf16>
    tpu.vector_store %arg12[%c0_60, %c8], %48 {strides = array<i32>} : memref<256x72xbf16, #tpu.memory_space<vmem>>, vector<256x4xbf16>,
    %c0_61 = arith.constant 0 : index
    %c1_62 = arith.constant 1 : index
    %c0_63 = arith.constant 0 : index
    %50 = vector.load %arg11[%c0_61, %c1_62, %c0_63] : memref<18x18x4xf32, #tpu.memory_space<vmem>>, vector<16x16x4xf32>
    %51 = vector.shape_cast %50 : vector<16x16x4xf32> to vector<256x4xf32>
    %52 = arith.truncf %51 : vector<256x4xf32> to vector<256x4xbf16>
    %c0_64 = arith.constant 0 : index
    %c12 = arith.constant 12 : index
    %53 = vector.load %arg12[%c0_64, %c12] : memref<256x72xbf16, #tpu.memory_space<vmem>>, vector<256x4xbf16>
    tpu.vector_store %arg12[%c0_64, %c12], %52 {strides = array<i32>} : memref<256x72xbf16, #tpu.memory_space<vmem>>, vector<256x4xbf16>,
    %c0_65 = arith.constant 0 : index
    %c2 = arith.constant 2 : index
    %c0_66 = arith.constant 0 : index
    %54 = vector.load %arg10[%c0_65, %c2, %c0_66] : memref<18x18x4xf32, #tpu.memory_space<vmem>>, vector<16x16x4xf32>
    %55 = vector.shape_cast %54 : vector<16x16x4xf32> to vector<256x4xf32>
    %56 = arith.truncf %55 : vector<256x4xf32> to vector<256x4xbf16>
    %c0_67 = arith.constant 0 : index
    %c16 = arith.constant 16 : index
    %57 = vector.load %arg12[%c0_67, %c16] : memref<256x72xbf16, #tpu.memory_space<vmem>>, vector<256x4xbf16>
    tpu.vector_store %arg12[%c0_67, %c16], %56 {strides = array<i32>} : memref<256x72xbf16, #tpu.memory_space<vmem>>, vector<256x4xbf16>,
    %c0_68 = arith.constant 0 : index
    %c2_69 = arith.constant 2 : index
    %c0_70 = arith.constant 0 : index
    %58 = vector.load %arg11[%c0_68, %c2_69, %c0_70] : memref<18x18x4xf32, #tpu.memory_space<vmem>>, vector<16x16x4xf32>
    %59 = vector.shape_cast %58 : vector<16x16x4xf32> to vector<256x4xf32>
    %60 = arith.truncf %59 : vector<256x4xf32> to vector<256x4xbf16>
    %c0_71 = arith.constant 0 : index
    %c20 = arith.constant 20 : index
    %61 = vector.load %arg12[%c0_71, %c20] : memref<256x72xbf16, #tpu.memory_space<vmem>>, vector<256x4xbf16>
    tpu.vector_store %arg12[%c0_71, %c20], %60 {strides = array<i32>} : memref<256x72xbf16, #tpu.memory_space<vmem>>, vector<256x4xbf16>,
    %c1_72 = arith.constant 1 : index
    %c0_73 = arith.constant 0 : index
    %c0_74 = arith.constant 0 : index
    %62 = vector.load %arg10[%c1_72, %c0_73, %c0_74] : memref<18x18x4xf32, #tpu.memory_space<vmem>>, vector<16x16x4xf32>
    %63 = vector.shape_cast %62 : vector<16x16x4xf32> to vector<256x4xf32>
    %64 = arith.truncf %63 : vector<256x4xf32> to vector<256x4xbf16>
    %c0_75 = arith.constant 0 : index
    %c24 = arith.constant 24 : index
    %65 = vector.load %arg12[%c0_75, %c24] : memref<256x72xbf16, #tpu.memory_space<vmem>>, vector<256x4xbf16>
    tpu.vector_store %arg12[%c0_75, %c24], %64 {strides = array<i32>} : memref<256x72xbf16, #tpu.memory_space<vmem>>, vector<256x4xbf16>,
    %c1_76 = arith.constant 1 : index
    %c0_77 = arith.constant 0 : index
    %c0_78 = arith.constant 0 : index
    %66 = vector.load %arg11[%c1_76, %c0_77, %c0_78] : memref<18x18x4xf32, #tpu.memory_space<vmem>>, vector<16x16x4xf32>
    %67 = vector.shape_cast %66 : vector<16x16x4xf32> to vector<256x4xf32>
    %68 = arith.truncf %67 : vector<256x4xf32> to vector<256x4xbf16>
    %c0_79 = arith.constant 0 : index
    %c28 = arith.constant 28 : index
    %69 = vector.load %arg12[%c0_79, %c28] : memref<256x72xbf16, #tpu.memory_space<vmem>>, vector<256x4xbf16>
    tpu.vector_store %arg12[%c0_79, %c28], %68 {strides = array<i32>} : memref<256x72xbf16, #tpu.memory_space<vmem>>, vector<256x4xbf16>,
    %c1_80 = arith.constant 1 : index
    %c1_81 = arith.constant 1 : index
    %c0_82 = arith.constant 0 : index
    %70 = vector.load %arg10[%c1_80, %c1_81, %c0_82] : memref<18x18x4xf32, #tpu.memory_space<vmem>>, vector<16x16x4xf32>
    %71 = vector.shape_cast %70 : vector<16x16x4xf32> to vector<256x4xf32>
    %72 = arith.truncf %71 : vector<256x4xf32> to vector<256x4xbf16>
    %c0_83 = arith.constant 0 : index
    %c32 = arith.constant 32 : index
    %73 = vector.load %arg12[%c0_83, %c32] : memref<256x72xbf16, #tpu.memory_space<vmem>>, vector<256x4xbf16>
    tpu.vector_store %arg12[%c0_83, %c32], %72 {strides = array<i32>} : memref<256x72xbf16, #tpu.memory_space<vmem>>, vector<256x4xbf16>,
    %c1_84 = arith.constant 1 : index
    %c1_85 = arith.constant 1 : index
    %c0_86 = arith.constant 0 : index
    %74 = vector.load %arg11[%c1_84, %c1_85, %c0_86] : memref<18x18x4xf32, #tpu.memory_space<vmem>>, vector<16x16x4xf32>
    %75 = vector.shape_cast %74 : vector<16x16x4xf32> to vector<256x4xf32>
    %76 = arith.truncf %75 : vector<256x4xf32> to vector<256x4xbf16>
    %c0_87 = arith.constant 0 : index
    %c36 = arith.constant 36 : index
    %77 = vector.load %arg12[%c0_87, %c36] : memref<256x72xbf16, #tpu.memory_space<vmem>>, vector<256x4xbf16>
    tpu.vector_store %arg12[%c0_87, %c36], %76 {strides = array<i32>} : memref<256x72xbf16, #tpu.memory_space<vmem>>, vector<256x4xbf16>,
    %c1_88 = arith.constant 1 : index
    %c2_89 = arith.constant 2 : index
    %c0_90 = arith.constant 0 : index
    %78 = vector.load %arg10[%c1_88, %c2_89, %c0_90] : memref<18x18x4xf32, #tpu.memory_space<vmem>>, vector<16x16x4xf32>
    %79 = vector.shape_cast %78 : vector<16x16x4xf32> to vector<256x4xf32>
    %80 = arith.truncf %79 : vector<256x4xf32> to vector<256x4xbf16>
    %c0_91 = arith.constant 0 : index
    %c40 = arith.constant 40 : index
    %81 = vector.load %arg12[%c0_91, %c40] : memref<256x72xbf16, #tpu.memory_space<vmem>>, vector<256x4xbf16>
    tpu.vector_store %arg12[%c0_91, %c40], %80 {strides = array<i32>} : memref<256x72xbf16, #tpu.memory_space<vmem>>, vector<256x4xbf16>,
    %c1_92 = arith.constant 1 : index
    %c2_93 = arith.constant 2 : index
    %c0_94 = arith.constant 0 : index
    %82 = vector.load %arg11[%c1_92, %c2_93, %c0_94] : memref<18x18x4xf32, #tpu.memory_space<vmem>>, vector<16x16x4xf32>
    %83 = vector.shape_cast %82 : vector<16x16x4xf32> to vector<256x4xf32>
    %84 = arith.truncf %83 : vector<256x4xf32> to vector<256x4xbf16>
    %c0_95 = arith.constant 0 : index
    %c44 = arith.constant 44 : index
    %85 = vector.load %arg12[%c0_95, %c44] : memref<256x72xbf16, #tpu.memory_space<vmem>>, vector<256x4xbf16>
    tpu.vector_store %arg12[%c0_95, %c44], %84 {strides = array<i32>} : memref<256x72xbf16, #tpu.memory_space<vmem>>, vector<256x4xbf16>,
    %c2_96 = arith.constant 2 : index
    %c0_97 = arith.constant 0 : index
    %c0_98 = arith.constant 0 : index
    %86 = vector.load %arg10[%c2_96, %c0_97, %c0_98] : memref<18x18x4xf32, #tpu.memory_space<vmem>>, vector<16x16x4xf32>
    %87 = vector.shape_cast %86 : vector<16x16x4xf32> to vector<256x4xf32>
    %88 = arith.truncf %87 : vector<256x4xf32> to vector<256x4xbf16>
    %c0_99 = arith.constant 0 : index
    %c48 = arith.constant 48 : index
    %89 = vector.load %arg12[%c0_99, %c48] : memref<256x72xbf16, #tpu.memory_space<vmem>>, vector<256x4xbf16>
    tpu.vector_store %arg12[%c0_99, %c48], %88 {strides = array<i32>} : memref<256x72xbf16, #tpu.memory_space<vmem>>, vector<256x4xbf16>,
    %c2_100 = arith.constant 2 : index
    %c0_101 = arith.constant 0 : index
    %c0_102 = arith.constant 0 : index
    %90 = vector.load %arg11[%c2_100, %c0_101, %c0_102] : memref<18x18x4xf32, #tpu.memory_space<vmem>>, vector<16x16x4xf32>
    %91 = vector.shape_cast %90 : vector<16x16x4xf32> to vector<256x4xf32>
    %92 = arith.truncf %91 : vector<256x4xf32> to vector<256x4xbf16>
    %c0_103 = arith.constant 0 : index
    %c52 = arith.constant 52 : index
    %93 = vector.load %arg12[%c0_103, %c52] : memref<256x72xbf16, #tpu.memory_space<vmem>>, vector<256x4xbf16>
    tpu.vector_store %arg12[%c0_103, %c52], %92 {strides = array<i32>} : memref<256x72xbf16, #tpu.memory_space<vmem>>, vector<256x4xbf16>,
    %c2_104 = arith.constant 2 : index
    %c1_105 = arith.constant 1 : index
    %c0_106 = arith.constant 0 : index
    %94 = vector.load %arg10[%c2_104, %c1_105, %c0_106] : memref<18x18x4xf32, #tpu.memory_space<vmem>>, vector<16x16x4xf32>
    %95 = vector.shape_cast %94 : vector<16x16x4xf32> to vector<256x4xf32>
    %96 = arith.truncf %95 : vector<256x4xf32> to vector<256x4xbf16>
    %c0_107 = arith.constant 0 : index
    %c56 = arith.constant 56 : index
    %97 = vector.load %arg12[%c0_107, %c56] : memref<256x72xbf16, #tpu.memory_space<vmem>>, vector<256x4xbf16>
    tpu.vector_store %arg12[%c0_107, %c56], %96 {strides = array<i32>} : memref<256x72xbf16, #tpu.memory_space<vmem>>, vector<256x4xbf16>,
    %c2_108 = arith.constant 2 : index
    %c1_109 = arith.constant 1 : index
    %c0_110 = arith.constant 0 : index
    %98 = vector.load %arg11[%c2_108, %c1_109, %c0_110] : memref<18x18x4xf32, #tpu.memory_space<vmem>>, vector<16x16x4xf32>
    %99 = vector.shape_cast %98 : vector<16x16x4xf32> to vector<256x4xf32>
    %100 = arith.truncf %99 : vector<256x4xf32> to vector<256x4xbf16>
    %c0_111 = arith.constant 0 : index
    %c60 = arith.constant 60 : index
    %101 = vector.load %arg12[%c0_111, %c60] : memref<256x72xbf16, #tpu.memory_space<vmem>>, vector<256x4xbf16>
    tpu.vector_store %arg12[%c0_111, %c60], %100 {strides = array<i32>} : memref<256x72xbf16, #tpu.memory_space<vmem>>, vector<256x4xbf16>,
    %c2_112 = arith.constant 2 : index
    %c2_113 = arith.constant 2 : index
    %c0_114 = arith.constant 0 : index
    %102 = vector.load %arg10[%c2_112, %c2_113, %c0_114] : memref<18x18x4xf32, #tpu.memory_space<vmem>>, vector<16x16x4xf32>
    %103 = vector.shape_cast %102 : vector<16x16x4xf32> to vector<256x4xf32>
    %104 = arith.truncf %103 : vector<256x4xf32> to vector<256x4xbf16>
    %c0_115 = arith.constant 0 : index
    %c64 = arith.constant 64 : index
    %105 = vector.load %arg12[%c0_115, %c64] : memref<256x72xbf16, #tpu.memory_space<vmem>>, vector<256x4xbf16>
    tpu.vector_store %arg12[%c0_115, %c64], %104 {strides = array<i32>} : memref<256x72xbf16, #tpu.memory_space<vmem>>, vector<256x4xbf16>,
    %c2_116 = arith.constant 2 : index
    %c2_117 = arith.constant 2 : index
    %c0_118 = arith.constant 0 : index
    %106 = vector.load %arg11[%c2_116, %c2_117, %c0_118] : memref<18x18x4xf32, #tpu.memory_space<vmem>>, vector<16x16x4xf32>
    %107 = vector.shape_cast %106 : vector<16x16x4xf32> to vector<256x4xf32>
    %108 = arith.truncf %107 : vector<256x4xf32> to vector<256x4xbf16>
    %c0_119 = arith.constant 0 : index
    %c68 = arith.constant 68 : index
    %109 = vector.load %arg12[%c0_119, %c68] : memref<256x72xbf16, #tpu.memory_space<vmem>>, vector<256x4xbf16>
    tpu.vector_store %arg12[%c0_119, %c68], %108 {strides = array<i32>} : memref<256x72xbf16, #tpu.memory_space<vmem>>, vector<256x4xbf16>,
    %c0_120 = arith.constant 0 : index
    %c0_121 = arith.constant 0 : index
    %110 = vector.load %arg12[%c0_120, %c0_121] : memref<256x72xbf16, #tpu.memory_space<vmem>>, vector<256x72xbf16>
    %c0_122 = arith.constant 0 : index
    %c0_123 = arith.constant 0 : index
    %111 = vector.load %arg5[%c0_122, %c0_123] : memref<72x4xbf16, #tpu.memory_space<vmem>>, vector<72x4xbf16>
    %cst_124 = arith.constant dense<0.000000e+00> : vector<256x4xf32>
    %112 = tpu.matmul %110, %111, %cst_124 {dimension_numbers = #tpu.dot_dimension_numbers<[1], [0], [0], [1], [0, 0, 1, 1], [], []>} : vector<256x72xbf16>, vector<72x4xbf16>, vector<256x4xf32> -> vector<256x4xf32>
    %c0_125 = arith.constant 0 : index
    %c0_126 = arith.constant 0 : index
    %113 = vector.load %arg6[%c0_125, %c0_126] : memref<1x4xf32, #tpu.memory_space<vmem>>, vector<1x4xf32>
    %114 = vector.broadcast %113 : vector<1x4xf32> to vector<256x4xf32>
    %115 = arith.mulf %112, %114 : vector<256x4xf32>
    %c0_127 = arith.constant 0 : index
    %c0_128 = arith.constant 0 : index
    %116 = vector.load %arg7[%c0_127, %c0_128] : memref<1x4xf32, #tpu.memory_space<vmem>>, vector<1x4xf32>
    %117 = vector.broadcast %116 : vector<1x4xf32> to vector<256x4xf32>
    %118 = arith.addf %115, %117 : vector<256x4xf32>
    %cst_129 = arith.constant 0.000000e+00 : f32
    %119 = vector.broadcast %cst_129 : f32 to vector<256x4xf32>
    %120 = arith.maximumf %118, %119 : vector<256x4xf32>
    %121 = vector.shape_cast %120 : vector<256x4xf32> to vector<16x16x4xf32>
    %c1_130 = arith.constant 1 : index
    %c1_131 = arith.constant 1 : index
    %c0_132 = arith.constant 0 : index
    %122 = vector.load %arg11[%c1_130, %c1_131, %c0_132] : memref<18x18x4xf32, #tpu.memory_space<vmem>>, vector<16x16x4xf32>
    tpu.vector_store %arg11[%c1_130, %c1_131, %c0_132], %121 {strides = array<i32>} : memref<18x18x4xf32, #tpu.memory_space<vmem>>, vector<16x16x4xf32>,
    %c0_133 = arith.constant 0 : index
    %c0_134 = arith.constant 0 : index
    %c0_135 = arith.constant 0 : index
    %123 = vector.load %arg11[%c0_133, %c0_134, %c0_135] : memref<18x18x4xf32, #tpu.memory_space<vmem>>, vector<16x16x4xf32>
    %124 = vector.shape_cast %123 : vector<16x16x4xf32> to vector<256x4xf32>
    %125 = arith.truncf %124 : vector<256x4xf32> to vector<256x4xbf16>
    %c0_136 = arith.constant 0 : index
    %c0_137 = arith.constant 0 : index
    %126 = vector.load %arg12[%c0_136, %c0_137] : memref<256x72xbf16, #tpu.memory_space<vmem>>, vector<256x4xbf16>
    tpu.vector_store %arg12[%c0_136, %c0_137], %125 {strides = array<i32>} : memref<256x72xbf16, #tpu.memory_space<vmem>>, vector<256x4xbf16>,
    %c0_138 = arith.constant 0 : index
    %c1_139 = arith.constant 1 : index
    %c0_140 = arith.constant 0 : index
    %127 = vector.load %arg11[%c0_138, %c1_139, %c0_140] : memref<18x18x4xf32, #tpu.memory_space<vmem>>, vector<16x16x4xf32>
    %128 = vector.shape_cast %127 : vector<16x16x4xf32> to vector<256x4xf32>
    %129 = arith.truncf %128 : vector<256x4xf32> to vector<256x4xbf16>
    %c0_141 = arith.constant 0 : index
    %c4_142 = arith.constant 4 : index
    %130 = vector.load %arg12[%c0_141, %c4_142] : memref<256x72xbf16, #tpu.memory_space<vmem>>, vector<256x4xbf16>
    tpu.vector_store %arg12[%c0_141, %c4_142], %129 {strides = array<i32>} : memref<256x72xbf16, #tpu.memory_space<vmem>>, vector<256x4xbf16>,
    %c0_143 = arith.constant 0 : index
    %c2_144 = arith.constant 2 : index
    %c0_145 = arith.constant 0 : index
    %131 = vector.load %arg11[%c0_143, %c2_144, %c0_145] : memref<18x18x4xf32, #tpu.memory_space<vmem>>, vector<16x16x4xf32>
    %132 = vector.shape_cast %131 : vector<16x16x4xf32> to vector<256x4xf32>
    %133 = arith.truncf %132 : vector<256x4xf32> to vector<256x4xbf16>
    %c0_146 = arith.constant 0 : index
    %c8_147 = arith.constant 8 : index
    %134 = vector.load %arg12[%c0_146, %c8_147] : memref<256x72xbf16, #tpu.memory_space<vmem>>, vector<256x4xbf16>
    tpu.vector_store %arg12[%c0_146, %c8_147], %133 {strides = array<i32>} : memref<256x72xbf16, #tpu.memory_space<vmem>>, vector<256x4xbf16>,
    %c1_148 = arith.constant 1 : index
    %c0_149 = arith.constant 0 : index
    %c0_150 = arith.constant 0 : index
    %135 = vector.load %arg11[%c1_148, %c0_149, %c0_150] : memref<18x18x4xf32, #tpu.memory_space<vmem>>, vector<16x16x4xf32>
    %136 = vector.shape_cast %135 : vector<16x16x4xf32> to vector<256x4xf32>
    %137 = arith.truncf %136 : vector<256x4xf32> to vector<256x4xbf16>
    %c0_151 = arith.constant 0 : index
    %c12_152 = arith.constant 12 : index
    %138 = vector.load %arg12[%c0_151, %c12_152] : memref<256x72xbf16, #tpu.memory_space<vmem>>, vector<256x4xbf16>
    tpu.vector_store %arg12[%c0_151, %c12_152], %137 {strides = array<i32>} : memref<256x72xbf16, #tpu.memory_space<vmem>>, vector<256x4xbf16>,
    %c1_153 = arith.constant 1 : index
    %c1_154 = arith.constant 1 : index
    %c0_155 = arith.constant 0 : index
    %139 = vector.load %arg11[%c1_153, %c1_154, %c0_155] : memref<18x18x4xf32, #tpu.memory_space<vmem>>, vector<16x16x4xf32>
    %140 = vector.shape_cast %139 : vector<16x16x4xf32> to vector<256x4xf32>
    %141 = arith.truncf %140 : vector<256x4xf32> to vector<256x4xbf16>
    %c0_156 = arith.constant 0 : index
    %c16_157 = arith.constant 16 : index
    %142 = vector.load %arg12[%c0_156, %c16_157] : memref<256x72xbf16, #tpu.memory_space<vmem>>, vector<256x4xbf16>
    tpu.vector_store %arg12[%c0_156, %c16_157], %141 {strides = array<i32>} : memref<256x72xbf16, #tpu.memory_space<vmem>>, vector<256x4xbf16>,
    %c1_158 = arith.constant 1 : index
    %c2_159 = arith.constant 2 : index
    %c0_160 = arith.constant 0 : index
    %143 = vector.load %arg11[%c1_158, %c2_159, %c0_160] : memref<18x18x4xf32, #tpu.memory_space<vmem>>, vector<16x16x4xf32>
    %144 = vector.shape_cast %143 : vector<16x16x4xf32> to vector<256x4xf32>
    %145 = arith.truncf %144 : vector<256x4xf32> to vector<256x4xbf16>
    %c0_161 = arith.constant 0 : index
    %c20_162 = arith.constant 20 : index
    %146 = vector.load %arg12[%c0_161, %c20_162] : memref<256x72xbf16, #tpu.memory_space<vmem>>, vector<256x4xbf16>
    tpu.vector_store %arg12[%c0_161, %c20_162], %145 {strides = array<i32>} : memref<256x72xbf16, #tpu.memory_space<vmem>>, vector<256x4xbf16>,
    %c2_163 = arith.constant 2 : index
    %c0_164 = arith.constant 0 : index
    %c0_165 = arith.constant 0 : index
    %147 = vector.load %arg11[%c2_163, %c0_164, %c0_165] : memref<18x18x4xf32, #tpu.memory_space<vmem>>, vector<16x16x4xf32>
    %148 = vector.shape_cast %147 : vector<16x16x4xf32> to vector<256x4xf32>
    %149 = arith.truncf %148 : vector<256x4xf32> to vector<256x4xbf16>
    %c0_166 = arith.constant 0 : index
    %c24_167 = arith.constant 24 : index
    %150 = vector.load %arg12[%c0_166, %c24_167] : memref<256x72xbf16, #tpu.memory_space<vmem>>, vector<256x4xbf16>
    tpu.vector_store %arg12[%c0_166, %c24_167], %149 {strides = array<i32>} : memref<256x72xbf16, #tpu.memory_space<vmem>>, vector<256x4xbf16>,
    %c2_168 = arith.constant 2 : index
    %c1_169 = arith.constant 1 : index
    %c0_170 = arith.constant 0 : index
    %151 = vector.load %arg11[%c2_168, %c1_169, %c0_170] : memref<18x18x4xf32, #tpu.memory_space<vmem>>, vector<16x16x4xf32>
    %152 = vector.shape_cast %151 : vector<16x16x4xf32> to vector<256x4xf32>
    %153 = arith.truncf %152 : vector<256x4xf32> to vector<256x4xbf16>
    %c0_171 = arith.constant 0 : index
    %c28_172 = arith.constant 28 : index
    %154 = vector.load %arg12[%c0_171, %c28_172] : memref<256x72xbf16, #tpu.memory_space<vmem>>, vector<256x4xbf16>
    tpu.vector_store %arg12[%c0_171, %c28_172], %153 {strides = array<i32>} : memref<256x72xbf16, #tpu.memory_space<vmem>>, vector<256x4xbf16>,
    %c2_173 = arith.constant 2 : index
    %c2_174 = arith.constant 2 : index
    %c0_175 = arith.constant 0 : index
    %155 = vector.load %arg11[%c2_173, %c2_174, %c0_175] : memref<18x18x4xf32, #tpu.memory_space<vmem>>, vector<16x16x4xf32>
    %156 = vector.shape_cast %155 : vector<16x16x4xf32> to vector<256x4xf32>
    %157 = arith.truncf %156 : vector<256x4xf32> to vector<256x4xbf16>
    %c0_176 = arith.constant 0 : index
    %c32_177 = arith.constant 32 : index
    %158 = vector.load %arg12[%c0_176, %c32_177] : memref<256x72xbf16, #tpu.memory_space<vmem>>, vector<256x4xbf16>
    tpu.vector_store %arg12[%c0_176, %c32_177], %157 {strides = array<i32>} : memref<256x72xbf16, #tpu.memory_space<vmem>>, vector<256x4xbf16>,
    %c0_178 = arith.constant 0 : index
    %c0_179 = arith.constant 0 : index
    %159 = vector.load %arg12[%c0_178, %c0_179] : memref<256x72xbf16, #tpu.memory_space<vmem>>, vector<256x36xbf16>
    %c0_180 = arith.constant 0 : index
    %c0_181 = arith.constant 0 : index
    %160 = vector.load %arg8[%c0_180, %c0_181] : memref<36x4xbf16, #tpu.memory_space<vmem>>, vector<36x4xbf16>
    %cst_182 = arith.constant dense<0.000000e+00> : vector<256x4xf32>
    %161 = tpu.matmul %159, %160, %cst_182 {dimension_numbers = #tpu.dot_dimension_numbers<[1], [0], [0], [1], [0, 0, 1, 1], [], []>} : vector<256x36xbf16>, vector<36x4xbf16>, vector<256x4xf32> -> vector<256x4xf32>
    %162 = vector.shape_cast %161 : vector<256x4xf32> to vector<16x16x4xf32>
    %c0_183 = arith.constant 0 : index
    %c0_184 = arith.constant 0 : index
    %c0_185 = arith.constant 0 : index
    %c0_186 = arith.constant 0 : index
    %163 = vector.load %arg9[%c0_183, %c0_184, %c0_185, %c0_186] : memref<1x16x16x4xf32, #tpu.memory_space<vmem>>, vector<1x16x16x4xf32>
    %164 = vector.shape_cast %163 : vector<1x16x16x4xf32> to vector<16x16x4xf32>
    %165 = vector.shape_cast %162 : vector<16x16x4xf32> to vector<1x16x16x4xf32>
    tpu.vector_store %arg9[%c0_183, %c0_184, %c0_185, %c0_186], %165 {strides = array<i32>} : memref<1x16x16x4xf32, #tpu.memory_space<vmem>>, vector<1x16x16x4xf32>,
    return
  }
  func.func @transform_0(%arg0: i32) -> (i32, i32, i32, i32) {
    %c0_i32 = arith.constant 0 : i32
    %c0_i32_0 = arith.constant 0 : i32
    %c0_i32_1 = arith.constant 0 : i32
    %c0_i32_2 = arith.constant 0 : i32
    return %arg0, %c0_i32, %c0_i32_0, %c0_i32_1 : i32, i32, i32, i32
  }
  func.func @transform_1(%arg0: i32) -> (i32, i32, i32, i32) {
    %c0_i32 = arith.constant 0 : i32
    %c0_i32_0 = arith.constant 0 : i32
    %c0_i32_1 = arith.constant 0 : i32
    %c0_i32_2 = arith.constant 0 : i32
    return %arg0, %c0_i32, %c0_i32_0, %c0_i32_1 : i32, i32, i32, i32
  }
  func.func @transform_2(%arg0: i32) -> (i32, i32) {
    %c0_i32 = arith.constant 0 : i32
    %c0_i32_0 = arith.constant 0 : i32
    %c0_i32_1 = arith.constant 0 : i32
    return %c0_i32, %c0_i32_0 : i32, i32
  }
  func.func @transform_3(%arg0: i32) -> (i32, i32) {
    %c0_i32 = arith.constant 0 : i32
    %c0_i32_0 = arith.constant 0 : i32
    %c0_i32_1 = arith.constant 0 : i32
    return %c0_i32, %c0_i32_0 : i32, i32
  }
  func.func @transform_4(%arg0: i32) -> (i32, i32) {
    %c0_i32 = arith.constant 0 : i32
    %c0_i32_0 = arith.constant 0 : i32
    %c0_i32_1 = arith.constant 0 : i32
    return %c0_i32, %c0_i32_0 : i32, i32
  }
  func.func @transform_5(%arg0: i32) -> (i32, i32) {
    %c0_i32 = arith.constant 0 : i32
    %c0_i32_0 = arith.constant 0 : i32
    %c0_i32_1 = arith.constant 0 : i32
    return %c0_i32, %c0_i32_0 : i32, i32
  }
  func.func @transform_6(%arg0: i32) -> (i32, i32) {
    %c0_i32 = arith.constant 0 : i32
    %c0_i32_0 = arith.constant 0 : i32
    %c0_i32_1 = arith.constant 0 : i32
    return %c0_i32, %c0_i32_0 : i32, i32
  }
  func.func @transform_7(%arg0: i32) -> (i32, i32) {
    %c0_i32 = arith.constant 0 : i32
    %c0_i32_0 = arith.constant 0 : i32
    %c0_i32_1 = arith.constant 0 : i32
    return %c0_i32, %c0_i32_0 : i32, i32
  }
  func.func @transform_8(%arg0: i32) -> (i32, i32, i32, i32) {
    %c0_i32 = arith.constant 0 : i32
    %c0_i32_0 = arith.constant 0 : i32
    %c0_i32_1 = arith.constant 0 : i32
    %c0_i32_2 = arith.constant 0 : i32
    return %arg0, %c0_i32, %c0_i32_0, %c0_i32_1 : i32, i32, i32, i32
  }
}

module attributes {stable_mosaic.version = 11 : i64} {
  func.func @_up_kernel(%arg0: i32, %arg1: i32, %arg2: memref<1x8x8x8xf32, #tpu.memory_space<vmem>>, %arg3: memref<1x8xf32, #tpu.memory_space<vmem>>, %arg4: memref<1x8xf32, #tpu.memory_space<vmem>>, %arg5: memref<1x8x8xbf16, #tpu.memory_space<vmem>>, %arg6: memref<1x1x8xf32, #tpu.memory_space<vmem>>, %arg7: memref<1x8x1x8x8xf32, #tpu.memory_space<vmem>>) attributes {dimension_semantics = [#tpu.dimension_semantics<parallel>, #tpu.dimension_semantics<parallel>], iteration_bounds = array<i64: 2, 2>, scalar_prefetch = 0 : i64, scratch_operands = 0 : i64, tpu.core_type = #tpu.core_type<tc>, window_params = [{transform_indices = @transform_0, window_bounds = array<i64: 1, 8, 8, 8>}, {pipeline_mode = #tpu.pipeline_mode<synchronous>, transform_indices = @transform_1, window_bounds = array<i64: 1, 8>}, {pipeline_mode = #tpu.pipeline_mode<synchronous>, transform_indices = @transform_2, window_bounds = array<i64: 1, 8>}, {transform_indices = @transform_3, window_bounds = array<i64: 1, 8, 8>}, {transform_indices = @transform_4, window_bounds = array<i64: 1, 1, 8>}, {transform_indices = @transform_5, window_bounds = array<i64: 1, 8, 1, 8, 8>}]} {
    %c0 = arith.constant 0 : index
    %c0_0 = arith.constant 0 : index
    %c0_1 = arith.constant 0 : index
    %c0_2 = arith.constant 0 : index
    %0 = vector.load %arg2[%c0, %c0_0, %c0_1, %c0_2] : memref<1x8x8x8xf32, #tpu.memory_space<vmem>>, vector<1x8x8x8xf32>
    %1 = vector.shape_cast %0 : vector<1x8x8x8xf32> to vector<8x8x8xf32>
    %c0_3 = arith.constant 0 : index
    %c0_4 = arith.constant 0 : index
    %2 = vector.load %arg3[%c0_3, %c0_4] : memref<1x8xf32, #tpu.memory_space<vmem>>, vector<1x8xf32>
    %3 = vector.shape_cast %2 : vector<1x8xf32> to vector<1x1x8xf32>
    %4 = vector.broadcast %3 : vector<1x1x8xf32> to vector<8x8x8xf32>
    %5 = arith.mulf %1, %4 : vector<8x8x8xf32>
    %c0_5 = arith.constant 0 : index
    %c0_6 = arith.constant 0 : index
    %6 = vector.load %arg4[%c0_5, %c0_6] : memref<1x8xf32, #tpu.memory_space<vmem>>, vector<1x8xf32>
    %7 = vector.shape_cast %6 : vector<1x8xf32> to vector<1x1x8xf32>
    %8 = vector.broadcast %7 : vector<1x1x8xf32> to vector<8x8x8xf32>
    %9 = arith.addf %5, %8 : vector<8x8x8xf32>
    %cst = arith.constant 0.000000e+00 : f32
    %10 = vector.broadcast %cst : f32 to vector<8x8x8xf32>
    %11 = arith.maximumf %9, %10 : vector<8x8x8xf32>
    %12 = vector.shape_cast %11 : vector<8x8x8xf32> to vector<64x8xf32>
    %13 = arith.truncf %12 : vector<64x8xf32> to vector<64x8xbf16>
    %c0_7 = arith.constant 0 : index
    %c0_8 = arith.constant 0 : index
    %c0_9 = arith.constant 0 : index
    %14 = vector.load %arg5[%c0_7, %c0_8, %c0_9] : memref<1x8x8xbf16, #tpu.memory_space<vmem>>, vector<1x8x8xbf16>
    %15 = vector.shape_cast %14 : vector<1x8x8xbf16> to vector<8x8xbf16>
    %cst_10 = arith.constant dense<0.000000e+00> : vector<64x8xf32>
    %16 = tpu.matmul %13, %15, %cst_10 {dimension_numbers = #tpu.dot_dimension_numbers<[1], [0], [0], [1], [0, 0, 1, 1], [], []>} : vector<64x8xbf16>, vector<8x8xbf16>, vector<64x8xf32> -> vector<64x8xf32>
    %c0_11 = arith.constant 0 : index
    %c0_12 = arith.constant 0 : index
    %c0_13 = arith.constant 0 : index
    %17 = vector.load %arg6[%c0_11, %c0_12, %c0_13] : memref<1x1x8xf32, #tpu.memory_space<vmem>>, vector<1x1x8xf32>
    %18 = vector.shape_cast %17 : vector<1x1x8xf32> to vector<1x8xf32>
    %19 = vector.broadcast %18 : vector<1x8xf32> to vector<64x8xf32>
    %20 = arith.addf %16, %19 : vector<64x8xf32>
    %21 = vector.shape_cast %20 : vector<64x8xf32> to vector<8x8x8xf32>
    %c0_14 = arith.constant 0 : index
    %c0_15 = arith.constant 0 : index
    %c0_16 = arith.constant 0 : index
    %c0_17 = arith.constant 0 : index
    %c0_18 = arith.constant 0 : index
    %22 = vector.load %arg7[%c0_14, %c0_15, %c0_16, %c0_17, %c0_18] : memref<1x8x1x8x8xf32, #tpu.memory_space<vmem>>, vector<1x8x1x8x8xf32>
    %23 = vector.shape_cast %22 : vector<1x8x1x8x8xf32> to vector<8x8x8xf32>
    %24 = vector.shape_cast %21 : vector<8x8x8xf32> to vector<1x8x1x8x8xf32>
    tpu.vector_store %arg7[%c0_14, %c0_15, %c0_16, %c0_17, %c0_18], %24 {strides = array<i32>} : memref<1x8x1x8x8xf32, #tpu.memory_space<vmem>>, vector<1x8x1x8x8xf32>,
    return
  }
  func.func @transform_0(%arg0: i32, %arg1: i32) -> (i32, i32, i32, i32) {
    %c0_i32 = arith.constant 0 : i32
    %c0_i32_0 = arith.constant 0 : i32
    %c0_i32_1 = arith.constant 0 : i32
    %c0_i32_2 = arith.constant 0 : i32
    return %arg0, %c0_i32, %c0_i32_0, %c0_i32_1 : i32, i32, i32, i32
  }
  func.func @transform_1(%arg0: i32, %arg1: i32) -> (i32, i32) {
    %c0_i32 = arith.constant 0 : i32
    %c0_i32_0 = arith.constant 0 : i32
    %c0_i32_1 = arith.constant 0 : i32
    return %c0_i32, %c0_i32_0 : i32, i32
  }
  func.func @transform_2(%arg0: i32, %arg1: i32) -> (i32, i32) {
    %c0_i32 = arith.constant 0 : i32
    %c0_i32_0 = arith.constant 0 : i32
    %c0_i32_1 = arith.constant 0 : i32
    return %c0_i32, %c0_i32_0 : i32, i32
  }
  func.func @transform_3(%arg0: i32, %arg1: i32) -> (i32, i32, i32) {
    %c0_i32 = arith.constant 0 : i32
    %c0_i32_0 = arith.constant 0 : i32
    %c0_i32_1 = arith.constant 0 : i32
    return %arg1, %c0_i32, %c0_i32_0 : i32, i32, i32
  }
  func.func @transform_4(%arg0: i32, %arg1: i32) -> (i32, i32, i32) {
    %c0_i32 = arith.constant 0 : i32
    %c0_i32_0 = arith.constant 0 : i32
    %c0_i32_1 = arith.constant 0 : i32
    return %arg1, %c0_i32, %c0_i32_0 : i32, i32, i32
  }
  func.func @transform_5(%arg0: i32, %arg1: i32) -> (i32, i32, i32, i32, i32) {
    %c0_i32 = arith.constant 0 : i32
    %c0_i32_0 = arith.constant 0 : i32
    %c0_i32_1 = arith.constant 0 : i32
    %c0_i32_2 = arith.constant 0 : i32
    return %arg0, %c0_i32, %arg1, %c0_i32_0, %c0_i32_1 : i32, i32, i32, i32, i32
  }
}

</mosaic_0001>

<bundles_post_ra>
// kernel: unet_up_forward.2
= control target key start
LH: loop header
LB: loop body
LE: loop exit
PB: predicated region body
PF: predicated region fallthrough
CT: control target
= control target key end

     0   :  { %s692_s18 = smov 0   ;;  %s694_s19 = smov 0   ;;  %s838_s0 = inlined_call_operand.vmem [shape: f32[2,8,8,8], index: 0, kind: input, shape index: {}]   ;;  %s839_s1 = inlined_call_operand.vmem [shape: f32[1,8], index: 1, kind: input, shape index: {}]   ;;  %s840_s2 = inlined_call_operand.vmem [shape: f32[1,8], index: 2, kind: input, shape index: {}]   ;;  %s841_s3 = inlined_call_operand.vmem [shape: bf16[2,8,8], index: 3, kind: input, shape index: {}]   ;;  %s842_s4 = inlined_call_operand.vmem [shape: f32[2,1,8], index: 4, kind: input, shape index: {}]   ;;  %s843_s5 = inlined_call_operand.vmem [shape: f32[2,8,2,8,8], index: 5, kind: output, shape index: {}]  }
   0x1   :  { %s696_s20 = smov 0   ;;  %s698_s21 = smov 0  }
   0x2   :  { %s700_s22 = smov 0   ;;  %s702_s23 = smov 0  }
   0x3   :  { %s704_s24 = smov 0  }
   0x4 LB: > { %847 = sst [smem:[#allocation3_spill]] %s656_s23  ;;  %s24_s25 = sadd.s32 1, %s652_s22  ;;  %s660_s24 = sphi %s704_s24, %s15_s24   ;;  %s656_s23 = sphi %s702_s23, %s853_s23   ;;  %s652_s22 = sphi %s700_s22, %s857_s22   ;;  %s648_s21 = sphi %s698_s21, %s851_s21   ;;  %s644_s20 = sphi %s696_s20, %s856_s20   ;;  %s640_s19 = sphi %s694_s19, %s855_s19   ;;  %s636_s18 = sphi %s692_s18, %s854_s18  }
   0x5   : > { %p25_p0 = scmp.ge.s32.totalorder %s24_s25, 2  ;;  %s27_s26 = sadd.s32 1, %s656_s23 }
   0x6   : > { %s525_s27 = sadd.s32 4294967295, %s660_s24   ;;  %p166_p1 = scmp.ne.s32.totalorder %s640_s19, %s636_s18 }
   0x7   : > { %s859_s25 = smov (%p25_p0, %s24_s25), 0  ;;  %s861_s26 = smov (!%p25_p0, %s27_s26), %s656_s23 }
   0x8   : > { %848 = sst [smem:[#allocation4_spill]] %s859_s25  ;;  %s152_s28 = ssub.s32 %s652_s22, %s859_s25 }
   0x9   : > { %p167_p2 = scmp.eq.s32.totalorder %s525_s27, 3  ;;  %p29_p3 = scmp.ge.s32.totalorder %s861_s26, 2 }
   0xa   : > { %p529_p4 = scmp.ge.s32.totalorder %s660_s24, 1  ;;  %p218_p6 = scmp.lt.s32.totalorder %s660_s24, 5 }
   0xb   : > { %p738_p5 = por %p167_p2, %p166_p1  ;;  %s863_s26 = smov (%p29_p3, %s861_s26), 0 }
   0xc   : > { %850 = sst [smem:[#allocation5_spill]] %s863_s26  ;;  %p219_p7 = pnand %p529_p4, %p218_p6 }
   0xd   : > { %s151_s30 = ssub.s32 %s656_s23, %s863_s26  ;;  %s156_s7 = sadd.s32 1, %s640_s19 }
   0xe   : > { %s153_s6 = sor.u32 %s152_s28, %s151_s30  ;;  %222 = sbr.rel (%p219_p7) target bundleno = 187 (0xbb), region = 40 }
   0xf   : > { %p154_p8 = scmp.eq.s32.totalorder %s153_s6, 0  ;;  %p257_p9 = scmp.lt.s32.totalorder (!%p219_p7), %s644_s20, 1 }
  0x10   : > { %p252_p10 = scmp.lt.s32.totalorder (!%p219_p7), %s648_s21, 1  ;;  %s249_s23 = sand.u32 (!%p219_p7), 1, %s636_s18  }
  0x11   : > { %s749_s8 = scalar_select %p154_p8, %s640_s19, %s156_s7  }
  0x13   : > { %s754_s9 = scalar_select %p257_p9, %s644_s20, 1  ;;  %vm327_vm0 = vcmask 1043456   ;;  %v604_v0 = vld [vmem:[%s839_s1] ss:$0 sm:$0xff]  ;;  %vm314_vm1 = vcmask 64512  }
  0x14   : > { %s253_s10 = scalar_select %p252_p10, %s648_s21, 1  ;;  %v605_v2 = vld [vmem:[%s840_s2] ss:$0 sm:$0xff] }
  0x15   : > { %s533_s11 = sshll.u32 %s754_s9, 2  ;;  %s263_s14 = scalar_lea.vmem %s842_s4, %s754_s9 }
  0x16   : > { %s260_s28 = scalar_lea.vmem %s841_s3, %s533_s11  ;;  %s543_s30 = sshll.u32 %s253_s10, 6  ;;  %v603_v40 = vld [vmem:[%s263_s14] ss:$0 sm:$0xff] }
  0x17   : > { %v309_v1 = vld [vmem:[%s260_s28] sm:$0xf]  ;;  %s256_s26 = scalar_lea.vmem %s838_s0, %s543_s30  ;;  %s530_s10 = sshll.u32 %s249_s23, 6 }
  0x18   : > { %v329_v3 = vsel %vm327_vm0, %v309_v1, 0  ;;  %v265_v4 = vld [vmem:[%s256_s26] sm:$0xff]  ;;  %v266_v5 = vld [vmem:[%s256_s26 + $0x8] sm:$0xff]  ;;  %v267_v6 = vld [vmem:[%s256_s26 + $0x10] sm:$0xff]  ;;  %s784_s11 = scalar_lea.vmem [#allocation2], %s530_s10  ;;  %s539_s18 = sshll.u32 (%p738_p5), %s648_s21, 4 }
  0x19   : > { %338 = vmatpush.bf16.msra.mxu0 %v329_v3  ;;  %544 = vmatpush.bf16.msra.mxu1 %v329_v3  ;;  %v277_v7 = vmul.f32 %v604_v0, %v265_v4  ;;  %v278_v8 = vmul.f32 %v604_v0, %v266_v5  ;;  %v268_v9 = vld [vmem:[%s256_s26 + $0x18] sm:$0xff]  ;;  %v279_v10 = vmul.f32 %v604_v0, %v267_v6  ;;  %v269_v11 = vld [vmem:[%s256_s26 + $0x20] sm:$0xff]  ;;  %v270_v12 = vld [vmem:[%s256_s26 + $0x28] sm:$0xff]  ;;  %s376_s9 = sadd.s32 (%p738_p5), %s644_s20, %s539_s18 }
  0x1a   : > { %545 = vmatpush.bf16.msra.mxu2 %v329_v3  ;;  %546 = vmatpush.bf16.msra.mxu3 %v329_v3  ;;  %v280_v13 = vmul.f32 %v604_v0, %v268_v9  ;;  %v281_v14 = vmul.f32 %v604_v0, %v269_v11  ;;  %v282_v15 = vmul.f32 %v604_v0, %v270_v12  ;;  %v271_v16 = vld [vmem:[%s256_s26 + $0x30] sm:$0xff]  ;;  %v272_v17 = vld [vmem:[%s256_s26 + $0x38] sm:$0xff]  ;;  %s540_s12 = sshll.u32 (%p738_p5), %s376_s9, 3 }
  0x1b   : > { %v289_v18 = vadd.f32 %v605_v2, %v277_v7  ;;  %v290_v19 = vadd.f32 %v605_v2, %v278_v8  ;;  %v291_v20 = vadd.f32 %v605_v2, %v279_v10  ;;  %v283_v21 = vmul.f32 %v604_v0, %v271_v16  ;;  %s378_s29 = scalar_lea.vmem (%p738_p5), %s843_s5, %s540_s12 }
  0x1c   : > { %v292_v22 = vadd.f32 %v605_v2, %v280_v13  ;;  %v293_v23 = vadd.f32 %v605_v2, %v281_v14  ;;  %v294_v24 = vadd.f32 %v605_v2, %v282_v15  ;;  %v284_v25 = vmul.f32 %v604_v0, %v272_v17 }
  0x1d   : > { %v297_v26 = vmax.f32 %v289_v18, 0.0  ;;  %v298_v27 = vmax.f32 %v290_v19, 0.0  ;;  %v299_v28 = vmax.f32 %v291_v20, 0.0  ;;  %v295_v29 = vadd.f32 %v605_v2, %v283_v21 }
  0x1e   : > { %v300_v30 = vmax.f32 %v292_v22, 0.0  ;;  %v301_v31 = vmax.f32 %v293_v23, 0.0  ;;  %v302_v32 = vmax.f32 %v294_v24, 0.0  ;;  %v296_v33 = vadd.f32 %v605_v2, %v284_v25 }
  0x1f   : > { %v305_v34 = vpack.c.bf16 %v298_v27, %v297_v26  ;;  %v303_v35 = vmax.f32 %v295_v29, 0.0 }
  0x20   : > { %v306_v36 = vpack.c.bf16 %v300_v30, %v299_v28  ;;  %v307_v37 = vpack.c.bf16 %v302_v32, %v301_v31  ;;  %v304_v38 = vmax.f32 %v296_v33, 0.0 }
  0x21   : > { %534 = vmatmul.msk.bf16.vlgmr.msra.gmra.mxu0 %vm314_vm1, %v305_v34 }
  0x22   : > { %535 = vmatmul.msk.bf16.vlgmr.msra.gmra.mxu1 %vm314_vm1, %v306_v36  ;;  %536 = vmatmul.msk.bf16.vlgmr.msra.gmra.mxu2 %vm314_vm1, %v307_v37  ;;  %v308_v39 = vpack.c.bf16 %v304_v38, %v303_v35 }
  0x24   : > { %537 = vmatmul.msk.bf16.vlgmr.msra.gmra.mxu3 %vm314_vm1, %v308_v39 }
  0x9e   : > { %v340_v41 = vpop.f32.mrf.mxu0 }
  0x9f   : > { %v341_v42 = vadd.f32 %v603_v40, %v340_v41  ;;  %v345_v43 = vpop.f32.mrf.mxu1 }
  0xa0   : > { %v346_v44 = vadd.f32 %v603_v40, %v345_v43 }
  0xa1   : > { %360 = vst.msk [vmem:[%s784_s11] sm:$0xff] %vm314_vm1, %v341_v42 }
  0xa2   : > { %362 = vst.msk [vmem:[%s784_s11 + $0x10] sm:$0xff] %vm314_vm1, %v346_v44 }
  0xa5   : > { %v350_v45 = vpop.f32.mrf.mxu2 }
  0xa6   : > { %v351_v46 = vadd.f32 %v603_v40, %v350_v45  ;;  %v342_v47 = vpop.f32.mrf.mxu0 }
  0xa7   : > { %v355_v48 = vpop.f32.mrf.mxu3  ;;  %v343_v49 = vadd.f32 %v603_v40, %v342_v47  ;;  %v347_v50 = vpop.f32.mrf.mxu1 }
  0xa8   : > { %364 = vst.msk [vmem:[%s784_s11 + $0x20] sm:$0xff] %vm314_vm1, %v351_v46  ;;  %v356_v51 = vadd.f32 %v603_v40, %v355_v48  ;;  %v348_v52 = vadd.f32 %v603_v40, %v347_v50  ;;  %v421_v57 = vld [vmem:[%s784_s11] sm:$0xff] (%p738_p5) }
  0xa9   : > { %361 = vst.msk [vmem:[%s784_s11 + $0x8] sm:$0xff] %vm314_vm1, %v343_v49  ;;  %v425_v59 = vld [vmem:[%s784_s11 + $0x10] sm:$0xff] (%p738_p5) }
  0xaa   : > { %366 = vst.msk [vmem:[%s784_s11 + $0x30] sm:$0xff] %vm314_vm1, %v356_v51 }
  0xab   : > { %363 = vst.msk [vmem:[%s784_s11 + $0x18] sm:$0xff] %vm314_vm1, %v348_v52 }
  0xac   : > { %422 = vst [vmem:[%s378_s29] sm:$0xff] (%p738_p5), %v421_v57 }
  0xad   : > { %v352_v53 = vpop.f32.mrf.mxu2  ;;  %426 = vst [vmem:[%s378_s29 + $0x20] sm:$0xff] (%p738_p5), %v425_v59 }
  0xae   : > { %v353_v54 = vadd.f32 %v603_v40, %v352_v53  ;;  %374 = sbr.rel (!%p738_p5) target bundleno = 187 (0xbb), region = 44 }
  0xaf   : > { %v357_v55 = vpop.f32.mrf.mxu3  ;;  %v429_v61 = vld [vmem:[%s784_s11 + $0x20] sm:$0xff] (%p738_p5) }
  0xb0   : > { %365 = vst.msk [vmem:[%s784_s11 + $0x28] sm:$0xff] %vm314_vm1, %v353_v54  ;;  %v358_v56 = vadd.f32 %v603_v40, %v357_v55  ;;  %v423_v58 = vld [vmem:[%s784_s11 + $0x8] sm:$0xff] (%p738_p5) }
  0xb1   : > { %424 = vst [vmem:[%s378_s29 + $0x10] sm:$0xff] (%p738_p5), %v423_v58  ;;  %v433_v63 = vld [vmem:[%s784_s11 + $0x30] sm:$0xff] (%p738_p5) }
  0xb2   : > { %367 = vst.msk [vmem:[%s784_s11 + $0x38] sm:$0xff] %vm314_vm1, %v358_v56  ;;  %v427_v60 = vld [vmem:[%s784_s11 + $0x18] sm:$0xff] (%p738_p5) }
  0xb3   : > { %428 = vst [vmem:[%s378_s29 + $0x30] sm:$0xff] %v427_v60 }
  0xb4   : > { %430 = vst [vmem:[%s378_s29 + $0x40] sm:$0xff] %v429_v61 }
  0xb5   : > { %434 = vst [vmem:[%s378_s29 + $0x60] sm:$0xff] %v433_v63 }
  0xb7   : > { %v431_v62 = vld [vmem:[%s784_s11 + $0x28] sm:$0xff] }
  0xb8   : > { %432 = vst [vmem:[%s378_s29 + $0x50] sm:$0xff] %v431_v62 }
  0xb9   : > { %v435_v0 = vld [vmem:[%s784_s11 + $0x38] sm:$0xff] }
  0xba   : > { %436 = vst [vmem:[%s378_s29 + $0x70] sm:$0xff] %v435_v0 }
  0xbb PF: > { %s15_s24 = sadd.s32 1, %s660_s24   ;;  %s851_s21 = sld [smem:[#allocation3_spill]] }
  0xbc   : > { %p12_p11 = scmp.ge.s32.totalorder %s15_s24, 6   ;;  %s852_s15 = sld [smem:[#allocation4_spill]] }
  0xbd   : > { %s853_s23 = sld [smem:[#allocation5_spill]]  ;;  %s854_s18 = smov %s640_s19 }
  0xbe   : > { %s855_s19 = smov %s749_s8  ;;  %s856_s20 = smov %s652_s22 }
  0xbf   :  { %14 = sbr.rel (!%p12_p11) target bundleno = 4 (0x4), region = 114 }
  0xc2   : > { %s857_s22 = smov %s852_s15 }

// kernel: unet_up_forward.3
= control target key start
LH: loop header
LB: loop body
LE: loop exit
PB: predicated region body
PF: predicated region fallthrough
CT: control target
= control target key end

     0   :  { %s7726_s27 = smov 0   ;;  %s10432_s0 = inlined_call_operand.vmem [shape: f32[2,16,16,4], index: 0, kind: input, shape index: {}]   ;;  %s10433_s1 = inlined_call_operand.vmem [shape: f32[2,16,16,4], index: 1, kind: input, shape index: {}]   ;;  %s10434_s2 = inlined_call_operand.vmem [shape: f32[1,8], index: 2, kind: input, shape index: {}]   ;;  %s10435_s3 = inlined_call_operand.vmem [shape: f32[1,8], index: 3, kind: input, shape index: {}]   ;;  %s10436_s4 = inlined_call_operand.vmem [shape: bf16[72,4], index: 4, kind: input, shape index: {}]   ;;  %s10437_s5 = inlined_call_operand.vmem [shape: f32[1,4], index: 5, kind: input, shape index: {}]   ;;  %s10438_s6 = inlined_call_operand.vmem [shape: f32[1,4], index: 6, kind: input, shape index: {}]   ;;  %s10439_s7 = inlined_call_operand.vmem [shape: bf16[36,4], index: 7, kind: input, shape index: {}]   ;;  %s10440_s8 = inlined_call_operand.vmem [shape: f32[2,16,16,4], index: 8, kind: output, shape index: {}]  }
   0x1 LB: > { %s7369_s28 = sadd.s32 4294967295, %s7660_s27   ;;  %p7373_p0 = scmp.ge.s32.totalorder %s7660_s27, 1  ;;  %s7660_s27 = sphi %s7726_s27, %s18_s27  }
   0x2   : > { %p272_p1 = scmp.lt.s32.totalorder %s7660_s27, 3 }
   0x4   : > { %p273_p2 = pnand %p7373_p0, %p272_p1 }
   0x5   : > { %s7662_s9 = smov (!%p273_p2), 124   ;;  %s7664_s12 = smov (!%p273_p2), 4  }
   0x6   : > { %276 = sbr.rel (%p273_p2) target bundleno = 2736 (0xab0), region = 52  ;;  %p311_p3 = scmp.lt.s32.totalorder (!%p273_p2), %s7369_s28, 1 }
   0x7   : > { %s7665_s13 = smov (!%p273_p2), 8   ;;  %s7666_s30 = smov (!%p273_p2), 12  }
   0x8   : > { %s7668_s10 = smov (!%p273_p2), 20   ;;  %s7669_s11 = smov (!%p273_p2), 24  }
   0x9   : > { %s7671_s20 = smov (!%p273_p2), 32   ;;  %s7672_s21 = smov (!%p273_p2), 36  }
   0xa   : > { %s7673_s22 = smov (!%p273_p2), 40   ;;  %s7674_s23 = smov (!%p273_p2), 44  }
   0xb   : > { %v7642_v0 = vld [vmem:[%s10434_s2] ss:$0 sm:$0xff]  ;;  %vm327_vm0 = vcmask 31744   ;;  %v7663_v1 = vmov 0.0   ;;  %vm336_vm1 = vcmask 24576   ;;  %s10442_s28 = smov (!%p311_p3, %s7369_s28), 1 }
   0xc   : > { %620 = vrot.lane.b32.xlu0 %v7642_v0, %s7662_s9  ;;  %374 = vst.msk [vmem:[#allocation3 + $0x8] sm:$0xff] %vm327_vm0, %v7663_v1  ;;  %v7643_v2 = vld [vmem:[%s10435_s3] ss:$0 sm:$0xff]  ;;  %s7875_s14 = sshll.u32 %s10442_s28, 8  ;;  %vm330_vm2 = vcmask 25600   ;;  %vm822_vm3 = vcmask 27648  }
   0xd   : > { %328 = vst.msk [vmem:[#allocation2] sm:$0xff] %vm327_vm0, %v7663_v1  ;;  %s7887_s17 = scalar_lea.vmem %s10432_s0, %s7875_s14  ;;  %v7896_v9 = vld [vmem:[%s10434_s2] ss:$0 sm:$0xff]  ;;  %s8007_s24 = scalar_lea.vmem %s10433_s1, %s7875_s14  ;;  %vm1047_vm4 = vcmask 60448   ;;  %vm1272_vm5 = vcmask 93248   ;;  %vm1497_vm6 = vcmask 126048  }
   0xe   : > { %329 = vst.msk [vmem:[#allocation2 + $0x8] sm:$0xff] %vm327_vm0, %v7663_v1  ;;  %v418_v10 = vld [vmem:[%s7887_s17 + $0x10] sm:$0xff]  ;;  %v417_v11 = vld [vmem:[%s7887_s17 + $0x8] sm:$0xff]  ;;  %v416_v12 = vld [vmem:[%s7887_s17] sm:$0xff]  ;;  %vm1722_vm7 = vcmask 158848   ;;  %vm1947_vm8 = vcmask 191648  }
   0xf   : > { %333 = vst.msk [vmem:[#allocation2 + $0x198] sm:$0xff] %vm327_vm0, %v7663_v1  ;;  %v454_v13 = vmul.f32 %v7896_v9, %v418_v10  ;;  %v7913_v14 = vld [vmem:[%s10435_s3] ss:$0 sm:$0xff]  ;;  %v421_v15 = vld [vmem:[%s7887_s17 + $0x28] sm:$0xff]  ;;  %v453_v16 = vmul.f32 %v7896_v9, %v417_v11  ;;  %v452_v18 = vmul.f32 %v7896_v9, %v416_v12  ;;  %v419_v19 = vld [vmem:[%s7887_s17 + $0x18] sm:$0xff]  ;;  %vm2172_vm9 = vcmask 224448  }
  0x10   : > { %334 = vst.msk [vmem:[#allocation2 + $0x1a0] sm:$0xff] %vm327_vm0, %v7663_v1  ;;  %v420_v17 = vld [vmem:[%s7887_s17 + $0x20] sm:$0xff]  ;;  %v457_v20 = vmul.f32 %v7896_v9, %v421_v15  ;;  %v423_v24 = vld [vmem:[%s7887_s17 + $0x38] sm:$0xff]  ;;  %v455_v26 = vmul.f32 %v7896_v9, %v419_v19  ;;  %v422_v27 = vld [vmem:[%s7887_s17 + $0x30] sm:$0xff]  ;;  %vm2397_vm10 = vcmask 257248   ;;  %vm2622_vm11 = vcmask 290048  }
  0x11   : > { %373 = vst.msk [vmem:[#allocation3] sm:$0xff] %vm327_vm0, %v7663_v1  ;;  %v424_v21 = vld [vmem:[%s7887_s17 + $0x40] sm:$0xff]  ;;  %v490_v22 = vadd.f32 %v7913_v14, %v454_v13  ;;  %v456_v23 = vmul.f32 %v7896_v9, %v420_v17  ;;  %v489_v25 = vadd.f32 %v7913_v14, %v453_v16  ;;  %v488_v28 = vadd.f32 %v7913_v14, %v452_v18  ;;  %v427_v30 = vld [vmem:[%s7887_s17 + $0x58] sm:$0xff]  ;;  %v426_v33 = vld [vmem:[%s7887_s17 + $0x50] sm:$0xff]  ;;  %s7676_s25 = smov 52   ;;  %s7677_s26 = smov 56  }
  0x12   : > { %377 = vst.msk [vmem:[#allocation3 + $0x198] sm:$0xff] %vm327_vm0, %v7663_v1  ;;  %v460_v29 = vmul.f32 %v7896_v9, %v424_v21  ;;  %v493_v31 = vadd.f32 %v7913_v14, %v457_v20  ;;  %v459_v32 = vmul.f32 %v7896_v9, %v423_v24  ;;  %v458_v36 = vmul.f32 %v7896_v9, %v422_v27  ;;  %v425_v37 = vld [vmem:[%s7887_s17 + $0x48] sm:$0xff]  ;;  %v430_v41 = vld [vmem:[%s7887_s17 + $0x70] sm:$0xff]  ;;  %v428_v50 = vld [vmem:[%s7887_s17 + $0x60] sm:$0xff]  ;;  %s7678_s28 = smov 60   ;;  %s7679_s29 = smov 64  }
  0x13   : > { %v856_v3 = vld [vmem:[#allocation3 + $0x8] sm:$0xff]  ;;  %378 = vst.msk [vmem:[#allocation3 + $0x1a0] sm:$0xff] %vm327_vm0, %v7663_v1  ;;  %v522_v34 = vmax.f32 %v490_v22, 0.0  ;;  %v492_v35 = vadd.f32 %v7913_v14, %v456_v23  ;;  %v521_v38 = vmax.f32 %v489_v25, 0.0  ;;  %v491_v39 = vadd.f32 %v7913_v14, %v455_v26  ;;  %v429_v45 = vld [vmem:[%s7887_s17 + $0x68] sm:$0xff]  ;;  %s7680_s15 = smov 68  }
  0x14   : > { %658 = vrot.lane.b32.xlu0 %v7643_v2, %s7662_s9  ;;  %v888_v4 = vpack.c.bf16 %v856_v3, %v856_v3  ;;  %380 = vst.msk [vmem:[#allocation3] sm:$0x1] %vm336_vm1, %v7663_v1  ;;  %v463_v40 = vmul.f32 %v7896_v9, %v427_v30  ;;  %v520_v42 = vmax.f32 %v488_v28, 0.0  ;;  %v496_v43 = vadd.f32 %v7913_v14, %v460_v29  ;;  %s7667_s9 = smov 16  }
  0x15   : > { %337 = vst.msk [vmem:[#allocation2] sm:$0x1] %vm336_vm1, %v7663_v1  ;;  %v1080_v7 = vld [vmem:[#allocation2 + $0x1] sm:$0xff]  ;;  %v462_v44 = vmul.f32 %v7896_v9, %v426_v33  ;;  %v525_v47 = vmax.f32 %v493_v31, 0.0  ;;  %v495_v48 = vadd.f32 %v7913_v14, %v459_v32  ;;  %v461_v49 = vmul.f32 %v7896_v9, %v425_v37 }
  0x16   : > { %953 = vrot.lane.b32.xlu1 %v888_v4, %s7664_s12  ;;  %338 = vst.msk [vmem:[#allocation2 + $0x18] sm:$0x1] %vm336_vm1, %v7663_v1  ;;  %v1112_v8 = vpack.c.bf16 %v1080_v7, %v1080_v7  ;;  %v524_v52 = vmax.f32 %v492_v35, 0.0  ;;  %v494_v53 = vadd.f32 %v7913_v14, %v458_v36  ;;  %v466_v54 = vmul.f32 %v7896_v9, %v430_v41  ;;  %v585_v36 = vld [vmem:[%s8007_s24] sm:$0xff]  ;;  %v586_v41 = vld [vmem:[%s8007_s24 + $0x8] sm:$0xff] }
  0x17   : > { %339 = vst.msk [vmem:[#allocation2 + $0x30] sm:$0x1] %vm336_vm1, %v7663_v1  ;;  %v523_v55 = vmax.f32 %v491_v39, 0.0  ;;  %v499_v56 = vadd.f32 %v7913_v14, %v463_v40  ;;  %v465_v57 = vmul.f32 %v7896_v9, %v429_v45  ;;  %v528_v58 = vmax.f32 %v496_v43, 0.0  ;;  %v587_v39 = vld [vmem:[%s8007_s24 + $0x10] sm:$0xff]  ;;  %v588_v40 = vld [vmem:[%s8007_s24 + $0x18] sm:$0xff] }
  0x18   : > { %340 = vst.msk [vmem:[#allocation2 + $0x48] sm:$0x1] %vm336_vm1, %v7663_v1  ;;  %v498_v59 = vadd.f32 %v7913_v14, %v462_v44  ;;  %v464_v60 = vmul.f32 %v7896_v9, %v428_v50  ;;  %v527_v61 = vmax.f32 %v495_v48, 0.0  ;;  %v497_v62 = vadd.f32 %v7913_v14, %v461_v49  ;;  %v589_v44 = vld [vmem:[%s8007_s24 + $0x20] sm:$0xff]  ;;  %v590_v45 = vld [vmem:[%s8007_s24 + $0x28] sm:$0xff] }
  0x19   : > { %341 = vst.msk [vmem:[#allocation2 + $0x60] sm:$0x1] %vm336_vm1, %v7663_v1  ;;  %v526_v63 = vmax.f32 %v494_v53, 0.0  ;;  %v502_v0 = vadd.f32 %v7913_v14, %v466_v54  ;;  %v501_v2 = vadd.f32 %v7913_v14, %v465_v57  ;;  %v594_v53 = vld [vmem:[%s8007_s24 + $0x48] sm:$0xff]  ;;  %vm2847_vm12 = vcmask 322848  }
  0x1a   : > { %342 = vst.msk [vmem:[#allocation2 + $0x78] sm:$0x1] %vm336_vm1, %v7663_v1  ;;  %v530_v3 = vmax.f32 %v498_v59, 0.0  ;;  %v500_v4 = vadd.f32 %v7913_v14, %v464_v60  ;;  %vm3072_vm13 = vcmask 355648   ;;  %vm3297_vm14 = vcmask 388448  }
  0x1b   : > { %v855_v5 = vld [vmem:[#allocation3] sm:$0xff]  ;;  %343 = vst.msk [vmem:[#allocation2 + $0x90] sm:$0x1] %vm336_vm1, %v7663_v1  ;;  %v534_v10 = vmax.f32 %v502_v0, 0.0  ;;  %v533_v13 = vmax.f32 %v501_v2, 0.0  ;;  %vm3523_vm15 = vcmask 421248  }
  0x1c   : > { %v887_v6 = vpack.c.bf16 %v855_v5, %v855_v5  ;;  %344 = vst.msk [vmem:[#allocation2 + $0xa8] sm:$0x1] %vm336_vm1, %v7663_v1  ;;  %v532_v16 = vmax.f32 %v500_v4, 0.0  ;;  %v597_v4 = vld [vmem:[%s8007_s24 + $0x60] sm:$0xff] }
  0x1d   : > { %345 = vst.msk [vmem:[#allocation2 + $0xc0] sm:$0x1] %vm336_vm1, %v7663_v1 }
  0x1e   : > { %951 = vrot.lane.b32.xlu1 %v887_v6, %s7664_s12  ;;  %346 = vst.msk [vmem:[#allocation2 + $0xd8] sm:$0x1] %vm336_vm1, %v7663_v1  ;;  %v529_v6 = vmax.f32 %v497_v62, 0.0 }
  0x1f   : > { %347 = vst.msk [vmem:[#allocation2 + $0xf0] sm:$0x1] %vm336_vm1, %v7663_v1 }
  0x20   : > { %348 = vst.msk [vmem:[#allocation2 + $0x108] sm:$0x1] %vm336_vm1, %v7663_v1 }
  0x21   : > { %349 = vst.msk [vmem:[#allocation2 + $0x120] sm:$0x1] %vm336_vm1, %v7663_v1 }
  0x22   : > { %350 = vst.msk [vmem:[#allocation2 + $0x138] sm:$0x1] %vm336_vm1, %v7663_v1 }
  0x23   : > { %351 = vst.msk [vmem:[#allocation2 + $0x150] sm:$0x1] %vm336_vm1, %v7663_v1 }
  0x24   : > { %352 = vst.msk [vmem:[#allocation2 + $0x168] sm:$0x1] %vm336_vm1, %v7663_v1 }
  0x25   : > { %353 = vst.msk [vmem:[#allocation2 + $0x180] sm:$0x1] %vm336_vm1, %v7663_v1 }
  0x26   : > { %354 = vst.msk [vmem:[#allocation2 + $0x198] sm:$0x1] %vm336_vm1, %v7663_v1  ;;  %1176 = vrot.lane.b32.xlu1 %v1112_v8, %s7665_s13 }
  0x27   : > { %356 = vst.msk [vmem:[#allocation2 + $0x29] sm:$0x1] %vm336_vm1, %v7663_v1 }
  0x28   : > { %357 = vst.msk [vmem:[#allocation2 + $0x41] sm:$0x1] %vm336_vm1, %v7663_v1 }
  0x29   : > { %358 = vst.msk [vmem:[#allocation2 + $0x59] sm:$0x1] %vm336_vm1, %v7663_v1 }
  0x2a   : > { %359 = vst.msk [vmem:[#allocation2 + $0x71] sm:$0x1] %vm336_vm1, %v7663_v1 }
  0x2b   : > { %360 = vst.msk [vmem:[#allocation2 + $0x89] sm:$0x1] %vm336_vm1, %v7663_v1 }
  0x2c   : > { %361 = vst.msk [vmem:[#allocation2 + $0xa1] sm:$0x1] %vm336_vm1, %v7663_v1 }
  0x2d   : > { %362 = vst.msk [vmem:[#allocation2 + $0xb9] sm:$0x1] %vm336_vm1, %v7663_v1 }
  0x2e   : > { %363 = vst.msk [vmem:[#allocation2 + $0xd1] sm:$0x1] %vm336_vm1, %v7663_v1 }
  0x2f   : > { %364 = vst.msk [vmem:[#allocation2 + $0xe9] sm:$0x1] %vm336_vm1, %v7663_v1 }
  0x30   : > { %365 = vst.msk [vmem:[#allocation2 + $0x101] sm:$0x1] %vm336_vm1, %v7663_v1 }
  0x31   : > { %366 = vst.msk [vmem:[#allocation2 + $0x119] sm:$0x1] %vm336_vm1, %v7663_v1 }
  0x32   : > { %367 = vst.msk [vmem:[#allocation2 + $0x131] sm:$0x1] %vm336_vm1, %v7663_v1 }
  0x33   : > { %368 = vst.msk [vmem:[#allocation2 + $0x149] sm:$0x1] %vm336_vm1, %v7663_v1 }
  0x34   : > { %369 = vst.msk [vmem:[#allocation2 + $0x161] sm:$0x1] %vm336_vm1, %v7663_v1 }
  0x35   : > { %370 = vst.msk [vmem:[#allocation2 + $0x179] sm:$0x1] %vm336_vm1, %v7663_v1 }
  0x36   : > { %371 = vst.msk [vmem:[#allocation2 + $0x191] sm:$0x1] %vm336_vm1, %v7663_v1 }
  0x37   : > { %381 = vst.msk [vmem:[#allocation3 + $0x18] sm:$0x1] %vm336_vm1, %v7663_v1 }
  0x38   : > { %382 = vst.msk [vmem:[#allocation3 + $0x30] sm:$0x1] %vm336_vm1, %v7663_v1 }
  0x39   : > { %383 = vst.msk [vmem:[#allocation3 + $0x48] sm:$0x1] %vm336_vm1, %v7663_v1 }
  0x3a   : > { %384 = vst.msk [vmem:[#allocation3 + $0x60] sm:$0x1] %vm336_vm1, %v7663_v1 }
  0x3b   : > { %385 = vst.msk [vmem:[#allocation3 + $0x78] sm:$0x1] %vm336_vm1, %v7663_v1 }
  0x3c   : > { %386 = vst.msk [vmem:[#allocation3 + $0x90] sm:$0x1] %vm336_vm1, %v7663_v1 }
  0x3d   : > { %387 = vst.msk [vmem:[#allocation3 + $0xa8] sm:$0x1] %vm336_vm1, %v7663_v1 }
  0x3e   : > { %388 = vst.msk [vmem:[#allocation3 + $0xc0] sm:$0x1] %vm336_vm1, %v7663_v1 }
  0x3f   : > { %389 = vst.msk [vmem:[#allocation3 + $0xd8] sm:$0x1] %vm336_vm1, %v7663_v1 }
  0x40   : > { %390 = vst.msk [vmem:[#allocation3 + $0xf0] sm:$0x1] %vm336_vm1, %v7663_v1 }
  0x41   : > { %391 = vst.msk [vmem:[#allocation3 + $0x108] sm:$0x1] %vm336_vm1, %v7663_v1 }
  0x42   : > { %392 = vst.msk [vmem:[#allocation3 + $0x120] sm:$0x1] %vm336_vm1, %v7663_v1 }
  0x43   : > { %393 = vst.msk [vmem:[#allocation3 + $0x138] sm:$0x1] %vm336_vm1, %v7663_v1 }
  0x44   : > { %394 = vst.msk [vmem:[#allocation3 + $0x150] sm:$0x1] %vm336_vm1, %v7663_v1 }
  0x45   : > { %395 = vst.msk [vmem:[#allocation3 + $0x168] sm:$0x1] %vm336_vm1, %v7663_v1 }
  0x46   : > { %396 = vst.msk [vmem:[#allocation3 + $0x180] sm:$0x1] %vm336_vm1, %v7663_v1 }
  0x47   : > { %397 = vst.msk [vmem:[#allocation3 + $0x198] sm:$0x1] %vm336_vm1, %v7663_v1 }
  0x48   : > { %399 = vst.msk [vmem:[#allocation3 + $0x29] sm:$0x1] %vm336_vm1, %v7663_v1 }
  0x49   : > { %400 = vst.msk [vmem:[#allocation3 + $0x41] sm:$0x1] %vm336_vm1, %v7663_v1 }
  0x4a   : > { %401 = vst.msk [vmem:[#allocation3 + $0x59] sm:$0x1] %vm336_vm1, %v7663_v1 }
  0x4b   : > { %402 = vst.msk [vmem:[#allocation3 + $0x71] sm:$0x1] %vm336_vm1, %v7663_v1 }
  0x4c   : > { %403 = vst.msk [vmem:[#allocation3 + $0x89] sm:$0x1] %vm336_vm1, %v7663_v1 }
  0x4d   : > { %404 = vst.msk [vmem:[#allocation3 + $0xa1] sm:$0x1] %vm336_vm1, %v7663_v1 }
  0x4e   : > { %405 = vst.msk [vmem:[#allocation3 + $0xb9] sm:$0x1] %vm336_vm1, %v7663_v1 }
  0x4f   : > { %406 = vst.msk [vmem:[#allocation3 + $0xd1] sm:$0x1] %vm336_vm1, %v7663_v1 }
  0x50   : > { %407 = vst.msk [vmem:[#allocation3 + $0xe9] sm:$0x1] %vm336_vm1, %v7663_v1 }
  0x51   : > { %408 = vst.msk [vmem:[#allocation3 + $0x101] sm:$0x1] %vm336_vm1, %v7663_v1 }
  0x52   : > { %409 = vst.msk [vmem:[#allocation3 + $0x119] sm:$0x1] %vm336_vm1, %v7663_v1 }
  0x53   : > { %410 = vst.msk [vmem:[#allocation3 + $0x131] sm:$0x1] %vm336_vm1, %v7663_v1 }
  0x54   : > { %411 = vst.msk [vmem:[#allocation3 + $0x149] sm:$0x1] %vm336_vm1, %v7663_v1 }
  0x55   : > { %412 = vst.msk [vmem:[#allocation3 + $0x161] sm:$0x1] %vm336_vm1, %v7663_v1 }
  0x56   : > { %413 = vst.msk [vmem:[#allocation3 + $0x179] sm:$0x1] %vm336_vm1, %v7663_v1 }
  0x57   : > { %414 = vst.msk [vmem:[#allocation3 + $0x191] sm:$0x1] %vm336_vm1, %v7663_v1 }
  0x58   : > { %331 = vst.msk [vmem:[#allocation2 + $0x10] sm:$0x3] %vm330_vm2, %v7663_v1 }
  0x59   : > { %355 = vst.msk [vmem:[#allocation2 + $0x11] sm:$0x1] %vm336_vm1, %v7663_v1 }
  0x5a   : > { %335 = vst.msk [vmem:[#allocation2 + $0x1a8] sm:$0x3] %vm330_vm2, %v7663_v1 }
  0x5b   : > { %375 = vst.msk [vmem:[#allocation3 + $0x10] sm:$0x3] %vm330_vm2, %v7663_v1 }
  0x5c   : > { %379 = vst.msk [vmem:[#allocation3 + $0x1a8] sm:$0x3] %vm330_vm2, %v7663_v1  ;;  %vm3974_vm2 = vcmask 486848  }
  0x5d   : > { %372 = vst.msk [vmem:[#allocation2 + $0x1a9] sm:$0x1] %vm336_vm1, %v7663_v1 }
  0x5e   : > { %398 = vst.msk [vmem:[#allocation3 + $0x11] sm:$0x1] %vm336_vm1, %v7663_v1 }
  0x5f   : > { %v1081_v46 = vld [vmem:[#allocation2 + $0x9] sm:$0xff]  ;;  %415 = vst.msk [vmem:[#allocation3 + $0x1a9] sm:$0x1] %vm336_vm1, %v7663_v1  ;;  %v531_v1 = vmax.f32 %v499_v56, 0.0  ;;  %vm3749_vm1 = vcmask 454048  }
  0x60   : > { %v1113_v51 = vpack.c.bf16 %v1081_v46, %v1081_v46  ;;  %555 = vst.msk [vmem:[#allocation2 + $0x31] sm:$0xff] %vm327_vm0, %v522_v34 }
  0x61   : > { %554 = vst.msk [vmem:[#allocation2 + $0x21] sm:$0xff] %vm327_vm0, %v521_v38 }
  0x62   : > { %1178 = vrot.lane.b32.xlu2 %v1113_v51, %s7665_s13  ;;  %553 = vst.msk [vmem:[#allocation2 + $0x19] sm:$0xff] %vm327_vm0, %v520_v42  ;;  %v591_v42 = vld [vmem:[%s8007_s24 + $0x30] sm:$0xff] }
  0x63   : > { %558 = vst.msk [vmem:[#allocation2 + $0x51] sm:$0xff] %vm327_vm0, %v525_v47 }
  0x64   : > { %557 = vst.msk [vmem:[#allocation2 + $0x49] sm:$0xff] %vm327_vm0, %v524_v52  ;;  %v593_v52 = vld [vmem:[%s8007_s24 + $0x40] sm:$0xff] }
  0x65   : > { %556 = vst.msk [vmem:[#allocation2 + $0x39] sm:$0xff] %vm327_vm0, %v523_v55 }
  0x66   : > { %561 = vst.msk [vmem:[#allocation2 + $0x79] sm:$0xff] %vm327_vm0, %v528_v58 }
  0x67   : > { %v1084_v5 = vld [vmem:[#allocation2 + $0x31] sm:$0xff]  ;;  %560 = vst.msk [vmem:[#allocation2 + $0x69] sm:$0xff] %vm327_vm0, %v527_v61 }
  0x68   : > { %v1116_v7 = vpack.c.bf16 %v1084_v5, %v1084_v5  ;;  %v1083_v8 = vld [vmem:[#allocation2 + $0x21] sm:$0xff]  ;;  %559 = vst.msk [vmem:[#allocation2 + $0x61] sm:$0xff] %vm327_vm0, %v526_v63  ;;  %v592_v63 = vld [vmem:[%s8007_s24 + $0x38] sm:$0xff] }
  0x69   : > { %v1115_v11 = vpack.c.bf16 %v1083_v8, %v1083_v8  ;;  %v1082_v12 = vld [vmem:[#allocation2 + $0x19] sm:$0xff]  ;;  %564 = vst.msk [vmem:[#allocation2 + $0x99] sm:$0xff] %vm327_vm0, %v531_v1 }
  0x6a   : > { %1184 = vrot.lane.b32.xlu2 %v1116_v7, %s7665_s13  ;;  %v1114_v15 = vpack.c.bf16 %v1082_v12, %v1082_v12  ;;  %563 = vst.msk [vmem:[#allocation2 + $0x91] sm:$0xff] %vm327_vm0, %v530_v3  ;;  %v1087_v17 = vld [vmem:[#allocation2 + $0x51] sm:$0xff] }
  0x6b   : > { %1182 = vrot.lane.b32.xlu1 %v1115_v11, %s7665_s13  ;;  %562 = vst.msk [vmem:[#allocation2 + $0x81] sm:$0xff] %vm327_vm0, %v529_v6  ;;  %v1086_v18 = vld [vmem:[#allocation2 + $0x49] sm:$0xff]  ;;  %v1119_v20 = vpack.c.bf16 %v1087_v17, %v1087_v17 }
  0x6c   : > { %1180 = vrot.lane.b32.xlu0 %v1114_v15, %s7665_s13  ;;  %567 = vst.msk [vmem:[#allocation2 + $0xc1] sm:$0xff] %vm327_vm0, %v534_v10  ;;  %v1085_v19 = vld [vmem:[#allocation2 + $0x39] sm:$0xff]  ;;  %v1118_v21 = vpack.c.bf16 %v1086_v18, %v1086_v18  ;;  %v595_v10 = vld [vmem:[%s8007_s24 + $0x50] sm:$0xff] }
  0x6d   : > { %566 = vst.msk [vmem:[#allocation2 + $0xb1] sm:$0xff] %vm327_vm0, %v533_v13  ;;  %v1117_v22 = vpack.c.bf16 %v1085_v19, %v1085_v19  ;;  %v1090_v23 = vld [vmem:[#allocation2 + $0x79] sm:$0xff]  ;;  %v599_v19 = vld [vmem:[%s8007_s24 + $0x70] sm:$0xff] }
  0x6e   : > { %565 = vst.msk [vmem:[#allocation2 + $0xa9] sm:$0xff] %vm327_vm0, %v532_v16  ;;  %v1089_v24 = vld [vmem:[#allocation2 + $0x69] sm:$0xff]  ;;  %v1122_v26 = vpack.c.bf16 %v1090_v23, %v1090_v23  ;;  %v596_v15 = vld [vmem:[%s8007_s24 + $0x58] sm:$0xff] }
  0x6f   : > { %v1088_v25 = vld [vmem:[#allocation2 + $0x61] sm:$0xff]  ;;  %v1121_v27 = vpack.c.bf16 %v1089_v24, %v1089_v24  ;;  %v600_v23 = vld [vmem:[%s8007_s24 + $0x78] sm:$0xff] }
  0x70   : > { %v1120_v28 = vpack.c.bf16 %v1088_v25, %v1088_v25  ;;  %v1093_v29 = vld [vmem:[#allocation2 + $0x99] sm:$0xff] }
  0x71   : > { %v1092_v30 = vld [vmem:[#allocation2 + $0x91] sm:$0xff]  ;;  %v1125_v33 = vpack.c.bf16 %v1093_v29, %v1093_v29 }
  0x72   : > { %1190 = vrot.lane.b32.xlu2 %v1119_v20, %s7665_s13  ;;  %v1091_v31 = vld [vmem:[#allocation2 + $0x81] sm:$0xff]  ;;  %v1124_v34 = vpack.c.bf16 %v1092_v30, %v1092_v30 }
  0x73   : > { %1188 = vrot.lane.b32.xlu1 %v1118_v21, %s7665_s13  ;;  %v1123_v35 = vpack.c.bf16 %v1091_v31, %v1091_v31  ;;  %v1096_v37 = vld [vmem:[#allocation2 + $0xc1] sm:$0xff]  ;;  %v603_v31 = vld [vmem:[%s8007_s24 + $0x90] sm:$0xff] }
  0x74   : > { %1186 = vrot.lane.b32.xlu0 %v1117_v22, %s7665_s13  ;;  %v1095_v38 = vld [vmem:[#allocation2 + $0xb1] sm:$0xff]  ;;  %v1128_v46 = vpack.c.bf16 %v1096_v37, %v1096_v37 }
  0x75   : > { %v1094_v43 = vld [vmem:[#allocation2 + $0xa9] sm:$0xff]  ;;  %v1127_v47 = vpack.c.bf16 %v1095_v38, %v1095_v38 }
  0x76   : > { %v1126_v55 = vpack.c.bf16 %v1094_v43, %v1094_v43 }
  0x7a   : > { %1196 = vrot.lane.b32.xlu2 %v1122_v26, %s7665_s13 }
  0x7b   : > { %1194 = vrot.lane.b32.xlu1 %v1121_v27, %s7665_s13  ;;  %v598_v27 = vld [vmem:[%s8007_s24 + $0x68] sm:$0xff] }
  0x7c   : > { %1192 = vrot.lane.b32.xlu0 %v1120_v28, %s7665_s13 }
  0x7e   : > { %v8009_v32 = vpop.permute.xlu0 %620 }
  0x7f   : > { %v623_v48 = vmul.f32 %v8009_v32, %v585_v36  ;;  %v625_v49 = vmul.f32 %v8009_v32, %v587_v39  ;;  %v626_v50 = vmul.f32 %v8009_v32, %v588_v40  ;;  %v624_v51 = vmul.f32 %v8009_v32, %v586_v41  ;;  %v601_v36 = vld [vmem:[%s8007_s24 + $0x80] sm:$0xff]  ;;  %v602_v40 = vld [vmem:[%s8007_s24 + $0x88] sm:$0xff] }
  0x80   : > { %v629_v56 = vmul.f32 %v8009_v32, %v591_v42  ;;  %v627_v57 = vmul.f32 %v8009_v32, %v589_v44  ;;  %v628_v58 = vmul.f32 %v8009_v32, %v590_v45  ;;  %v631_v2 = vmul.f32 %v8009_v32, %v593_v52  ;;  %v605_v44 = vld [vmem:[%s8007_s24 + $0xa0] sm:$0xff] }
  0x81   : > { %v632_v3 = vmul.f32 %v8009_v32, %v594_v53  ;;  %v630_v13 = vmul.f32 %v8009_v32, %v592_v63  ;;  %v635_v18 = vmul.f32 %v8009_v32, %v597_v4  ;;  %v633_v22 = vmul.f32 %v8009_v32, %v595_v10 }
  0x82   : > { %1202 = vrot.lane.b32.xlu2 %v1125_v33, %s7665_s13  ;;  %v634_v26 = vmul.f32 %v8009_v32, %v596_v15  ;;  %v637_v30 = vmul.f32 %v8009_v32, %v599_v19  ;;  %v636_v39 = vmul.f32 %v8009_v32, %v598_v27  ;;  %v641_v43 = vmul.f32 %v8009_v32, %v603_v31 }
  0x83   : > { %1200 = vrot.lane.b32.xlu1 %v1124_v34, %s7665_s13 }
  0x84   : > { %1198 = vrot.lane.b32.xlu0 %v1123_v35, %s7665_s13  ;;  %v638_v35 = vmul.f32 %v8009_v32, %v600_v23  ;;  %v610_v23 = vld [vmem:[%s8007_s24 + $0xc8] sm:$0xff] }
  0x86   : > { %v8027_v54 = vpop.permute.xlu0 %658 }
  0x87   : > { %v661_v59 = vadd.f32 %v8027_v54, %v623_v48  ;;  %v663_v60 = vadd.f32 %v8027_v54, %v625_v49  ;;  %v664_v61 = vadd.f32 %v8027_v54, %v626_v50  ;;  %v662_v62 = vadd.f32 %v8027_v54, %v624_v51  ;;  %v606_v49 = vld [vmem:[%s8007_s24 + $0xa8] sm:$0xff] }
  0x88   : > { %v667_v0 = vadd.f32 %v8027_v54, %v629_v56  ;;  %v665_v1 = vadd.f32 %v8027_v54, %v627_v57  ;;  %v666_v8 = vadd.f32 %v8027_v54, %v628_v58  ;;  %v669_v12 = vadd.f32 %v8027_v54, %v631_v2  ;;  %v604_v56 = vld [vmem:[%s8007_s24 + $0x98] sm:$0xff] }
  0x89   : > { %v693_v5 = vmax.f32 %v661_v59, 0.0  ;;  %v695_v6 = vmax.f32 %v663_v60, 0.0  ;;  %v696_v7 = vmax.f32 %v664_v61, 0.0  ;;  %v694_v11 = vmax.f32 %v662_v62, 0.0  ;;  %v609_v62 = vld [vmem:[%s8007_s24 + $0xc0] sm:$0xff] }
  0x8a   : > { %1208 = vrot.lane.b32.xlu2 %v1128_v46, %s7665_s13  ;;  %v699_v16 = vmax.f32 %v667_v0, 0.0  ;;  %v670_v17 = vadd.f32 %v8027_v54, %v632_v3  ;;  %v697_v20 = vmax.f32 %v665_v1, 0.0  ;;  %v668_v21 = vadd.f32 %v8027_v54, %v630_v13  ;;  %v607_v3 = vld [vmem:[%s8007_s24 + $0xb0] sm:$0xff] }
  0x8b   : > { %1206 = vrot.lane.b32.xlu1 %v1127_v47, %s7665_s13  ;;  %726 = vst.msk [vmem:[#allocation3 + $0x19] sm:$0xff] %vm327_vm0, %v693_v5  ;;  %v698_v24 = vmax.f32 %v666_v8, 0.0  ;;  %v673_v25 = vadd.f32 %v8027_v54, %v635_v18  ;;  %v701_v28 = vmax.f32 %v669_v12, 0.0  ;;  %v671_v29 = vadd.f32 %v8027_v54, %v633_v22  ;;  %v611_v12 = vld [vmem:[%s8007_s24 + $0xd0] sm:$0xff]  ;;  %v612_v18 = vld [vmem:[%s8007_s24 + $0xd8] sm:$0xff] }
  0x8c   : > { %1204 = vrot.lane.b32.xlu0 %v1126_v55, %s7665_s13  ;;  %728 = vst.msk [vmem:[#allocation3 + $0x31] sm:$0xff] %vm327_vm0, %v695_v6  ;;  %v702_v33 = vmax.f32 %v670_v17, 0.0  ;;  %v672_v34 = vadd.f32 %v8027_v54, %v634_v26  ;;  %v700_v37 = vmax.f32 %v668_v21, 0.0  ;;  %v675_v38 = vadd.f32 %v8027_v54, %v637_v30 }
  0x8d   : > { %729 = vst.msk [vmem:[#allocation3 + $0x39] sm:$0xff] %vm327_vm0, %v696_v7  ;;  %v705_v41 = vmax.f32 %v673_v25, 0.0  ;;  %v676_v42 = vadd.f32 %v8027_v54, %v638_v35  ;;  %v703_v46 = vmax.f32 %v671_v29, 0.0  ;;  %v674_v47 = vadd.f32 %v8027_v54, %v636_v39  ;;  %v608_v7 = vld [vmem:[%s8007_s24 + $0xb8] sm:$0xff] }
  0x8e   : > { %727 = vst.msk [vmem:[#allocation3 + $0x21] sm:$0xff] %vm327_vm0, %v694_v11  ;;  %v639_v48 = vmul.f32 %v8009_v32, %v601_v36  ;;  %v704_v52 = vmax.f32 %v672_v34, 0.0  ;;  %v679_v53 = vadd.f32 %v8027_v54, %v641_v43  ;;  %v640_v55 = vmul.f32 %v8009_v32, %v602_v40  ;;  %v614_v34 = vld [vmem:[%s8007_s24 + $0xe8] sm:$0xff] }
  0x8f   : > { %732 = vst.msk [vmem:[#allocation3 + $0x61] sm:$0xff] %vm327_vm0, %v699_v16  ;;  %v707_v59 = vmax.f32 %v675_v38, 0.0  ;;  %v643_v61 = vmul.f32 %v8009_v32, %v605_v44  ;;  %v708_v0 = vmax.f32 %v676_v42, 0.0  ;;  %v644_v2 = vmul.f32 %v8009_v32, %v606_v49  ;;  %v616_v49 = vld [vmem:[%s8007_s24 + $0xf8] sm:$0xff] }
  0x90   : > { %730 = vst.msk [vmem:[#allocation3 + $0x49] sm:$0xff] %vm327_vm0, %v697_v20  ;;  %v677_v60 = vadd.f32 %v8027_v54, %v639_v48  ;;  %v678_v1 = vadd.f32 %v8027_v54, %v640_v55  ;;  %v706_v4 = vmax.f32 %v674_v47, 0.0  ;;  %v642_v6 = vmul.f32 %v8009_v32, %v604_v56 }
  0x91   : > { %731 = vst.msk [vmem:[#allocation3 + $0x51] sm:$0xff] %vm327_vm0, %v698_v24  ;;  %v681_v5 = vadd.f32 %v8027_v54, %v643_v61  ;;  %v711_v8 = vmax.f32 %v679_v53, 0.0  ;;  %v682_v10 = vadd.f32 %v8027_v54, %v644_v2  ;;  %v647_v11 = vmul.f32 %v8009_v32, %v609_v62 }
  0x92   : > { %v857_v45 = vld [vmem:[#allocation3 + $0x18] sm:$0xff]  ;;  %734 = vst.msk [vmem:[#allocation3 + $0x79] sm:$0xff] %vm327_vm0, %v701_v28  ;;  %v709_v15 = vmax.f32 %v677_v60, 0.0  ;;  %v680_v16 = vadd.f32 %v8027_v54, %v642_v6  ;;  %v645_v17 = vmul.f32 %v8009_v32, %v607_v3  ;;  %v710_v20 = vmax.f32 %v678_v1, 0.0  ;;  %v613_v28 = vld [vmem:[%s8007_s24 + $0xe0] sm:$0xff] }
  0x93   : > { %v889_v50 = vpack.c.bf16 %v857_v45, %v857_v45  ;;  %v859_v51 = vld [vmem:[#allocation3 + $0x30] sm:$0xff]  ;;  %735 = vst.msk [vmem:[#allocation3 + $0x81] sm:$0xff] %vm327_vm0, %v702_v33  ;;  %v685_v21 = vadd.f32 %v8027_v54, %v647_v11  ;;  %v646_v22 = vmul.f32 %v8009_v32, %v608_v7  ;;  %v713_v25 = vmax.f32 %v681_v5, 0.0 }
  0x94   : > { %v860_v57 = vld [vmem:[#allocation3 + $0x38] sm:$0xff]  ;;  %v891_v58 = vpack.c.bf16 %v859_v51, %v859_v51  ;;  %733 = vst.msk [vmem:[#allocation3 + $0x69] sm:$0xff] %vm327_vm0, %v700_v37  ;;  %v683_v26 = vadd.f32 %v8027_v54, %v645_v17  ;;  %v649_v27 = vmul.f32 %v8009_v32, %v611_v12  ;;  %v714_v30 = vmax.f32 %v682_v10, 0.0 }
  0x95   : > { %955 = vrot.lane.b32.xlu2 %v889_v50, %s7664_s12  ;;  %v892_v63 = vpack.c.bf16 %v860_v57, %v860_v57  ;;  %738 = vst.msk [vmem:[#allocation3 + $0xa9] sm:$0xff] %vm327_vm0, %v705_v41  ;;  %v858_v13 = vld [vmem:[#allocation3 + $0x20] sm:$0xff]  ;;  %v684_v31 = vadd.f32 %v8027_v54, %v646_v22  ;;  %v650_v33 = vmul.f32 %v8009_v32, %v612_v18  ;;  %v712_v36 = vmax.f32 %v680_v16, 0.0 }
  0x96   : > { %959 = vrot.lane.b32.xlu0 %v891_v58, %s7664_s12  ;;  %736 = vst.msk [vmem:[#allocation3 + $0x91] sm:$0xff] %vm327_vm0, %v703_v46  ;;  %v863_v24 = vld [vmem:[#allocation3 + $0x60] sm:$0xff]  ;;  %v890_v29 = vpack.c.bf16 %v858_v13, %v858_v13  ;;  %v687_v37 = vadd.f32 %v8027_v54, %v649_v27  ;;  %v648_v38 = vmul.f32 %v8009_v32, %v610_v23  ;;  %v717_v40 = vmax.f32 %v685_v21, 0.0 }
  0x97   : > { %961 = vrot.lane.b32.xlu1 %v892_v63, %s7664_s12  ;;  %737 = vst.msk [vmem:[#allocation3 + $0x99] sm:$0xff] %vm327_vm0, %v704_v52  ;;  %v895_v39 = vpack.c.bf16 %v863_v24, %v863_v24  ;;  %v688_v41 = vadd.f32 %v8027_v54, %v650_v33  ;;  %v651_v42 = vmul.f32 %v8009_v32, %v613_v28  ;;  %v715_v43 = vmax.f32 %v683_v26, 0.0  ;;  %v615_v46 = vld [vmem:[%s8007_s24 + $0xf0] sm:$0xff]  ;;  %v861_v50 = vld [vmem:[#allocation3 + $0x48] sm:$0xff]  ;;  %s7675_s24 = smov 48  }
  0x98   : > { %740 = vst.msk [vmem:[#allocation3 + $0xc1] sm:$0xff] %vm327_vm0, %v707_v59  ;;  %v862_v19 = vld [vmem:[#allocation3 + $0x50] sm:$0xff]  ;;  %v686_v44 = vadd.f32 %v8027_v54, %v648_v38  ;;  %v652_v45 = vmul.f32 %v8009_v32, %v614_v34  ;;  %v716_v47 = vmax.f32 %v684_v31, 0.0  ;;  %v719_v51 = vmax.f32 %v687_v37, 0.0 }
  0x99   : > { %741 = vst.msk [vmem:[#allocation3 + $0xc9] sm:$0xff] %vm327_vm0, %v708_v0  ;;  %v894_v35 = vpack.c.bf16 %v862_v19, %v862_v19  ;;  %v689_v48 = vadd.f32 %v8027_v54, %v651_v42  ;;  %v865_v53 = vld [vmem:[#allocation3 + $0x78] sm:$0xff]  ;;  %v720_v55 = vmax.f32 %v688_v41, 0.0  ;;  %v653_v56 = vmul.f32 %v8009_v32, %v615_v46  ;;  %v432_v31 = vld [vmem:[%s7887_s17 + $0x80] sm:$0xff] }
  0x9a   : > { %739 = vst.msk [vmem:[#allocation3 + $0xb1] sm:$0xff] %vm327_vm0, %v706_v4  ;;  %v690_v52 = vadd.f32 %v8027_v54, %v652_v45  ;;  %v866_v57 = vld [vmem:[#allocation3 + $0x80] sm:$0xff]  ;;  %v718_v58 = vmax.f32 %v686_v44, 0.0  ;;  %v654_v59 = vmul.f32 %v8009_v32, %v616_v49  ;;  %v893_v60 = vpack.c.bf16 %v861_v50, %v861_v50  ;;  %v954_v32 = vpop.permute.xlu1 %953  ;;  %v759_v4 = vld [vmem:[#allocation2 + $0x8] sm:$0xff]  ;;  %v431_v45 = vld [vmem:[%s7887_s17 + $0x78] sm:$0xff] }
  0x9b   : > { %744 = vst.msk [vmem:[#allocation3 + $0xf1] sm:$0xff] %vm327_vm0, %v711_v8  ;;  %v721_v61 = vmax.f32 %v689_v48, 0.0  ;;  %v691_v62 = vadd.f32 %v8027_v54, %v653_v56  ;;  %v897_v63 = vpack.c.bf16 %v865_v53, %v865_v53  ;;  %v898_v2 = vpack.c.bf16 %v866_v57, %v866_v57  ;;  %v864_v5 = vld [vmem:[#allocation3 + $0x68] sm:$0xff]  ;;  %v433_v46 = vld [vmem:[%s7887_s17 + $0x88] sm:$0xff] }
  0x9c   : > { %742 = vst.msk [vmem:[#allocation3 + $0xd9] sm:$0xff] %vm327_vm0, %v709_v15  ;;  %v722_v0 = vmax.f32 %v690_v52, 0.0  ;;  %v692_v1 = vadd.f32 %v8027_v54, %v654_v59  ;;  %v791_v54 = vpack.c.bf16 %v759_v4, %v759_v4  ;;  %v869_v8 = vld [vmem:[#allocation3 + $0xa8] sm:$0xff]  ;;  %v896_v10 = vpack.c.bf16 %v864_v5, %v864_v5  ;;  %v758_v15 = vld [vmem:[#allocation2] sm:$0xff] }
  0x9d   : > { %957 = vrot.lane.b32.xlu2 %v890_v29, %s7664_s12  ;;  %743 = vst.msk [vmem:[#allocation3 + $0xe1] sm:$0xff] %vm327_vm0, %v710_v20  ;;  %v723_v3 = vmax.f32 %v691_v62, 0.0  ;;  %v901_v12 = vpack.c.bf16 %v869_v8, %v869_v8  ;;  %v867_v16 = vld [vmem:[#allocation3 + $0x90] sm:$0xff]  ;;  %v790_v17 = vpack.c.bf16 %v758_v15, %v758_v15  ;;  %v468_v33 = vmul.f32 %v7896_v9, %v432_v31 }
  0x9e   : > { %965 = vrot.lane.b32.xlu0 %v894_v35, %s7664_s12  ;;  %746 = vst.msk [vmem:[#allocation3 + $0x109] sm:$0xff] %vm327_vm0, %v713_v25  ;;  %v724_v6 = vmax.f32 %v692_v1, 0.0  ;;  %v868_v7 = vld [vmem:[#allocation3 + $0x98] sm:$0xff]  ;;  %v899_v20 = vpack.c.bf16 %v867_v16, %v867_v16  ;;  %v467_v49 = vmul.f32 %v7896_v9, %v431_v45  ;;  %v469_v50 = vmul.f32 %v7896_v9, %v433_v46  ;;  %v434_v1 = vld [vmem:[%s7887_s17 + $0x90] sm:$0xff] }
  0x9f   : > { %967 = vrot.lane.b32.xlu1 %v895_v39, %s7664_s12  ;;  %747 = vst.msk [vmem:[#allocation3 + $0x111] sm:$0xff] %vm327_vm0, %v714_v30  ;;  %v900_v11 = vpack.c.bf16 %v868_v7, %v868_v7  ;;  %v871_v18 = vld [vmem:[#allocation3 + $0xc0] sm:$0xff]  ;;  %v504_v35 = vadd.f32 %v7913_v14, %v468_v33  ;;  %v470_v4 = vmul.f32 %v7896_v9, %v434_v1 }
  0xa0   : > { %745 = vst.msk [vmem:[#allocation3 + $0xf9] sm:$0xff] %vm327_vm0, %v712_v36  ;;  %v872_v19 = vld [vmem:[#allocation3 + $0xc8] sm:$0xff]  ;;  %v903_v21 = vpack.c.bf16 %v871_v18, %v871_v18  ;;  %v505_v56 = vadd.f32 %v7913_v14, %v469_v50 }
  0xa1   : > { %750 = vst.msk [vmem:[#allocation3 + $0x139] sm:$0xff] %vm327_vm0, %v717_v40  ;;  %v904_v22 = vpack.c.bf16 %v872_v19, %v872_v19  ;;  %v870_v24 = vld [vmem:[#allocation3 + $0xb0] sm:$0xff]  ;;  %v536_v38 = vmax.f32 %v504_v35, 0.0  ;;  %v441_v19 = vld [vmem:[%s7887_s17 + $0xc8] sm:$0xff] }
  0xa2   : > { %748 = vst.msk [vmem:[#allocation3 + $0x121] sm:$0xff] %vm327_vm0, %v715_v43  ;;  %v952_v13 = vpop.permute.xlu1 %951  ;;  %v875_v26 = vld [vmem:[#allocation3 + $0xf0] sm:$0xff]  ;;  %v902_v27 = vpack.c.bf16 %v870_v24, %v870_v24  ;;  %v435_v43 = vld [vmem:[%s7887_s17 + $0x98] sm:$0xff] }
  0xa3   : > { %749 = vst.msk [vmem:[#allocation3 + $0x129] sm:$0xff] %vm327_vm0, %v716_v47  ;;  %v907_v30 = vpack.c.bf16 %v875_v26, %v875_v26  ;;  %v873_v34 = vld [vmem:[#allocation3 + $0xd8] sm:$0xff]  ;;  %v471_v44 = vmul.f32 %v7896_v9, %v435_v43  ;;  %v444_v43 = vld [vmem:[%s7887_s17 + $0xe0] sm:$0xff] }
  0xa4   : > { %752 = vst.msk [vmem:[#allocation3 + $0x151] sm:$0xff] %vm327_vm0, %v719_v51  ;;  %v874_v25 = vld [vmem:[#allocation3 + $0xe0] sm:$0xff]  ;;  %v905_v39 = vpack.c.bf16 %v873_v34, %v873_v34  ;;  %v480_v46 = vmul.f32 %v7896_v9, %v444_v43 }
  0xa5   : > { %963 = vrot.lane.b32.xlu2 %v893_v60, %s7664_s12  ;;  %753 = vst.msk [vmem:[#allocation3 + $0x159] sm:$0xff] %vm327_vm0, %v720_v55  ;;  %v906_v28 = vpack.c.bf16 %v874_v25, %v874_v25  ;;  %v877_v36 = vld [vmem:[#allocation3 + $0x108] sm:$0xff]  ;;  %v507_v48 = vadd.f32 %v7913_v14, %v471_v44  ;;  %v503_v55 = vadd.f32 %v7913_v14, %v467_v49  ;;  %v764_v49 = vld [vmem:[#allocation2 + $0x48] sm:$0xff] }
  0xa6   : > { %971 = vrot.lane.b32.xlu0 %v897_v63, %s7664_s12  ;;  %751 = vst.msk [vmem:[#allocation3 + $0x141] sm:$0xff] %vm327_vm0, %v718_v58  ;;  %v878_v37 = vld [vmem:[#allocation3 + $0x110] sm:$0xff]  ;;  %v909_v40 = vpack.c.bf16 %v877_v36, %v877_v36  ;;  %v438_v63 = vld [vmem:[%s7887_s17 + $0xb0] sm:$0xff] }
  0xa7   : > { %973 = vrot.lane.b32.xlu1 %v898_v2, %s7664_s12  ;;  %754 = vst.msk [vmem:[#allocation3 + $0x169] sm:$0xff] %vm327_vm0, %v721_v61  ;;  %v910_v42 = vpack.c.bf16 %v878_v37, %v878_v37  ;;  %v876_v47 = vld [vmem:[#allocation3 + $0xf8] sm:$0xff]  ;;  %v539_v53 = vmax.f32 %v507_v48, 0.0  ;;  %v535_v60 = vmax.f32 %v503_v55, 0.0  ;;  %v537_v61 = vmax.f32 %v505_v56, 0.0  ;;  %v760_v2 = vld [vmem:[#allocation2 + $0x18] sm:$0xff] }
  0xa8   : > { %755 = vst.msk [vmem:[#allocation3 + $0x171] sm:$0xff] %vm327_vm0, %v722_v0  ;;  %v881_v52 = vld [vmem:[#allocation3 + $0x138] sm:$0xff]  ;;  %v908_v57 = vpack.c.bf16 %v876_v47, %v876_v47  ;;  %v474_v0 = vmul.f32 %v7896_v9, %v438_v63  ;;  %v792_v5 = vpack.c.bf16 %v760_v2, %v760_v2  ;;  %v440_v48 = vld [vmem:[%s7887_s17 + $0xc0] sm:$0xff]  ;;  %v796_v55 = vpack.c.bf16 %v764_v49, %v764_v49  ;;  %v442_v56 = vld [vmem:[%s7887_s17 + $0xd0] sm:$0xff] }
  0xa9   : > { %756 = vst.msk [vmem:[#allocation3 + $0x181] sm:$0xff] %vm327_vm0, %v723_v3  ;;  %v913_v62 = vpack.c.bf16 %v881_v52, %v881_v52  ;;  %v879_v3 = vld [vmem:[#allocation3 + $0x120] sm:$0xff]  ;;  %v516_v52 = vadd.f32 %v7913_v14, %v480_v46 }
  0xaa   : > { %824 = vst.msk [vmem:[#allocation4 + $0x4] sm:$0xf] %vm822_vm3, %v791_v54  ;;  %v1177_v23 = vpop.permute.xlu1 %1176  ;;  %v880_v51 = vld [vmem:[#allocation3 + $0x128] sm:$0xff] }
  0xab   : > { %1049 = vst.msk [vmem:[#allocation4 + $0x4] sm:$0xf] %vm1047_vm4, %v954_v32  ;;  %v912_v58 = vpack.c.bf16 %v880_v51, %v880_v51  ;;  %v510_v32 = vadd.f32 %v7913_v14, %v474_v0  ;;  %v883_v54 = vld [vmem:[#allocation3 + $0x150] sm:$0xff] }
  0xac   : > { %757 = vst.msk [vmem:[#allocation3 + $0x189] sm:$0xff] %vm327_vm0, %v724_v6  ;;  %v436_v6 = vld [vmem:[%s7887_s17 + $0xa0] sm:$0xff]  ;;  %v884_v7 = vld [vmem:[#allocation3 + $0x158] sm:$0xff] }
  0xad   : > { %969 = vrot.lane.b32.xlu2 %v896_v10, %s7664_s12  ;;  %823 = vst.msk [vmem:[#allocation4] sm:$0xf] %vm822_vm3, %v790_v17  ;;  %v542_v8 = vmax.f32 %v510_v32, 0.0  ;;  %v506_v10 = vadd.f32 %v7913_v14, %v470_v4  ;;  %v916_v18 = vpack.c.bf16 %v884_v7, %v884_v7  ;;  %v882_v24 = vld [vmem:[#allocation3 + $0x140] sm:$0xff]  ;;  %v767_v7 = vld [vmem:[#allocation2 + $0x68] sm:$0xff] }
  0xae   : > { %977 = vrot.lane.b32.xlu0 %v900_v11, %s7664_s12  ;;  %1048 = vst.msk [vmem:[#allocation4] sm:$0xf] %vm1047_vm4, %v952_v13  ;;  %v472_v11 = vmul.f32 %v7896_v9, %v436_v6  ;;  %v915_v13 = vpack.c.bf16 %v883_v54, %v883_v54  ;;  %v914_v35 = vpack.c.bf16 %v882_v24, %v882_v24  ;;  %v885_v50 = vld [vmem:[#allocation3 + $0x168] sm:$0xff] }
  0xaf   : > { %979 = vrot.lane.b32.xlu1 %v901_v12, %s7664_s12  ;;  %1273 = vst.msk [vmem:[#allocation4] sm:$0xf] %vm1272_vm5, %v1177_v23  ;;  %v911_v12 = vpack.c.bf16 %v879_v3, %v879_v3  ;;  %v538_v16 = vmax.f32 %v506_v10, 0.0  ;;  %v761_v23 = vld [vmem:[#allocation2 + $0x20] sm:$0xff]  ;;  %v443_v6 = vld [vmem:[%s7887_s17 + $0xd8] sm:$0xff] }
  0xb0   : > { %569 = vst.msk [vmem:[#allocation2 + $0xd9] sm:$0xff] %vm327_vm0, %v536_v38  ;;  %v508_v17 = vadd.f32 %v7913_v14, %v472_v11  ;;  %v479_v10 = vmul.f32 %v7896_v9, %v443_v6  ;;  %v799_v11 = vpack.c.bf16 %v767_v7, %v767_v7  ;;  %v772_v7 = vld [vmem:[#allocation2 + $0xa8] sm:$0xff] }
  0xb1   : > { %572 = vst.msk [vmem:[#allocation2 + $0xf9] sm:$0xff] %vm327_vm0, %v539_v53  ;;  %v476_v53 = vmul.f32 %v7896_v9, %v440_v48 }
  0xb2   : > { %568 = vst.msk [vmem:[#allocation2 + $0xc9] sm:$0xff] %vm327_vm0, %v535_v60 }
  0xb3   : > { %570 = vst.msk [vmem:[#allocation2 + $0xe1] sm:$0xff] %vm327_vm0, %v537_v61  ;;  %v512_v60 = vadd.f32 %v7913_v14, %v476_v53  ;;  %v478_v61 = vmul.f32 %v7896_v9, %v442_v56  ;;  %v769_v56 = vld [vmem:[#allocation2 + $0x80] sm:$0xff] }
  0xb4   : > { %825 = vst.msk [vmem:[#allocation4 + $0x8] sm:$0xf] %vm822_vm3, %v792_v5 }
  0xb5   : > { %975 = vrot.lane.b32.xlu2 %v899_v20, %s7664_s12  ;;  %575 = vst.msk [vmem:[#allocation2 + $0x121] sm:$0xff] %vm327_vm0, %v542_v8  ;;  %v540_v20 = vmax.f32 %v508_v17, 0.0  ;;  %v544_v0 = vmax.f32 %v512_v60, 0.0  ;;  %v514_v1 = vadd.f32 %v7913_v14, %v478_v61  ;;  %v515_v17 = vadd.f32 %v7913_v14, %v479_v10  ;;  %v768_v61 = vld [vmem:[#allocation2 + $0x78] sm:$0xff] }
  0xb6   : > { %983 = vrot.lane.b32.xlu0 %v903_v21, %s7664_s12  ;;  %571 = vst.msk [vmem:[#allocation2 + $0xf1] sm:$0xff] %vm327_vm0, %v538_v16  ;;  %v477_v21 = vmul.f32 %v7896_v9, %v441_v19  ;;  %v804_v10 = vpack.c.bf16 %v772_v7, %v772_v7 }
  0xb7   : > { %985 = vrot.lane.b32.xlu1 %v904_v22, %s7664_s12  ;;  %v437_v22 = vld [vmem:[%s7887_s17 + $0xa8] sm:$0xff]  ;;  %v1098_v25 = vld [vmem:[#allocation2 + $0xd9] sm:$0xff]  ;;  %573 = vst.msk [vmem:[#allocation2 + $0x109] sm:$0xff] %vm327_vm0, %v540_v20  ;;  %v546_v5 = vmax.f32 %v514_v1, 0.0  ;;  %v762_v20 = vld [vmem:[#allocation2 + $0x30] sm:$0xff] }
  0xb8   : > { %v513_v26 = vadd.f32 %v7913_v14, %v477_v21  ;;  %v1130_v36 = vpack.c.bf16 %v1098_v25, %v1098_v25  ;;  %v1101_v51 = vld [vmem:[#allocation2 + $0xf9] sm:$0xff]  ;;  %829 = vst.msk [vmem:[#allocation4 + $0x18] sm:$0xf] %vm822_vm3, %v796_v55  ;;  %v547_v21 = vmax.f32 %v515_v17, 0.0 }
  0xb9   : > { %v1097_v47 = vld [vmem:[#allocation2 + $0xc9] sm:$0xff]  ;;  %v1133_v63 = vpack.c.bf16 %v1101_v51, %v1101_v51  ;;  %577 = vst.msk [vmem:[#allocation2 + $0x139] sm:$0xff] %vm327_vm0, %v544_v0 }
  0xba   : > { %v545_v31 = vmax.f32 %v513_v26, 0.0  ;;  %v1099_v4 = vld [vmem:[#allocation2 + $0xe1] sm:$0xff]  ;;  %579 = vst.msk [vmem:[#allocation2 + $0x151] sm:$0xff] %vm327_vm0, %v546_v5  ;;  %v773_v51 = vld [vmem:[#allocation2 + $0xb0] sm:$0xff]  ;;  %v776_v5 = vld [vmem:[#allocation2 + $0xd8] sm:$0xff] }
  0xbb   : > { %832 = vst.msk [vmem:[#allocation4 + $0x24] sm:$0xf] %vm822_vm3, %v799_v11  ;;  %v805_v53 = vpack.c.bf16 %v773_v51, %v773_v51  ;;  %v808_v6 = vpack.c.bf16 %v776_v5, %v776_v5 }
  0xbc   : > { %v1179_v29 = vpop.permute.xlu2 %1178  ;;  %578 = vst.msk [vmem:[#allocation2 + $0x141] sm:$0xff] %vm327_vm0, %v545_v31  ;;  %v1104_v8 = vld [vmem:[#allocation2 + $0x121] sm:$0xff]  ;;  %v7649_v31 = vld [vmem:[%s10435_s3] ss:$0 sm:$0xff] }
  0xbd   : > { %981 = vrot.lane.b32.xlu2 %v902_v27, %s7664_s12  ;;  %1274 = vst.msk [vmem:[#allocation4 + $0x4] sm:$0xf] %vm1272_vm5, %v1179_v29  ;;  %v473_v27 = vmul.f32 %v7896_v9, %v437_v22  ;;  %v886_v29 = vld [vmem:[#allocation3 + $0x170] sm:$0xff]  ;;  %v1100_v54 = vld [vmem:[#allocation2 + $0xf1] sm:$0xff]  ;;  %v1136_v19 = vpack.c.bf16 %v1104_v8, %v1104_v8  ;;  %v794_v22 = vpack.c.bf16 %v762_v20, %v762_v20 }
  0xbe   : > { %989 = vrot.lane.b32.xlu0 %v906_v28, %s7664_s12  ;;  %v793_v28 = vpack.c.bf16 %v761_v23, %v761_v23  ;;  %v918_v37 = vpack.c.bf16 %v886_v29, %v886_v29  ;;  %v1132_v16 = vpack.c.bf16 %v1100_v54, %v1100_v54  ;;  %v1102_v25 = vld [vmem:[#allocation2 + $0x109] sm:$0xff]  ;;  %580 = vst.msk [vmem:[#allocation2 + $0x159] sm:$0xff] %vm327_vm0, %v547_v21  ;;  %v1306_v54 = vld [vmem:[#allocation3 + $0x9] sm:$0xff] }
  0xbf   : > { %991 = vrot.lane.b32.xlu1 %v907_v30, %s7664_s12  ;;  %v439_v30 = vld [vmem:[%s7887_s17 + $0xb8] sm:$0xff]  ;;  %v509_v33 = vadd.f32 %v7913_v14, %v473_v27  ;;  %827 = vst.msk [vmem:[#allocation4 + $0x10] sm:$0xf] %vm822_vm3, %v794_v22  ;;  %v770_v29 = vld [vmem:[#allocation2 + $0x90] sm:$0xff]  ;;  %v775_v21 = vld [vmem:[#allocation2 + $0xc8] sm:$0xff] }
  0xc0   : > { %826 = vst.msk [vmem:[#allocation4 + $0xc] sm:$0xf] %vm822_vm3, %v793_v28  ;;  %v475_v34 = vmul.f32 %v7896_v9, %v439_v30  ;;  %v445_v9 = vld [vmem:[%s7887_s17 + $0xe8] sm:$0xff] }
  0xc1   : > { %838 = vst.msk [vmem:[#allocation4 + $0x3c] sm:$0xf] %vm822_vm3, %v805_v53  ;;  %v1108_v0 = vld [vmem:[#allocation2 + $0x151] sm:$0xff] }
  0xc2   : > { %v1140_v8 = vpack.c.bf16 %v1108_v0, %v1108_v0  ;;  %841 = vst.msk [vmem:[#allocation4 + $0x48] sm:$0xf] %vm822_vm3, %v808_v6 }
  0xc3   : > { %v1107_v30 = vld [vmem:[#allocation2 + $0x141] sm:$0xff]  ;;  %837 = vst.msk [vmem:[#allocation4 + $0x38] sm:$0xf] %vm822_vm3, %v804_v10 }
  0xc4   : > { %v8174_v41 = vpop.permute.xlu2 %1184  ;;  %v1139_v43 = vpack.c.bf16 %v1107_v30, %v1107_v30  ;;  %v1307_v30 = vld [vmem:[#allocation3 + $0x19] sm:$0xff] }
  0xc5   : > { %987 = vrot.lane.b32.xlu2 %v905_v39, %s7664_s12  ;;  %v541_v39 = vmax.f32 %v509_v33, 0.0 }
  0xc6   : > { %995 = vrot.lane.b32.xlu0 %v909_v40, %s7664_s12  ;;  %v511_v40 = vadd.f32 %v7913_v14, %v475_v34  ;;  %v7648_v14 = vld [vmem:[%s10434_s2] ss:$0 sm:$0xff]  ;;  %v802_v34 = vpack.c.bf16 %v770_v29, %v770_v29 }
  0xc7   : > { %997 = vrot.lane.b32.xlu1 %v910_v42, %s7664_s12  ;;  %574 = vst.msk [vmem:[#allocation2 + $0x111] sm:$0xff] %vm327_vm0, %v541_v39  ;;  %v481_v26 = vmul.f32 %v7648_v14, %v445_v9  ;;  %v774_v29 = vld [vmem:[#allocation2 + $0xc0] sm:$0xff] }
  0xc8   : > { %v543_v45 = vmax.f32 %v511_v40, 0.0  ;;  %835 = vst.msk [vmem:[#allocation4 + $0x30] sm:$0xf] %vm822_vm3, %v802_v34  ;;  %v1312_v34 = vld [vmem:[#allocation3 + $0x51] sm:$0xff] }
  0xc9   : > { %v517_v33 = vadd.f32 %v7649_v31, %v481_v26  ;;  %v782_v31 = vld [vmem:[#allocation2 + $0x120] sm:$0xff] }
  0xca   : > { %576 = vst.msk [vmem:[#allocation2 + $0x129] sm:$0xff] %vm327_vm0, %v543_v45  ;;  %v765_v45 = vld [vmem:[#allocation2 + $0x50] sm:$0xff] }
  0xcb   : > { %v549_v39 = vmax.f32 %v517_v33, 0.0  ;;  %v797_v46 = vpack.c.bf16 %v765_v45, %v765_v45  ;;  %v1308_v33 = vld [vmem:[#allocation3 + $0x21] sm:$0xff] }
  0xcc   : > { %v8189_v59 = vpop.permute.xlu2 %1190 }
  0xcd   : > { %993 = vrot.lane.b32.xlu2 %v908_v57, %s7664_s12  ;;  %v1129_v57 = vpack.c.bf16 %v1097_v47, %v1097_v47  ;;  %582 = vst.msk [vmem:[#allocation2 + $0x171] sm:$0xff] %vm327_vm0, %v549_v39  ;;  %v1340_v39 = vpack.c.bf16 %v1308_v33, %v1308_v33 }
  0xce   : > { %1001 = vrot.lane.b32.xlu0 %v912_v58, %s7664_s12  ;;  %v548_v58 = vmax.f32 %v516_v52, 0.0  ;;  %v1103_v28 = vld [vmem:[#allocation2 + $0x111] sm:$0xff]  ;;  %830 = vst.msk [vmem:[#allocation4 + $0x1c] sm:$0xf] %vm822_vm3, %v797_v46  ;;  %v1310_v46 = vld [vmem:[#allocation3 + $0x39] sm:$0xff] }
  0xcf   : > { %1003 = vrot.lane.b32.xlu1 %v913_v62, %s7664_s12  ;;  %v917_v62 = vpack.c.bf16 %v885_v50, %v885_v50  ;;  %v1106_v50 = vld [vmem:[#allocation2 + $0x139] sm:$0xff]  ;;  %v1342_v51 = vpack.c.bf16 %v1310_v46, %v1310_v46 }
  0xd0   : > { %581 = vst.msk [vmem:[#allocation2 + $0x169] sm:$0xff] %vm327_vm0, %v548_v58  ;;  %v801_v58 = vpack.c.bf16 %v769_v56, %v769_v56  ;;  %v785_v56 = vld [vmem:[#allocation2 + $0x140] sm:$0xff] }
  0xd1   : > { %v1105_v48 = vld [vmem:[#allocation2 + $0x129] sm:$0xff]  ;;  %v817_v0 = vpack.c.bf16 %v785_v56, %v785_v56 }
  0xd2   : > { %v1137_v55 = vpack.c.bf16 %v1105_v48, %v1105_v48  ;;  %834 = vst.msk [vmem:[#allocation4 + $0x2c] sm:$0xf] %vm822_vm3, %v801_v58  ;;  %v1311_v48 = vld [vmem:[#allocation3 + $0x49] sm:$0xff]  ;;  %v783_v10 = vld [vmem:[#allocation2 + $0x128] sm:$0xff] }
  0xd3   : > { %v1343_v53 = vpack.c.bf16 %v1311_v48, %v1311_v48  ;;  %850 = vst.msk [vmem:[#allocation4 + $0x6c] sm:$0xf] %vm822_vm3, %v817_v0 }
  0xd4   : > { %v8206_v15 = vpop.permute.xlu2 %1196  ;;  %v1111_v17 = vld [vmem:[#allocation2 + $0x171] sm:$0xff] }
  0xd5   : > { %999 = vrot.lane.b32.xlu2 %v911_v12, %s7664_s12  ;;  %v1131_v12 = vpack.c.bf16 %v1099_v4, %v1099_v4  ;;  %v1109_v4 = vld [vmem:[#allocation2 + $0x159] sm:$0xff]  ;;  %v1143_v9 = vpack.c.bf16 %v1111_v17, %v1111_v17  ;;  %v1317_v17 = vld [vmem:[#allocation3 + $0x91] sm:$0xff] }
  0xd6   : > { %1007 = vrot.lane.b32.xlu0 %v915_v13, %s7664_s12  ;;  %v763_v13 = vld [vmem:[#allocation2 + $0x38] sm:$0xff]  ;;  %v1141_v11 = vpack.c.bf16 %v1109_v4, %v1109_v4 }
  0xd7   : > { %1009 = vrot.lane.b32.xlu1 %v916_v18, %s7664_s12  ;;  %v795_v18 = vpack.c.bf16 %v763_v13, %v763_v13  ;;  %v1110_v52 = vld [vmem:[#allocation2 + $0x169] sm:$0xff]  ;;  %v771_v13 = vld [vmem:[#allocation2 + $0x98] sm:$0xff] }
  0xd8   : > { %v1142_v60 = vpack.c.bf16 %v1110_v52, %v1110_v52  ;;  %v788_v7 = vld [vmem:[#allocation2 + $0x168] sm:$0xff] }
  0xd9   : > { %828 = vst.msk [vmem:[#allocation4 + $0x14] sm:$0xf] %vm822_vm3, %v795_v18  ;;  %v1305_v18 = vld [vmem:[#allocation3 + $0x1] sm:$0xff] }
  0xda   : > { %v1337_v14 = vpack.c.bf16 %v1305_v18, %v1305_v18  ;;  %v1321_v18 = vld [vmem:[#allocation3 + $0xc1] sm:$0xff] }
  0xdc   : > { %v8224_v38 = vpop.permute.xlu2 %1202 }
  0xdd   : > { %1005 = vrot.lane.b32.xlu2 %v914_v35, %s7664_s12  ;;  %v8229_v42 = vpop.permute.xlu1 %1182  ;;  %v1134_v35 = vpack.c.bf16 %v1102_v25, %v1102_v25  ;;  %v1309_v25 = vld [vmem:[#allocation3 + $0x31] sm:$0xff] }
  0xde   : > { %1013 = vrot.lane.b32.xlu0 %v918_v37, %s7664_s12  ;;  %v8233_v44 = vpop.permute.xlu0 %1180  ;;  %v1135_v37 = vpack.c.bf16 %v1103_v28, %v1103_v28  ;;  %v1341_v28 = vpack.c.bf16 %v1309_v25, %v1309_v25  ;;  %v1353_v25 = vpack.c.bf16 %v1321_v18, %v1321_v18  ;;  %v1530_v18 = vld [vmem:[#allocation2 + $0x2] sm:$0xff] }
  0xdf   : > { %1212 = vrot.lane.b32.xlu1 %v1130_v36, %s7665_s13  ;;  %v766_v36 = vld [vmem:[#allocation2 + $0x60] sm:$0xff] }
  0xe0   : > { %v798_v40 = vpack.c.bf16 %v766_v36, %v766_v36  ;;  %v1339_v36 = vpack.c.bf16 %v1307_v30, %v1307_v30 }
  0xe2   : > { %831 = vst.msk [vmem:[#allocation4 + $0x20] sm:$0xf] %vm822_vm3, %v798_v40  ;;  %v1344_v40 = vpack.c.bf16 %v1312_v34, %v1312_v34 }
  0xe4   : > { %v8249_v2 = vpop.permute.xlu2 %1208 }
  0xe5   : > { %1011 = vrot.lane.b32.xlu2 %v917_v62, %s7664_s12  ;;  %v8251_v3 = vpop.permute.xlu1 %1188  ;;  %v800_v62 = vpack.c.bf16 %v768_v61, %v768_v61  ;;  %v780_v61 = vld [vmem:[#allocation2 + $0x108] sm:$0xff] }
  0xe6   : > { %1210 = vrot.lane.b32.xlu0 %v1129_v57, %s7665_s13  ;;  %v8254_v32 = vpop.permute.xlu0 %1186  ;;  %v1138_v57 = vpack.c.bf16 %v1106_v50, %v1106_v50  ;;  %v812_v5 = vpack.c.bf16 %v780_v61, %v780_v61 }
  0xe7   : > { %1218 = vrot.lane.b32.xlu1 %v1133_v63, %s7665_s13  ;;  %833 = vst.msk [vmem:[#allocation4 + $0x28] sm:$0xf] %vm822_vm3, %v800_v62  ;;  %v1314_v62 = vld [vmem:[#allocation3 + $0x69] sm:$0xff] }
  0xe8   : > { %845 = vst.msk [vmem:[#allocation4 + $0x58] sm:$0xf] %vm822_vm3, %v812_v5  ;;  %v1332_v5 = vld [vmem:[#allocation3 + $0x141] sm:$0xff] }
  0xed   : > { %1214 = vrot.lane.b32.xlu2 %v1131_v12, %s7665_s13  ;;  %v8265_v23 = vpop.permute.xlu1 %1194  ;;  %v1338_v12 = vpack.c.bf16 %v1306_v54, %v1306_v54  ;;  %v1346_v54 = vpack.c.bf16 %v1314_v62, %v1314_v62 }
  0xee   : > { %1216 = vrot.lane.b32.xlu0 %v1132_v16, %s7665_s13  ;;  %v8269_v24 = vpop.permute.xlu0 %1192  ;;  %v803_v16 = vpack.c.bf16 %v771_v13, %v771_v13  ;;  %v787_v13 = vld [vmem:[#allocation2 + $0x158] sm:$0xff] }
  0xef   : > { %1224 = vrot.lane.b32.xlu1 %v1136_v19, %s7665_s13  ;;  %v956_v27 = vpop.permute.xlu2 %955  ;;  %v779_v19 = vld [vmem:[#allocation2 + $0xf8] sm:$0xff] }
  0xf0   : > { %1050 = vst.msk [vmem:[#allocation4 + $0x8] sm:$0xf] %vm1047_vm4, %v956_v27  ;;  %v811_v26 = vpack.c.bf16 %v779_v19, %v779_v19  ;;  %v807_v27 = vpack.c.bf16 %v775_v21, %v775_v21  ;;  %v815_v19 = vpack.c.bf16 %v783_v10, %v783_v10  ;;  %v819_v21 = vpack.c.bf16 %v787_v13, %v787_v13  ;;  %v1335_v13 = vld [vmem:[#allocation3 + $0x169] sm:$0xff] }
  0xf1   : > { %1275 = vst.msk [vmem:[#allocation4 + $0x8] sm:$0xf] %vm1272_vm5, %v8233_v44 }
  0xf2   : > { %836 = vst.msk [vmem:[#allocation4 + $0x34] sm:$0xf] %vm822_vm3, %v803_v16 }
  0xf3   : > { %844 = vst.msk [vmem:[#allocation4 + $0x54] sm:$0xf] %vm822_vm3, %v811_v26 }
  0xf4   : > { %840 = vst.msk [vmem:[#allocation4 + $0x44] sm:$0xf] %vm822_vm3, %v807_v27  ;;  %v1319_v27 = vld [vmem:[#allocation3 + $0xa9] sm:$0xff] }
  0xf5   : > { %1220 = vrot.lane.b32.xlu2 %v1134_v35, %s7665_s13  ;;  %v8286_v47 = vpop.permute.xlu1 %1200  ;;  %v806_v35 = vpack.c.bf16 %v774_v29, %v774_v29  ;;  %848 = vst.msk [vmem:[#allocation4 + $0x64] sm:$0xf] %vm822_vm3, %v815_v19  ;;  %v1324_v29 = vld [vmem:[#allocation3 + $0xe1] sm:$0xff]  ;;  %v1351_v30 = vpack.c.bf16 %v1319_v27, %v1319_v27  ;;  %v1533_v27 = vld [vmem:[#allocation2 + $0x22] sm:$0xff] }
  0xf6   : > { %1222 = vrot.lane.b32.xlu0 %v1135_v37, %s7665_s13  ;;  %v8290_v44 = vpop.permute.xlu0 %1198  ;;  %v814_v37 = vpack.c.bf16 %v782_v31, %v782_v31  ;;  %852 = vst.msk [vmem:[#allocation4 + $0x74] sm:$0xf] %vm822_vm3, %v819_v21  ;;  %v1356_v33 = vpack.c.bf16 %v1324_v29, %v1324_v29 }
  0xf7   : > { %1230 = vrot.lane.b32.xlu1 %v1139_v43, %s7665_s13  ;;  %v958_v49 = vpop.permute.xlu2 %957  ;;  %839 = vst.msk [vmem:[#allocation4 + $0x40] sm:$0xf] %vm822_vm3, %v806_v35 }
  0xf8   : > { %1051 = vst.msk [vmem:[#allocation4 + $0xc] sm:$0xf] %vm1047_vm4, %v958_v49  ;;  %v1315_v49 = vld [vmem:[#allocation3 + $0x79] sm:$0xff] }
  0xf9   : > { %1276 = vst.msk [vmem:[#allocation4 + $0xc] sm:$0xf] %vm1272_vm5, %v8229_v42 }
  0xfa   : > { %847 = vst.msk [vmem:[#allocation4 + $0x60] sm:$0xf] %vm822_vm3, %v814_v37 }
  0xfd   : > { %1226 = vrot.lane.b32.xlu2 %v1137_v55, %s7665_s13  ;;  %v8305_v1 = vpop.permute.xlu1 %1206  ;;  %v1347_v55 = vpack.c.bf16 %v1315_v49, %v1315_v49  ;;  %v1326_v49 = vld [vmem:[#allocation3 + $0xf9] sm:$0xff] }
  0xfe   : > { %1228 = vrot.lane.b32.xlu0 %v1138_v57, %s7665_s13  ;;  %v8301_v63 = vpop.permute.xlu0 %1204 }
  0xff   : > { %1236 = vrot.lane.b32.xlu1 %v1142_v60, %s7665_s13  ;;  %v964_v42 = vpop.permute.xlu2 %963  ;;  %v1313_v60 = vld [vmem:[#allocation3 + $0x61] sm:$0xff] }
 0x100   : > { %1054 = vst.msk [vmem:[#allocation4 + $0x18] sm:$0xf] %vm1047_vm4, %v964_v42  ;;  %v1318_v42 = vld [vmem:[#allocation3 + $0x99] sm:$0xff]  ;;  %v1345_v4 = vpack.c.bf16 %v1313_v60, %v1313_v60  ;;  %v1333_v60 = vld [vmem:[#allocation3 + $0x151] sm:$0xff] }
 0x101   : > { %1279 = vst.msk [vmem:[#allocation4 + $0x18] sm:$0xf] %vm1272_vm5, %v8251_v3  ;;  %v1350_v6 = vpack.c.bf16 %v1318_v42, %v1318_v42  ;;  %v1365_v62 = vpack.c.bf16 %v1333_v60, %v1333_v60 }
 0x105   : > { %1232 = vrot.lane.b32.xlu2 %v1140_v8, %s7665_s13  ;;  %v784_v8 = vld [vmem:[#allocation2 + $0x138] sm:$0xff] }
 0x106   : > { %1234 = vrot.lane.b32.xlu0 %v1141_v11, %s7665_s13  ;;  %v1316_v11 = vld [vmem:[#allocation3 + $0x81] sm:$0xff] }
 0x107   : > { %1403 = vrot.lane.b32.xlu1 %v1338_v12, %s7666_s30  ;;  %v970_v3 = vpop.permute.xlu2 %969  ;;  %v820_v12 = vpack.c.bf16 %v788_v7, %v788_v7  ;;  %v1364_v7 = vpack.c.bf16 %v1332_v5, %v1332_v5  ;;  %v1550_v5 = vld [vmem:[#allocation2 + $0xf2] sm:$0xff] }
 0x108   : > { %1057 = vst.msk [vmem:[#allocation4 + $0x24] sm:$0xf] %vm1047_vm4, %v970_v3  ;;  %v960_v20 = vpop.permute.xlu0 %959  ;;  %v816_v3 = vpack.c.bf16 %v784_v8, %v784_v8 }
 0x109   : > { %1282 = vst.msk [vmem:[#allocation4 + $0x24] sm:$0xf] %vm1272_vm5, %v8265_v23  ;;  %v962_v22 = vpop.permute.xlu1 %961 }
 0x10a   : > { %1053 = vst.msk [vmem:[#allocation4 + $0x14] sm:$0xf] %vm1047_vm4, %v962_v22  ;;  %v1349_v22 = vpack.c.bf16 %v1317_v17, %v1317_v17 }
 0x10b   : > { %1278 = vst.msk [vmem:[#allocation4 + $0x14] sm:$0xf] %vm1272_vm5, %v8254_v32 }
 0x10c   : > { %1052 = vst.msk [vmem:[#allocation4 + $0x10] sm:$0xf] %vm1047_vm4, %v960_v20  ;;  %v1348_v20 = vpack.c.bf16 %v1316_v11, %v1316_v11  ;;  %v1532_v11 = vld [vmem:[#allocation2 + $0x1a] sm:$0xff] }
 0x10d   : > { %1277 = vst.msk [vmem:[#allocation4 + $0x10] sm:$0xf] %vm1272_vm5, %v8174_v41  ;;  %1238 = vrot.lane.b32.xlu2 %v1143_v9, %s7665_s13  ;;  %v786_v9 = vld [vmem:[#allocation2 + $0x150] sm:$0xff]  ;;  %v1564_v17 = vpack.c.bf16 %v1532_v11, %v1532_v11 }
 0x10e   : > { %1401 = vrot.lane.b32.xlu0 %v1337_v14, %s7666_s30  ;;  %853 = vst.msk [vmem:[#allocation4 + $0x78] sm:$0xf] %vm822_vm3, %v820_v12 }
 0x10f   : > { %1409 = vrot.lane.b32.xlu1 %v1341_v28, %s7666_s30  ;;  %v976_v23 = vpop.permute.xlu2 %975  ;;  %849 = vst.msk [vmem:[#allocation4 + $0x68] sm:$0xf] %vm822_vm3, %v816_v3  ;;  %v1367_v3 = vpack.c.bf16 %v1335_v13, %v1335_v13 }
 0x110   : > { %1060 = vst.msk [vmem:[#allocation4 + $0x30] sm:$0xf] %vm1047_vm4, %v976_v23  ;;  %v966_v32 = vpop.permute.xlu0 %965  ;;  %v1320_v23 = vld [vmem:[#allocation3 + $0xb1] sm:$0xff] }
 0x111   : > { %1285 = vst.msk [vmem:[#allocation4 + $0x30] sm:$0xf] %vm1272_vm5, %v8286_v47  ;;  %v968_v41 = vpop.permute.xlu1 %967  ;;  %v777_v47 = vld [vmem:[#allocation2 + $0xe0] sm:$0xff] }
 0x112   : > { %1056 = vst.msk [vmem:[#allocation4 + $0x20] sm:$0xf] %vm1047_vm4, %v968_v41  ;;  %v809_v52 = vpack.c.bf16 %v777_v47, %v777_v47  ;;  %v1352_v41 = vpack.c.bf16 %v1320_v23, %v1320_v23  ;;  %v1534_v23 = vld [vmem:[#allocation2 + $0x32] sm:$0xff] }
 0x113   : > { %1281 = vst.msk [vmem:[#allocation4 + $0x20] sm:$0xf] %vm1272_vm5, %v8269_v24  ;;  %v778_v24 = vld [vmem:[#allocation2 + $0xf0] sm:$0xff] }
 0x114   : > { %1055 = vst.msk [vmem:[#allocation4 + $0x1c] sm:$0xf] %vm1047_vm4, %v966_v32  ;;  %v810_v50 = vpack.c.bf16 %v778_v24, %v778_v24  ;;  %v789_v32 = vld [vmem:[#allocation2 + $0x170] sm:$0xff] }
 0x115   : > { %1280 = vst.msk [vmem:[#allocation4 + $0x1c] sm:$0xf] %vm1272_vm5, %v8189_v59  ;;  %1405 = vrot.lane.b32.xlu2 %v1339_v36, %s7666_s30  ;;  %v821_v31 = vpack.c.bf16 %v789_v32, %v789_v32  ;;  %v1322_v36 = vld [vmem:[#allocation3 + $0xc9] sm:$0xff]  ;;  %v1538_v32 = vld [vmem:[#allocation2 + $0x62] sm:$0xff] }
 0x116   : > { %1407 = vrot.lane.b32.xlu0 %v1340_v39, %s7666_s30  ;;  %843 = vst.msk [vmem:[#allocation4 + $0x50] sm:$0xf] %vm822_vm3, %v810_v50  ;;  %v1323_v39 = vld [vmem:[#allocation3 + $0xd9] sm:$0xff]  ;;  %v1330_v50 = vld [vmem:[#allocation3 + $0x129] sm:$0xff] }
 0x117   : > { %1415 = vrot.lane.b32.xlu1 %v1344_v40, %s7666_s30  ;;  %v982_v43 = vpop.permute.xlu2 %981  ;;  %842 = vst.msk [vmem:[#allocation4 + $0x4c] sm:$0xf] %vm822_vm3, %v809_v52  ;;  %v1327_v40 = vld [vmem:[#allocation3 + $0x109] sm:$0xff]  ;;  %v1355_v24 = vpack.c.bf16 %v1323_v39, %v1323_v39  ;;  %v1358_v52 = vpack.c.bf16 %v1326_v49, %v1326_v49  ;;  %v1541_v39 = vld [vmem:[#allocation2 + $0x82] sm:$0xff]  ;;  %v1544_v49 = vld [vmem:[#allocation2 + $0xaa] sm:$0xff] }
 0x118   : > { %1063 = vst.msk [vmem:[#allocation4 + $0x3c] sm:$0xf] %vm1047_vm4, %v982_v43  ;;  %v972_v45 = vpop.permute.xlu0 %971  ;;  %v1354_v43 = vpack.c.bf16 %v1322_v36, %v1322_v36  ;;  %v1537_v36 = vld [vmem:[#allocation2 + $0x52] sm:$0xff] }
 0x119   : > { %1288 = vst.msk [vmem:[#allocation4 + $0x3c] sm:$0xf] %vm1272_vm5, %v8305_v1  ;;  %v974_v59 = vpop.permute.xlu1 %973 }
 0x11a   : > { %1059 = vst.msk [vmem:[#allocation4 + $0x2c] sm:$0xf] %vm1047_vm4, %v974_v59  ;;  %v1325_v59 = vld [vmem:[#allocation3 + $0xf1] sm:$0xff] }
 0x11b   : > { %1284 = vst.msk [vmem:[#allocation4 + $0x2c] sm:$0xf] %vm1272_vm5, %v8290_v44  ;;  %v781_v44 = vld [vmem:[#allocation2 + $0x110] sm:$0xff] }
 0x11c   : > { %1058 = vst.msk [vmem:[#allocation4 + $0x28] sm:$0xf] %vm1047_vm4, %v972_v45  ;;  %v813_v1 = vpack.c.bf16 %v781_v44, %v781_v44  ;;  %v1359_v45 = vpack.c.bf16 %v1327_v40, %v1327_v40 }
 0x11d   : > { %1283 = vst.msk [vmem:[#allocation4 + $0x28] sm:$0xf] %vm1272_vm5, %v8206_v15  ;;  %1411 = vrot.lane.b32.xlu2 %v1342_v51, %s7666_s30  ;;  %v1357_v51 = vpack.c.bf16 %v1325_v59, %v1325_v59  ;;  %v1540_v59 = vld [vmem:[#allocation2 + $0x7a] sm:$0xff] }
 0x11e   : > { %1413 = vrot.lane.b32.xlu0 %v1343_v53, %s7666_s30  ;;  %846 = vst.msk [vmem:[#allocation4 + $0x5c] sm:$0xf] %vm822_vm3, %v813_v1  ;;  %v1362_v53 = vpack.c.bf16 %v1330_v50, %v1330_v50  ;;  %v1331_v1 = vld [vmem:[#allocation3 + $0x139] sm:$0xff] }
 0x11f   : > { %1421 = vrot.lane.b32.xlu1 %v1347_v55, %s7666_s30  ;;  %v988_v57 = vpop.permute.xlu2 %987  ;;  %854 = vst.msk [vmem:[#allocation4 + $0x7c] sm:$0xf] %vm822_vm3, %v821_v31  ;;  %v1565_v31 = vpack.c.bf16 %v1533_v27, %v1533_v27  ;;  %v1554_v27 = vld [vmem:[#allocation2 + $0x122] sm:$0xff] }
 0x120   : > { %1066 = vst.msk [vmem:[#allocation4 + $0x48] sm:$0xf] %vm1047_vm4, %v988_v57  ;;  %v978_v58 = vpop.permute.xlu0 %977  ;;  %v1328_v57 = vld [vmem:[#allocation3 + $0x111] sm:$0xff] }
 0x121   : > { %v980_v15 = vpop.permute.xlu1 %979  ;;  %1061 = vst.msk [vmem:[#allocation4 + $0x34] sm:$0xf] %vm1047_vm4, %v978_v58  ;;  %v1329_v58 = vld [vmem:[#allocation3 + $0x121] sm:$0xff]  ;;  %v1360_v61 = vpack.c.bf16 %v1328_v57, %v1328_v57  ;;  %v1543_v57 = vld [vmem:[#allocation2 + $0x9a] sm:$0xff] }
 0x122   : > { %1062 = vst.msk [vmem:[#allocation4 + $0x38] sm:$0xf] %vm1047_vm4, %v980_v15  ;;  %v1361_v15 = vpack.c.bf16 %v1329_v58, %v1329_v58  ;;  %v1547_v58 = vld [vmem:[#allocation2 + $0xca] sm:$0xff] }
 0x123   : > { %1287 = vst.msk [vmem:[#allocation4 + $0x38] sm:$0xf] %vm1272_vm5, %v8301_v63 }
 0x124   : > { %1286 = vst.msk [vmem:[#allocation4 + $0x34] sm:$0xf] %vm1272_vm5, %v8224_v38 }
 0x125   : > { %1417 = vrot.lane.b32.xlu2 %v1345_v4, %s7666_s30 }
 0x126   : > { %1419 = vrot.lane.b32.xlu0 %v1346_v54, %s7666_s30  ;;  %v1336_v54 = vld [vmem:[#allocation3 + $0x171] sm:$0xff] }
 0x127   : > { %1427 = vrot.lane.b32.xlu1 %v1350_v6, %s7666_s30  ;;  %v994_v63 = vpop.permute.xlu2 %993  ;;  %v1363_v6 = vpack.c.bf16 %v1331_v1, %v1331_v1  ;;  %v1368_v8 = vpack.c.bf16 %v1336_v54, %v1336_v54  ;;  %v1546_v1 = vld [vmem:[#allocation2 + $0xc2] sm:$0xff] }
 0x128   : > { %1069 = vst.msk [vmem:[#allocation4 + $0x54] sm:$0xf] %vm1047_vm4, %v994_v63  ;;  %v984_v38 = vpop.permute.xlu0 %983 }
 0x129   : > { %v986_v16 = vpop.permute.xlu1 %985  ;;  %1064 = vst.msk [vmem:[#allocation4 + $0x40] sm:$0xf] %vm1047_vm4, %v984_v38  ;;  %v1334_v38 = vld [vmem:[#allocation3 + $0x159] sm:$0xff] }
 0x12a   : > { %1065 = vst.msk [vmem:[#allocation4 + $0x44] sm:$0xf] %vm1047_vm4, %v986_v16  ;;  %v1366_v16 = vpack.c.bf16 %v1334_v38, %v1334_v38  ;;  %v1549_v38 = vld [vmem:[#allocation2 + $0xe2] sm:$0xff] }
 0x12b   : > { %1289 = vst.msk [vmem:[#allocation4 + $0x40] sm:$0xf] %vm1272_vm5, %v8249_v2  ;;  %v8383_v2 = vpack.c.bf16 %v786_v9, %v786_v9 }
 0x12d   : > { %1423 = vrot.lane.b32.xlu2 %v1348_v20, %s7666_s30  ;;  %851 = vst.msk [vmem:[#allocation4 + $0x70] sm:$0xf] %vm822_vm3, %v8383_v2  ;;  %v1531_v20 = vld [vmem:[#allocation2 + $0xa] sm:$0xff] }
 0x12e   : > { %1425 = vrot.lane.b32.xlu0 %v1349_v22, %s7666_s30  ;;  %v1535_v22 = vld [vmem:[#allocation2 + $0x3a] sm:$0xff] }
 0x12f   : > { %1433 = vrot.lane.b32.xlu1 %v1353_v25, %s7666_s30  ;;  %v1000_v14 = vpop.permute.xlu2 %999  ;;  %v1562_v25 = vpack.c.bf16 %v1530_v18, %v1530_v18  ;;  %v1551_v18 = vld [vmem:[#allocation2 + $0xfa] sm:$0xff] }
 0x130   : > { %1072 = vst.msk [vmem:[#allocation4 + $0x60] sm:$0xf] %vm1047_vm4, %v1000_v14  ;;  %v990_v26 = vpop.permute.xlu0 %989  ;;  %v1563_v14 = vpack.c.bf16 %v1531_v20, %v1531_v20  ;;  %v1552_v20 = vld [vmem:[#allocation2 + $0x10a] sm:$0xff] }
 0x131   : > { %v992_v28 = vpop.permute.xlu1 %991  ;;  %1067 = vst.msk [vmem:[#allocation4 + $0x4c] sm:$0xf] %vm1047_vm4, %v990_v26  ;;  %v1567_v26 = vpack.c.bf16 %v1535_v22, %v1535_v22  ;;  %v1556_v22 = vld [vmem:[#allocation2 + $0x13a] sm:$0xff] }
 0x132   : > { %1068 = vst.msk [vmem:[#allocation4 + $0x50] sm:$0xf] %vm1047_vm4, %v992_v28 }
 0x135   : > { %1429 = vrot.lane.b32.xlu2 %v1351_v30, %s7666_s30 }
 0x136   : > { %1431 = vrot.lane.b32.xlu0 %v1352_v41, %s7666_s30  ;;  %v1566_v41 = vpack.c.bf16 %v1534_v23, %v1534_v23  ;;  %v1555_v23 = vld [vmem:[#allocation2 + $0x12a] sm:$0xff] }
 0x137   : > { %1439 = vrot.lane.b32.xlu1 %v1356_v33, %s7666_s30  ;;  %v1006_v34 = vpop.permute.xlu2 %1005  ;;  %v1570_v33 = vpack.c.bf16 %v1538_v32, %v1538_v32  ;;  %v1559_v32 = vld [vmem:[#allocation2 + $0x15a] sm:$0xff] }
 0x138   : > { %1075 = vst.msk [vmem:[#allocation4 + $0x6c] sm:$0xf] %vm1047_vm4, %v1006_v34  ;;  %v996_v35 = vpop.permute.xlu0 %995  ;;  %v1536_v34 = vld [vmem:[#allocation2 + $0x4a] sm:$0xff] }
 0x139   : > { %v998_v37 = vpop.permute.xlu1 %997  ;;  %1070 = vst.msk [vmem:[#allocation4 + $0x58] sm:$0xf] %vm1047_vm4, %v996_v35 }
 0x13a   : > { %1071 = vst.msk [vmem:[#allocation4 + $0x5c] sm:$0xf] %vm1047_vm4, %v998_v37 }
 0x13d   : > { %1435 = vrot.lane.b32.xlu2 %v1354_v43, %s7666_s30  ;;  %v1568_v43 = vpack.c.bf16 %v1536_v34, %v1536_v34  ;;  %v1557_v34 = vld [vmem:[#allocation2 + $0x142] sm:$0xff] }
 0x13e   : > { %1437 = vrot.lane.b32.xlu0 %v1355_v24, %s7666_s30  ;;  %v1569_v24 = vpack.c.bf16 %v1537_v36, %v1537_v36  ;;  %v1558_v36 = vld [vmem:[#allocation2 + $0x152] sm:$0xff] }
 0x13f   : > { %1445 = vrot.lane.b32.xlu1 %v1359_v45, %s7666_s30  ;;  %v1012_v46 = vpop.permute.xlu2 %1011  ;;  %v1573_v45 = vpack.c.bf16 %v1541_v39, %v1541_v39  ;;  %v1755_v39 = vld [vmem:[#allocation3 + $0x2] sm:$0xff] }
 0x140   : > { %1078 = vst.msk [vmem:[#allocation4 + $0x78] sm:$0xf] %vm1047_vm4, %v1012_v46  ;;  %v1002_v47 = vpop.permute.xlu0 %1001  ;;  %v1539_v46 = vld [vmem:[#allocation2 + $0x6a] sm:$0xff] }
 0x141   : > { %v1004_v48 = vpop.permute.xlu1 %1003  ;;  %1073 = vst.msk [vmem:[#allocation4 + $0x64] sm:$0xf] %vm1047_vm4, %v1002_v47 }
 0x142   : > { %1074 = vst.msk [vmem:[#allocation4 + $0x68] sm:$0xf] %vm1047_vm4, %v1004_v48 }
 0x145   : > { %1441 = vrot.lane.b32.xlu2 %v1357_v51, %s7666_s30  ;;  %v1571_v51 = vpack.c.bf16 %v1539_v46, %v1539_v46  ;;  %v1560_v46 = vld [vmem:[#allocation2 + $0x16a] sm:$0xff] }
 0x146   : > { %1443 = vrot.lane.b32.xlu0 %v1358_v52, %s7666_s30  ;;  %v1572_v52 = vpack.c.bf16 %v1540_v59, %v1540_v59  ;;  %v1561_v59 = vld [vmem:[#allocation2 + $0x172] sm:$0xff] }
 0x147   : > { %1451 = vrot.lane.b32.xlu1 %v1362_v53, %s7666_s30  ;;  %v1215_v55 = vpop.permute.xlu2 %1214  ;;  %v1576_v53 = vpack.c.bf16 %v1544_v49, %v1544_v49 }
 0x148   : > { %1292 = vst.msk [vmem:[#allocation4 + $0x4c] sm:$0xf] %vm1272_vm5, %v1215_v55  ;;  %v1008_v56 = vpop.permute.xlu0 %1007  ;;  %v1542_v55 = vld [vmem:[#allocation2 + $0x92] sm:$0xff] }
 0x149   : > { %v1010_v44 = vpop.permute.xlu1 %1009  ;;  %1076 = vst.msk [vmem:[#allocation4 + $0x70] sm:$0xf] %vm1047_vm4, %v1008_v56 }
 0x14a   : > { %1077 = vst.msk [vmem:[#allocation4 + $0x74] sm:$0xf] %vm1047_vm4, %v1010_v44 }
 0x14d   : > { %1447 = vrot.lane.b32.xlu2 %v1360_v61, %s7666_s30  ;;  %v1574_v61 = vpack.c.bf16 %v1542_v55, %v1542_v55  ;;  %v1756_v55 = vld [vmem:[#allocation3 + $0xa] sm:$0xff] }
 0x14e   : > { %1449 = vrot.lane.b32.xlu0 %v1361_v15, %s7666_s30  ;;  %v1575_v15 = vpack.c.bf16 %v1543_v57, %v1543_v57 }
 0x14f   : > { %1457 = vrot.lane.b32.xlu1 %v1365_v62, %s7666_s30  ;;  %v1221_v0 = vpop.permute.xlu2 %1220  ;;  %v1579_v62 = vpack.c.bf16 %v1547_v58, %v1547_v58  ;;  %v1788_v58 = vpack.c.bf16 %v1756_v55, %v1756_v55 }
 0x150   : > { %1295 = vst.msk [vmem:[#allocation4 + $0x58] sm:$0xf] %vm1272_vm5, %v1221_v0  ;;  %v1014_v42 = vpop.permute.xlu0 %1013  ;;  %v1545_v0 = vld [vmem:[#allocation2 + $0xb2] sm:$0xff] }
 0x151   : > { %v1213_v4 = vpop.permute.xlu1 %1212  ;;  %1079 = vst.msk [vmem:[#allocation4 + $0x7c] sm:$0xf] %vm1047_vm4, %v1014_v42 }
 0x152   : > { %1291 = vst.msk [vmem:[#allocation4 + $0x48] sm:$0xf] %vm1272_vm5, %v1213_v4 }
 0x155   : > { %1453 = vrot.lane.b32.xlu2 %v1363_v6, %s7666_s30  ;;  %v1577_v6 = vpack.c.bf16 %v1545_v0, %v1545_v0 }
 0x156   : > { %1455 = vrot.lane.b32.xlu0 %v1364_v7, %s7666_s30  ;;  %v1578_v7 = vpack.c.bf16 %v1546_v1, %v1546_v1  ;;  %v1759_v1 = vld [vmem:[#allocation3 + $0x32] sm:$0xff] }
 0x157   : > { %1463 = vrot.lane.b32.xlu1 %v1368_v8, %s7666_s30  ;;  %v1227_v63 = vpop.permute.xlu2 %1226  ;;  %v1582_v8 = vpack.c.bf16 %v1550_v5, %v1550_v5  ;;  %v1760_v5 = vld [vmem:[#allocation3 + $0x3a] sm:$0xff] }
 0x158   : > { %1298 = vst.msk [vmem:[#allocation4 + $0x64] sm:$0xf] %vm1272_vm5, %v1227_v63  ;;  %v1211_v10 = vpop.permute.xlu0 %1210  ;;  %v1548_v63 = vld [vmem:[#allocation2 + $0xda] sm:$0xff] }
 0x159   : > { %v1219_v12 = vpop.permute.xlu1 %1218  ;;  %1290 = vst.msk [vmem:[#allocation4 + $0x44] sm:$0xf] %vm1272_vm5, %v1211_v10 }
 0x15a   : > { %1294 = vst.msk [vmem:[#allocation4 + $0x54] sm:$0xf] %vm1272_vm5, %v1219_v12  ;;  %v1553_v12 = vld [vmem:[#allocation2 + $0x112] sm:$0xff] }
 0x15d   : > { %1459 = vrot.lane.b32.xlu2 %v1366_v16, %s7666_s30  ;;  %v1580_v16 = vpack.c.bf16 %v1548_v63, %v1548_v63 }
 0x15e   : > { %1461 = vrot.lane.b32.xlu0 %v1367_v3, %s7666_s30  ;;  %v1585_v3 = vpack.c.bf16 %v1553_v12, %v1553_v12  ;;  %v1763_v12 = vld [vmem:[#allocation3 + $0x62] sm:$0xff] }
 0x15f   : > { %1630 = vrot.lane.b32.xlu1 %v1564_v17, %s7667_s9  ;;  %v1233_v19 = vpop.permute.xlu2 %1232  ;;  %v1581_v17 = vpack.c.bf16 %v1549_v38, %v1549_v38  ;;  %v1762_v38 = vld [vmem:[#allocation3 + $0x52] sm:$0xff] }
 0x160   : > { %1301 = vst.msk [vmem:[#allocation4 + $0x70] sm:$0xf] %vm1272_vm5, %v1233_v19  ;;  %v1217_v21 = vpop.permute.xlu0 %1216 }
 0x161   : > { %v1225_v9 = vpop.permute.xlu1 %1224  ;;  %1293 = vst.msk [vmem:[#allocation4 + $0x50] sm:$0xf] %vm1272_vm5, %v1217_v21 }
 0x162   : > { %1297 = vst.msk [vmem:[#allocation4 + $0x60] sm:$0xf] %vm1272_vm5, %v1225_v9 }
 0x165   : > { %1626 = vrot.lane.b32.xlu2 %v1562_v25, %s7667_s9  ;;  %v1583_v25 = vpack.c.bf16 %v1551_v18, %v1551_v18 }
 0x166   : > { %1628 = vrot.lane.b32.xlu0 %v1563_v14, %s7667_s9  ;;  %v1584_v14 = vpack.c.bf16 %v1552_v20, %v1552_v20  ;;  %v1765_v20 = vld [vmem:[#allocation3 + $0x7a] sm:$0xff] }
 0x167   : > { %1636 = vrot.lane.b32.xlu1 %v1567_v26, %s7667_s9  ;;  %v1239_v28 = vpop.permute.xlu2 %1238  ;;  %v1588_v26 = vpack.c.bf16 %v1556_v22, %v1556_v22  ;;  %v1766_v22 = vld [vmem:[#allocation3 + $0x82] sm:$0xff] }
 0x168   : > { %1304 = vst.msk [vmem:[#allocation4 + $0x7c] sm:$0xf] %vm1272_vm5, %v1239_v28  ;;  %v1223_v29 = vpop.permute.xlu0 %1222 }
 0x169   : > { %v1231_v30 = vpop.permute.xlu1 %1230  ;;  %1296 = vst.msk [vmem:[#allocation4 + $0x5c] sm:$0xf] %vm1272_vm5, %v1223_v29 }
 0x16a   : > { %1300 = vst.msk [vmem:[#allocation4 + $0x6c] sm:$0xf] %vm1272_vm5, %v1231_v30 }
 0x16d   : > { %1632 = vrot.lane.b32.xlu2 %v1565_v31, %s7667_s9  ;;  %v1586_v31 = vpack.c.bf16 %v1554_v27, %v1554_v27 }
 0x16e   : > { %1634 = vrot.lane.b32.xlu0 %v1566_v41, %s7667_s9  ;;  %v1587_v41 = vpack.c.bf16 %v1555_v23, %v1555_v23  ;;  %v1768_v23 = vld [vmem:[#allocation3 + $0x9a] sm:$0xff] }
 0x16f   : > { %1642 = vrot.lane.b32.xlu1 %v1570_v33, %s7667_s9  ;;  %v1406_v35 = vpop.permute.xlu2 %1405  ;;  %v1591_v33 = vpack.c.bf16 %v1559_v32, %v1559_v32  ;;  %v1769_v32 = vld [vmem:[#allocation3 + $0xaa] sm:$0xff] }
 0x170   : > { %1500 = vst.msk [vmem:[#allocation4 + $0x8] sm:$0xf] %vm1497_vm6, %v1406_v35  ;;  %v1229_v37 = vpop.permute.xlu0 %1228 }
 0x171   : > { %v1237_v40 = vpop.permute.xlu1 %1236  ;;  %1299 = vst.msk [vmem:[#allocation4 + $0x68] sm:$0xf] %vm1272_vm5, %v1229_v37 }
 0x172   : > { %1303 = vst.msk [vmem:[#allocation4 + $0x78] sm:$0xf] %vm1272_vm5, %v1237_v40 }
 0x175   : > { %1638 = vrot.lane.b32.xlu2 %v1568_v43, %s7667_s9  ;;  %v1589_v43 = vpack.c.bf16 %v1557_v34, %v1557_v34 }
 0x176   : > { %1640 = vrot.lane.b32.xlu0 %v1569_v24, %s7667_s9  ;;  %v1590_v24 = vpack.c.bf16 %v1558_v36, %v1558_v36  ;;  %v1771_v36 = vld [vmem:[#allocation3 + $0xc2] sm:$0xff] }
 0x177   : > { %1648 = vrot.lane.b32.xlu1 %v1573_v45, %s7667_s9  ;;  %v1412_v47 = vpop.permute.xlu2 %1411  ;;  %v1787_v45 = vpack.c.bf16 %v1755_v39, %v1755_v39  ;;  %v1772_v39 = vld [vmem:[#allocation3 + $0xca] sm:$0xff] }
 0x178   : > { %1503 = vst.msk [vmem:[#allocation4 + $0x14] sm:$0xf] %vm1497_vm6, %v1412_v47  ;;  %v1235_v48 = vpop.permute.xlu0 %1234 }
 0x179   : > { %v1404_v50 = vpop.permute.xlu1 %1403  ;;  %1302 = vst.msk [vmem:[#allocation4 + $0x74] sm:$0xf] %vm1272_vm5, %v1235_v48 }
 0x17a   : > { %1499 = vst.msk [vmem:[#allocation4 + $0x4] sm:$0xf] %vm1497_vm6, %v1404_v50  ;;  %v1592_v50 = vpack.c.bf16 %v1560_v46, %v1560_v46 }
 0x17d   : > { %1644 = vrot.lane.b32.xlu2 %v1571_v51, %s7667_s9  ;;  %v1758_v51 = vld [vmem:[#allocation3 + $0x22] sm:$0xff] }
 0x17e   : > { %1646 = vrot.lane.b32.xlu0 %v1572_v52, %s7667_s9  ;;  %v1593_v52 = vpack.c.bf16 %v1561_v59, %v1561_v59  ;;  %v1774_v59 = vld [vmem:[#allocation3 + $0xe2] sm:$0xff] }
 0x17f   : > { %1654 = vrot.lane.b32.xlu1 %v1576_v53, %s7667_s9  ;;  %v1418_v56 = vpop.permute.xlu2 %1417  ;;  %v1790_v53 = vpack.c.bf16 %v1758_v51, %v1758_v51  ;;  %v1806_v51 = vpack.c.bf16 %v1774_v59, %v1774_v59  ;;  %v1989_v59 = vld [vmem:[#allocation2 + $0x80] sm:$0xff] }
 0x180   : > { %1506 = vst.msk [vmem:[#allocation4 + $0x20] sm:$0xf] %vm1497_vm6, %v1418_v56  ;;  %v1402_v44 = vpop.permute.xlu0 %1401 }
 0x181   : > { %v1410_v60 = vpop.permute.xlu1 %1409  ;;  %1498 = vst.msk [vmem:[#allocation4] sm:$0xf] %vm1497_vm6, %v1402_v44 }
 0x182   : > { %1502 = vst.msk [vmem:[#allocation4 + $0x10] sm:$0xf] %vm1497_vm6, %v1410_v60  ;;  %v1757_v60 = vld [vmem:[#allocation3 + $0x1a] sm:$0xff] }
 0x185   : > { %1650 = vrot.lane.b32.xlu2 %v1574_v61, %s7667_s9  ;;  %v1761_v61 = vld [vmem:[#allocation3 + $0x4a] sm:$0xff] }
 0x186   : > { %1652 = vrot.lane.b32.xlu0 %v1575_v15, %s7667_s9  ;;  %v1789_v15 = vpack.c.bf16 %v1757_v60, %v1757_v60  ;;  %v1782_v60 = vld [vmem:[#allocation3 + $0x142] sm:$0xff] }
 0x187   : > { %1660 = vrot.lane.b32.xlu1 %v1579_v62, %s7667_s9  ;;  %v1424_v42 = vpop.permute.xlu2 %1423  ;;  %v1793_v62 = vpack.c.bf16 %v1761_v61, %v1761_v61 }
 0x188   : > { %1509 = vst.msk [vmem:[#allocation4 + $0x2c] sm:$0xf] %vm1497_vm6, %v1424_v42  ;;  %v1408_v4 = vpop.permute.xlu0 %1407 }
 0x189   : > { %v1416_v54 = vpop.permute.xlu1 %1415  ;;  %1501 = vst.msk [vmem:[#allocation4 + $0xc] sm:$0xf] %vm1497_vm6, %v1408_v4 }
 0x18a   : > { %1505 = vst.msk [vmem:[#allocation4 + $0x1c] sm:$0xf] %vm1497_vm6, %v1416_v54  ;;  %v1764_v54 = vld [vmem:[#allocation3 + $0x6a] sm:$0xff] }
 0x18d   : > { %1656 = vrot.lane.b32.xlu2 %v1577_v6, %s7667_s9  ;;  %v1791_v6 = vpack.c.bf16 %v1759_v1, %v1759_v1  ;;  %v1780_v1 = vld [vmem:[#allocation3 + $0x12a] sm:$0xff] }
 0x18e   : > { %1658 = vrot.lane.b32.xlu0 %v1578_v7, %s7667_s9  ;;  %v1792_v7 = vpack.c.bf16 %v1760_v5, %v1760_v5  ;;  %v1781_v5 = vld [vmem:[#allocation3 + $0x13a] sm:$0xff] }
 0x18f   : > { %1666 = vrot.lane.b32.xlu1 %v1582_v8, %s7667_s9  ;;  %v1430_v10 = vpop.permute.xlu2 %1429  ;;  %v1796_v8 = vpack.c.bf16 %v1764_v54, %v1764_v54  ;;  %v1785_v54 = vld [vmem:[#allocation3 + $0x16a] sm:$0xff] }
 0x190   : > { %1512 = vst.msk [vmem:[#allocation4 + $0x38] sm:$0xf] %vm1497_vm6, %v1430_v10  ;;  %v1414_v11 = vpop.permute.xlu0 %1413 }
 0x191   : > { %v1422_v13 = vpop.permute.xlu1 %1421  ;;  %1504 = vst.msk [vmem:[#allocation4 + $0x18] sm:$0xf] %vm1497_vm6, %v1414_v11 }
 0x192   : > { %1508 = vst.msk [vmem:[#allocation4 + $0x28] sm:$0xf] %vm1497_vm6, %v1422_v13  ;;  %v1767_v13 = vld [vmem:[#allocation3 + $0x92] sm:$0xff] }
 0x195   : > { %1662 = vrot.lane.b32.xlu2 %v1580_v16, %s7667_s9  ;;  %v1794_v16 = vpack.c.bf16 %v1762_v38, %v1762_v38  ;;  %v1783_v38 = vld [vmem:[#allocation3 + $0x152] sm:$0xff] }
 0x196   : > { %1664 = vrot.lane.b32.xlu0 %v1581_v17, %s7667_s9  ;;  %v1795_v17 = vpack.c.bf16 %v1763_v12, %v1763_v12 }
 0x197   : > { %1672 = vrot.lane.b32.xlu1 %v1585_v3, %s7667_s9  ;;  %v1436_v19 = vpop.permute.xlu2 %1435  ;;  %v1799_v3 = vpack.c.bf16 %v1767_v13, %v1767_v13  ;;  %v1784_v13 = vld [vmem:[#allocation3 + $0x15a] sm:$0xff] }
 0x198   : > { %1515 = vst.msk [vmem:[#allocation4 + $0x44] sm:$0xf] %vm1497_vm6, %v1436_v19  ;;  %v1420_v21 = vpop.permute.xlu0 %1419 }
 0x199   : > { %v1428_v9 = vpop.permute.xlu1 %1427  ;;  %1507 = vst.msk [vmem:[#allocation4 + $0x24] sm:$0xf] %vm1497_vm6, %v1420_v21 }
 0x19a   : > { %1511 = vst.msk [vmem:[#allocation4 + $0x34] sm:$0xf] %vm1497_vm6, %v1428_v9  ;;  %v1770_v9 = vld [vmem:[#allocation3 + $0xb2] sm:$0xff] }
 0x19d   : > { %1668 = vrot.lane.b32.xlu2 %v1583_v25, %s7667_s9  ;;  %v1797_v25 = vpack.c.bf16 %v1765_v20, %v1765_v20 }
 0x19e   : > { %1670 = vrot.lane.b32.xlu0 %v1584_v14, %s7667_s9  ;;  %v1798_v14 = vpack.c.bf16 %v1766_v22, %v1766_v22  ;;  %v1984_v22 = vld [vmem:[#allocation2 + $0x48] sm:$0xff] }
 0x19f   : > { %1678 = vrot.lane.b32.xlu1 %v1588_v26, %s7667_s9  ;;  %v1442_v28 = vpop.permute.xlu2 %1441  ;;  %v1802_v26 = vpack.c.bf16 %v1770_v9, %v1770_v9 }
 0x1a0   : > { %1518 = vst.msk [vmem:[#allocation4 + $0x50] sm:$0xf] %vm1497_vm6, %v1442_v28  ;;  %v1426_v29 = vpop.permute.xlu0 %1425 }
 0x1a1   : > { %v1434_v30 = vpop.permute.xlu1 %1433  ;;  %1510 = vst.msk [vmem:[#allocation4 + $0x30] sm:$0xf] %vm1497_vm6, %v1426_v29 }
 0x1a2   : > { %1514 = vst.msk [vmem:[#allocation4 + $0x40] sm:$0xf] %vm1497_vm6, %v1434_v30  ;;  %v1773_v30 = vld [vmem:[#allocation3 + $0xda] sm:$0xff] }
 0x1a5   : > { %1674 = vrot.lane.b32.xlu2 %v1586_v31, %s7667_s9  ;;  %v1800_v31 = vpack.c.bf16 %v1768_v23, %v1768_v23  ;;  %v1983_v23 = vld [vmem:[#allocation2 + $0x38] sm:$0xff] }
 0x1a6   : > { %1676 = vrot.lane.b32.xlu0 %v1587_v41, %s7667_s9  ;;  %v1801_v41 = vpack.c.bf16 %v1769_v32, %v1769_v32  ;;  %v1987_v32 = vld [vmem:[#allocation2 + $0x68] sm:$0xff] }
 0x1a7   : > { %1684 = vrot.lane.b32.xlu1 %v1591_v33, %s7667_s9  ;;  %v1448_v35 = vpop.permute.xlu2 %1447  ;;  %v1805_v33 = vpack.c.bf16 %v1773_v30, %v1773_v30 }
 0x1a8   : > { %1521 = vst.msk [vmem:[#allocation4 + $0x5c] sm:$0xf] %vm1497_vm6, %v1448_v35  ;;  %v1432_v37 = vpop.permute.xlu0 %1431 }
 0x1a9   : > { %v1440_v40 = vpop.permute.xlu1 %1439  ;;  %1513 = vst.msk [vmem:[#allocation4 + $0x3c] sm:$0xf] %vm1497_vm6, %v1432_v37 }
 0x1aa   : > { %1517 = vst.msk [vmem:[#allocation4 + $0x4c] sm:$0xf] %vm1497_vm6, %v1440_v40  ;;  %v1776_v40 = vld [vmem:[#allocation3 + $0xfa] sm:$0xff] }
 0x1ad   : > { %1680 = vrot.lane.b32.xlu2 %v1589_v43, %s7667_s9  ;;  %v1803_v43 = vpack.c.bf16 %v1771_v36, %v1771_v36  ;;  %v1986_v36 = vld [vmem:[#allocation2 + $0x60] sm:$0xff] }
 0x1ae   : > { %1682 = vrot.lane.b32.xlu0 %v1590_v24, %s7667_s9  ;;  %v1804_v24 = vpack.c.bf16 %v1772_v39, %v1772_v39  ;;  %v1990_v39 = vld [vmem:[#allocation2 + $0x90] sm:$0xff] }
 0x1af   : > { %1851 = vrot.lane.b32.xlu1 %v1787_v45, %s7668_s10  ;;  %v1454_v47 = vpop.permute.xlu2 %1453  ;;  %v1808_v45 = vpack.c.bf16 %v1776_v40, %v1776_v40 }
 0x1b0   : > { %1524 = vst.msk [vmem:[#allocation4 + $0x68] sm:$0xf] %vm1497_vm6, %v1454_v47  ;;  %v1438_v48 = vpop.permute.xlu0 %1437 }
 0x1b1   : > { %v1446_v49 = vpop.permute.xlu1 %1445  ;;  %1516 = vst.msk [vmem:[#allocation4 + $0x48] sm:$0xf] %vm1497_vm6, %v1438_v48 }
 0x1b2   : > { %1520 = vst.msk [vmem:[#allocation4 + $0x58] sm:$0xf] %vm1497_vm6, %v1446_v49  ;;  %v1775_v49 = vld [vmem:[#allocation3 + $0xf2] sm:$0xff] }
 0x1b5   : > { %1686 = vrot.lane.b32.xlu2 %v1592_v50, %s7667_s9  ;;  %v1779_v50 = vld [vmem:[#allocation3 + $0x122] sm:$0xff] }
 0x1b6   : > { %1688 = vrot.lane.b32.xlu0 %v1593_v52, %s7667_s9  ;;  %v1807_v52 = vpack.c.bf16 %v1775_v49, %v1775_v49  ;;  %v1993_v49 = vld [vmem:[#allocation2 + $0xb0] sm:$0xff] }
 0x1b7   : > { %1857 = vrot.lane.b32.xlu1 %v1790_v53, %s7668_s10  ;;  %v1460_v56 = vpop.permute.xlu2 %1459  ;;  %v1811_v53 = vpack.c.bf16 %v1779_v50, %v1779_v50 }
 0x1b8   : > { %1527 = vst.msk [vmem:[#allocation4 + $0x74] sm:$0xf] %vm1497_vm6, %v1460_v56  ;;  %v1444_v57 = vpop.permute.xlu0 %1443 }
 0x1b9   : > { %v1452_v44 = vpop.permute.xlu1 %1451  ;;  %1519 = vst.msk [vmem:[#allocation4 + $0x54] sm:$0xf] %vm1497_vm6, %v1444_v57  ;;  %v1777_v57 = vld [vmem:[#allocation3 + $0x10a] sm:$0xff] }
 0x1ba   : > { %1523 = vst.msk [vmem:[#allocation4 + $0x64] sm:$0xf] %vm1497_vm6, %v1452_v44  ;;  %v1809_v61 = vpack.c.bf16 %v1777_v57, %v1777_v57  ;;  %v1992_v57 = vld [vmem:[#allocation2 + $0xa8] sm:$0xff] }
 0x1bd   : > { %1853 = vrot.lane.b32.xlu2 %v1788_v58, %s7668_s10  ;;  %v1778_v58 = vld [vmem:[#allocation3 + $0x112] sm:$0xff] }
 0x1be   : > { %1855 = vrot.lane.b32.xlu0 %v1789_v15, %s7668_s10  ;;  %v1810_v15 = vpack.c.bf16 %v1778_v58, %v1778_v58  ;;  %v1996_v58 = vld [vmem:[#allocation2 + $0xd8] sm:$0xff] }
 0x1bf   : > { %1863 = vrot.lane.b32.xlu1 %v1793_v62, %s7668_s10  ;;  %v1627_v0 = vpop.permute.xlu2 %1626  ;;  %v1814_v62 = vpack.c.bf16 %v1782_v60, %v1782_v60 }
 0x1c0   : > { %1723 = vst.msk [vmem:[#allocation4] sm:$0xf] %vm1722_vm7, %v1627_v0  ;;  %v1450_v42 = vpop.permute.xlu0 %1449 }
 0x1c1   : > { %v1458_v4 = vpop.permute.xlu1 %1457  ;;  %1522 = vst.msk [vmem:[#allocation4 + $0x60] sm:$0xf] %vm1497_vm6, %v1450_v42 }
 0x1c2   : > { %1526 = vst.msk [vmem:[#allocation4 + $0x70] sm:$0xf] %vm1497_vm6, %v1458_v4 }
 0x1c5   : > { %1859 = vrot.lane.b32.xlu2 %v1791_v6, %s7668_s10  ;;  %v1812_v6 = vpack.c.bf16 %v1780_v1, %v1780_v1  ;;  %v1995_v1 = vld [vmem:[#allocation2 + $0xc8] sm:$0xff] }
 0x1c6   : > { %1861 = vrot.lane.b32.xlu0 %v1792_v7, %s7668_s10  ;;  %v1813_v7 = vpack.c.bf16 %v1781_v5, %v1781_v5  ;;  %v1999_v5 = vld [vmem:[#allocation2 + $0xf8] sm:$0xff] }
 0x1c7   : > { %1869 = vrot.lane.b32.xlu1 %v1796_v8, %s7668_s10  ;;  %v1633_v63 = vpop.permute.xlu2 %1632  ;;  %v1817_v8 = vpack.c.bf16 %v1785_v54, %v1785_v54 }
 0x1c8   : > { %1726 = vst.msk [vmem:[#allocation4 + $0xc] sm:$0xf] %vm1722_vm7, %v1633_v63  ;;  %v1456_v10 = vpop.permute.xlu0 %1455 }
 0x1c9   : > { %v1464_v11 = vpop.permute.xlu1 %1463  ;;  %1525 = vst.msk [vmem:[#allocation4 + $0x6c] sm:$0xf] %vm1497_vm6, %v1456_v10 }
 0x1ca   : > { %1529 = vst.msk [vmem:[#allocation4 + $0x7c] sm:$0xf] %vm1497_vm6, %v1464_v11  ;;  %v1981_v11 = vld [vmem:[#allocation2 + $0x20] sm:$0xff] }
 0x1cd   : > { %1865 = vrot.lane.b32.xlu2 %v1794_v16, %s7668_s10  ;;  %v1815_v16 = vpack.c.bf16 %v1783_v38, %v1783_v38  ;;  %v1997_v38 = vld [vmem:[#allocation2 + $0xe0] sm:$0xff] }
 0x1ce   : > { %1867 = vrot.lane.b32.xlu0 %v1795_v17, %s7668_s10  ;;  %v2013_v17 = vpack.c.bf16 %v1981_v11, %v1981_v11  ;;  %v7650_v11 = vld [vmem:[%s10434_s2] ss:$0 sm:$0xff] }
 0x1cf   : > { %1875 = vrot.lane.b32.xlu1 %v1799_v3, %s7668_s10  ;;  %v1639_v18 = vpop.permute.xlu2 %1638  ;;  %v1816_v3 = vpack.c.bf16 %v1784_v13, %v1784_v13 }
 0x1d0   : > { %1729 = vst.msk [vmem:[#allocation4 + $0x18] sm:$0xf] %vm1722_vm7, %v1639_v18  ;;  %v1462_v19 = vpop.permute.xlu0 %1461 }
 0x1d1   : > { %v1631_v21 = vpop.permute.xlu1 %1630  ;;  %1528 = vst.msk [vmem:[#allocation4 + $0x78] sm:$0xf] %vm1497_vm6, %v1462_v19  ;;  %v1980_v19 = vld [vmem:[#allocation2 + $0x18] sm:$0xff] }
 0x1d2   : > { %1725 = vst.msk [vmem:[#allocation4 + $0x8] sm:$0xf] %vm1722_vm7, %v1631_v21  ;;  %v1786_v21 = vld [vmem:[#allocation3 + $0x172] sm:$0xff] }
 0x1d5   : > { %1871 = vrot.lane.b32.xlu2 %v1797_v25, %s7668_s10  ;;  %v2012_v25 = vpack.c.bf16 %v1980_v19, %v1980_v19  ;;  %v7651_v19 = vld [vmem:[%s10435_s3] ss:$0 sm:$0xff] }
 0x1d6   : > { %1873 = vrot.lane.b32.xlu0 %v1798_v14, %s7668_s10  ;;  %v1818_v14 = vpack.c.bf16 %v1786_v21, %v1786_v21 }
 0x1d7   : > { %1881 = vrot.lane.b32.xlu1 %v1802_v26, %s7668_s10  ;;  %v1645_v27 = vpop.permute.xlu2 %1644  ;;  %v2016_v26 = vpack.c.bf16 %v1984_v22, %v1984_v22 }
 0x1d8   : > { %1732 = vst.msk [vmem:[#allocation4 + $0x24] sm:$0xf] %vm1722_vm7, %v1645_v27  ;;  %v1629_v28 = vpop.permute.xlu0 %1628  ;;  %v1982_v27 = vld [vmem:[#allocation2 + $0x30] sm:$0xff] }
 0x1d9   : > { %v1637_v29 = vpop.permute.xlu1 %1636  ;;  %1724 = vst.msk [vmem:[#allocation4 + $0x4] sm:$0xf] %vm1722_vm7, %v1629_v28 }
 0x1da   : > { %1728 = vst.msk [vmem:[#allocation4 + $0x14] sm:$0xf] %vm1722_vm7, %v1637_v29 }
 0x1dd   : > { %1877 = vrot.lane.b32.xlu2 %v1800_v31, %s7668_s10  ;;  %v2014_v31 = vpack.c.bf16 %v1982_v27, %v1982_v27 }
 0x1de   : > { %1879 = vrot.lane.b32.xlu0 %v1801_v41, %s7668_s10  ;;  %v2015_v41 = vpack.c.bf16 %v1983_v23, %v1983_v23 }
 0x1df   : > { %1887 = vrot.lane.b32.xlu1 %v1805_v33, %s7668_s10  ;;  %v1651_v34 = vpop.permute.xlu2 %1650  ;;  %v2019_v33 = vpack.c.bf16 %v1987_v32, %v1987_v32 }
 0x1e0   : > { %1735 = vst.msk [vmem:[#allocation4 + $0x30] sm:$0xf] %vm1722_vm7, %v1651_v34  ;;  %v1635_v35 = vpop.permute.xlu0 %1634  ;;  %v1985_v34 = vld [vmem:[#allocation2 + $0x50] sm:$0xff] }
 0x1e1   : > { %v1643_v37 = vpop.permute.xlu1 %1642  ;;  %1727 = vst.msk [vmem:[#allocation4 + $0x10] sm:$0xf] %vm1722_vm7, %v1635_v35 }
 0x1e2   : > { %1731 = vst.msk [vmem:[#allocation4 + $0x20] sm:$0xf] %vm1722_vm7, %v1643_v37 }
 0x1e5   : > { %1883 = vrot.lane.b32.xlu2 %v1803_v43, %s7668_s10  ;;  %v2017_v43 = vpack.c.bf16 %v1985_v34, %v1985_v34 }
 0x1e6   : > { %1885 = vrot.lane.b32.xlu0 %v1804_v24, %s7668_s10  ;;  %v2018_v24 = vpack.c.bf16 %v1986_v36, %v1986_v36 }
 0x1e7   : > { %1893 = vrot.lane.b32.xlu1 %v1808_v45, %s7668_s10  ;;  %v1657_v46 = vpop.permute.xlu2 %1656  ;;  %v2022_v45 = vpack.c.bf16 %v1990_v39, %v1990_v39 }
 0x1e8   : > { %1738 = vst.msk [vmem:[#allocation4 + $0x3c] sm:$0xf] %vm1722_vm7, %v1657_v46  ;;  %v1641_v47 = vpop.permute.xlu0 %1640  ;;  %v1988_v46 = vld [vmem:[#allocation2 + $0x78] sm:$0xff] }
 0x1e9   : > { %v1649_v48 = vpop.permute.xlu1 %1648  ;;  %1730 = vst.msk [vmem:[#allocation4 + $0x1c] sm:$0xf] %vm1722_vm7, %v1641_v47 }
 0x1ea   : > { %1734 = vst.msk [vmem:[#allocation4 + $0x2c] sm:$0xf] %vm1722_vm7, %v1649_v48 }
 0x1ed   : > { %1889 = vrot.lane.b32.xlu2 %v1806_v51, %s7668_s10  ;;  %v2020_v51 = vpack.c.bf16 %v1988_v46, %v1988_v46 }
 0x1ee   : > { %1891 = vrot.lane.b32.xlu0 %v1807_v52, %s7668_s10  ;;  %v2021_v52 = vpack.c.bf16 %v1989_v59, %v1989_v59  ;;  %v2007_v59 = vld [vmem:[#allocation2 + $0x158] sm:$0xff] }
 0x1ef   : > { %1899 = vrot.lane.b32.xlu1 %v1811_v53, %s7668_s10  ;;  %v1663_v55 = vpop.permute.xlu2 %1662  ;;  %v2025_v53 = vpack.c.bf16 %v1993_v49, %v1993_v49 }
 0x1f0   : > { %1741 = vst.msk [vmem:[#allocation4 + $0x48] sm:$0xf] %vm1722_vm7, %v1663_v55  ;;  %v1647_v56 = vpop.permute.xlu0 %1646  ;;  %v1991_v55 = vld [vmem:[#allocation2 + $0x98] sm:$0xff] }
 0x1f1   : > { %v1655_v44 = vpop.permute.xlu1 %1654  ;;  %1733 = vst.msk [vmem:[#allocation4 + $0x28] sm:$0xf] %vm1722_vm7, %v1647_v56 }
 0x1f2   : > { %1737 = vst.msk [vmem:[#allocation4 + $0x38] sm:$0xf] %vm1722_vm7, %v1655_v44 }
 0x1f5   : > { %1895 = vrot.lane.b32.xlu2 %v1809_v61, %s7668_s10  ;;  %v2023_v61 = vpack.c.bf16 %v1991_v55, %v1991_v55 }
 0x1f6   : > { %1897 = vrot.lane.b32.xlu0 %v1810_v15, %s7668_s10  ;;  %v2024_v15 = vpack.c.bf16 %v1992_v57, %v1992_v57 }
 0x1f7   : > { %1905 = vrot.lane.b32.xlu1 %v1814_v62, %s7668_s10  ;;  %v1669_v0 = vpop.permute.xlu2 %1668  ;;  %v2028_v62 = vpack.c.bf16 %v1996_v58, %v1996_v58 }
 0x1f8   : > { %1744 = vst.msk [vmem:[#allocation4 + $0x54] sm:$0xf] %vm1722_vm7, %v1669_v0  ;;  %v1653_v42 = vpop.permute.xlu0 %1652  ;;  %v1994_v0 = vld [vmem:[#allocation2 + $0xc0] sm:$0xff] }
 0x1f9   : > { %v1661_v4 = vpop.permute.xlu1 %1660  ;;  %1736 = vst.msk [vmem:[#allocation4 + $0x34] sm:$0xf] %vm1722_vm7, %v1653_v42 }
 0x1fa   : > { %1740 = vst.msk [vmem:[#allocation4 + $0x44] sm:$0xf] %vm1722_vm7, %v1661_v4 }
 0x1fd   : > { %1901 = vrot.lane.b32.xlu2 %v1812_v6, %s7668_s10  ;;  %v2026_v6 = vpack.c.bf16 %v1994_v0, %v1994_v0  ;;  %v2205_v0 = vld [vmem:[#allocation3 + $0x18] sm:$0xff] }
 0x1fe   : > { %1903 = vrot.lane.b32.xlu0 %v1813_v7, %s7668_s10  ;;  %v2027_v7 = vpack.c.bf16 %v1995_v1, %v1995_v1  ;;  %v2206_v1 = vld [vmem:[#allocation3 + $0x20] sm:$0xff] }
 0x1ff   : > { %1911 = vrot.lane.b32.xlu1 %v1817_v8, %s7668_s10  ;;  %v1675_v63 = vpop.permute.xlu2 %1674  ;;  %v2031_v8 = vpack.c.bf16 %v1999_v5, %v1999_v5  ;;  %v2237_v5 = vpack.c.bf16 %v2205_v0, %v2205_v0 }
 0x200   : > { %1747 = vst.msk [vmem:[#allocation4 + $0x60] sm:$0xf] %vm1722_vm7, %v1675_v63  ;;  %v1659_v10 = vpop.permute.xlu0 %1658  ;;  %v446_v63 = vld [vmem:[%s7887_s17 + $0xf0] sm:$0xff] }
 0x201   : > { %v1667_v12 = vpop.permute.xlu1 %1666  ;;  %1739 = vst.msk [vmem:[#allocation4 + $0x40] sm:$0xf] %vm1722_vm7, %v1659_v10  ;;  %v447_v10 = vld [vmem:[%s7887_s17 + $0xf8] sm:$0xff]  ;;  %s7670_s17 = smov 28  }
 0x202   : > { %1743 = vst.msk [vmem:[#allocation4 + $0x50] sm:$0xf] %vm1722_vm7, %v1667_v12  ;;  %v482_v12 = vmul.f32 %v7650_v11, %v446_v63  ;;  %v483_v13 = vmul.f32 %v7650_v11, %v447_v10  ;;  %v2208_v63 = vld [vmem:[#allocation3 + $0x38] sm:$0xff] }
 0x203   : > { %v2213_v11 = vld [vmem:[#allocation3 + $0x78] sm:$0xff] }
 0x204   : > { %v519_v21 = vadd.f32 %v7651_v19, %v483_v13 }
 0x205   : > { %1907 = vrot.lane.b32.xlu2 %v1815_v16, %s7668_s10 }
 0x206   : > { %1909 = vrot.lane.b32.xlu0 %v1816_v3, %s7668_s10 }
 0x207   : > { %2078 = vrot.lane.b32.xlu1 %v2013_v17, %s7669_s11  ;;  %v1681_v18 = vpop.permute.xlu2 %1680  ;;  %v1998_v17 = vld [vmem:[#allocation2 + $0xf0] sm:$0xff] }
 0x208   : > { %1750 = vst.msk [vmem:[#allocation4 + $0x6c] sm:$0xf] %vm1722_vm7, %v1681_v18  ;;  %v1665_v20 = vpop.permute.xlu0 %1664  ;;  %v2002_v18 = vld [vmem:[#allocation2 + $0x120] sm:$0xff] }
 0x209   : > { %v1673_v9 = vpop.permute.xlu1 %1672  ;;  %1742 = vst.msk [vmem:[#allocation4 + $0x4c] sm:$0xf] %vm1722_vm7, %v1665_v20  ;;  %v518_v20 = vadd.f32 %v7651_v19, %v482_v12  ;;  %v2034_v27 = vpack.c.bf16 %v2002_v18, %v2002_v18  ;;  %v2240_v12 = vpack.c.bf16 %v2208_v63, %v2208_v63  ;;  %v2211_v18 = vld [vmem:[#allocation3 + $0x60] sm:$0xff] }
 0x20a   : > { %1746 = vst.msk [vmem:[#allocation4 + $0x5c] sm:$0xf] %vm1722_vm7, %v1673_v9  ;;  %v2029_v9 = vpack.c.bf16 %v1997_v38, %v1997_v38  ;;  %v2209_v38 = vld [vmem:[#allocation3 + $0x48] sm:$0xff] }
 0x20b   : > { %v2241_v13 = vpack.c.bf16 %v2209_v38, %v2209_v38  ;;  %v2234_v38 = vld [vmem:[#allocation3 + $0x170] sm:$0xff] }
 0x20d   : > { %1913 = vrot.lane.b32.xlu2 %v1818_v14, %s7668_s10  ;;  %v550_v14 = vmax.f32 %v518_v20, 0.0  ;;  %v2212_v20 = vld [vmem:[#allocation3 + $0x68] sm:$0xff] }
 0x20e   : > { %2076 = vrot.lane.b32.xlu0 %v2012_v25, %s7669_s11  ;;  %v2030_v25 = vpack.c.bf16 %v1998_v17, %v1998_v17 }
 0x20f   : > { %2084 = vrot.lane.b32.xlu1 %v2016_v26, %s7669_s11  ;;  %v1687_v28 = vpop.permute.xlu2 %1686  ;;  %v551_v26 = vmax.f32 %v519_v21, 0.0  ;;  %583 = vst.msk [vmem:[#allocation2 + $0x181] sm:$0xff] %vm327_vm0, %v550_v14  ;;  %v2216_v21 = vld [vmem:[#allocation3 + $0x98] sm:$0xff] }
 0x210   : > { %1753 = vst.msk [vmem:[#allocation4 + $0x78] sm:$0xf] %vm1722_vm7, %v1687_v28  ;;  %v1671_v29 = vpop.permute.xlu0 %1670  ;;  %v2000_v28 = vld [vmem:[#allocation2 + $0x108] sm:$0xff] }
 0x211   : > { %v1679_v30 = vpop.permute.xlu1 %1678  ;;  %1745 = vst.msk [vmem:[#allocation4 + $0x58] sm:$0xf] %vm1722_vm7, %v1671_v29  ;;  %v2001_v29 = vld [vmem:[#allocation2 + $0x110] sm:$0xff] }
 0x212   : > { %1749 = vst.msk [vmem:[#allocation4 + $0x68] sm:$0xf] %vm1722_vm7, %v1679_v30  ;;  %v2005_v30 = vld [vmem:[#allocation2 + $0x140] sm:$0xff] }
 0x213   : > { %584 = vst.msk [vmem:[#allocation2 + $0x189] sm:$0xff] %vm327_vm0, %v551_v26  ;;  %v2037_v34 = vpack.c.bf16 %v2005_v30, %v2005_v30 }
 0x215   : > { %2080 = vrot.lane.b32.xlu2 %v2014_v31, %s7669_s11 }
 0x216   : > { %2082 = vrot.lane.b32.xlu0 %v2015_v41, %s7669_s11  ;;  %v2032_v41 = vpack.c.bf16 %v2000_v28, %v2000_v28 }
 0x217   : > { %2090 = vrot.lane.b32.xlu1 %v2019_v33, %s7669_s11  ;;  %v1854_v35 = vpop.permute.xlu2 %1853  ;;  %v2033_v33 = vpack.c.bf16 %v2001_v29, %v2001_v29  ;;  %v2219_v29 = vld [vmem:[#allocation3 + $0xc0] sm:$0xff] }
 0x218   : > { %1949 = vst.msk [vmem:[#allocation4 + $0x4] sm:$0xf] %vm1947_vm8, %v1854_v35  ;;  %v1677_v37 = vpop.permute.xlu0 %1676  ;;  %v2003_v35 = vld [vmem:[#allocation2 + $0x128] sm:$0xff] }
 0x219   : > { %v1685_v40 = vpop.permute.xlu1 %1684  ;;  %1748 = vst.msk [vmem:[#allocation4 + $0x64] sm:$0xf] %vm1722_vm7, %v1677_v37  ;;  %v2004_v37 = vld [vmem:[#allocation2 + $0x138] sm:$0xff] }
 0x21a   : > { %1752 = vst.msk [vmem:[#allocation4 + $0x74] sm:$0xf] %vm1722_vm7, %v1685_v40  ;;  %v2008_v40 = vld [vmem:[#allocation2 + $0x168] sm:$0xff] }
 0x21b   : > { %v2040_v46 = vpack.c.bf16 %v2008_v40, %v2008_v40  ;;  %v2011_v49 = vld [vmem:[#allocation2 + $0x188] sm:$0xff] }
 0x21d   : > { %2086 = vrot.lane.b32.xlu2 %v2017_v43, %s7669_s11 }
 0x21e   : > { %2088 = vrot.lane.b32.xlu0 %v2018_v24, %s7669_s11  ;;  %v2035_v24 = vpack.c.bf16 %v2003_v35, %v2003_v35 }
 0x21f   : > { %2096 = vrot.lane.b32.xlu1 %v2022_v45, %s7669_s11  ;;  %v1860_v47 = vpop.permute.xlu2 %1859  ;;  %v2036_v45 = vpack.c.bf16 %v2004_v37, %v2004_v37  ;;  %v2222_v37 = vld [vmem:[#allocation3 + $0xe0] sm:$0xff] }
 0x220   : > { %1952 = vst.msk [vmem:[#allocation4 + $0x10] sm:$0xf] %vm1947_vm8, %v1860_v47  ;;  %v1683_v48 = vpop.permute.xlu0 %1682 }
 0x221   : > { %v1852_v50 = vpop.permute.xlu1 %1851  ;;  %1751 = vst.msk [vmem:[#allocation4 + $0x70] sm:$0xf] %vm1722_vm7, %v1683_v48 }
 0x222   : > { %1948 = vst.msk [vmem:[#allocation4] sm:$0xf] %vm1947_vm8, %v1852_v50 }
 0x225   : > { %2092 = vrot.lane.b32.xlu2 %v2020_v51, %s7669_s11  ;;  %v2039_v51 = vpack.c.bf16 %v2007_v59, %v2007_v59  ;;  %v2221_v59 = vld [vmem:[#allocation3 + $0xd8] sm:$0xff] }
 0x226   : > { %2094 = vrot.lane.b32.xlu0 %v2021_v52, %s7669_s11  ;;  %v2043_v52 = vpack.c.bf16 %v2011_v49, %v2011_v49 }
 0x227   : > { %2102 = vrot.lane.b32.xlu1 %v2025_v53, %s7669_s11  ;;  %v1866_v56 = vpop.permute.xlu2 %1865  ;;  %v2009_v53 = vld [vmem:[#allocation2 + $0x170] sm:$0xff] }
 0x228   : > { %1955 = vst.msk [vmem:[#allocation4 + $0x1c] sm:$0xf] %vm1947_vm8, %v1866_v56  ;;  %v1689_v44 = vpop.permute.xlu0 %1688  ;;  %v2010_v56 = vld [vmem:[#allocation2 + $0x180] sm:$0xff]  ;;  %v2041_v58 = vpack.c.bf16 %v2009_v53, %v2009_v53 }
 0x229   : > { %v1858_v60 = vpop.permute.xlu1 %1857  ;;  %1754 = vst.msk [vmem:[#allocation4 + $0x7c] sm:$0xf] %vm1722_vm7, %v1689_v44 }
 0x22a   : > { %1951 = vst.msk [vmem:[#allocation4 + $0xc] sm:$0xf] %vm1947_vm8, %v1858_v60  ;;  %v2207_v60 = vld [vmem:[#allocation3 + $0x30] sm:$0xff] }
 0x22d   : > { %2098 = vrot.lane.b32.xlu2 %v2023_v61, %s7669_s11  ;;  %v2042_v61 = vpack.c.bf16 %v2010_v56, %v2010_v56 }
 0x22e   : > { %2100 = vrot.lane.b32.xlu0 %v2024_v15, %s7669_s11 }
 0x22f   : > { %2108 = vrot.lane.b32.xlu1 %v2028_v62, %s7669_s11  ;;  %v1872_v42 = vpop.permute.xlu2 %1871 }
 0x230   : > { %1958 = vst.msk [vmem:[#allocation4 + $0x28] sm:$0xf] %vm1947_vm8, %v1872_v42  ;;  %v1856_v4 = vpop.permute.xlu0 %1855 }
 0x231   : > { %v1864_v54 = vpop.permute.xlu1 %1863  ;;  %1950 = vst.msk [vmem:[#allocation4 + $0x8] sm:$0xf] %vm1947_vm8, %v1856_v4  ;;  %v2210_v4 = vld [vmem:[#allocation3 + $0x50] sm:$0xff] }
 0x232   : > { %1954 = vst.msk [vmem:[#allocation4 + $0x18] sm:$0xf] %vm1947_vm8, %v1864_v54  ;;  %v2238_v54 = vpack.c.bf16 %v2206_v1, %v2206_v1  ;;  %v2231_v1 = vld [vmem:[#allocation3 + $0x150] sm:$0xff] }
 0x235   : > { %2104 = vrot.lane.b32.xlu2 %v2026_v6, %s7669_s11  ;;  %v2242_v6 = vpack.c.bf16 %v2210_v4, %v2210_v4 }
 0x236   : > { %2106 = vrot.lane.b32.xlu0 %v2027_v7, %s7669_s11 }
 0x237   : > { %2114 = vrot.lane.b32.xlu1 %v2031_v8, %s7669_s11  ;;  %v1878_v16 = vpop.permute.xlu2 %1877 }
 0x238   : > { %1961 = vst.msk [vmem:[#allocation4 + $0x34] sm:$0xf] %vm1947_vm8, %v1878_v16  ;;  %v1862_v3 = vpop.permute.xlu0 %1861  ;;  %v2245_v16 = vpack.c.bf16 %v2213_v11, %v2213_v11 }
 0x239   : > { %v1870_v22 = vpop.permute.xlu1 %1869  ;;  %1953 = vst.msk [vmem:[#allocation4 + $0x14] sm:$0xf] %vm1947_vm8, %v1862_v3 }
 0x23a   : > { %1957 = vst.msk [vmem:[#allocation4 + $0x24] sm:$0xf] %vm1947_vm8, %v1870_v22  ;;  %v2243_v22 = vpack.c.bf16 %v2211_v18, %v2211_v18  ;;  %v2430_v18 = vld [vmem:[#allocation2 + $0x19] sm:$0xff] }
 0x23d   : > { %2110 = vrot.lane.b32.xlu2 %v2029_v9, %s7669_s11  ;;  %v2244_v9 = vpack.c.bf16 %v2212_v20, %v2212_v20  ;;  %v2233_v20 = vld [vmem:[#allocation3 + $0x168] sm:$0xff] }
 0x23e   : > { %2112 = vrot.lane.b32.xlu0 %v2030_v25, %s7669_s11  ;;  %v2248_v25 = vpack.c.bf16 %v2216_v21, %v2216_v21 }
 0x23f   : > { %2120 = vrot.lane.b32.xlu1 %v2034_v27, %s7669_s11  ;;  %v1884_v23 = vpop.permute.xlu2 %1883  ;;  %v2214_v27 = vld [vmem:[#allocation3 + $0x80] sm:$0xff] }
 0x240   : > { %1964 = vst.msk [vmem:[#allocation4 + $0x40] sm:$0xf] %vm1947_vm8, %v1884_v23  ;;  %v1868_v32 = vpop.permute.xlu0 %1867  ;;  %v2215_v23 = vld [vmem:[#allocation3 + $0x90] sm:$0xff] }
 0x241   : > { %v1876_v31 = vpop.permute.xlu1 %1875  ;;  %1956 = vst.msk [vmem:[#allocation4 + $0x20] sm:$0xf] %vm1947_vm8, %v1868_v32  ;;  %v2246_v32 = vpack.c.bf16 %v2214_v27, %v2214_v27  ;;  %v2247_v30 = vpack.c.bf16 %v2215_v23, %v2215_v23  ;;  %v2433_v27 = vld [vmem:[#allocation2 + $0x39] sm:$0xff] }
 0x242   : > { %1960 = vst.msk [vmem:[#allocation4 + $0x30] sm:$0xf] %vm1947_vm8, %v1876_v31  ;;  %v2251_v31 = vpack.c.bf16 %v2219_v29, %v2219_v29  ;;  %v2236_v23 = vld [vmem:[#allocation3 + $0x188] sm:$0xff] }
 0x245   : > { %2116 = vrot.lane.b32.xlu2 %v2032_v41, %s7669_s11 }
 0x246   : > { %2118 = vrot.lane.b32.xlu0 %v2033_v33, %s7669_s11 }
 0x247   : > { %2126 = vrot.lane.b32.xlu1 %v2037_v34, %s7669_s11  ;;  %v1890_v36 = vpop.permute.xlu2 %1889  ;;  %v2217_v34 = vld [vmem:[#allocation3 + $0xa8] sm:$0xff] }
 0x248   : > { %1967 = vst.msk [vmem:[#allocation4 + $0x4c] sm:$0xf] %vm1947_vm8, %v1890_v36  ;;  %v1874_v39 = vpop.permute.xlu0 %1873  ;;  %v2218_v36 = vld [vmem:[#allocation3 + $0xb0] sm:$0xff] }
 0x249   : > { %v1882_v43 = vpop.permute.xlu1 %1881  ;;  %1959 = vst.msk [vmem:[#allocation4 + $0x2c] sm:$0xf] %vm1947_vm8, %v1874_v39  ;;  %v2249_v39 = vpack.c.bf16 %v2217_v34, %v2217_v34  ;;  %v2250_v40 = vpack.c.bf16 %v2218_v36, %v2218_v36 }
 0x24a   : > { %1963 = vst.msk [vmem:[#allocation4 + $0x3c] sm:$0xf] %vm1947_vm8, %v1882_v43  ;;  %v2254_v43 = vpack.c.bf16 %v2222_v37, %v2222_v37 }
 0x24d   : > { %2122 = vrot.lane.b32.xlu2 %v2035_v24, %s7669_s11 }
 0x24e   : > { %2124 = vrot.lane.b32.xlu0 %v2036_v45, %s7669_s11 }
 0x24f   : > { %2132 = vrot.lane.b32.xlu1 %v2040_v46, %s7669_s11  ;;  %v1896_v47 = vpop.permute.xlu2 %1895  ;;  %v2220_v46 = vld [vmem:[#allocation3 + $0xc8] sm:$0xff] }
 0x250   : > { %1970 = vst.msk [vmem:[#allocation4 + $0x58] sm:$0xf] %vm1947_vm8, %v1896_v47  ;;  %v1880_v48 = vpop.permute.xlu0 %1879  ;;  %v2252_v49 = vpack.c.bf16 %v2220_v46, %v2220_v46 }
 0x251   : > { %v1888_v50 = vpop.permute.xlu1 %1887  ;;  %1962 = vst.msk [vmem:[#allocation4 + $0x38] sm:$0xf] %vm1947_vm8, %v1880_v48  ;;  %v2225_v48 = vld [vmem:[#allocation3 + $0x108] sm:$0xff] }
 0x252   : > { %1966 = vst.msk [vmem:[#allocation4 + $0x48] sm:$0xf] %vm1947_vm8, %v1888_v50  ;;  %v2253_v50 = vpack.c.bf16 %v2221_v59, %v2221_v59 }
 0x255   : > { %2128 = vrot.lane.b32.xlu2 %v8383_v2, %s7669_s11  ;;  %v2239_v2 = vpack.c.bf16 %v2207_v60, %v2207_v60 }
 0x256   : > { %2130 = vrot.lane.b32.xlu0 %v2039_v51, %s7669_s11  ;;  %v2257_v51 = vpack.c.bf16 %v2225_v48, %v2225_v48 }
 0x257   : > { %2138 = vrot.lane.b32.xlu1 %v2043_v52, %s7669_s11  ;;  %v1902_v55 = vpop.permute.xlu2 %1901 }
 0x258   : > { %1973 = vst.msk [vmem:[#allocation4 + $0x64] sm:$0xf] %vm1947_vm8, %v1902_v55  ;;  %v1886_v57 = vpop.permute.xlu0 %1885  ;;  %v2223_v55 = vld [vmem:[#allocation3 + $0xf0] sm:$0xff] }
 0x259   : > { %v1894_v44 = vpop.permute.xlu1 %1893  ;;  %1965 = vst.msk [vmem:[#allocation4 + $0x44] sm:$0xf] %vm1947_vm8, %v1886_v57  ;;  %v2224_v57 = vld [vmem:[#allocation3 + $0xf8] sm:$0xff] }
 0x25a   : > { %1969 = vst.msk [vmem:[#allocation4 + $0x54] sm:$0xf] %vm1947_vm8, %v1894_v44  ;;  %v2228_v44 = vld [vmem:[#allocation3 + $0x128] sm:$0xff]  ;;  %v2256_v60 = vpack.c.bf16 %v2224_v57, %v2224_v57 }
 0x25d   : > { %2134 = vrot.lane.b32.xlu2 %v2041_v58, %s7669_s11  ;;  %v2255_v58 = vpack.c.bf16 %v2223_v55, %v2223_v55 }
 0x25e   : > { %2136 = vrot.lane.b32.xlu0 %v2042_v61, %s7669_s11  ;;  %v2260_v61 = vpack.c.bf16 %v2228_v44, %v2228_v44 }
 0x25f   : > { %2305 = vrot.lane.b32.xlu1 %v2239_v2, %s7670_s17  ;;  %v1908_v15 = vpop.permute.xlu2 %1907 }
 0x260   : > { %1976 = vst.msk [vmem:[#allocation4 + $0x70] sm:$0xf] %vm1947_vm8, %v1908_v15  ;;  %v1892_v62 = vpop.permute.xlu0 %1891 }
 0x261   : > { %v1900_v42 = vpop.permute.xlu1 %1899  ;;  %1968 = vst.msk [vmem:[#allocation4 + $0x50] sm:$0xf] %vm1947_vm8, %v1892_v62  ;;  %v2226_v62 = vld [vmem:[#allocation3 + $0x110] sm:$0xff] }
 0x262   : > { %1972 = vst.msk [vmem:[#allocation4 + $0x60] sm:$0xf] %vm1947_vm8, %v1900_v42  ;;  %v2227_v42 = vld [vmem:[#allocation3 + $0x120] sm:$0xff]  ;;  %v2258_v4 = vpack.c.bf16 %v2226_v62, %v2226_v62 }
 0x265   : > { %2301 = vrot.lane.b32.xlu2 %v2237_v5, %s7670_s17  ;;  %v2259_v5 = vpack.c.bf16 %v2227_v42, %v2227_v42 }
 0x266   : > { %2303 = vrot.lane.b32.xlu0 %v2238_v54, %s7670_s17  ;;  %v2263_v54 = vpack.c.bf16 %v2231_v1, %v2231_v1 }
 0x267   : > { %2311 = vrot.lane.b32.xlu1 %v2242_v6, %s7670_s17  ;;  %v1914_v7 = vpop.permute.xlu2 %1913 }
 0x268   : > { %1979 = vst.msk [vmem:[#allocation4 + $0x7c] sm:$0xf] %vm1947_vm8, %v1914_v7  ;;  %v1898_v8 = vpop.permute.xlu0 %1897 }
 0x269   : > { %v1906_v10 = vpop.permute.xlu1 %1905  ;;  %1971 = vst.msk [vmem:[#allocation4 + $0x5c] sm:$0xf] %vm1947_vm8, %v1898_v8  ;;  %v2229_v8 = vld [vmem:[#allocation3 + $0x138] sm:$0xff] }
 0x26a   : > { %1975 = vst.msk [vmem:[#allocation4 + $0x6c] sm:$0xf] %vm1947_vm8, %v1906_v10  ;;  %v2230_v10 = vld [vmem:[#allocation3 + $0x140] sm:$0xff]  ;;  %v2261_v11 = vpack.c.bf16 %v2229_v8, %v2229_v8 }
 0x26d   : > { %2307 = vrot.lane.b32.xlu2 %v2240_v12, %s7670_s17  ;;  %v2262_v12 = vpack.c.bf16 %v2230_v10, %v2230_v10 }
 0x26e   : > { %2309 = vrot.lane.b32.xlu0 %v2241_v13, %s7670_s17  ;;  %v2266_v13 = vpack.c.bf16 %v2234_v38, %v2234_v38 }
 0x26f   : > { %2317 = vrot.lane.b32.xlu1 %v2245_v16, %s7670_s17  ;;  %v2081_v17 = vpop.permute.xlu2 %2080 }
 0x270   : > { %2175 = vst.msk [vmem:[#allocation4 + $0x8] sm:$0xf] %vm2172_vm9, %v2081_v17  ;;  %v1904_v3 = vpop.permute.xlu0 %1903 }
 0x271   : > { %v1912_v19 = vpop.permute.xlu1 %1911  ;;  %1974 = vst.msk [vmem:[#allocation4 + $0x68] sm:$0xf] %vm1947_vm8, %v1904_v3  ;;  %v2232_v3 = vld [vmem:[#allocation3 + $0x158] sm:$0xff] }
 0x272   : > { %1978 = vst.msk [vmem:[#allocation4 + $0x78] sm:$0xf] %vm1947_vm8, %v1912_v19  ;;  %v2264_v21 = vpack.c.bf16 %v2232_v3, %v2232_v3 }
 0x275   : > { %2313 = vrot.lane.b32.xlu2 %v2243_v22, %s7670_s17  ;;  %v2462_v22 = vpack.c.bf16 %v2430_v18, %v2430_v18  ;;  %v2451_v18 = vld [vmem:[#allocation2 + $0x111] sm:$0xff] }
 0x276   : > { %2315 = vrot.lane.b32.xlu0 %v2244_v9, %s7670_s17  ;;  %v2265_v9 = vpack.c.bf16 %v2233_v20, %v2233_v20 }
 0x277   : > { %2323 = vrot.lane.b32.xlu1 %v2248_v25, %s7670_s17  ;;  %v2087_v14 = vpop.permute.xlu2 %2086 }
 0x278   : > { %2178 = vst.msk [vmem:[#allocation4 + $0x14] sm:$0xf] %vm2172_vm9, %v2087_v14  ;;  %v1910_v26 = vpop.permute.xlu0 %1909 }
 0x279   : > { %v2079_v28 = vpop.permute.xlu1 %2078  ;;  %1977 = vst.msk [vmem:[#allocation4 + $0x74] sm:$0xf] %vm1947_vm8, %v1910_v26  ;;  %v2235_v26 = vld [vmem:[#allocation3 + $0x180] sm:$0xff] }
 0x27a   : > { %2174 = vst.msk [vmem:[#allocation4 + $0x4] sm:$0xf] %vm2172_vm9, %v2079_v28  ;;  %v2267_v29 = vpack.c.bf16 %v2235_v26, %v2235_v26 }
 0x27d   : > { %2319 = vrot.lane.b32.xlu2 %v2246_v32, %s7670_s17  ;;  %v2465_v32 = vpack.c.bf16 %v2433_v27, %v2433_v27  ;;  %v2454_v27 = vld [vmem:[#allocation2 + $0x139] sm:$0xff] }
 0x27e   : > { %2321 = vrot.lane.b32.xlu0 %v2247_v30, %s7670_s17  ;;  %v2268_v30 = vpack.c.bf16 %v2236_v23, %v2236_v23 }
 0x27f   : > { %2329 = vrot.lane.b32.xlu1 %v2251_v31, %s7670_s17  ;;  %v2093_v41 = vpop.permute.xlu2 %2092  ;;  %v2431_v31 = vld [vmem:[#allocation2 + $0x21] sm:$0xff] }
 0x280   : > { %2181 = vst.msk [vmem:[#allocation4 + $0x20] sm:$0xf] %vm2172_vm9, %v2093_v41  ;;  %v2077_v33 = vpop.permute.xlu0 %2076  ;;  %v2463_v37 = vpack.c.bf16 %v2431_v31, %v2431_v31 }
 0x281   : > { %v2085_v35 = vpop.permute.xlu1 %2084  ;;  %2173 = vst.msk [vmem:[#allocation4] sm:$0xf] %vm2172_vm9, %v2077_v33  ;;  %v2432_v33 = vld [vmem:[#allocation2 + $0x31] sm:$0xff] }
 0x282   : > { %2177 = vst.msk [vmem:[#allocation4 + $0x10] sm:$0xf] %vm2172_vm9, %v2085_v35  ;;  %v2436_v35 = vld [vmem:[#allocation2 + $0x61] sm:$0xff] }
 0x285   : > { %2325 = vrot.lane.b32.xlu2 %v2249_v39, %s7670_s17  ;;  %v2464_v39 = vpack.c.bf16 %v2432_v33, %v2432_v33 }
 0x286   : > { %2327 = vrot.lane.b32.xlu0 %v2250_v40, %s7670_s17  ;;  %v2468_v40 = vpack.c.bf16 %v2436_v35, %v2436_v35 }
 0x287   : > { %2335 = vrot.lane.b32.xlu1 %v2254_v43, %s7670_s17  ;;  %v2099_v24 = vpop.permute.xlu2 %2098  ;;  %v2434_v43 = vld [vmem:[#allocation2 + $0x49] sm:$0xff] }
 0x288   : > { %2184 = vst.msk [vmem:[#allocation4 + $0x2c] sm:$0xf] %vm2172_vm9, %v2099_v24  ;;  %v2083_v45 = vpop.permute.xlu0 %2082  ;;  %v2466_v48 = vpack.c.bf16 %v2434_v43, %v2434_v43 }
 0x289   : > { %v2091_v47 = vpop.permute.xlu1 %2090  ;;  %2176 = vst.msk [vmem:[#allocation4 + $0xc] sm:$0xf] %vm2172_vm9, %v2083_v45  ;;  %v2435_v45 = vld [vmem:[#allocation2 + $0x51] sm:$0xff] }
 0x28a   : > { %2180 = vst.msk [vmem:[#allocation4 + $0x1c] sm:$0xf] %vm2172_vm9, %v2091_v47  ;;  %v2439_v47 = vld [vmem:[#allocation2 + $0x81] sm:$0xff] }
 0x28d   : > { %2331 = vrot.lane.b32.xlu2 %v2252_v49, %s7670_s17  ;;  %v2467_v49 = vpack.c.bf16 %v2435_v45, %v2435_v45 }
 0x28e   : > { %2333 = vrot.lane.b32.xlu0 %v2253_v50, %s7670_s17  ;;  %v2471_v50 = vpack.c.bf16 %v2439_v47, %v2439_v47 }
 0x28f   : > { %2341 = vrot.lane.b32.xlu1 %v2257_v51, %s7670_s17  ;;  %v2105_v52 = vpop.permute.xlu2 %2104  ;;  %v2437_v51 = vld [vmem:[#allocation2 + $0x69] sm:$0xff] }
 0x290   : > { %2187 = vst.msk [vmem:[#allocation4 + $0x38] sm:$0xf] %vm2172_vm9, %v2105_v52  ;;  %v2089_v53 = vpop.permute.xlu0 %2088  ;;  %v2469_v44 = vpack.c.bf16 %v2437_v51, %v2437_v51 }
 0x291   : > { %v2097_v56 = vpop.permute.xlu1 %2096  ;;  %2179 = vst.msk [vmem:[#allocation4 + $0x18] sm:$0xf] %vm2172_vm9, %v2089_v53  ;;  %v2438_v53 = vld [vmem:[#allocation2 + $0x79] sm:$0xff] }
 0x292   : > { %2183 = vst.msk [vmem:[#allocation4 + $0x28] sm:$0xf] %vm2172_vm9, %v2097_v56  ;;  %v2442_v56 = vld [vmem:[#allocation2 + $0xa9] sm:$0xff] }
 0x295   : > { %2337 = vrot.lane.b32.xlu2 %v2255_v58, %s7670_s17  ;;  %v2470_v58 = vpack.c.bf16 %v2438_v53, %v2438_v53 }
 0x296   : > { %2339 = vrot.lane.b32.xlu0 %v2256_v60, %s7670_s17  ;;  %v2474_v60 = vpack.c.bf16 %v2442_v56, %v2442_v56 }
 0x297   : > { %2347 = vrot.lane.b32.xlu1 %v2260_v61, %s7670_s17  ;;  %v2111_v2 = vpop.permute.xlu2 %2110  ;;  %v2440_v61 = vld [vmem:[#allocation2 + $0x91] sm:$0xff] }
 0x298   : > { %2190 = vst.msk [vmem:[#allocation4 + $0x44] sm:$0xf] %vm2172_vm9, %v2111_v2  ;;  %v2095_v15 = vpop.permute.xlu0 %2094  ;;  %v2472_v1 = vpack.c.bf16 %v2440_v61, %v2440_v61 }
 0x299   : > { %v2103_v0 = vpop.permute.xlu1 %2102  ;;  %2182 = vst.msk [vmem:[#allocation4 + $0x24] sm:$0xf] %vm2172_vm9, %v2095_v15  ;;  %v2441_v15 = vld [vmem:[#allocation2 + $0x99] sm:$0xff] }
 0x29a   : > { %2186 = vst.msk [vmem:[#allocation4 + $0x34] sm:$0xf] %vm2172_vm9, %v2103_v0  ;;  %v2445_v0 = vld [vmem:[#allocation2 + $0xc9] sm:$0xff] }
 0x29d   : > { %2343 = vrot.lane.b32.xlu2 %v2258_v4, %s7670_s17  ;;  %v2473_v4 = vpack.c.bf16 %v2441_v15, %v2441_v15 }
 0x29e   : > { %2345 = vrot.lane.b32.xlu0 %v2259_v5, %s7670_s17  ;;  %v2477_v5 = vpack.c.bf16 %v2445_v0, %v2445_v0  ;;  %v2655_v0 = vld [vmem:[#allocation3 + $0x19] sm:$0xff] }
 0x29f   : > { %2353 = vrot.lane.b32.xlu1 %v2263_v54, %s7670_s17  ;;  %v2117_v6 = vpop.permute.xlu2 %2116  ;;  %v2443_v54 = vld [vmem:[#allocation2 + $0xb1] sm:$0xff] }
 0x2a0   : > { %2193 = vst.msk [vmem:[#allocation4 + $0x50] sm:$0xf] %vm2172_vm9, %v2117_v6  ;;  %v2101_v7 = vpop.permute.xlu0 %2100  ;;  %v2475_v38 = vpack.c.bf16 %v2443_v54, %v2443_v54 }
 0x2a1   : > { %v2109_v63 = vpop.permute.xlu1 %2108  ;;  %2185 = vst.msk [vmem:[#allocation4 + $0x30] sm:$0xf] %vm2172_vm9, %v2101_v7  ;;  %v2444_v7 = vld [vmem:[#allocation2 + $0xc1] sm:$0xff] }
 0x2a2   : > { %2189 = vst.msk [vmem:[#allocation4 + $0x40] sm:$0xf] %vm2172_vm9, %v2109_v63  ;;  %v2448_v63 = vld [vmem:[#allocation2 + $0xf1] sm:$0xff] }
 0x2a5   : > { %2349 = vrot.lane.b32.xlu2 %v2261_v11, %s7670_s17  ;;  %v2476_v11 = vpack.c.bf16 %v2444_v7, %v2444_v7 }
 0x2a6   : > { %2351 = vrot.lane.b32.xlu0 %v2262_v12, %s7670_s17  ;;  %v2480_v12 = vpack.c.bf16 %v2448_v63, %v2448_v63  ;;  %v2662_v63 = vld [vmem:[#allocation3 + $0x69] sm:$0xff] }
 0x2a7   : > { %2359 = vrot.lane.b32.xlu1 %v2266_v13, %s7670_s17  ;;  %v2123_v16 = vpop.permute.xlu2 %2122  ;;  %v2446_v13 = vld [vmem:[#allocation2 + $0xd9] sm:$0xff] }
 0x2a8   : > { %2196 = vst.msk [vmem:[#allocation4 + $0x5c] sm:$0xf] %vm2172_vm9, %v2123_v16  ;;  %v2107_v17 = vpop.permute.xlu0 %2106  ;;  %v2478_v20 = vpack.c.bf16 %v2446_v13, %v2446_v13 }
 0x2a9   : > { %v2115_v19 = vpop.permute.xlu1 %2114  ;;  %2188 = vst.msk [vmem:[#allocation4 + $0x3c] sm:$0xf] %vm2172_vm9, %v2107_v17  ;;  %v2447_v17 = vld [vmem:[#allocation2 + $0xe1] sm:$0xff] }
 0x2aa   : > { %2192 = vst.msk [vmem:[#allocation4 + $0x4c] sm:$0xf] %vm2172_vm9, %v2115_v19 }
 0x2ad   : > { %2355 = vrot.lane.b32.xlu2 %v2264_v21, %s7670_s17  ;;  %v2479_v21 = vpack.c.bf16 %v2447_v17, %v2447_v17 }
 0x2ae   : > { %2357 = vrot.lane.b32.xlu0 %v2265_v9, %s7670_s17  ;;  %v2449_v9 = vld [vmem:[#allocation2 + $0xf9] sm:$0xff] }
 0x2af   : > { %2526 = vrot.lane.b32.xlu1 %v2462_v22, %s7671_s20  ;;  %v2129_v25 = vpop.permute.xlu2 %2128  ;;  %v2483_v22 = vpack.c.bf16 %v2451_v18, %v2451_v18  ;;  %v2481_v23 = vpack.c.bf16 %v2449_v9, %v2449_v9  ;;  %v2665_v18 = vld [vmem:[#allocation3 + $0x91] sm:$0xff] }
 0x2b0   : > { %2199 = vst.msk [vmem:[#allocation4 + $0x68] sm:$0xf] %vm2172_vm9, %v2129_v25  ;;  %v2113_v14 = vpop.permute.xlu0 %2112 }
 0x2b1   : > { %v2121_v28 = vpop.permute.xlu1 %2120  ;;  %2191 = vst.msk [vmem:[#allocation4 + $0x48] sm:$0xf] %vm2172_vm9, %v2113_v14  ;;  %v2450_v14 = vld [vmem:[#allocation2 + $0x109] sm:$0xff] }
 0x2b2   : > { %2195 = vst.msk [vmem:[#allocation4 + $0x58] sm:$0xf] %vm2172_vm9, %v2121_v28 }
 0x2b5   : > { %2361 = vrot.lane.b32.xlu2 %v2267_v29, %s7670_s17  ;;  %v2482_v29 = vpack.c.bf16 %v2450_v14, %v2450_v14 }
 0x2b6   : > { %2363 = vrot.lane.b32.xlu0 %v2268_v30, %s7670_s17  ;;  %v2452_v30 = vld [vmem:[#allocation2 + $0x121] sm:$0xff] }
 0x2b7   : > { %2532 = vrot.lane.b32.xlu1 %v2465_v32, %s7671_s20  ;;  %v2135_v41 = vpop.permute.xlu2 %2134  ;;  %v2486_v32 = vpack.c.bf16 %v2454_v27, %v2454_v27  ;;  %v2668_v27 = vld [vmem:[#allocation3 + $0xb1] sm:$0xff] }
 0x2b8   : > { %2202 = vst.msk [vmem:[#allocation4 + $0x74] sm:$0xf] %vm2172_vm9, %v2135_v41  ;;  %v2119_v34 = vpop.permute.xlu0 %2118  ;;  %v2453_v41 = vld [vmem:[#allocation2 + $0x129] sm:$0xff] }
 0x2b9   : > { %v2127_v36 = vpop.permute.xlu1 %2126  ;;  %2194 = vst.msk [vmem:[#allocation4 + $0x54] sm:$0xf] %vm2172_vm9, %v2119_v34  ;;  %v2457_v34 = vld [vmem:[#allocation2 + $0x159] sm:$0xff] }
 0x2ba   : > { %2198 = vst.msk [vmem:[#allocation4 + $0x64] sm:$0xf] %vm2172_vm9, %v2127_v36  ;;  %v2484_v36 = vpack.c.bf16 %v2452_v30, %v2452_v30 }
 0x2bd   : > { %2528 = vrot.lane.b32.xlu2 %v2463_v37, %s7671_s20  ;;  %v2485_v37 = vpack.c.bf16 %v2453_v41, %v2453_v41 }
 0x2be   : > { %2530 = vrot.lane.b32.xlu0 %v2464_v39, %s7671_s20  ;;  %v2489_v39 = vpack.c.bf16 %v2457_v34, %v2457_v34  ;;  %v2671_v34 = vld [vmem:[#allocation3 + $0xd9] sm:$0xff] }
 0x2bf   : > { %2538 = vrot.lane.b32.xlu1 %v2468_v40, %s7671_s20  ;;  %v2302_v24 = vpop.permute.xlu2 %2301  ;;  %v2455_v40 = vld [vmem:[#allocation2 + $0x141] sm:$0xff] }
 0x2c0   : > { %2398 = vst.msk [vmem:[#allocation4] sm:$0xf] %vm2397_vm10, %v2302_v24  ;;  %v2125_v46 = vpop.permute.xlu0 %2124  ;;  %v2456_v24 = vld [vmem:[#allocation2 + $0x151] sm:$0xff] }
 0x2c1   : > { %v2133_v59 = vpop.permute.xlu1 %2132  ;;  %2197 = vst.msk [vmem:[#allocation4 + $0x60] sm:$0xf] %vm2172_vm9, %v2125_v46  ;;  %v2460_v46 = vld [vmem:[#allocation2 + $0x181] sm:$0xff] }
 0x2c2   : > { %2201 = vst.msk [vmem:[#allocation4 + $0x70] sm:$0xf] %vm2172_vm9, %v2133_v59  ;;  %v2487_v59 = vpack.c.bf16 %v2455_v40, %v2455_v40 }
 0x2c5   : > { %2534 = vrot.lane.b32.xlu2 %v2466_v48, %s7671_s20  ;;  %v2488_v48 = vpack.c.bf16 %v2456_v24, %v2456_v24 }
 0x2c6   : > { %2536 = vrot.lane.b32.xlu0 %v2467_v49, %s7671_s20  ;;  %v2492_v49 = vpack.c.bf16 %v2460_v46, %v2460_v46  ;;  %v2674_v46 = vld [vmem:[#allocation3 + $0xf9] sm:$0xff] }
 0x2c7   : > { %2544 = vrot.lane.b32.xlu1 %v2471_v50, %s7671_s20  ;;  %v2308_v52 = vpop.permute.xlu2 %2307  ;;  %v2458_v50 = vld [vmem:[#allocation2 + $0x169] sm:$0xff] }
 0x2c8   : > { %2401 = vst.msk [vmem:[#allocation4 + $0xc] sm:$0xf] %vm2397_vm10, %v2308_v52  ;;  %v2131_v55 = vpop.permute.xlu0 %2130  ;;  %v2459_v52 = vld [vmem:[#allocation2 + $0x171] sm:$0xff]  ;;  %v2490_v56 = vpack.c.bf16 %v2458_v50, %v2458_v50 }
 0x2c9   : > { %v2139_v57 = vpop.permute.xlu1 %2138  ;;  %2200 = vst.msk [vmem:[#allocation4 + $0x6c] sm:$0xf] %vm2172_vm9, %v2131_v55 }
 0x2ca   : > { %2204 = vst.msk [vmem:[#allocation4 + $0x7c] sm:$0xf] %vm2172_vm9, %v2139_v57  ;;  %v2656_v57 = vld [vmem:[#allocation3 + $0x21] sm:$0xff] }
 0x2cd   : > { %2540 = vrot.lane.b32.xlu2 %v2469_v44, %s7671_s20  ;;  %v2491_v44 = vpack.c.bf16 %v2459_v52, %v2459_v52 }
 0x2ce   : > { %2542 = vrot.lane.b32.xlu0 %v2470_v58, %s7671_s20  ;;  %v2688_v58 = vpack.c.bf16 %v2656_v57, %v2656_v57 }
 0x2cf   : > { %2550 = vrot.lane.b32.xlu1 %v2474_v60, %s7671_s20  ;;  %v2314_v2 = vpop.permute.xlu2 %2313  ;;  %v2461_v60 = vld [vmem:[#allocation2 + $0x189] sm:$0xff] }
 0x2d0   : > { %2404 = vst.msk [vmem:[#allocation4 + $0x18] sm:$0xf] %vm2397_vm10, %v2314_v2  ;;  %v2137_v62 = vpop.permute.xlu0 %2136 }
 0x2d1   : > { %v2306_v42 = vpop.permute.xlu1 %2305  ;;  %2203 = vst.msk [vmem:[#allocation4 + $0x78] sm:$0xf] %vm2172_vm9, %v2137_v62  ;;  %v2493_v62 = vpack.c.bf16 %v2461_v60, %v2461_v60 }
 0x2d2   : > { %2400 = vst.msk [vmem:[#allocation4 + $0x8] sm:$0xf] %vm2397_vm10, %v2306_v42  ;;  %v2659_v42 = vld [vmem:[#allocation3 + $0x49] sm:$0xff] }
 0x2d5   : > { %2546 = vrot.lane.b32.xlu2 %v2472_v1, %s7671_s20  ;;  %v2687_v1 = vpack.c.bf16 %v2655_v0, %v2655_v0 }
 0x2d6   : > { %2548 = vrot.lane.b32.xlu0 %v2473_v4, %s7671_s20  ;;  %v2691_v4 = vpack.c.bf16 %v2659_v42, %v2659_v42 }
 0x2d7   : > { %2556 = vrot.lane.b32.xlu1 %v2477_v5, %s7671_s20  ;;  %v2320_v6 = vpop.permute.xlu2 %2319 }
 0x2d8   : > { %2407 = vst.msk [vmem:[#allocation4 + $0x24] sm:$0xf] %vm2397_vm10, %v2320_v6  ;;  %v2304_v8 = vpop.permute.xlu0 %2303  ;;  %v2657_v6 = vld [vmem:[#allocation3 + $0x31] sm:$0xff] }
 0x2d9   : > { %v2312_v10 = vpop.permute.xlu1 %2311  ;;  %2399 = vst.msk [vmem:[#allocation4 + $0x4] sm:$0xf] %vm2397_vm10, %v2304_v8  ;;  %v2658_v8 = vld [vmem:[#allocation3 + $0x39] sm:$0xff] }
 0x2da   : > { %2403 = vst.msk [vmem:[#allocation4 + $0x14] sm:$0xf] %vm2397_vm10, %v2312_v10  ;;  %v2689_v10 = vpack.c.bf16 %v2657_v6, %v2657_v6 }
 0x2dd   : > { %2552 = vrot.lane.b32.xlu2 %v2475_v38, %s7671_s20  ;;  %v2690_v38 = vpack.c.bf16 %v2658_v8, %v2658_v8  ;;  %v2683_v8 = vld [vmem:[#allocation3 + $0x169] sm:$0xff] }
 0x2de   : > { %2554 = vrot.lane.b32.xlu0 %v2476_v11, %s7671_s20  ;;  %v2694_v11 = vpack.c.bf16 %v2662_v63, %v2662_v63 }
 0x2df   : > { %2562 = vrot.lane.b32.xlu1 %v2480_v12, %s7671_s20  ;;  %v2326_v16 = vpop.permute.xlu2 %2325 }
 0x2e0   : > { %2410 = vst.msk [vmem:[#allocation4 + $0x30] sm:$0xf] %vm2397_vm10, %v2326_v16  ;;  %v2310_v3 = vpop.permute.xlu0 %2309  ;;  %v2660_v16 = vld [vmem:[#allocation3 + $0x51] sm:$0xff] }
 0x2e1   : > { %v2318_v19 = vpop.permute.xlu1 %2317  ;;  %2402 = vst.msk [vmem:[#allocation4 + $0x10] sm:$0xf] %vm2397_vm10, %v2310_v3  ;;  %v2661_v3 = vld [vmem:[#allocation3 + $0x61] sm:$0xff] }
 0x2e2   : > { %2406 = vst.msk [vmem:[#allocation4 + $0x20] sm:$0xf] %vm2397_vm10, %v2318_v19  ;;  %v2692_v19 = vpack.c.bf16 %v2660_v16, %v2660_v16 }
 0x2e5   : > { %2558 = vrot.lane.b32.xlu2 %v2478_v20, %s7671_s20  ;;  %v2693_v20 = vpack.c.bf16 %v2661_v3, %v2661_v3  ;;  %v2686_v3 = vld [vmem:[#allocation3 + $0x189] sm:$0xff] }
 0x2e6   : > { %2560 = vrot.lane.b32.xlu0 %v2479_v21, %s7671_s20  ;;  %v2697_v21 = vpack.c.bf16 %v2665_v18, %v2665_v18 }
 0x2e7   : > { %2568 = vrot.lane.b32.xlu1 %v2483_v22, %s7671_s20  ;;  %v2332_v25 = vpop.permute.xlu2 %2331 }
 0x2e8   : > { %2413 = vst.msk [vmem:[#allocation4 + $0x3c] sm:$0xf] %vm2397_vm10, %v2332_v25  ;;  %v2316_v26 = vpop.permute.xlu0 %2315  ;;  %v2663_v25 = vld [vmem:[#allocation3 + $0x79] sm:$0xff] }
 0x2e9   : > { %v2324_v28 = vpop.permute.xlu1 %2323  ;;  %2405 = vst.msk [vmem:[#allocation4 + $0x1c] sm:$0xf] %vm2397_vm10, %v2316_v26  ;;  %v2664_v26 = vld [vmem:[#allocation3 + $0x81] sm:$0xff] }
 0x2ea   : > { %2409 = vst.msk [vmem:[#allocation4 + $0x2c] sm:$0xf] %vm2397_vm10, %v2324_v28  ;;  %v2695_v28 = vpack.c.bf16 %v2663_v25, %v2663_v25  ;;  %v2882_v25 = vld [vmem:[#allocation2 + $0x32] sm:$0xff] }
 0x2ed   : > { %2564 = vrot.lane.b32.xlu2 %v2481_v23, %s7671_s20  ;;  %v2696_v23 = vpack.c.bf16 %v2664_v26, %v2664_v26  ;;  %v2685_v26 = vld [vmem:[#allocation3 + $0x181] sm:$0xff] }
 0x2ee   : > { %2566 = vrot.lane.b32.xlu0 %v2482_v29, %s7671_s20  ;;  %v2700_v29 = vpack.c.bf16 %v2668_v27, %v2668_v27 }
 0x2ef   : > { %2574 = vrot.lane.b32.xlu1 %v2486_v32, %s7671_s20  ;;  %v2338_v31 = vpop.permute.xlu2 %2337 }
 0x2f0   : > { %2416 = vst.msk [vmem:[#allocation4 + $0x48] sm:$0xf] %vm2397_vm10, %v2338_v31  ;;  %v2322_v33 = vpop.permute.xlu0 %2321  ;;  %v2666_v31 = vld [vmem:[#allocation3 + $0x99] sm:$0xff] }
 0x2f1   : > { %v2330_v35 = vpop.permute.xlu1 %2329  ;;  %2408 = vst.msk [vmem:[#allocation4 + $0x28] sm:$0xf] %vm2397_vm10, %v2322_v33  ;;  %v2667_v33 = vld [vmem:[#allocation3 + $0xa9] sm:$0xff] }
 0x2f2   : > { %2412 = vst.msk [vmem:[#allocation4 + $0x38] sm:$0xf] %vm2397_vm10, %v2330_v35  ;;  %v2698_v35 = vpack.c.bf16 %v2666_v31, %v2666_v31 }
 0x2f5   : > { %2570 = vrot.lane.b32.xlu2 %v2484_v36, %s7671_s20  ;;  %v2699_v36 = vpack.c.bf16 %v2667_v33, %v2667_v33 }
 0x2f6   : > { %2572 = vrot.lane.b32.xlu0 %v2485_v37, %s7671_s20  ;;  %v2703_v37 = vpack.c.bf16 %v2671_v34, %v2671_v34 }
 0x2f7   : > { %2580 = vrot.lane.b32.xlu1 %v2489_v39, %s7671_s20  ;;  %v2344_v43 = vpop.permute.xlu2 %2343 }
 0x2f8   : > { %2419 = vst.msk [vmem:[#allocation4 + $0x54] sm:$0xf] %vm2397_vm10, %v2344_v43  ;;  %v2328_v45 = vpop.permute.xlu0 %2327  ;;  %v2669_v43 = vld [vmem:[#allocation3 + $0xc1] sm:$0xff] }
 0x2f9   : > { %v2336_v47 = vpop.permute.xlu1 %2335  ;;  %2411 = vst.msk [vmem:[#allocation4 + $0x34] sm:$0xf] %vm2397_vm10, %v2328_v45  ;;  %v2670_v45 = vld [vmem:[#allocation3 + $0xc9] sm:$0xff] }
 0x2fa   : > { %2415 = vst.msk [vmem:[#allocation4 + $0x44] sm:$0xf] %vm2397_vm10, %v2336_v47  ;;  %v2701_v47 = vpack.c.bf16 %v2669_v43, %v2669_v43 }
 0x2fd   : > { %2576 = vrot.lane.b32.xlu2 %v2487_v59, %s7671_s20  ;;  %v2702_v59 = vpack.c.bf16 %v2670_v45, %v2670_v45 }
 0x2fe   : > { %2578 = vrot.lane.b32.xlu0 %v2488_v48, %s7671_s20  ;;  %v2706_v48 = vpack.c.bf16 %v2674_v46, %v2674_v46 }
 0x2ff   : > { %2586 = vrot.lane.b32.xlu1 %v2492_v49, %s7671_s20  ;;  %v2350_v51 = vpop.permute.xlu2 %2349 }
 0x300   : > { %2422 = vst.msk [vmem:[#allocation4 + $0x60] sm:$0xf] %vm2397_vm10, %v2350_v51  ;;  %v2334_v53 = vpop.permute.xlu0 %2333  ;;  %v2672_v51 = vld [vmem:[#allocation3 + $0xe1] sm:$0xff] }
 0x301   : > { %v2342_v55 = vpop.permute.xlu1 %2341  ;;  %2414 = vst.msk [vmem:[#allocation4 + $0x40] sm:$0xf] %vm2397_vm10, %v2334_v53  ;;  %v2673_v53 = vld [vmem:[#allocation3 + $0xf1] sm:$0xff] }
 0x302   : > { %2418 = vst.msk [vmem:[#allocation4 + $0x50] sm:$0xf] %vm2397_vm10, %v2342_v55  ;;  %v2677_v55 = vld [vmem:[#allocation3 + $0x121] sm:$0xff]  ;;  %v2705_v57 = vpack.c.bf16 %v2673_v53, %v2673_v53 }
 0x305   : > { %2582 = vrot.lane.b32.xlu2 %v2490_v56, %s7671_s20  ;;  %v2704_v56 = vpack.c.bf16 %v2672_v51, %v2672_v51 }
 0x306   : > { %2584 = vrot.lane.b32.xlu0 %v2491_v44, %s7671_s20  ;;  %v2709_v44 = vpack.c.bf16 %v2677_v55, %v2677_v55 }
 0x307   : > { %2753 = vrot.lane.b32.xlu1 %v2688_v58, %s7672_s21  ;;  %v2356_v61 = vpop.permute.xlu2 %2355 }
 0x308   : > { %2425 = vst.msk [vmem:[#allocation4 + $0x6c] sm:$0xf] %vm2397_vm10, %v2356_v61  ;;  %v2340_v2 = vpop.permute.xlu0 %2339  ;;  %v2675_v61 = vld [vmem:[#allocation3 + $0x109] sm:$0xff] }
 0x309   : > { %v2348_v15 = vpop.permute.xlu1 %2347  ;;  %2417 = vst.msk [vmem:[#allocation4 + $0x4c] sm:$0xf] %vm2397_vm10, %v2340_v2  ;;  %v2707_v0 = vpack.c.bf16 %v2675_v61, %v2675_v61 }
 0x30a   : > { %2421 = vst.msk [vmem:[#allocation4 + $0x5c] sm:$0xf] %vm2397_vm10, %v2348_v15  ;;  %v2676_v15 = vld [vmem:[#allocation3 + $0x111] sm:$0xff] }
 0x30b   : > { %v2708_v42 = vpack.c.bf16 %v2676_v15, %v2676_v15 }
 0x30d   : > { %2588 = vrot.lane.b32.xlu2 %v2493_v62, %s7671_s20  ;;  %v2680_v62 = vld [vmem:[#allocation3 + $0x141] sm:$0xff] }
 0x30e   : > { %2751 = vrot.lane.b32.xlu0 %v2687_v1, %s7672_s21  ;;  %v2712_v1 = vpack.c.bf16 %v2680_v62, %v2680_v62 }
 0x30f   : > { %2759 = vrot.lane.b32.xlu1 %v2691_v4, %s7672_s21  ;;  %v2362_v5 = vpop.permute.xlu2 %2361 }
 0x310   : > { %2428 = vst.msk [vmem:[#allocation4 + $0x78] sm:$0xf] %vm2397_vm10, %v2362_v5  ;;  %v2346_v54 = vpop.permute.xlu0 %2345 }
 0x311   : > { %v2354_v7 = vpop.permute.xlu1 %2353  ;;  %2420 = vst.msk [vmem:[#allocation4 + $0x58] sm:$0xf] %vm2397_vm10, %v2346_v54  ;;  %v2678_v54 = vld [vmem:[#allocation3 + $0x129] sm:$0xff] }
 0x312   : > { %2424 = vst.msk [vmem:[#allocation4 + $0x68] sm:$0xf] %vm2397_vm10, %v2354_v7  ;;  %v2679_v7 = vld [vmem:[#allocation3 + $0x139] sm:$0xff]  ;;  %v2710_v63 = vpack.c.bf16 %v2678_v54, %v2678_v54 }
 0x315   : > { %2755 = vrot.lane.b32.xlu2 %v2689_v10, %s7672_s21  ;;  %v2711_v10 = vpack.c.bf16 %v2679_v7, %v2679_v7 }
 0x316   : > { %2757 = vrot.lane.b32.xlu0 %v2690_v38, %s7672_s21  ;;  %v2715_v38 = vpack.c.bf16 %v2683_v8, %v2683_v8 }
 0x317   : > { %2765 = vrot.lane.b32.xlu1 %v2694_v11, %s7672_s21  ;;  %v2529_v12 = vpop.permute.xlu2 %2528 }
 0x318   : > { %2624 = vst.msk [vmem:[#allocation4 + $0x4] sm:$0xf] %vm2622_vm11, %v2529_v12  ;;  %v2352_v13 = vpop.permute.xlu0 %2351 }
 0x319   : > { %v2360_v17 = vpop.permute.xlu1 %2359  ;;  %2423 = vst.msk [vmem:[#allocation4 + $0x64] sm:$0xf] %vm2397_vm10, %v2352_v13  ;;  %v2681_v13 = vld [vmem:[#allocation3 + $0x151] sm:$0xff] }
 0x31a   : > { %2427 = vst.msk [vmem:[#allocation4 + $0x74] sm:$0xf] %vm2397_vm10, %v2360_v17  ;;  %v2682_v17 = vld [vmem:[#allocation3 + $0x159] sm:$0xff]  ;;  %v2713_v18 = vpack.c.bf16 %v2681_v13, %v2681_v13 }
 0x31d   : > { %2761 = vrot.lane.b32.xlu2 %v2692_v19, %s7672_s21  ;;  %v2714_v19 = vpack.c.bf16 %v2682_v17, %v2682_v17 }
 0x31e   : > { %2763 = vrot.lane.b32.xlu0 %v2693_v20, %s7672_s21  ;;  %v2718_v20 = vpack.c.bf16 %v2686_v3, %v2686_v3 }
 0x31f   : > { %2771 = vrot.lane.b32.xlu1 %v2697_v21, %s7672_s21  ;;  %v2535_v22 = vpop.permute.xlu2 %2534 }
 0x320   : > { %2627 = vst.msk [vmem:[#allocation4 + $0x10] sm:$0xf] %vm2622_vm11, %v2535_v22  ;;  %v2358_v9 = vpop.permute.xlu0 %2357 }
 0x321   : > { %v2527_v14 = vpop.permute.xlu1 %2526  ;;  %2426 = vst.msk [vmem:[#allocation4 + $0x70] sm:$0xf] %vm2397_vm10, %v2358_v9  ;;  %v2684_v9 = vld [vmem:[#allocation3 + $0x171] sm:$0xff] }
 0x322   : > { %2623 = vst.msk [vmem:[#allocation4] sm:$0xf] %vm2622_vm11, %v2527_v14  ;;  %v2716_v27 = vpack.c.bf16 %v2684_v9, %v2684_v9 }
 0x325   : > { %2767 = vrot.lane.b32.xlu2 %v2695_v28, %s7672_s21  ;;  %v2914_v28 = vpack.c.bf16 %v2882_v25, %v2882_v25  ;;  %v2903_v25 = vld [vmem:[#allocation2 + $0x12a] sm:$0xff] }
 0x326   : > { %2769 = vrot.lane.b32.xlu0 %v2696_v23, %s7672_s21  ;;  %v2717_v23 = vpack.c.bf16 %v2685_v26, %v2685_v26 }
 0x327   : > { %2777 = vrot.lane.b32.xlu1 %v2700_v29, %s7672_s21  ;;  %v2541_v32 = vpop.permute.xlu2 %2540  ;;  %v2880_v29 = vld [vmem:[#allocation2 + $0x1a] sm:$0xff] }
 0x328   : > { %2630 = vst.msk [vmem:[#allocation4 + $0x1c] sm:$0xf] %vm2622_vm11, %v2541_v32  ;;  %v2364_v30 = vpop.permute.xlu0 %2363  ;;  %v2912_v34 = vpack.c.bf16 %v2880_v29, %v2880_v29 }
 0x329   : > { %v2533_v41 = vpop.permute.xlu1 %2532  ;;  %2429 = vst.msk [vmem:[#allocation4 + $0x7c] sm:$0xf] %vm2397_vm10, %v2364_v30  ;;  %v2881_v30 = vld [vmem:[#allocation2 + $0x22] sm:$0xff] }
 0x32a   : > { %2626 = vst.msk [vmem:[#allocation4 + $0xc] sm:$0xf] %vm2622_vm11, %v2533_v41  ;;  %v2885_v41 = vld [vmem:[#allocation2 + $0x52] sm:$0xff] }
 0x32d   : > { %2773 = vrot.lane.b32.xlu2 %v2698_v35, %s7672_s21  ;;  %v2913_v35 = vpack.c.bf16 %v2881_v30, %v2881_v30 }
 0x32e   : > { %2775 = vrot.lane.b32.xlu0 %v2699_v36, %s7672_s21  ;;  %v2917_v36 = vpack.c.bf16 %v2885_v41, %v2885_v41 }
 0x32f   : > { %2783 = vrot.lane.b32.xlu1 %v2703_v37, %s7672_s21  ;;  %v2547_v39 = vpop.permute.xlu2 %2546  ;;  %v2883_v37 = vld [vmem:[#allocation2 + $0x3a] sm:$0xff] }
 0x330   : > { %2633 = vst.msk [vmem:[#allocation4 + $0x28] sm:$0xf] %vm2622_vm11, %v2547_v39  ;;  %v2531_v40 = vpop.permute.xlu0 %2530  ;;  %v2915_v46 = vpack.c.bf16 %v2883_v37, %v2883_v37 }
 0x331   : > { %v2539_v24 = vpop.permute.xlu1 %2538  ;;  %2625 = vst.msk [vmem:[#allocation4 + $0x8] sm:$0xf] %vm2622_vm11, %v2531_v40  ;;  %v2884_v40 = vld [vmem:[#allocation2 + $0x4a] sm:$0xff] }
 0x332   : > { %2629 = vst.msk [vmem:[#allocation4 + $0x18] sm:$0xf] %vm2622_vm11, %v2539_v24  ;;  %v2888_v24 = vld [vmem:[#allocation2 + $0x7a] sm:$0xff] }
 0x335   : > { %2779 = vrot.lane.b32.xlu2 %v2701_v47, %s7672_s21  ;;  %v2916_v47 = vpack.c.bf16 %v2884_v40, %v2884_v40 }
 0x336   : > { %2781 = vrot.lane.b32.xlu0 %v2702_v59, %s7672_s21  ;;  %v2920_v59 = vpack.c.bf16 %v2888_v24, %v2888_v24 }
 0x337   : > { %2789 = vrot.lane.b32.xlu1 %v2706_v48, %s7672_s21  ;;  %v2553_v49 = vpop.permute.xlu2 %2552  ;;  %v2886_v48 = vld [vmem:[#allocation2 + $0x62] sm:$0xff] }
 0x338   : > { %2636 = vst.msk [vmem:[#allocation4 + $0x34] sm:$0xf] %vm2622_vm11, %v2553_v49  ;;  %v2537_v50 = vpop.permute.xlu0 %2536  ;;  %v2918_v55 = vpack.c.bf16 %v2886_v48, %v2886_v48 }
 0x339   : > { %v2545_v52 = vpop.permute.xlu1 %2544  ;;  %2628 = vst.msk [vmem:[#allocation4 + $0x14] sm:$0xf] %vm2622_vm11, %v2537_v50  ;;  %v2887_v50 = vld [vmem:[#allocation2 + $0x6a] sm:$0xff] }
 0x33a   : > { %2632 = vst.msk [vmem:[#allocation4 + $0x24] sm:$0xf] %vm2622_vm11, %v2545_v52  ;;  %v2891_v52 = vld [vmem:[#allocation2 + $0x9a] sm:$0xff] }
 0x33d   : > { %2785 = vrot.lane.b32.xlu2 %v2704_v56, %s7672_s21  ;;  %v2919_v56 = vpack.c.bf16 %v2887_v50, %v2887_v50 }
 0x33e   : > { %2787 = vrot.lane.b32.xlu0 %v2705_v57, %s7672_s21  ;;  %v2923_v57 = vpack.c.bf16 %v2891_v52, %v2891_v52 }
 0x33f   : > { %2795 = vrot.lane.b32.xlu1 %v2709_v44, %s7672_s21  ;;  %v2559_v58 = vpop.permute.xlu2 %2558  ;;  %v2889_v44 = vld [vmem:[#allocation2 + $0x82] sm:$0xff] }
 0x340   : > { %2639 = vst.msk [vmem:[#allocation4 + $0x40] sm:$0xf] %vm2622_vm11, %v2559_v58  ;;  %v2543_v60 = vpop.permute.xlu0 %2542  ;;  %v2921_v62 = vpack.c.bf16 %v2889_v44, %v2889_v44 }
 0x341   : > { %v2551_v2 = vpop.permute.xlu1 %2550  ;;  %2631 = vst.msk [vmem:[#allocation4 + $0x20] sm:$0xf] %vm2622_vm11, %v2543_v60  ;;  %v2890_v60 = vld [vmem:[#allocation2 + $0x92] sm:$0xff] }
 0x342   : > { %2635 = vst.msk [vmem:[#allocation4 + $0x30] sm:$0xf] %vm2622_vm11, %v2551_v2  ;;  %v2894_v2 = vld [vmem:[#allocation2 + $0xc2] sm:$0xff] }
 0x345   : > { %2791 = vrot.lane.b32.xlu2 %v2707_v0, %s7672_s21  ;;  %v2922_v0 = vpack.c.bf16 %v2890_v60, %v2890_v60 }
 0x346   : > { %2793 = vrot.lane.b32.xlu0 %v2708_v42, %s7672_s21  ;;  %v2926_v42 = vpack.c.bf16 %v2894_v2, %v2894_v2 }
 0x347   : > { %2801 = vrot.lane.b32.xlu1 %v2712_v1, %s7672_s21  ;;  %v2565_v4 = vpop.permute.xlu2 %2564  ;;  %v2892_v1 = vld [vmem:[#allocation2 + $0xaa] sm:$0xff] }
 0x348   : > { %2642 = vst.msk [vmem:[#allocation4 + $0x4c] sm:$0xf] %vm2622_vm11, %v2565_v4  ;;  %v2549_v5 = vpop.permute.xlu0 %2548  ;;  %v2924_v8 = vpack.c.bf16 %v2892_v1, %v2892_v1 }
 0x349   : > { %v2557_v6 = vpop.permute.xlu1 %2556  ;;  %2634 = vst.msk [vmem:[#allocation4 + $0x2c] sm:$0xf] %vm2622_vm11, %v2549_v5  ;;  %v2893_v5 = vld [vmem:[#allocation2 + $0xb2] sm:$0xff] }
 0x34a   : > { %2638 = vst.msk [vmem:[#allocation4 + $0x3c] sm:$0xf] %vm2622_vm11, %v2557_v6  ;;  %v2897_v6 = vld [vmem:[#allocation2 + $0xe2] sm:$0xff] }
 0x34d   : > { %2797 = vrot.lane.b32.xlu2 %v2710_v63, %s7672_s21  ;;  %v2925_v63 = vpack.c.bf16 %v2893_v5, %v2893_v5 }
 0x34e   : > { %2799 = vrot.lane.b32.xlu0 %v2711_v10, %s7672_s21  ;;  %v2929_v10 = vpack.c.bf16 %v2897_v6, %v2897_v6  ;;  %v3111_v6 = vld [vmem:[#allocation3 + $0x62] sm:$0xff] }
 0x34f   : > { %2807 = vrot.lane.b32.xlu1 %v2715_v38, %s7672_s21  ;;  %v2571_v11 = vpop.permute.xlu2 %2570  ;;  %v2895_v38 = vld [vmem:[#allocation2 + $0xca] sm:$0xff] }
 0x350   : > { %2645 = vst.msk [vmem:[#allocation4 + $0x58] sm:$0xf] %vm2622_vm11, %v2571_v11  ;;  %v2555_v12 = vpop.permute.xlu0 %2554  ;;  %v2927_v3 = vpack.c.bf16 %v2895_v38, %v2895_v38 }
 0x351   : > { %v2563_v16 = vpop.permute.xlu1 %2562  ;;  %2637 = vst.msk [vmem:[#allocation4 + $0x38] sm:$0xf] %vm2622_vm11, %v2555_v12  ;;  %v2896_v12 = vld [vmem:[#allocation2 + $0xda] sm:$0xff] }
 0x352   : > { %2641 = vst.msk [vmem:[#allocation4 + $0x48] sm:$0xf] %vm2622_vm11, %v2563_v16  ;;  %v2900_v16 = vld [vmem:[#allocation2 + $0x10a] sm:$0xff] }
 0x355   : > { %2803 = vrot.lane.b32.xlu2 %v2713_v18, %s7672_s21  ;;  %v2928_v18 = vpack.c.bf16 %v2896_v12, %v2896_v12 }
 0x356   : > { %2805 = vrot.lane.b32.xlu0 %v2714_v19, %s7672_s21  ;;  %v2932_v19 = vpack.c.bf16 %v2900_v16, %v2900_v16  ;;  %v3114_v16 = vld [vmem:[#allocation3 + $0x82] sm:$0xff] }
 0x357   : > { %2813 = vrot.lane.b32.xlu1 %v2718_v20, %s7672_s21  ;;  %v2577_v21 = vpop.permute.xlu2 %2576  ;;  %v2898_v20 = vld [vmem:[#allocation2 + $0xf2] sm:$0xff] }
 0x358   : > { %2648 = vst.msk [vmem:[#allocation4 + $0x64] sm:$0xf] %vm2622_vm11, %v2577_v21  ;;  %v2561_v22 = vpop.permute.xlu0 %2560  ;;  %v2930_v26 = vpack.c.bf16 %v2898_v20, %v2898_v20 }
 0x359   : > { %v2569_v14 = vpop.permute.xlu1 %2568  ;;  %2640 = vst.msk [vmem:[#allocation4 + $0x44] sm:$0xf] %vm2622_vm11, %v2561_v22  ;;  %v2899_v22 = vld [vmem:[#allocation2 + $0xfa] sm:$0xff] }
 0x35a   : > { %2644 = vst.msk [vmem:[#allocation4 + $0x54] sm:$0xf] %vm2622_vm11, %v2569_v14 }
 0x35d   : > { %2809 = vrot.lane.b32.xlu2 %v2716_v27, %s7672_s21  ;;  %v2931_v27 = vpack.c.bf16 %v2899_v22, %v2899_v22 }
 0x35e   : > { %2811 = vrot.lane.b32.xlu0 %v2717_v23, %s7672_s21  ;;  %v2901_v23 = vld [vmem:[#allocation2 + $0x112] sm:$0xff] }
 0x35f   : > { %2980 = vrot.lane.b32.xlu1 %v2914_v28, %s7673_s22  ;;  %v2583_v32 = vpop.permute.xlu2 %2582  ;;  %v2935_v28 = vpack.c.bf16 %v2903_v25, %v2903_v25  ;;  %v3117_v25 = vld [vmem:[#allocation3 + $0xaa] sm:$0xff] }
 0x360   : > { %2651 = vst.msk [vmem:[#allocation4 + $0x70] sm:$0xf] %vm2622_vm11, %v2583_v32  ;;  %v2567_v31 = vpop.permute.xlu0 %2566  ;;  %v2902_v32 = vld [vmem:[#allocation2 + $0x122] sm:$0xff] }
 0x361   : > { %v2575_v33 = vpop.permute.xlu1 %2574  ;;  %2643 = vst.msk [vmem:[#allocation4 + $0x50] sm:$0xf] %vm2622_vm11, %v2567_v31  ;;  %v2906_v31 = vld [vmem:[#allocation2 + $0x152] sm:$0xff] }
 0x362   : > { %2647 = vst.msk [vmem:[#allocation4 + $0x60] sm:$0xf] %vm2622_vm11, %v2575_v33  ;;  %v2933_v33 = vpack.c.bf16 %v2901_v23, %v2901_v23 }
 0x365   : > { %2976 = vrot.lane.b32.xlu2 %v2912_v34, %s7673_s22  ;;  %v2934_v34 = vpack.c.bf16 %v2902_v32, %v2902_v32 }
 0x366   : > { %2978 = vrot.lane.b32.xlu0 %v2913_v35, %s7673_s22  ;;  %v2938_v35 = vpack.c.bf16 %v2906_v31, %v2906_v31  ;;  %v3120_v31 = vld [vmem:[#allocation3 + $0xca] sm:$0xff] }
 0x367   : > { %2986 = vrot.lane.b32.xlu1 %v2917_v36, %s7673_s22  ;;  %v2589_v39 = vpop.permute.xlu2 %2588  ;;  %v2904_v36 = vld [vmem:[#allocation2 + $0x13a] sm:$0xff] }
 0x368   : > { %2654 = vst.msk [vmem:[#allocation4 + $0x7c] sm:$0xf] %vm2622_vm11, %v2589_v39  ;;  %v2573_v43 = vpop.permute.xlu0 %2572  ;;  %v2905_v39 = vld [vmem:[#allocation2 + $0x142] sm:$0xff] }
 0x369   : > { %v2581_v45 = vpop.permute.xlu1 %2580  ;;  %2646 = vst.msk [vmem:[#allocation4 + $0x5c] sm:$0xf] %vm2622_vm11, %v2573_v43  ;;  %v2909_v43 = vld [vmem:[#allocation2 + $0x172] sm:$0xff] }
 0x36a   : > { %2650 = vst.msk [vmem:[#allocation4 + $0x6c] sm:$0xf] %vm2622_vm11, %v2581_v45  ;;  %v2936_v45 = vpack.c.bf16 %v2904_v36, %v2904_v36 }
 0x36d   : > { %2982 = vrot.lane.b32.xlu2 %v2915_v46, %s7673_s22  ;;  %v2937_v46 = vpack.c.bf16 %v2905_v39, %v2905_v39 }
 0x36e   : > { %2984 = vrot.lane.b32.xlu0 %v2916_v47, %s7673_s22  ;;  %v2941_v47 = vpack.c.bf16 %v2909_v43, %v2909_v43  ;;  %v3123_v43 = vld [vmem:[#allocation3 + $0xf2] sm:$0xff] }
 0x36f   : > { %2992 = vrot.lane.b32.xlu1 %v2920_v59, %s7673_s22  ;;  %v2756_v49 = vpop.permute.xlu2 %2755  ;;  %v2907_v59 = vld [vmem:[#allocation2 + $0x15a] sm:$0xff] }
 0x370   : > { %2850 = vst.msk [vmem:[#allocation4 + $0x8] sm:$0xf] %vm2847_vm12, %v2756_v49  ;;  %v2579_v51 = vpop.permute.xlu0 %2578  ;;  %v2908_v49 = vld [vmem:[#allocation2 + $0x16a] sm:$0xff]  ;;  %v2939_v52 = vpack.c.bf16 %v2907_v59, %v2907_v59 }
 0x371   : > { %v2587_v53 = vpop.permute.xlu1 %2586  ;;  %2649 = vst.msk [vmem:[#allocation4 + $0x68] sm:$0xf] %vm2622_vm11, %v2579_v51 }
 0x372   : > { %2653 = vst.msk [vmem:[#allocation4 + $0x78] sm:$0xf] %vm2622_vm11, %v2587_v53  ;;  %v3105_v53 = vld [vmem:[#allocation3 + $0x1a] sm:$0xff] }
 0x375   : > { %2988 = vrot.lane.b32.xlu2 %v2918_v55, %s7673_s22  ;;  %v2940_v55 = vpack.c.bf16 %v2908_v49, %v2908_v49 }
 0x376   : > { %2990 = vrot.lane.b32.xlu0 %v2919_v56, %s7673_s22  ;;  %v3137_v56 = vpack.c.bf16 %v3105_v53, %v3105_v53 }
 0x377   : > { %2998 = vrot.lane.b32.xlu1 %v2923_v57, %s7673_s22  ;;  %v2762_v58 = vpop.permute.xlu2 %2761  ;;  %v2910_v57 = vld [vmem:[#allocation2 + $0x182] sm:$0xff] }
 0x378   : > { %2853 = vst.msk [vmem:[#allocation4 + $0x14] sm:$0xf] %vm2847_vm12, %v2762_v58  ;;  %v2585_v61 = vpop.permute.xlu0 %2584  ;;  %v2911_v58 = vld [vmem:[#allocation2 + $0x18a] sm:$0xff]  ;;  %v2942_v2 = vpack.c.bf16 %v2910_v57, %v2910_v57 }
 0x379   : > { %v2754_v15 = vpop.permute.xlu1 %2753  ;;  %2652 = vst.msk [vmem:[#allocation4 + $0x74] sm:$0xf] %vm2622_vm11, %v2585_v61 }
 0x37a   : > { %2849 = vst.msk [vmem:[#allocation4 + $0x4] sm:$0xf] %vm2847_vm12, %v2754_v15  ;;  %v3108_v15 = vld [vmem:[#allocation3 + $0x3a] sm:$0xff] }
 0x37d   : > { %2994 = vrot.lane.b32.xlu2 %v2921_v62, %s7673_s22  ;;  %v2943_v62 = vpack.c.bf16 %v2911_v58, %v2911_v58 }
 0x37e   : > { %2996 = vrot.lane.b32.xlu0 %v2922_v0, %s7673_s22  ;;  %v3140_v0 = vpack.c.bf16 %v3108_v15, %v3108_v15 }
 0x37f   : > { %3004 = vrot.lane.b32.xlu1 %v2926_v42, %s7673_s22  ;;  %v2768_v4 = vpop.permute.xlu2 %2767 }
 0x380   : > { %2856 = vst.msk [vmem:[#allocation4 + $0x20] sm:$0xf] %vm2847_vm12, %v2768_v4  ;;  %v2752_v54 = vpop.permute.xlu0 %2751  ;;  %v3106_v4 = vld [vmem:[#allocation3 + $0x22] sm:$0xff] }
 0x381   : > { %v2760_v7 = vpop.permute.xlu1 %2759  ;;  %2848 = vst.msk [vmem:[#allocation4] sm:$0xf] %vm2847_vm12, %v2752_v54  ;;  %v3107_v54 = vld [vmem:[#allocation3 + $0x32] sm:$0xff] }
 0x382   : > { %2852 = vst.msk [vmem:[#allocation4 + $0x10] sm:$0xf] %vm2847_vm12, %v2760_v7  ;;  %v3138_v7 = vpack.c.bf16 %v3106_v4, %v3106_v4 }
 0x385   : > { %3000 = vrot.lane.b32.xlu2 %v2924_v8, %s7673_s22  ;;  %v3139_v8 = vpack.c.bf16 %v3107_v54, %v3107_v54  ;;  %v3132_v54 = vld [vmem:[#allocation3 + $0x15a] sm:$0xff] }
 0x386   : > { %3002 = vrot.lane.b32.xlu0 %v2925_v63, %s7673_s22  ;;  %v3143_v63 = vpack.c.bf16 %v3111_v6, %v3111_v6 }
 0x387   : > { %3010 = vrot.lane.b32.xlu1 %v2929_v10, %s7673_s22  ;;  %v2774_v11 = vpop.permute.xlu2 %2773 }
 0x388   : > { %2859 = vst.msk [vmem:[#allocation4 + $0x2c] sm:$0xf] %vm2847_vm12, %v2774_v11  ;;  %v2758_v13 = vpop.permute.xlu0 %2757  ;;  %v3109_v11 = vld [vmem:[#allocation3 + $0x4a] sm:$0xff] }
 0x389   : > { %v2766_v17 = vpop.permute.xlu1 %2765  ;;  %2851 = vst.msk [vmem:[#allocation4 + $0xc] sm:$0xf] %vm2847_vm12, %v2758_v13  ;;  %v3110_v13 = vld [vmem:[#allocation3 + $0x52] sm:$0xff] }
 0x38a   : > { %2855 = vst.msk [vmem:[#allocation4 + $0x1c] sm:$0xf] %vm2847_vm12, %v2766_v17  ;;  %v3141_v17 = vpack.c.bf16 %v3109_v11, %v3109_v11 }
 0x38d   : > { %3006 = vrot.lane.b32.xlu2 %v2927_v3, %s7673_s22  ;;  %v3142_v3 = vpack.c.bf16 %v3110_v13, %v3110_v13  ;;  %v3135_v13 = vld [vmem:[#allocation3 + $0x182] sm:$0xff] }
 0x38e   : > { %3008 = vrot.lane.b32.xlu0 %v2928_v18, %s7673_s22  ;;  %v3146_v18 = vpack.c.bf16 %v3114_v16, %v3114_v16 }
 0x38f   : > { %3016 = vrot.lane.b32.xlu1 %v2932_v19, %s7673_s22  ;;  %v2780_v21 = vpop.permute.xlu2 %2779 }
 0x390   : > { %2862 = vst.msk [vmem:[#allocation4 + $0x38] sm:$0xf] %vm2847_vm12, %v2780_v21  ;;  %v2764_v9 = vpop.permute.xlu0 %2763  ;;  %v3112_v21 = vld [vmem:[#allocation3 + $0x6a] sm:$0xff] }
 0x391   : > { %v2772_v14 = vpop.permute.xlu1 %2771  ;;  %2854 = vst.msk [vmem:[#allocation4 + $0x18] sm:$0xf] %vm2847_vm12, %v2764_v9  ;;  %v3113_v9 = vld [vmem:[#allocation3 + $0x7a] sm:$0xff] }
 0x392   : > { %2858 = vst.msk [vmem:[#allocation4 + $0x28] sm:$0xf] %vm2847_vm12, %v2772_v14  ;;  %v3144_v14 = vpack.c.bf16 %v3112_v21, %v3112_v21  ;;  %v3332_v21 = vld [vmem:[#allocation2 + $0x38] sm:$0xff] }
 0x395   : > { %3012 = vrot.lane.b32.xlu2 %v2930_v26, %s7673_s22  ;;  %v3145_v26 = vpack.c.bf16 %v3113_v9, %v3113_v9  ;;  %v3134_v9 = vld [vmem:[#allocation3 + $0x172] sm:$0xff] }
 0x396   : > { %3014 = vrot.lane.b32.xlu0 %v2931_v27, %s7673_s22  ;;  %v3149_v27 = vpack.c.bf16 %v3117_v25, %v3117_v25 }
 0x397   : > { %3022 = vrot.lane.b32.xlu1 %v2935_v28, %s7673_s22  ;;  %v2786_v29 = vpop.permute.xlu2 %2785 }
 0x398   : > { %2865 = vst.msk [vmem:[#allocation4 + $0x44] sm:$0xf] %vm2847_vm12, %v2786_v29  ;;  %v2770_v30 = vpop.permute.xlu0 %2769  ;;  %v3115_v29 = vld [vmem:[#allocation3 + $0x92] sm:$0xff] }
 0x399   : > { %v2778_v41 = vpop.permute.xlu1 %2777  ;;  %2857 = vst.msk [vmem:[#allocation4 + $0x24] sm:$0xf] %vm2847_vm12, %v2770_v30  ;;  %v3116_v30 = vld [vmem:[#allocation3 + $0x9a] sm:$0xff] }
 0x39a   : > { %2861 = vst.msk [vmem:[#allocation4 + $0x34] sm:$0xf] %vm2847_vm12, %v2778_v41  ;;  %v3147_v41 = vpack.c.bf16 %v3115_v29, %v3115_v29  ;;  %v3136_v29 = vld [vmem:[#allocation3 + $0x18a] sm:$0xff] }
 0x39d   : > { %3018 = vrot.lane.b32.xlu2 %v2933_v33, %s7673_s22  ;;  %v3148_v33 = vpack.c.bf16 %v3116_v30, %v3116_v30 }
 0x39e   : > { %3020 = vrot.lane.b32.xlu0 %v2934_v34, %s7673_s22  ;;  %v3152_v34 = vpack.c.bf16 %v3120_v31, %v3120_v31 }
 0x39f   : > { %3028 = vrot.lane.b32.xlu1 %v2938_v35, %s7673_s22  ;;  %v2792_v37 = vpop.permute.xlu2 %2791 }
 0x3a0   : > { %2868 = vst.msk [vmem:[#allocation4 + $0x50] sm:$0xf] %vm2847_vm12, %v2792_v37  ;;  %v2776_v40 = vpop.permute.xlu0 %2775  ;;  %v3118_v37 = vld [vmem:[#allocation3 + $0xb2] sm:$0xff] }
 0x3a1   : > { %v2784_v24 = vpop.permute.xlu1 %2783  ;;  %2860 = vst.msk [vmem:[#allocation4 + $0x30] sm:$0xf] %vm2847_vm12, %v2776_v40  ;;  %v3119_v40 = vld [vmem:[#allocation3 + $0xc2] sm:$0xff] }
 0x3a2   : > { %2864 = vst.msk [vmem:[#allocation4 + $0x40] sm:$0xf] %vm2847_vm12, %v2784_v24  ;;  %v3150_v24 = vpack.c.bf16 %v3118_v37, %v3118_v37 }
 0x3a5   : > { %3024 = vrot.lane.b32.xlu2 %v2936_v45, %s7673_s22  ;;  %v3151_v45 = vpack.c.bf16 %v3119_v40, %v3119_v40 }
 0x3a6   : > { %3026 = vrot.lane.b32.xlu0 %v2937_v46, %s7673_s22  ;;  %v3155_v46 = vpack.c.bf16 %v3123_v43, %v3123_v43 }
 0x3a7   : > { %3034 = vrot.lane.b32.xlu1 %v2941_v47, %s7673_s22  ;;  %v2798_v48 = vpop.permute.xlu2 %2797 }
 0x3a8   : > { %2871 = vst.msk [vmem:[#allocation4 + $0x5c] sm:$0xf] %vm2847_vm12, %v2798_v48  ;;  %v2782_v50 = vpop.permute.xlu0 %2781  ;;  %v3121_v48 = vld [vmem:[#allocation3 + $0xda] sm:$0xff] }
 0x3a9   : > { %v2790_v51 = vpop.permute.xlu1 %2789  ;;  %2863 = vst.msk [vmem:[#allocation4 + $0x3c] sm:$0xf] %vm2847_vm12, %v2782_v50  ;;  %v3122_v50 = vld [vmem:[#allocation3 + $0xe2] sm:$0xff] }
 0x3aa   : > { %2867 = vst.msk [vmem:[#allocation4 + $0x4c] sm:$0xf] %vm2847_vm12, %v2790_v51  ;;  %v3126_v51 = vld [vmem:[#allocation3 + $0x112] sm:$0xff]  ;;  %v3154_v53 = vpack.c.bf16 %v3122_v50, %v3122_v50 }
 0x3ad   : > { %3030 = vrot.lane.b32.xlu2 %v2939_v52, %s7673_s22  ;;  %v3153_v52 = vpack.c.bf16 %v3121_v48, %v3121_v48 }
 0x3ae   : > { %3032 = vrot.lane.b32.xlu0 %v2940_v55, %s7673_s22  ;;  %v3158_v55 = vpack.c.bf16 %v3126_v51, %v3126_v51 }
 0x3af   : > { %3201 = vrot.lane.b32.xlu1 %v3137_v56, %s7674_s23  ;;  %v2804_v44 = vpop.permute.xlu2 %2803 }
 0x3b0   : > { %2874 = vst.msk [vmem:[#allocation4 + $0x68] sm:$0xf] %vm2847_vm12, %v2804_v44  ;;  %v2788_v60 = vpop.permute.xlu0 %2787  ;;  %v3124_v44 = vld [vmem:[#allocation3 + $0xfa] sm:$0xff] }
 0x3b1   : > { %v2796_v61 = vpop.permute.xlu1 %2795  ;;  %2866 = vst.msk [vmem:[#allocation4 + $0x48] sm:$0xf] %vm2847_vm12, %v2788_v60  ;;  %v3125_v60 = vld [vmem:[#allocation3 + $0x10a] sm:$0xff] }
 0x3b2   : > { %2870 = vst.msk [vmem:[#allocation4 + $0x58] sm:$0xf] %vm2847_vm12, %v2796_v61  ;;  %v3129_v61 = vld [vmem:[#allocation3 + $0x13a] sm:$0xff]  ;;  %v3157_v15 = vpack.c.bf16 %v3125_v60, %v3125_v60 }
 0x3b5   : > { %3036 = vrot.lane.b32.xlu2 %v2942_v2, %s7673_s22  ;;  %v3156_v2 = vpack.c.bf16 %v3124_v44, %v3124_v44 }
 0x3b6   : > { %3038 = vrot.lane.b32.xlu0 %v2943_v62, %s7673_s22  ;;  %v3161_v62 = vpack.c.bf16 %v3129_v61, %v3129_v61 }
 0x3b7   : > { %3207 = vrot.lane.b32.xlu1 %v3140_v0, %s7674_s23  ;;  %v2810_v42 = vpop.permute.xlu2 %2809 }
 0x3b8   : > { %2877 = vst.msk [vmem:[#allocation4 + $0x74] sm:$0xf] %vm2847_vm12, %v2810_v42  ;;  %v2794_v1 = vpop.permute.xlu0 %2793 }
 0x3b9   : > { %v2802_v5 = vpop.permute.xlu1 %2801  ;;  %2869 = vst.msk [vmem:[#allocation4 + $0x54] sm:$0xf] %vm2847_vm12, %v2794_v1  ;;  %v3127_v1 = vld [vmem:[#allocation3 + $0x122] sm:$0xff] }
 0x3ba   : > { %2873 = vst.msk [vmem:[#allocation4 + $0x64] sm:$0xf] %vm2847_vm12, %v2802_v5  ;;  %v3128_v5 = vld [vmem:[#allocation3 + $0x12a] sm:$0xff]  ;;  %v3159_v6 = vpack.c.bf16 %v3127_v1, %v3127_v1 }
 0x3bd   : > { %3203 = vrot.lane.b32.xlu2 %v3138_v7, %s7674_s23  ;;  %v3160_v7 = vpack.c.bf16 %v3128_v5, %v3128_v5 }
 0x3be   : > { %3205 = vrot.lane.b32.xlu0 %v3139_v8, %s7674_s23  ;;  %v3164_v8 = vpack.c.bf16 %v3132_v54, %v3132_v54 }
 0x3bf   : > { %3213 = vrot.lane.b32.xlu1 %v3143_v63, %s7674_s23  ;;  %v2977_v10 = vpop.permute.xlu2 %2976 }
 0x3c0   : > { %3073 = vst.msk [vmem:[#allocation4] sm:$0xf] %vm3072_vm13, %v2977_v10  ;;  %v2800_v38 = vpop.permute.xlu0 %2799 }
 0x3c1   : > { %v2808_v12 = vpop.permute.xlu1 %2807  ;;  %2872 = vst.msk [vmem:[#allocation4 + $0x60] sm:$0xf] %vm2847_vm12, %v2800_v38  ;;  %v3130_v38 = vld [vmem:[#allocation3 + $0x142] sm:$0xff] }
 0x3c2   : > { %2876 = vst.msk [vmem:[#allocation4 + $0x70] sm:$0xf] %vm2847_vm12, %v2808_v12  ;;  %v3131_v12 = vld [vmem:[#allocation3 + $0x152] sm:$0xff]  ;;  %v3162_v16 = vpack.c.bf16 %v3130_v38, %v3130_v38 }
 0x3c5   : > { %3209 = vrot.lane.b32.xlu2 %v3141_v17, %s7674_s23  ;;  %v3163_v17 = vpack.c.bf16 %v3131_v12, %v3131_v12 }
 0x3c6   : > { %3211 = vrot.lane.b32.xlu0 %v3142_v3, %s7674_s23  ;;  %v3167_v3 = vpack.c.bf16 %v3135_v13, %v3135_v13 }
 0x3c7   : > { %3219 = vrot.lane.b32.xlu1 %v3146_v18, %s7674_s23  ;;  %v2983_v19 = vpop.permute.xlu2 %2982 }
 0x3c8   : > { %3076 = vst.msk [vmem:[#allocation4 + $0xc] sm:$0xf] %vm3072_vm13, %v2983_v19  ;;  %v2806_v20 = vpop.permute.xlu0 %2805 }
 0x3c9   : > { %v2814_v22 = vpop.permute.xlu1 %2813  ;;  %2875 = vst.msk [vmem:[#allocation4 + $0x6c] sm:$0xf] %vm2847_vm12, %v2806_v20  ;;  %v3133_v20 = vld [vmem:[#allocation3 + $0x16a] sm:$0xff] }
 0x3ca   : > { %2879 = vst.msk [vmem:[#allocation4 + $0x7c] sm:$0xf] %vm2847_vm12, %v2814_v22  ;;  %v3165_v25 = vpack.c.bf16 %v3133_v20, %v3133_v20 }
 0x3cd   : > { %3215 = vrot.lane.b32.xlu2 %v3144_v14, %s7674_s23  ;;  %v3364_v14 = vpack.c.bf16 %v3332_v21, %v3332_v21  ;;  %v3353_v21 = vld [vmem:[#allocation2 + $0x138] sm:$0xff] }
 0x3ce   : > { %3217 = vrot.lane.b32.xlu0 %v3145_v26, %s7674_s23  ;;  %v3166_v26 = vpack.c.bf16 %v3134_v9, %v3134_v9 }
 0x3cf   : > { %3225 = vrot.lane.b32.xlu1 %v3149_v27, %s7674_s23  ;;  %v2989_v28 = vpop.permute.xlu2 %2988 }
 0x3d0   : > { %3079 = vst.msk [vmem:[#allocation4 + $0x18] sm:$0xf] %vm3072_vm13, %v2989_v28  ;;  %v2812_v23 = vpop.permute.xlu0 %2811  ;;  %v3331_v28 = vld [vmem:[#allocation2 + $0x30] sm:$0xff] }
 0x3d1   : > { %v2981_v32 = vpop.permute.xlu1 %2980  ;;  %2878 = vst.msk [vmem:[#allocation4 + $0x78] sm:$0xf] %vm2847_vm12, %v2812_v23  ;;  %v3363_v31 = vpack.c.bf16 %v3331_v28, %v3331_v28  ;;  %v3352_v28 = vld [vmem:[#allocation2 + $0x128] sm:$0xff]  ;;  %vm4199_vm12 = vcmask 519648  }
 0x3d2   : > { %3075 = vst.msk [vmem:[#allocation4 + $0x8] sm:$0xf] %vm3072_vm13, %v2981_v32  ;;  %v3335_v32 = vld [vmem:[#allocation2 + $0x60] sm:$0xff] }
 0x3d5   : > { %3221 = vrot.lane.b32.xlu2 %v3147_v41, %s7674_s23  ;;  %v3168_v41 = vpack.c.bf16 %v3136_v29, %v3136_v29  ;;  %v3356_v29 = vld [vmem:[#allocation2 + $0x158] sm:$0xff] }
 0x3d6   : > { %3223 = vrot.lane.b32.xlu0 %v3148_v33, %s7674_s23  ;;  %v3367_v33 = vpack.c.bf16 %v3335_v32, %v3335_v32 }
 0x3d7   : > { %3231 = vrot.lane.b32.xlu1 %v3152_v34, %s7674_s23  ;;  %v2995_v35 = vpop.permute.xlu2 %2994  ;;  %v3333_v34 = vld [vmem:[#allocation2 + $0x48] sm:$0xff] }
 0x3d8   : > { %3082 = vst.msk [vmem:[#allocation4 + $0x24] sm:$0xf] %vm3072_vm13, %v2995_v35  ;;  %v2979_v36 = vpop.permute.xlu0 %2978  ;;  %v3365_v43 = vpack.c.bf16 %v3333_v34, %v3333_v34 }
 0x3d9   : > { %v2987_v39 = vpop.permute.xlu1 %2986  ;;  %3074 = vst.msk [vmem:[#allocation4 + $0x4] sm:$0xf] %vm3072_vm13, %v2979_v36  ;;  %v3334_v36 = vld [vmem:[#allocation2 + $0x50] sm:$0xff] }
 0x3da   : > { %3078 = vst.msk [vmem:[#allocation4 + $0x14] sm:$0xf] %vm3072_vm13, %v2987_v39  ;;  %v3338_v39 = vld [vmem:[#allocation2 + $0x80] sm:$0xff] }
 0x3dd   : > { %3227 = vrot.lane.b32.xlu2 %v3150_v24, %s7674_s23  ;;  %v3366_v24 = vpack.c.bf16 %v3334_v36, %v3334_v36 }
 0x3de   : > { %3229 = vrot.lane.b32.xlu0 %v3151_v45, %s7674_s23  ;;  %v3370_v45 = vpack.c.bf16 %v3338_v39, %v3338_v39 }
 0x3df   : > { %3237 = vrot.lane.b32.xlu1 %v3155_v46, %s7674_s23  ;;  %v3001_v47 = vpop.permute.xlu2 %3000  ;;  %v3336_v46 = vld [vmem:[#allocation2 + $0x68] sm:$0xff] }
 0x3e0   : > { %3085 = vst.msk [vmem:[#allocation4 + $0x30] sm:$0xf] %vm3072_vm13, %v3001_v47  ;;  %v2985_v59 = vpop.permute.xlu0 %2984  ;;  %v3368_v51 = vpack.c.bf16 %v3336_v46, %v3336_v46 }
 0x3e1   : > { %v2993_v49 = vpop.permute.xlu1 %2992  ;;  %3077 = vst.msk [vmem:[#allocation4 + $0x10] sm:$0xf] %vm3072_vm13, %v2985_v59  ;;  %v3337_v59 = vld [vmem:[#allocation2 + $0x78] sm:$0xff] }
 0x3e2   : > { %3081 = vst.msk [vmem:[#allocation4 + $0x20] sm:$0xf] %vm3072_vm13, %v2993_v49  ;;  %v3341_v49 = vld [vmem:[#allocation2 + $0xa8] sm:$0xff] }
 0x3e5   : > { %3233 = vrot.lane.b32.xlu2 %v3153_v52, %s7674_s23  ;;  %v3369_v52 = vpack.c.bf16 %v3337_v59, %v3337_v59 }
 0x3e6   : > { %3235 = vrot.lane.b32.xlu0 %v3154_v53, %s7674_s23  ;;  %v3373_v53 = vpack.c.bf16 %v3341_v49, %v3341_v49 }
 0x3e7   : > { %3243 = vrot.lane.b32.xlu1 %v3158_v55, %s7674_s23  ;;  %v3007_v56 = vpop.permute.xlu2 %3006  ;;  %v3339_v55 = vld [vmem:[#allocation2 + $0x90] sm:$0xff] }
 0x3e8   : > { %3088 = vst.msk [vmem:[#allocation4 + $0x3c] sm:$0xf] %vm3072_vm13, %v3007_v56  ;;  %v2991_v57 = vpop.permute.xlu0 %2990  ;;  %v3371_v61 = vpack.c.bf16 %v3339_v55, %v3339_v55 }
 0x3e9   : > { %v2999_v58 = vpop.permute.xlu1 %2998  ;;  %3080 = vst.msk [vmem:[#allocation4 + $0x1c] sm:$0xf] %vm3072_vm13, %v2991_v57  ;;  %v3340_v57 = vld [vmem:[#allocation2 + $0x98] sm:$0xff] }
 0x3ea   : > { %3084 = vst.msk [vmem:[#allocation4 + $0x2c] sm:$0xf] %vm3072_vm13, %v2999_v58  ;;  %v3344_v58 = vld [vmem:[#allocation2 + $0xc8] sm:$0xff] }
 0x3ed   : > { %3239 = vrot.lane.b32.xlu2 %v3156_v2, %s7674_s23  ;;  %v3372_v2 = vpack.c.bf16 %v3340_v57, %v3340_v57 }
 0x3ee   : > { %3241 = vrot.lane.b32.xlu0 %v3157_v15, %s7674_s23  ;;  %v3376_v15 = vpack.c.bf16 %v3344_v58, %v3344_v58 }
 0x3ef   : > { %3249 = vrot.lane.b32.xlu1 %v3161_v62, %s7674_s23  ;;  %v3013_v0 = vpop.permute.xlu2 %3012  ;;  %v3342_v62 = vld [vmem:[#allocation2 + $0xb0] sm:$0xff] }
 0x3f0   : > { %3091 = vst.msk [vmem:[#allocation4 + $0x48] sm:$0xf] %vm3072_vm13, %v3013_v0  ;;  %v2997_v42 = vpop.permute.xlu0 %2996  ;;  %v3374_v54 = vpack.c.bf16 %v3342_v62, %v3342_v62 }
 0x3f1   : > { %v3005_v4 = vpop.permute.xlu1 %3004  ;;  %3083 = vst.msk [vmem:[#allocation4 + $0x28] sm:$0xf] %vm3072_vm13, %v2997_v42  ;;  %v3343_v42 = vld [vmem:[#allocation2 + $0xc0] sm:$0xff] }
 0x3f2   : > { %3087 = vst.msk [vmem:[#allocation4 + $0x38] sm:$0xf] %vm3072_vm13, %v3005_v4  ;;  %v3347_v4 = vld [vmem:[#allocation2 + $0xf0] sm:$0xff] }
 0x3f5   : > { %3245 = vrot.lane.b32.xlu2 %v3159_v6, %s7674_s23  ;;  %v3375_v6 = vpack.c.bf16 %v3343_v42, %v3343_v42 }
 0x3f6   : > { %3247 = vrot.lane.b32.xlu0 %v3160_v7, %s7674_s23  ;;  %v3379_v7 = vpack.c.bf16 %v3347_v4, %v3347_v4  ;;  %v3562_v4 = vld [vmem:[#allocation3 + $0x68] sm:$0xff] }
 0x3f7   : > { %3255 = vrot.lane.b32.xlu1 %v3164_v8, %s7674_s23  ;;  %v3019_v63 = vpop.permute.xlu2 %3018  ;;  %v3345_v8 = vld [vmem:[#allocation2 + $0xd8] sm:$0xff] }
 0x3f8   : > { %3094 = vst.msk [vmem:[#allocation4 + $0x54] sm:$0xf] %vm3072_vm13, %v3019_v63  ;;  %v3003_v10 = vpop.permute.xlu0 %3002  ;;  %v3377_v13 = vpack.c.bf16 %v3345_v8, %v3345_v8 }
 0x3f9   : > { %v3011_v11 = vpop.permute.xlu1 %3010  ;;  %3086 = vst.msk [vmem:[#allocation4 + $0x34] sm:$0xf] %vm3072_vm13, %v3003_v10  ;;  %v3346_v10 = vld [vmem:[#allocation2 + $0xe0] sm:$0xff] }
 0x3fa   : > { %3090 = vst.msk [vmem:[#allocation4 + $0x44] sm:$0xf] %vm3072_vm13, %v3011_v11  ;;  %v3350_v11 = vld [vmem:[#allocation2 + $0x110] sm:$0xff] }
 0x3fd   : > { %3251 = vrot.lane.b32.xlu2 %v3162_v16, %s7674_s23  ;;  %v3378_v16 = vpack.c.bf16 %v3346_v10, %v3346_v10 }
 0x3fe   : > { %3253 = vrot.lane.b32.xlu0 %v3163_v17, %s7674_s23  ;;  %v3382_v17 = vpack.c.bf16 %v3350_v11, %v3350_v11  ;;  %v3565_v11 = vld [vmem:[#allocation3 + $0x90] sm:$0xff] }
 0x3ff   : > { %3261 = vrot.lane.b32.xlu1 %v3167_v3, %s7674_s23  ;;  %v3025_v18 = vpop.permute.xlu2 %3024  ;;  %v3348_v3 = vld [vmem:[#allocation2 + $0xf8] sm:$0xff] }
 0x400   : > { %3097 = vst.msk [vmem:[#allocation4 + $0x60] sm:$0xf] %vm3072_vm13, %v3025_v18  ;;  %v3009_v19 = vpop.permute.xlu0 %3008  ;;  %v3380_v9 = vpack.c.bf16 %v3348_v3, %v3348_v3 }
 0x401   : > { %v3017_v22 = vpop.permute.xlu1 %3016  ;;  %3089 = vst.msk [vmem:[#allocation4 + $0x40] sm:$0xf] %vm3072_vm13, %v3009_v19  ;;  %v3349_v19 = vld [vmem:[#allocation2 + $0x108] sm:$0xff] }
 0x402   : > { %3093 = vst.msk [vmem:[#allocation4 + $0x50] sm:$0xf] %vm3072_vm13, %v3017_v22 }
 0x405   : > { %3257 = vrot.lane.b32.xlu2 %v3165_v25, %s7674_s23  ;;  %v3381_v25 = vpack.c.bf16 %v3349_v19, %v3349_v19 }
 0x406   : > { %3259 = vrot.lane.b32.xlu0 %v3166_v26, %s7674_s23  ;;  %v3351_v26 = vld [vmem:[#allocation2 + $0x120] sm:$0xff] }
 0x407   : > { %3429 = vrot.lane.b32.xlu1 %v3364_v14, %s7675_s24  ;;  %v3031_v27 = vpop.permute.xlu2 %3030  ;;  %v3385_v14 = vpack.c.bf16 %v3353_v21, %v3353_v21  ;;  %v3568_v21 = vld [vmem:[#allocation3 + $0xb0] sm:$0xff] }
 0x408   : > { %3100 = vst.msk [vmem:[#allocation4 + $0x6c] sm:$0xf] %vm3072_vm13, %v3031_v27  ;;  %v3015_v23 = vpop.permute.xlu0 %3014 }
 0x409   : > { %v3023_v30 = vpop.permute.xlu1 %3022  ;;  %3092 = vst.msk [vmem:[#allocation4 + $0x4c] sm:$0xf] %vm3072_vm13, %v3015_v23 }
 0x40a   : > { %3096 = vst.msk [vmem:[#allocation4 + $0x5c] sm:$0xf] %vm3072_vm13, %v3023_v30  ;;  %v3383_v30 = vpack.c.bf16 %v3351_v26, %v3351_v26 }
 0x40d   : > { %3263 = vrot.lane.b32.xlu2 %v3168_v41, %s7674_s23  ;;  %v3388_v41 = vpack.c.bf16 %v3356_v29, %v3356_v29  ;;  %v3571_v29 = vld [vmem:[#allocation3 + $0xd8] sm:$0xff] }
 0x40e   : > { %3427 = vrot.lane.b32.xlu0 %v3363_v31, %s7675_s24  ;;  %v3384_v31 = vpack.c.bf16 %v3352_v28, %v3352_v28 }
 0x40f   : > { %3435 = vrot.lane.b32.xlu1 %v3367_v33, %s7675_s24  ;;  %v3037_v35 = vpop.permute.xlu2 %3036  ;;  %v3354_v33 = vld [vmem:[#allocation2 + $0x140] sm:$0xff] }
 0x410   : > { %3103 = vst.msk [vmem:[#allocation4 + $0x78] sm:$0xf] %vm3072_vm13, %v3037_v35  ;;  %v3021_v37 = vpop.permute.xlu0 %3020  ;;  %v3355_v35 = vld [vmem:[#allocation2 + $0x150] sm:$0xff] }
 0x411   : > { %v3029_v40 = vpop.permute.xlu1 %3028  ;;  %3095 = vst.msk [vmem:[#allocation4 + $0x58] sm:$0xf] %vm3072_vm13, %v3021_v37  ;;  %v3359_v37 = vld [vmem:[#allocation2 + $0x180] sm:$0xff] }
 0x412   : > { %3099 = vst.msk [vmem:[#allocation4 + $0x68] sm:$0xf] %vm3072_vm13, %v3029_v40  ;;  %v3386_v40 = vpack.c.bf16 %v3354_v33, %v3354_v33 }
 0x415   : > { %3431 = vrot.lane.b32.xlu2 %v3365_v43, %s7675_s24  ;;  %v3387_v43 = vpack.c.bf16 %v3355_v35, %v3355_v35 }
 0x416   : > { %3433 = vrot.lane.b32.xlu0 %v3366_v24, %s7675_s24  ;;  %v3391_v24 = vpack.c.bf16 %v3359_v37, %v3359_v37  ;;  %v3574_v37 = vld [vmem:[#allocation3 + $0xf8] sm:$0xff] }
 0x417   : > { %3441 = vrot.lane.b32.xlu1 %v3370_v45, %s7675_s24  ;;  %v3204_v47 = vpop.permute.xlu2 %3203  ;;  %v3357_v45 = vld [vmem:[#allocation2 + $0x168] sm:$0xff] }
 0x418   : > { %3299 = vst.msk [vmem:[#allocation4 + $0x4] sm:$0xf] %vm3297_vm14, %v3204_v47  ;;  %v3027_v48 = vpop.permute.xlu0 %3026  ;;  %v3358_v47 = vld [vmem:[#allocation2 + $0x170] sm:$0xff] }
 0x419   : > { %v3035_v50 = vpop.permute.xlu1 %3034  ;;  %3098 = vst.msk [vmem:[#allocation4 + $0x64] sm:$0xf] %vm3072_vm13, %v3027_v48  ;;  %v3362_v48 = vld [vmem:[#allocation2 + $0x1a0] sm:$0xff] }
 0x41a   : > { %3102 = vst.msk [vmem:[#allocation4 + $0x74] sm:$0xf] %vm3072_vm13, %v3035_v50  ;;  %v3389_v50 = vpack.c.bf16 %v3357_v45, %v3357_v45 }
 0x41d   : > { %3437 = vrot.lane.b32.xlu2 %v3368_v51, %s7675_s24  ;;  %v3390_v51 = vpack.c.bf16 %v3358_v47, %v3358_v47 }
 0x41e   : > { %3439 = vrot.lane.b32.xlu0 %v3369_v52, %s7675_s24  ;;  %v3394_v52 = vpack.c.bf16 %v3362_v48, %v3362_v48  ;;  %v3577_v48 = vld [vmem:[#allocation3 + $0x120] sm:$0xff] }
 0x41f   : > { %3447 = vrot.lane.b32.xlu1 %v3373_v53, %s7675_s24  ;;  %v3210_v56 = vpop.permute.xlu2 %3209  ;;  %v3360_v53 = vld [vmem:[#allocation2 + $0x188] sm:$0xff] }
 0x420   : > { %3302 = vst.msk [vmem:[#allocation4 + $0x10] sm:$0xf] %vm3297_vm14, %v3210_v56  ;;  %v3033_v44 = vpop.permute.xlu0 %3032  ;;  %v3361_v56 = vld [vmem:[#allocation2 + $0x198] sm:$0xff]  ;;  %v3392_v58 = vpack.c.bf16 %v3360_v53, %v3360_v53 }
 0x421   : > { %v3202_v60 = vpop.permute.xlu1 %3201  ;;  %3101 = vst.msk [vmem:[#allocation4 + $0x70] sm:$0xf] %vm3072_vm13, %v3033_v44 }
 0x422   : > { %3298 = vst.msk [vmem:[#allocation4] sm:$0xf] %vm3297_vm14, %v3202_v60  ;;  %v3559_v60 = vld [vmem:[#allocation3 + $0x48] sm:$0xff] }
 0x425   : > { %3443 = vrot.lane.b32.xlu2 %v3371_v61, %s7675_s24  ;;  %v3393_v61 = vpack.c.bf16 %v3361_v56, %v3361_v56 }
 0x426   : > { %3445 = vrot.lane.b32.xlu0 %v3372_v2, %s7675_s24  ;;  %v3591_v2 = vpack.c.bf16 %v3559_v60, %v3559_v60 }
 0x427   : > { %3453 = vrot.lane.b32.xlu1 %v3376_v15, %s7675_s24  ;;  %v3216_v0 = vpop.permute.xlu2 %3215 }
 0x428   : > { %3305 = vst.msk [vmem:[#allocation4 + $0x1c] sm:$0xf] %vm3297_vm14, %v3216_v0  ;;  %v3039_v1 = vpop.permute.xlu0 %3038  ;;  %v3557_v0 = vld [vmem:[#allocation3 + $0x30] sm:$0xff] }
 0x429   : > { %v3208_v5 = vpop.permute.xlu1 %3207  ;;  %3104 = vst.msk [vmem:[#allocation4 + $0x7c] sm:$0xf] %vm3072_vm13, %v3039_v1  ;;  %v3558_v1 = vld [vmem:[#allocation3 + $0x38] sm:$0xff]  ;;  %vm4424_vm13 = vcmask 552448  }
 0x42a   : > { %3301 = vst.msk [vmem:[#allocation4 + $0xc] sm:$0xf] %vm3297_vm14, %v3208_v5  ;;  %v3589_v5 = vpack.c.bf16 %v3557_v0, %v3557_v0 }
 0x42d   : > { %3449 = vrot.lane.b32.xlu2 %v3374_v54, %s7675_s24  ;;  %v3590_v54 = vpack.c.bf16 %v3558_v1, %v3558_v1  ;;  %v3583_v1 = vld [vmem:[#allocation3 + $0x168] sm:$0xff] }
 0x42e   : > { %3451 = vrot.lane.b32.xlu0 %v3375_v6, %s7675_s24  ;;  %v3594_v6 = vpack.c.bf16 %v3562_v4, %v3562_v4 }
 0x42f   : > { %3459 = vrot.lane.b32.xlu1 %v3379_v7, %s7675_s24  ;;  %v3222_v63 = vpop.permute.xlu2 %3221 }
 0x430   : > { %3308 = vst.msk [vmem:[#allocation4 + $0x28] sm:$0xf] %vm3297_vm14, %v3222_v63  ;;  %v3206_v38 = vpop.permute.xlu0 %3205  ;;  %v3560_v63 = vld [vmem:[#allocation3 + $0x50] sm:$0xff] }
 0x431   : > { %v3214_v12 = vpop.permute.xlu1 %3213  ;;  %3300 = vst.msk [vmem:[#allocation4 + $0x8] sm:$0xf] %vm3297_vm14, %v3206_v38  ;;  %v3561_v38 = vld [vmem:[#allocation3 + $0x60] sm:$0xff] }
 0x432   : > { %3304 = vst.msk [vmem:[#allocation4 + $0x18] sm:$0xf] %vm3297_vm14, %v3214_v12  ;;  %v3592_v12 = vpack.c.bf16 %v3560_v63, %v3560_v63 }
 0x435   : > { %3455 = vrot.lane.b32.xlu2 %v3377_v13, %s7675_s24  ;;  %v3593_v13 = vpack.c.bf16 %v3561_v38, %v3561_v38  ;;  %v3586_v38 = vld [vmem:[#allocation3 + $0x188] sm:$0xff] }
 0x436   : > { %3457 = vrot.lane.b32.xlu0 %v3378_v16, %s7675_s24  ;;  %v3597_v16 = vpack.c.bf16 %v3565_v11, %v3565_v11 }
 0x437   : > { %3465 = vrot.lane.b32.xlu1 %v3382_v17, %s7675_s24  ;;  %v3228_v18 = vpop.permute.xlu2 %3227 }
 0x438   : > { %3311 = vst.msk [vmem:[#allocation4 + $0x34] sm:$0xf] %vm3297_vm14, %v3228_v18  ;;  %v3212_v20 = vpop.permute.xlu0 %3211  ;;  %v3563_v18 = vld [vmem:[#allocation3 + $0x78] sm:$0xff] }
 0x439   : > { %v3220_v22 = vpop.permute.xlu1 %3219  ;;  %3303 = vst.msk [vmem:[#allocation4 + $0x14] sm:$0xf] %vm3297_vm14, %v3212_v20  ;;  %v3564_v20 = vld [vmem:[#allocation3 + $0x80] sm:$0xff] }
 0x43a   : > { %3307 = vst.msk [vmem:[#allocation4 + $0x24] sm:$0xf] %vm3297_vm14, %v3220_v22  ;;  %v3595_v22 = vpack.c.bf16 %v3563_v18, %v3563_v18  ;;  %v3782_v18 = vld [vmem:[#allocation2 + $0x31] sm:$0xff] }
 0x43d   : > { %3461 = vrot.lane.b32.xlu2 %v3380_v9, %s7675_s24  ;;  %v3596_v9 = vpack.c.bf16 %v3564_v20, %v3564_v20  ;;  %v3585_v20 = vld [vmem:[#allocation3 + $0x180] sm:$0xff] }
 0x43e   : > { %3463 = vrot.lane.b32.xlu0 %v3381_v25, %s7675_s24  ;;  %v3600_v25 = vpack.c.bf16 %v3568_v21, %v3568_v21 }
 0x43f   : > { %3471 = vrot.lane.b32.xlu1 %v3385_v14, %s7675_s24  ;;  %v3234_v27 = vpop.permute.xlu2 %3233 }
 0x440   : > { %3314 = vst.msk [vmem:[#allocation4 + $0x40] sm:$0xf] %vm3297_vm14, %v3234_v27  ;;  %v3218_v23 = vpop.permute.xlu0 %3217  ;;  %v3566_v27 = vld [vmem:[#allocation3 + $0x98] sm:$0xff] }
 0x441   : > { %v3226_v32 = vpop.permute.xlu1 %3225  ;;  %3306 = vst.msk [vmem:[#allocation4 + $0x20] sm:$0xf] %vm3297_vm14, %v3218_v23  ;;  %v3567_v23 = vld [vmem:[#allocation3 + $0xa8] sm:$0xff] }
 0x442   : > { %3310 = vst.msk [vmem:[#allocation4 + $0x30] sm:$0xf] %vm3297_vm14, %v3226_v32  ;;  %v3598_v32 = vpack.c.bf16 %v3566_v27, %v3566_v27 }
 0x445   : > { %3467 = vrot.lane.b32.xlu2 %v3383_v30, %s7675_s24  ;;  %v3599_v30 = vpack.c.bf16 %v3567_v23, %v3567_v23 }
 0x446   : > { %3469 = vrot.lane.b32.xlu0 %v3384_v31, %s7675_s24  ;;  %v3603_v31 = vpack.c.bf16 %v3571_v29, %v3571_v29 }
 0x447   : > { %3477 = vrot.lane.b32.xlu1 %v3388_v41, %s7675_s24  ;;  %v3240_v34 = vpop.permute.xlu2 %3239 }
 0x448   : > { %3317 = vst.msk [vmem:[#allocation4 + $0x4c] sm:$0xf] %vm3297_vm14, %v3240_v34  ;;  %v3224_v36 = vpop.permute.xlu0 %3223  ;;  %v3569_v34 = vld [vmem:[#allocation3 + $0xc0] sm:$0xff] }
 0x449   : > { %v3232_v39 = vpop.permute.xlu1 %3231  ;;  %3309 = vst.msk [vmem:[#allocation4 + $0x2c] sm:$0xf] %vm3297_vm14, %v3224_v36  ;;  %v3570_v36 = vld [vmem:[#allocation3 + $0xc8] sm:$0xff] }
 0x44a   : > { %3313 = vst.msk [vmem:[#allocation4 + $0x3c] sm:$0xf] %vm3297_vm14, %v3232_v39  ;;  %v3601_v39 = vpack.c.bf16 %v3569_v34, %v3569_v34 }
 0x44d   : > { %3473 = vrot.lane.b32.xlu2 %v3386_v40, %s7675_s24  ;;  %v3602_v40 = vpack.c.bf16 %v3570_v36, %v3570_v36 }
 0x44e   : > { %3475 = vrot.lane.b32.xlu0 %v3387_v43, %s7675_s24  ;;  %v3606_v43 = vpack.c.bf16 %v3574_v37, %v3574_v37 }
 0x44f   : > { %3483 = vrot.lane.b32.xlu1 %v3391_v24, %s7675_s24  ;;  %v3246_v46 = vpop.permute.xlu2 %3245 }
 0x450   : > { %3320 = vst.msk [vmem:[#allocation4 + $0x58] sm:$0xf] %vm3297_vm14, %v3246_v46  ;;  %v3230_v59 = vpop.permute.xlu0 %3229  ;;  %v3572_v46 = vld [vmem:[#allocation3 + $0xe0] sm:$0xff] }
 0x451   : > { %v3238_v49 = vpop.permute.xlu1 %3237  ;;  %3312 = vst.msk [vmem:[#allocation4 + $0x38] sm:$0xf] %vm3297_vm14, %v3230_v59  ;;  %v3573_v59 = vld [vmem:[#allocation3 + $0xf0] sm:$0xff] }
 0x452   : > { %3316 = vst.msk [vmem:[#allocation4 + $0x48] sm:$0xf] %vm3297_vm14, %v3238_v49  ;;  %v3604_v49 = vpack.c.bf16 %v3572_v46, %v3572_v46 }
 0x455   : > { %3479 = vrot.lane.b32.xlu2 %v3389_v50, %s7675_s24  ;;  %v3605_v50 = vpack.c.bf16 %v3573_v59, %v3573_v59 }
 0x456   : > { %3481 = vrot.lane.b32.xlu0 %v3390_v51, %s7675_s24  ;;  %v3609_v51 = vpack.c.bf16 %v3577_v48, %v3577_v48 }
 0x457   : > { %3489 = vrot.lane.b32.xlu1 %v3394_v52, %s7675_s24  ;;  %v3252_v55 = vpop.permute.xlu2 %3251 }
 0x458   : > { %3323 = vst.msk [vmem:[#allocation4 + $0x64] sm:$0xf] %vm3297_vm14, %v3252_v55  ;;  %v3236_v57 = vpop.permute.xlu0 %3235  ;;  %v3575_v55 = vld [vmem:[#allocation3 + $0x108] sm:$0xff] }
 0x459   : > { %v3244_v44 = vpop.permute.xlu1 %3243  ;;  %3315 = vst.msk [vmem:[#allocation4 + $0x44] sm:$0xf] %vm3297_vm14, %v3236_v57  ;;  %v3576_v57 = vld [vmem:[#allocation3 + $0x110] sm:$0xff] }
 0x45a   : > { %3319 = vst.msk [vmem:[#allocation4 + $0x54] sm:$0xf] %vm3297_vm14, %v3244_v44  ;;  %v3580_v44 = vld [vmem:[#allocation3 + $0x140] sm:$0xff]  ;;  %v3608_v60 = vpack.c.bf16 %v3576_v57, %v3576_v57 }
 0x45d   : > { %3485 = vrot.lane.b32.xlu2 %v3392_v58, %s7675_s24  ;;  %v3607_v58 = vpack.c.bf16 %v3575_v55, %v3575_v55 }
 0x45e   : > { %3487 = vrot.lane.b32.xlu0 %v3393_v61, %s7675_s24  ;;  %v3612_v61 = vpack.c.bf16 %v3580_v44, %v3580_v44 }
 0x45f   : > { %3657 = vrot.lane.b32.xlu1 %v3591_v2, %s7676_s25  ;;  %v3258_v15 = vpop.permute.xlu2 %3257 }
 0x460   : > { %3326 = vst.msk [vmem:[#allocation4 + $0x70] sm:$0xf] %vm3297_vm14, %v3258_v15  ;;  %v3242_v62 = vpop.permute.xlu0 %3241 }
 0x461   : > { %v3250_v42 = vpop.permute.xlu1 %3249  ;;  %3318 = vst.msk [vmem:[#allocation4 + $0x50] sm:$0xf] %vm3297_vm14, %v3242_v62  ;;  %v3578_v62 = vld [vmem:[#allocation3 + $0x128] sm:$0xff] }
 0x462   : > { %3322 = vst.msk [vmem:[#allocation4 + $0x60] sm:$0xf] %vm3297_vm14, %v3250_v42  ;;  %v3579_v42 = vld [vmem:[#allocation3 + $0x138] sm:$0xff]  ;;  %v3610_v4 = vpack.c.bf16 %v3578_v62, %v3578_v62 }
 0x465   : > { %3653 = vrot.lane.b32.xlu2 %v3589_v5, %s7676_s25  ;;  %v3611_v5 = vpack.c.bf16 %v3579_v42, %v3579_v42 }
 0x466   : > { %3655 = vrot.lane.b32.xlu0 %v3590_v54, %s7676_s25  ;;  %v3615_v54 = vpack.c.bf16 %v3583_v1, %v3583_v1 }
 0x467   : > { %3663 = vrot.lane.b32.xlu1 %v3594_v6, %s7676_s25  ;;  %v3264_v7 = vpop.permute.xlu2 %3263 }
 0x468   : > { %3329 = vst.msk [vmem:[#allocation4 + $0x7c] sm:$0xf] %vm3297_vm14, %v3264_v7  ;;  %v3248_v8 = vpop.permute.xlu0 %3247 }
 0x469   : > { %v3256_v10 = vpop.permute.xlu1 %3255  ;;  %3321 = vst.msk [vmem:[#allocation4 + $0x5c] sm:$0xf] %vm3297_vm14, %v3248_v8  ;;  %v3581_v8 = vld [vmem:[#allocation3 + $0x150] sm:$0xff] }
 0x46a   : > { %3325 = vst.msk [vmem:[#allocation4 + $0x6c] sm:$0xf] %vm3297_vm14, %v3256_v10  ;;  %v3582_v10 = vld [vmem:[#allocation3 + $0x158] sm:$0xff]  ;;  %v3613_v11 = vpack.c.bf16 %v3581_v8, %v3581_v8 }
 0x46d   : > { %3659 = vrot.lane.b32.xlu2 %v3592_v12, %s7676_s25  ;;  %v3614_v12 = vpack.c.bf16 %v3582_v10, %v3582_v10 }
 0x46e   : > { %3661 = vrot.lane.b32.xlu0 %v3593_v13, %s7676_s25  ;;  %v3618_v13 = vpack.c.bf16 %v3586_v38, %v3586_v38 }
 0x46f   : > { %3669 = vrot.lane.b32.xlu1 %v3597_v16, %s7676_s25  ;;  %v3432_v17 = vpop.permute.xlu2 %3431 }
 0x470   : > { %3526 = vst.msk [vmem:[#allocation4 + $0x8] sm:$0xf] %vm3523_vm15, %v3432_v17  ;;  %v3254_v3 = vpop.permute.xlu0 %3253 }
 0x471   : > { %v3262_v19 = vpop.permute.xlu1 %3261  ;;  %3324 = vst.msk [vmem:[#allocation4 + $0x68] sm:$0xf] %vm3297_vm14, %v3254_v3  ;;  %v3584_v3 = vld [vmem:[#allocation3 + $0x170] sm:$0xff] }
 0x472   : > { %3328 = vst.msk [vmem:[#allocation4 + $0x78] sm:$0xf] %vm3297_vm14, %v3262_v19  ;;  %v3616_v21 = vpack.c.bf16 %v3584_v3, %v3584_v3 }
 0x475   : > { %3665 = vrot.lane.b32.xlu2 %v3595_v22, %s7676_s25  ;;  %v3814_v22 = vpack.c.bf16 %v3782_v18, %v3782_v18  ;;  %v3803_v18 = vld [vmem:[#allocation2 + $0x129] sm:$0xff] }
 0x476   : > { %3667 = vrot.lane.b32.xlu0 %v3596_v9, %s7676_s25  ;;  %v3617_v9 = vpack.c.bf16 %v3585_v20, %v3585_v20 }
 0x477   : > { %3675 = vrot.lane.b32.xlu1 %v3600_v25, %s7676_s25  ;;  %v3438_v14 = vpop.permute.xlu2 %3437  ;;  %v3587_v25 = vld [vmem:[#allocation3 + $0x198] sm:$0xff] }
 0x478   : > { %3529 = vst.msk [vmem:[#allocation4 + $0x14] sm:$0xf] %vm3523_vm15, %v3438_v14  ;;  %v3260_v26 = vpop.permute.xlu0 %3259  ;;  %v3619_v29 = vpack.c.bf16 %v3587_v25, %v3587_v25 }
 0x479   : > { %v3430_v28 = vpop.permute.xlu1 %3429  ;;  %3327 = vst.msk [vmem:[#allocation4 + $0x74] sm:$0xf] %vm3297_vm14, %v3260_v26  ;;  %v3588_v26 = vld [vmem:[#allocation3 + $0x1a0] sm:$0xff]  ;;  %vm4879_vm14 = vcmask 1043456  }
 0x47a   : > { %3525 = vst.msk [vmem:[#allocation4 + $0x4] sm:$0xf] %vm3523_vm15, %v3430_v28  ;;  %v3785_v28 = vld [vmem:[#allocation2 + $0x51] sm:$0xff] }
 0x47d   : > { %3671 = vrot.lane.b32.xlu2 %v3598_v32, %s7676_s25  ;;  %v3620_v32 = vpack.c.bf16 %v3588_v26, %v3588_v26 }
 0x47e   : > { %3673 = vrot.lane.b32.xlu0 %v3599_v30, %s7676_s25  ;;  %v3817_v30 = vpack.c.bf16 %v3785_v28, %v3785_v28 }
 0x47f   : > { %3681 = vrot.lane.b32.xlu1 %v3603_v31, %s7676_s25  ;;  %v3444_v41 = vpop.permute.xlu2 %3443  ;;  %v3783_v31 = vld [vmem:[#allocation2 + $0x39] sm:$0xff] }
 0x480   : > { %3532 = vst.msk [vmem:[#allocation4 + $0x20] sm:$0xf] %vm3523_vm15, %v3444_v41  ;;  %v3428_v33 = vpop.permute.xlu0 %3427  ;;  %v3815_v37 = vpack.c.bf16 %v3783_v31, %v3783_v31 }
 0x481   : > { %v3436_v35 = vpop.permute.xlu1 %3435  ;;  %3524 = vst.msk [vmem:[#allocation4] sm:$0xf] %vm3523_vm15, %v3428_v33  ;;  %v3784_v33 = vld [vmem:[#allocation2 + $0x49] sm:$0xff] }
 0x482   : > { %3528 = vst.msk [vmem:[#allocation4 + $0x10] sm:$0xf] %vm3523_vm15, %v3436_v35  ;;  %v3788_v35 = vld [vmem:[#allocation2 + $0x79] sm:$0xff] }
 0x485   : > { %3677 = vrot.lane.b32.xlu2 %v3601_v39, %s7676_s25  ;;  %v3816_v39 = vpack.c.bf16 %v3784_v33, %v3784_v33 }
 0x486   : > { %3679 = vrot.lane.b32.xlu0 %v3602_v40, %s7676_s25  ;;  %v3820_v40 = vpack.c.bf16 %v3788_v35, %v3788_v35 }
 0x487   : > { %3687 = vrot.lane.b32.xlu1 %v3606_v43, %s7676_s25  ;;  %v3450_v24 = vpop.permute.xlu2 %3449  ;;  %v3786_v43 = vld [vmem:[#allocation2 + $0x61] sm:$0xff] }
 0x488   : > { %3535 = vst.msk [vmem:[#allocation4 + $0x2c] sm:$0xf] %vm3523_vm15, %v3450_v24  ;;  %v3434_v45 = vpop.permute.xlu0 %3433  ;;  %v3818_v48 = vpack.c.bf16 %v3786_v43, %v3786_v43 }
 0x489   : > { %v3442_v47 = vpop.permute.xlu1 %3441  ;;  %3527 = vst.msk [vmem:[#allocation4 + $0xc] sm:$0xf] %vm3523_vm15, %v3434_v45  ;;  %v3787_v45 = vld [vmem:[#allocation2 + $0x69] sm:$0xff] }
 0x48a   : > { %3531 = vst.msk [vmem:[#allocation4 + $0x1c] sm:$0xf] %vm3523_vm15, %v3442_v47  ;;  %v3791_v47 = vld [vmem:[#allocation2 + $0x99] sm:$0xff] }
 0x48d   : > { %3683 = vrot.lane.b32.xlu2 %v3604_v49, %s7676_s25  ;;  %v3819_v49 = vpack.c.bf16 %v3787_v45, %v3787_v45 }
 0x48e   : > { %3685 = vrot.lane.b32.xlu0 %v3605_v50, %s7676_s25  ;;  %v3823_v50 = vpack.c.bf16 %v3791_v47, %v3791_v47 }
 0x48f   : > { %3693 = vrot.lane.b32.xlu1 %v3609_v51, %s7676_s25  ;;  %v3456_v52 = vpop.permute.xlu2 %3455  ;;  %v3789_v51 = vld [vmem:[#allocation2 + $0x81] sm:$0xff] }
 0x490   : > { %3538 = vst.msk [vmem:[#allocation4 + $0x38] sm:$0xf] %vm3523_vm15, %v3456_v52  ;;  %v3440_v53 = vpop.permute.xlu0 %3439  ;;  %v3821_v44 = vpack.c.bf16 %v3789_v51, %v3789_v51 }
 0x491   : > { %v3448_v56 = vpop.permute.xlu1 %3447  ;;  %3530 = vst.msk [vmem:[#allocation4 + $0x18] sm:$0xf] %vm3523_vm15, %v3440_v53  ;;  %v3790_v53 = vld [vmem:[#allocation2 + $0x91] sm:$0xff] }
 0x492   : > { %3534 = vst.msk [vmem:[#allocation4 + $0x28] sm:$0xf] %vm3523_vm15, %v3448_v56  ;;  %v3794_v56 = vld [vmem:[#allocation2 + $0xc1] sm:$0xff] }
 0x495   : > { %3689 = vrot.lane.b32.xlu2 %v3607_v58, %s7676_s25  ;;  %v3822_v58 = vpack.c.bf16 %v3790_v53, %v3790_v53 }
 0x496   : > { %3691 = vrot.lane.b32.xlu0 %v3608_v60, %s7676_s25  ;;  %v3826_v60 = vpack.c.bf16 %v3794_v56, %v3794_v56 }
 0x497   : > { %3699 = vrot.lane.b32.xlu1 %v3612_v61, %s7676_s25  ;;  %v3462_v2 = vpop.permute.xlu2 %3461  ;;  %v3792_v61 = vld [vmem:[#allocation2 + $0xa9] sm:$0xff] }
 0x498   : > { %3541 = vst.msk [vmem:[#allocation4 + $0x44] sm:$0xf] %vm3523_vm15, %v3462_v2  ;;  %v3446_v15 = vpop.permute.xlu0 %3445  ;;  %v3824_v1 = vpack.c.bf16 %v3792_v61, %v3792_v61 }
 0x499   : > { %v3454_v0 = vpop.permute.xlu1 %3453  ;;  %3533 = vst.msk [vmem:[#allocation4 + $0x24] sm:$0xf] %vm3523_vm15, %v3446_v15  ;;  %v3793_v15 = vld [vmem:[#allocation2 + $0xb1] sm:$0xff] }
 0x49a   : > { %3537 = vst.msk [vmem:[#allocation4 + $0x34] sm:$0xf] %vm3523_vm15, %v3454_v0  ;;  %v3797_v0 = vld [vmem:[#allocation2 + $0xe1] sm:$0xff] }
 0x49d   : > { %3695 = vrot.lane.b32.xlu2 %v3610_v4, %s7676_s25  ;;  %v3825_v4 = vpack.c.bf16 %v3793_v15, %v3793_v15 }
 0x49e   : > { %3697 = vrot.lane.b32.xlu0 %v3611_v5, %s7676_s25  ;;  %v3829_v5 = vpack.c.bf16 %v3797_v0, %v3797_v0  ;;  %v4007_v0 = vld [vmem:[#allocation3 + $0x31] sm:$0xff] }
 0x49f   : > { %3705 = vrot.lane.b32.xlu1 %v3615_v54, %s7676_s25  ;;  %v3468_v6 = vpop.permute.xlu2 %3467  ;;  %v3795_v54 = vld [vmem:[#allocation2 + $0xc9] sm:$0xff] }
 0x4a0   : > { %3544 = vst.msk [vmem:[#allocation4 + $0x50] sm:$0xf] %vm3523_vm15, %v3468_v6  ;;  %v3452_v7 = vpop.permute.xlu0 %3451  ;;  %v3827_v38 = vpack.c.bf16 %v3795_v54, %v3795_v54 }
 0x4a1   : > { %v3460_v63 = vpop.permute.xlu1 %3459  ;;  %3536 = vst.msk [vmem:[#allocation4 + $0x30] sm:$0xf] %vm3523_vm15, %v3452_v7  ;;  %v3796_v7 = vld [vmem:[#allocation2 + $0xd9] sm:$0xff] }
 0x4a2   : > { %3540 = vst.msk [vmem:[#allocation4 + $0x40] sm:$0xf] %vm3523_vm15, %v3460_v63  ;;  %v3800_v63 = vld [vmem:[#allocation2 + $0x109] sm:$0xff] }
 0x4a5   : > { %3701 = vrot.lane.b32.xlu2 %v3613_v11, %s7676_s25  ;;  %v3828_v11 = vpack.c.bf16 %v3796_v7, %v3796_v7 }
 0x4a6   : > { %3703 = vrot.lane.b32.xlu0 %v3614_v12, %s7676_s25  ;;  %v3832_v12 = vpack.c.bf16 %v3800_v63, %v3800_v63  ;;  %v4014_v63 = vld [vmem:[#allocation3 + $0x81] sm:$0xff] }
 0x4a7   : > { %3711 = vrot.lane.b32.xlu1 %v3618_v13, %s7676_s25  ;;  %v3474_v16 = vpop.permute.xlu2 %3473  ;;  %v3798_v13 = vld [vmem:[#allocation2 + $0xf1] sm:$0xff] }
 0x4a8   : > { %3547 = vst.msk [vmem:[#allocation4 + $0x5c] sm:$0xf] %vm3523_vm15, %v3474_v16  ;;  %v3458_v17 = vpop.permute.xlu0 %3457  ;;  %v3830_v20 = vpack.c.bf16 %v3798_v13, %v3798_v13 }
 0x4a9   : > { %v3466_v19 = vpop.permute.xlu1 %3465  ;;  %3539 = vst.msk [vmem:[#allocation4 + $0x3c] sm:$0xf] %vm3523_vm15, %v3458_v17  ;;  %v3799_v17 = vld [vmem:[#allocation2 + $0xf9] sm:$0xff] }
 0x4aa   : > { %3543 = vst.msk [vmem:[#allocation4 + $0x4c] sm:$0xf] %vm3523_vm15, %v3466_v19 }
 0x4ad   : > { %3707 = vrot.lane.b32.xlu2 %v3616_v21, %s7676_s25  ;;  %v3831_v21 = vpack.c.bf16 %v3799_v17, %v3799_v17 }
 0x4ae   : > { %3709 = vrot.lane.b32.xlu0 %v3617_v9, %s7676_s25  ;;  %v3801_v9 = vld [vmem:[#allocation2 + $0x111] sm:$0xff] }
 0x4af   : > { %3878 = vrot.lane.b32.xlu1 %v3814_v22, %s7677_s26  ;;  %v3480_v14 = vpop.permute.xlu2 %3479  ;;  %v3835_v22 = vpack.c.bf16 %v3803_v18, %v3803_v18  ;;  %v4017_v18 = vld [vmem:[#allocation3 + $0xa9] sm:$0xff] }
 0x4b0   : > { %3550 = vst.msk [vmem:[#allocation4 + $0x68] sm:$0xf] %vm3523_vm15, %v3480_v14  ;;  %v3464_v27 = vpop.permute.xlu0 %3463  ;;  %v3802_v14 = vld [vmem:[#allocation2 + $0x121] sm:$0xff] }
 0x4b1   : > { %v3472_v23 = vpop.permute.xlu1 %3471  ;;  %3542 = vst.msk [vmem:[#allocation4 + $0x48] sm:$0xf] %vm3523_vm15, %v3464_v27  ;;  %v3806_v27 = vld [vmem:[#allocation2 + $0x151] sm:$0xff] }
 0x4b2   : > { %3546 = vst.msk [vmem:[#allocation4 + $0x58] sm:$0xf] %vm3523_vm15, %v3472_v23  ;;  %v3833_v23 = vpack.c.bf16 %v3801_v9, %v3801_v9 }
 0x4b5   : > { %3713 = vrot.lane.b32.xlu2 %v3619_v29, %s7676_s25  ;;  %v3834_v29 = vpack.c.bf16 %v3802_v14, %v3802_v14 }
 0x4b6   : > { %3715 = vrot.lane.b32.xlu0 %v3620_v32, %s7676_s25  ;;  %v3838_v32 = vpack.c.bf16 %v3806_v27, %v3806_v27  ;;  %v4020_v27 = vld [vmem:[#allocation3 + $0xc9] sm:$0xff] }
 0x4b7   : > { %3884 = vrot.lane.b32.xlu1 %v3817_v30, %s7677_s26  ;;  %v3486_v41 = vpop.permute.xlu2 %3485  ;;  %v3804_v30 = vld [vmem:[#allocation2 + $0x139] sm:$0xff] }
 0x4b8   : > { %3553 = vst.msk [vmem:[#allocation4 + $0x74] sm:$0xf] %vm3523_vm15, %v3486_v41  ;;  %v3470_v34 = vpop.permute.xlu0 %3469  ;;  %v3805_v41 = vld [vmem:[#allocation2 + $0x141] sm:$0xff] }
 0x4b9   : > { %v3478_v36 = vpop.permute.xlu1 %3477  ;;  %3545 = vst.msk [vmem:[#allocation4 + $0x54] sm:$0xf] %vm3523_vm15, %v3470_v34  ;;  %v3809_v34 = vld [vmem:[#allocation2 + $0x171] sm:$0xff] }
 0x4ba   : > { %3549 = vst.msk [vmem:[#allocation4 + $0x64] sm:$0xf] %vm3523_vm15, %v3478_v36  ;;  %v3836_v36 = vpack.c.bf16 %v3804_v30, %v3804_v30 }
 0x4bd   : > { %3880 = vrot.lane.b32.xlu2 %v3815_v37, %s7677_s26  ;;  %v3837_v37 = vpack.c.bf16 %v3805_v41, %v3805_v41 }
 0x4be   : > { %3882 = vrot.lane.b32.xlu0 %v3816_v39, %s7677_s26  ;;  %v3841_v39 = vpack.c.bf16 %v3809_v34, %v3809_v34  ;;  %v4023_v34 = vld [vmem:[#allocation3 + $0xf1] sm:$0xff] }
 0x4bf   : > { %3890 = vrot.lane.b32.xlu1 %v3820_v40, %s7677_s26  ;;  %v3654_v24 = vpop.permute.xlu2 %3653  ;;  %v3807_v40 = vld [vmem:[#allocation2 + $0x159] sm:$0xff] }
 0x4c0   : > { %3750 = vst.msk [vmem:[#allocation4] sm:$0xf] %vm3749_vm1, %v3654_v24  ;;  %v3476_v46 = vpop.permute.xlu0 %3475  ;;  %v3808_v24 = vld [vmem:[#allocation2 + $0x169] sm:$0xff] }
 0x4c1   : > { %v3484_v59 = vpop.permute.xlu1 %3483  ;;  %3548 = vst.msk [vmem:[#allocation4 + $0x60] sm:$0xf] %vm3523_vm15, %v3476_v46  ;;  %v3812_v46 = vld [vmem:[#allocation2 + $0x199] sm:$0xff] }
 0x4c2   : > { %3552 = vst.msk [vmem:[#allocation4 + $0x70] sm:$0xf] %vm3523_vm15, %v3484_v59  ;;  %v3839_v59 = vpack.c.bf16 %v3807_v40, %v3807_v40 }
 0x4c5   : > { %3886 = vrot.lane.b32.xlu2 %v3818_v48, %s7677_s26  ;;  %v3840_v48 = vpack.c.bf16 %v3808_v24, %v3808_v24 }
 0x4c6   : > { %3888 = vrot.lane.b32.xlu0 %v3819_v49, %s7677_s26  ;;  %v3844_v49 = vpack.c.bf16 %v3812_v46, %v3812_v46  ;;  %v4026_v46 = vld [vmem:[#allocation3 + $0x111] sm:$0xff] }
 0x4c7   : > { %3896 = vrot.lane.b32.xlu1 %v3823_v50, %s7677_s26  ;;  %v3660_v52 = vpop.permute.xlu2 %3659  ;;  %v3810_v50 = vld [vmem:[#allocation2 + $0x181] sm:$0xff] }
 0x4c8   : > { %3753 = vst.msk [vmem:[#allocation4 + $0xc] sm:$0xf] %vm3749_vm1, %v3660_v52  ;;  %v3482_v55 = vpop.permute.xlu0 %3481  ;;  %v3811_v52 = vld [vmem:[#allocation2 + $0x189] sm:$0xff]  ;;  %v3842_v56 = vpack.c.bf16 %v3810_v50, %v3810_v50 }
 0x4c9   : > { %v3490_v57 = vpop.permute.xlu1 %3489  ;;  %3551 = vst.msk [vmem:[#allocation4 + $0x6c] sm:$0xf] %vm3523_vm15, %v3482_v55 }
 0x4ca   : > { %3555 = vst.msk [vmem:[#allocation4 + $0x7c] sm:$0xf] %vm3523_vm15, %v3490_v57  ;;  %v4008_v57 = vld [vmem:[#allocation3 + $0x39] sm:$0xff] }
 0x4cd   : > { %3892 = vrot.lane.b32.xlu2 %v3821_v44, %s7677_s26  ;;  %v3843_v44 = vpack.c.bf16 %v3811_v52, %v3811_v52 }
 0x4ce   : > { %3894 = vrot.lane.b32.xlu0 %v3822_v58, %s7677_s26  ;;  %v4040_v58 = vpack.c.bf16 %v4008_v57, %v4008_v57 }
 0x4cf   : > { %3902 = vrot.lane.b32.xlu1 %v3826_v60, %s7677_s26  ;;  %v3666_v2 = vpop.permute.xlu2 %3665  ;;  %v3813_v60 = vld [vmem:[#allocation2 + $0x1a1] sm:$0xff] }
 0x4d0   : > { %3756 = vst.msk [vmem:[#allocation4 + $0x18] sm:$0xf] %vm3749_vm1, %v3666_v2  ;;  %v3488_v62 = vpop.permute.xlu0 %3487 }
 0x4d1   : > { %v3658_v42 = vpop.permute.xlu1 %3657  ;;  %3554 = vst.msk [vmem:[#allocation4 + $0x78] sm:$0xf] %vm3523_vm15, %v3488_v62  ;;  %v3845_v62 = vpack.c.bf16 %v3813_v60, %v3813_v60  ;;  %vm4649_vm15 = vcmask 585248  }
 0x4d2   : > { %3752 = vst.msk [vmem:[#allocation4 + $0x8] sm:$0xf] %vm3749_vm1, %v3658_v42  ;;  %v4011_v42 = vld [vmem:[#allocation3 + $0x61] sm:$0xff] }
 0x4d5   : > { %3898 = vrot.lane.b32.xlu2 %v3824_v1, %s7677_s26  ;;  %v4039_v1 = vpack.c.bf16 %v4007_v0, %v4007_v0 }
 0x4d6   : > { %3900 = vrot.lane.b32.xlu0 %v3825_v4, %s7677_s26  ;;  %v4043_v4 = vpack.c.bf16 %v4011_v42, %v4011_v42 }
 0x4d7   : > { %3908 = vrot.lane.b32.xlu1 %v3829_v5, %s7677_s26  ;;  %v3672_v6 = vpop.permute.xlu2 %3671 }
 0x4d8   : > { %3759 = vst.msk [vmem:[#allocation4 + $0x24] sm:$0xf] %vm3749_vm1, %v3672_v6  ;;  %v3656_v8 = vpop.permute.xlu0 %3655  ;;  %v4009_v6 = vld [vmem:[#allocation3 + $0x49] sm:$0xff] }
 0x4d9   : > { %v3664_v10 = vpop.permute.xlu1 %3663  ;;  %3751 = vst.msk [vmem:[#allocation4 + $0x4] sm:$0xf] %vm3749_vm1, %v3656_v8  ;;  %v4010_v8 = vld [vmem:[#allocation3 + $0x51] sm:$0xff] }
 0x4da   : > { %3755 = vst.msk [vmem:[#allocation4 + $0x14] sm:$0xf] %vm3749_vm1, %v3664_v10  ;;  %v4041_v10 = vpack.c.bf16 %v4009_v6, %v4009_v6 }
 0x4dd   : > { %3904 = vrot.lane.b32.xlu2 %v3827_v38, %s7677_s26  ;;  %v4042_v38 = vpack.c.bf16 %v4010_v8, %v4010_v8  ;;  %v4035_v8 = vld [vmem:[#allocation3 + $0x181] sm:$0xff] }
 0x4de   : > { %3906 = vrot.lane.b32.xlu0 %v3828_v11, %s7677_s26  ;;  %v4046_v11 = vpack.c.bf16 %v4014_v63, %v4014_v63 }
 0x4df   : > { %3914 = vrot.lane.b32.xlu1 %v3832_v12, %s7677_s26  ;;  %v3678_v16 = vpop.permute.xlu2 %3677 }
 0x4e0   : > { %3762 = vst.msk [vmem:[#allocation4 + $0x30] sm:$0xf] %vm3749_vm1, %v3678_v16  ;;  %v3662_v3 = vpop.permute.xlu0 %3661  ;;  %v4012_v16 = vld [vmem:[#allocation3 + $0x69] sm:$0xff] }
 0x4e1   : > { %v3670_v19 = vpop.permute.xlu1 %3669  ;;  %3754 = vst.msk [vmem:[#allocation4 + $0x10] sm:$0xf] %vm3749_vm1, %v3662_v3  ;;  %v4013_v3 = vld [vmem:[#allocation3 + $0x79] sm:$0xff] }
 0x4e2   : > { %3758 = vst.msk [vmem:[#allocation4 + $0x20] sm:$0xf] %vm3749_vm1, %v3670_v19  ;;  %v4044_v19 = vpack.c.bf16 %v4012_v16, %v4012_v16  ;;  %v4038_v16 = vld [vmem:[#allocation3 + $0x1a1] sm:$0xff] }
 0x4e5   : > { %3910 = vrot.lane.b32.xlu2 %v3830_v20, %s7677_s26  ;;  %v4045_v20 = vpack.c.bf16 %v4013_v3, %v4013_v3  ;;  %v4034_v3 = vld [vmem:[#allocation3 + $0x171] sm:$0xff] }
 0x4e6   : > { %3912 = vrot.lane.b32.xlu0 %v3831_v21, %s7677_s26  ;;  %v4049_v21 = vpack.c.bf16 %v4017_v18, %v4017_v18 }
 0x4e7   : > { %3920 = vrot.lane.b32.xlu1 %v3835_v22, %s7677_s26  ;;  %v3684_v25 = vpop.permute.xlu2 %3683 }
 0x4e8   : > { %3765 = vst.msk [vmem:[#allocation4 + $0x3c] sm:$0xf] %vm3749_vm1, %v3684_v25  ;;  %v3668_v26 = vpop.permute.xlu0 %3667  ;;  %v4015_v25 = vld [vmem:[#allocation3 + $0x91] sm:$0xff] }
 0x4e9   : > { %v3676_v28 = vpop.permute.xlu1 %3675  ;;  %3757 = vst.msk [vmem:[#allocation4 + $0x1c] sm:$0xf] %vm3749_vm1, %v3668_v26  ;;  %v4016_v26 = vld [vmem:[#allocation3 + $0x99] sm:$0xff] }
 0x4ea   : > { %3761 = vst.msk [vmem:[#allocation4 + $0x2c] sm:$0xf] %vm3749_vm1, %v3676_v28  ;;  %v4047_v28 = vpack.c.bf16 %v4015_v25, %v4015_v25  ;;  %v4036_v25 = vld [vmem:[#allocation3 + $0x189] sm:$0xff] }
 0x4ed   : > { %3916 = vrot.lane.b32.xlu2 %v3833_v23, %s7677_s26  ;;  %v4048_v23 = vpack.c.bf16 %v4016_v26, %v4016_v26 }
 0x4ee   : > { %3918 = vrot.lane.b32.xlu0 %v3834_v29, %s7677_s26  ;;  %v4052_v29 = vpack.c.bf16 %v4020_v27, %v4020_v27 }
 0x4ef   : > { %3926 = vrot.lane.b32.xlu1 %v3838_v32, %s7677_s26  ;;  %v3690_v31 = vpop.permute.xlu2 %3689 }
 0x4f0   : > { %3768 = vst.msk [vmem:[#allocation4 + $0x48] sm:$0xf] %vm3749_vm1, %v3690_v31  ;;  %v3674_v33 = vpop.permute.xlu0 %3673  ;;  %v4018_v31 = vld [vmem:[#allocation3 + $0xb1] sm:$0xff] }
 0x4f1   : > { %v3682_v35 = vpop.permute.xlu1 %3681  ;;  %3760 = vst.msk [vmem:[#allocation4 + $0x28] sm:$0xf] %vm3749_vm1, %v3674_v33  ;;  %v4019_v33 = vld [vmem:[#allocation3 + $0xc1] sm:$0xff] }
 0x4f2   : > { %3764 = vst.msk [vmem:[#allocation4 + $0x38] sm:$0xf] %vm3749_vm1, %v3682_v35  ;;  %v4050_v35 = vpack.c.bf16 %v4018_v31, %v4018_v31 }
 0x4f5   : > { %3922 = vrot.lane.b32.xlu2 %v3836_v36, %s7677_s26  ;;  %v4051_v36 = vpack.c.bf16 %v4019_v33, %v4019_v33 }
 0x4f6   : > { %3924 = vrot.lane.b32.xlu0 %v3837_v37, %s7677_s26  ;;  %v4055_v37 = vpack.c.bf16 %v4023_v34, %v4023_v34 }
 0x4f7   : > { %3932 = vrot.lane.b32.xlu1 %v3841_v39, %s7677_s26  ;;  %v3696_v43 = vpop.permute.xlu2 %3695 }
 0x4f8   : > { %3771 = vst.msk [vmem:[#allocation4 + $0x54] sm:$0xf] %vm3749_vm1, %v3696_v43  ;;  %v3680_v45 = vpop.permute.xlu0 %3679  ;;  %v4021_v43 = vld [vmem:[#allocation3 + $0xd9] sm:$0xff] }
 0x4f9   : > { %v3688_v47 = vpop.permute.xlu1 %3687  ;;  %3763 = vst.msk [vmem:[#allocation4 + $0x34] sm:$0xf] %vm3749_vm1, %v3680_v45  ;;  %v4022_v45 = vld [vmem:[#allocation3 + $0xe1] sm:$0xff] }
 0x4fa   : > { %3767 = vst.msk [vmem:[#allocation4 + $0x44] sm:$0xf] %vm3749_vm1, %v3688_v47  ;;  %v4053_v47 = vpack.c.bf16 %v4021_v43, %v4021_v43 }
 0x4fd   : > { %3928 = vrot.lane.b32.xlu2 %v3839_v59, %s7677_s26  ;;  %v4054_v59 = vpack.c.bf16 %v4022_v45, %v4022_v45 }
 0x4fe   : > { %3930 = vrot.lane.b32.xlu0 %v3840_v48, %s7677_s26  ;;  %v4058_v48 = vpack.c.bf16 %v4026_v46, %v4026_v46 }
 0x4ff   : > { %3938 = vrot.lane.b32.xlu1 %v3844_v49, %s7677_s26  ;;  %v3702_v51 = vpop.permute.xlu2 %3701 }
 0x500   : > { %3774 = vst.msk [vmem:[#allocation4 + $0x60] sm:$0xf] %vm3749_vm1, %v3702_v51  ;;  %v3686_v53 = vpop.permute.xlu0 %3685  ;;  %v4024_v51 = vld [vmem:[#allocation3 + $0xf9] sm:$0xff] }
 0x501   : > { %v3694_v55 = vpop.permute.xlu1 %3693  ;;  %3766 = vst.msk [vmem:[#allocation4 + $0x40] sm:$0xf] %vm3749_vm1, %v3686_v53  ;;  %v4025_v53 = vld [vmem:[#allocation3 + $0x109] sm:$0xff] }
 0x502   : > { %3770 = vst.msk [vmem:[#allocation4 + $0x50] sm:$0xf] %vm3749_vm1, %v3694_v55  ;;  %v4029_v55 = vld [vmem:[#allocation3 + $0x139] sm:$0xff]  ;;  %v4057_v57 = vpack.c.bf16 %v4025_v53, %v4025_v53 }
 0x505   : > { %3934 = vrot.lane.b32.xlu2 %v3842_v56, %s7677_s26  ;;  %v4056_v56 = vpack.c.bf16 %v4024_v51, %v4024_v51 }
 0x506   : > { %3936 = vrot.lane.b32.xlu0 %v3843_v44, %s7677_s26  ;;  %v4061_v44 = vpack.c.bf16 %v4029_v55, %v4029_v55 }
 0x507   : > { %4105 = vrot.lane.b32.xlu1 %v4040_v58, %s7678_s28  ;;  %v3708_v61 = vpop.permute.xlu2 %3707 }
 0x508   : > { %3777 = vst.msk [vmem:[#allocation4 + $0x6c] sm:$0xf] %vm3749_vm1, %v3708_v61  ;;  %v3692_v2 = vpop.permute.xlu0 %3691  ;;  %v4027_v61 = vld [vmem:[#allocation3 + $0x121] sm:$0xff] }
 0x509   : > { %v3700_v15 = vpop.permute.xlu1 %3699  ;;  %3769 = vst.msk [vmem:[#allocation4 + $0x4c] sm:$0xf] %vm3749_vm1, %v3692_v2  ;;  %v4059_v0 = vpack.c.bf16 %v4027_v61, %v4027_v61 }
 0x50a   : > { %3773 = vst.msk [vmem:[#allocation4 + $0x5c] sm:$0xf] %vm3749_vm1, %v3700_v15  ;;  %v4028_v15 = vld [vmem:[#allocation3 + $0x129] sm:$0xff] }
 0x50b   : > { %v4060_v42 = vpack.c.bf16 %v4028_v15, %v4028_v15 }
 0x50d   : > { %3940 = vrot.lane.b32.xlu2 %v3845_v62, %s7677_s26  ;;  %v4032_v62 = vld [vmem:[#allocation3 + $0x159] sm:$0xff] }
 0x50e   : > { %4103 = vrot.lane.b32.xlu0 %v4039_v1, %s7678_s28  ;;  %v4064_v1 = vpack.c.bf16 %v4032_v62, %v4032_v62 }
 0x50f   : > { %4111 = vrot.lane.b32.xlu1 %v4043_v4, %s7678_s28  ;;  %v3714_v5 = vpop.permute.xlu2 %3713 }
 0x510   : > { %3780 = vst.msk [vmem:[#allocation4 + $0x78] sm:$0xf] %vm3749_vm1, %v3714_v5  ;;  %v3698_v54 = vpop.permute.xlu0 %3697 }
 0x511   : > { %v3706_v7 = vpop.permute.xlu1 %3705  ;;  %3772 = vst.msk [vmem:[#allocation4 + $0x58] sm:$0xf] %vm3749_vm1, %v3698_v54  ;;  %v4030_v54 = vld [vmem:[#allocation3 + $0x141] sm:$0xff] }
 0x512   : > { %3776 = vst.msk [vmem:[#allocation4 + $0x68] sm:$0xf] %vm3749_vm1, %v3706_v7  ;;  %v4031_v7 = vld [vmem:[#allocation3 + $0x151] sm:$0xff]  ;;  %v4062_v63 = vpack.c.bf16 %v4030_v54, %v4030_v54 }
 0x515   : > { %4107 = vrot.lane.b32.xlu2 %v4041_v10, %s7678_s28  ;;  %v4063_v10 = vpack.c.bf16 %v4031_v7, %v4031_v7 }
 0x516   : > { %4109 = vrot.lane.b32.xlu0 %v4042_v38, %s7678_s28  ;;  %v4067_v38 = vpack.c.bf16 %v4035_v8, %v4035_v8 }
 0x517   : > { %4117 = vrot.lane.b32.xlu1 %v4046_v11, %s7678_s28  ;;  %v3881_v12 = vpop.permute.xlu2 %3880 }
 0x518   : > { %3976 = vst.msk [vmem:[#allocation4 + $0x4] sm:$0xf] %vm3974_vm2, %v3881_v12  ;;  %v3704_v13 = vpop.permute.xlu0 %3703 }
 0x519   : > { %v3712_v17 = vpop.permute.xlu1 %3711  ;;  %3775 = vst.msk [vmem:[#allocation4 + $0x64] sm:$0xf] %vm3749_vm1, %v3704_v13  ;;  %v4033_v13 = vld [vmem:[#allocation3 + $0x169] sm:$0xff] }
 0x51a   : > { %3779 = vst.msk [vmem:[#allocation4 + $0x74] sm:$0xf] %vm3749_vm1, %v3712_v17  ;;  %v4065_v18 = vpack.c.bf16 %v4033_v13, %v4033_v13 }
 0x51d   : > { %4113 = vrot.lane.b32.xlu2 %v4044_v19, %s7678_s28  ;;  %v4070_v19 = vpack.c.bf16 %v4038_v16, %v4038_v16  ;;  %v4252_v16 = vld [vmem:[#allocation2 + $0x122] sm:$0xff] }
 0x51e   : > { %4115 = vrot.lane.b32.xlu0 %v4045_v20, %s7678_s28  ;;  %v4066_v20 = vpack.c.bf16 %v4034_v3, %v4034_v3 }
 0x51f   : > { %4123 = vrot.lane.b32.xlu1 %v4049_v21, %s7678_s28  ;;  %v3887_v22 = vpop.permute.xlu2 %3886 }
 0x520   : > { %3979 = vst.msk [vmem:[#allocation4 + $0x10] sm:$0xf] %vm3974_vm2, %v3887_v22  ;;  %v3710_v9 = vpop.permute.xlu0 %3709  ;;  %v4037_v22 = vld [vmem:[#allocation3 + $0x199] sm:$0xff] }
 0x521   : > { %v3879_v14 = vpop.permute.xlu1 %3878  ;;  %3778 = vst.msk [vmem:[#allocation4 + $0x70] sm:$0xf] %vm3749_vm1, %v3710_v9  ;;  %v4069_v27 = vpack.c.bf16 %v4037_v22, %v4037_v22  ;;  %v4251_v22 = vld [vmem:[#allocation2 + $0x112] sm:$0xff] }
 0x522   : > { %3975 = vst.msk [vmem:[#allocation4] sm:$0xf] %vm3974_vm2, %v3879_v14  ;;  %v4234_v14 = vld [vmem:[#allocation2 + $0x4a] sm:$0xff] }
 0x525   : > { %4119 = vrot.lane.b32.xlu2 %v4047_v28, %s7678_s28  ;;  %v4068_v28 = vpack.c.bf16 %v4036_v25, %v4036_v25  ;;  %v4255_v25 = vld [vmem:[#allocation2 + $0x142] sm:$0xff] }
 0x526   : > { %4121 = vrot.lane.b32.xlu0 %v4048_v23, %s7678_s28  ;;  %v4266_v23 = vpack.c.bf16 %v4234_v14, %v4234_v14 }
 0x527   : > { %4129 = vrot.lane.b32.xlu1 %v4052_v29, %s7678_s28  ;;  %v3893_v32 = vpop.permute.xlu2 %3892  ;;  %v4232_v29 = vld [vmem:[#allocation2 + $0x32] sm:$0xff] }
 0x528   : > { %3982 = vst.msk [vmem:[#allocation4 + $0x1c] sm:$0xf] %vm3974_vm2, %v3893_v32  ;;  %v3716_v30 = vpop.permute.xlu0 %3715  ;;  %v4264_v34 = vpack.c.bf16 %v4232_v29, %v4232_v29 }
 0x529   : > { %v3885_v41 = vpop.permute.xlu1 %3884  ;;  %3781 = vst.msk [vmem:[#allocation4 + $0x7c] sm:$0xf] %vm3749_vm1, %v3716_v30  ;;  %v4233_v30 = vld [vmem:[#allocation2 + $0x3a] sm:$0xff]  ;;  %vm4830_vm1 = vcmask 588800  }
 0x52a   : > { %3978 = vst.msk [vmem:[#allocation4 + $0xc] sm:$0xf] %vm3974_vm2, %v3885_v41  ;;  %v4237_v41 = vld [vmem:[#allocation2 + $0x6a] sm:$0xff] }
 0x52d   : > { %4125 = vrot.lane.b32.xlu2 %v4050_v35, %s7678_s28  ;;  %v4265_v35 = vpack.c.bf16 %v4233_v30, %v4233_v30 }
 0x52e   : > { %4127 = vrot.lane.b32.xlu0 %v4051_v36, %s7678_s28  ;;  %v4269_v36 = vpack.c.bf16 %v4237_v41, %v4237_v41 }
 0x52f   : > { %4135 = vrot.lane.b32.xlu1 %v4055_v37, %s7678_s28  ;;  %v3899_v39 = vpop.permute.xlu2 %3898  ;;  %v4235_v37 = vld [vmem:[#allocation2 + $0x52] sm:$0xff] }
 0x530   : > { %3985 = vst.msk [vmem:[#allocation4 + $0x28] sm:$0xf] %vm3974_vm2, %v3899_v39  ;;  %v3883_v40 = vpop.permute.xlu0 %3882  ;;  %v4267_v46 = vpack.c.bf16 %v4235_v37, %v4235_v37 }
 0x531   : > { %v3891_v24 = vpop.permute.xlu1 %3890  ;;  %3977 = vst.msk [vmem:[#allocation4 + $0x8] sm:$0xf] %vm3974_vm2, %v3883_v40  ;;  %v4236_v40 = vld [vmem:[#allocation2 + $0x62] sm:$0xff] }
 0x532   : > { %3981 = vst.msk [vmem:[#allocation4 + $0x18] sm:$0xf] %vm3974_vm2, %v3891_v24  ;;  %v4240_v24 = vld [vmem:[#allocation2 + $0x92] sm:$0xff] }
 0x535   : > { %4131 = vrot.lane.b32.xlu2 %v4053_v47, %s7678_s28  ;;  %v4268_v47 = vpack.c.bf16 %v4236_v40, %v4236_v40 }
 0x536   : > { %4133 = vrot.lane.b32.xlu0 %v4054_v59, %s7678_s28  ;;  %v4272_v59 = vpack.c.bf16 %v4240_v24, %v4240_v24 }
 0x537   : > { %4141 = vrot.lane.b32.xlu1 %v4058_v48, %s7678_s28  ;;  %v3905_v49 = vpop.permute.xlu2 %3904  ;;  %v4238_v48 = vld [vmem:[#allocation2 + $0x7a] sm:$0xff] }
 0x538   : > { %3988 = vst.msk [vmem:[#allocation4 + $0x34] sm:$0xf] %vm3974_vm2, %v3905_v49  ;;  %v3889_v50 = vpop.permute.xlu0 %3888  ;;  %v4270_v55 = vpack.c.bf16 %v4238_v48, %v4238_v48 }
 0x539   : > { %v3897_v52 = vpop.permute.xlu1 %3896  ;;  %3980 = vst.msk [vmem:[#allocation4 + $0x14] sm:$0xf] %vm3974_vm2, %v3889_v50  ;;  %v4239_v50 = vld [vmem:[#allocation2 + $0x82] sm:$0xff] }
 0x53a   : > { %3984 = vst.msk [vmem:[#allocation4 + $0x24] sm:$0xf] %vm3974_vm2, %v3897_v52  ;;  %v4243_v52 = vld [vmem:[#allocation2 + $0xb2] sm:$0xff] }
 0x53d   : > { %4137 = vrot.lane.b32.xlu2 %v4056_v56, %s7678_s28  ;;  %v4271_v56 = vpack.c.bf16 %v4239_v50, %v4239_v50 }
 0x53e   : > { %4139 = vrot.lane.b32.xlu0 %v4057_v57, %s7678_s28  ;;  %v4275_v57 = vpack.c.bf16 %v4243_v52, %v4243_v52 }
 0x53f   : > { %4147 = vrot.lane.b32.xlu1 %v4061_v44, %s7678_s28  ;;  %v3911_v58 = vpop.permute.xlu2 %3910  ;;  %v4241_v44 = vld [vmem:[#allocation2 + $0x9a] sm:$0xff] }
 0x540   : > { %3991 = vst.msk [vmem:[#allocation4 + $0x40] sm:$0xf] %vm3974_vm2, %v3911_v58  ;;  %v3895_v60 = vpop.permute.xlu0 %3894  ;;  %v4273_v62 = vpack.c.bf16 %v4241_v44, %v4241_v44 }
 0x541   : > { %v3903_v2 = vpop.permute.xlu1 %3902  ;;  %3983 = vst.msk [vmem:[#allocation4 + $0x20] sm:$0xf] %vm3974_vm2, %v3895_v60  ;;  %v4242_v60 = vld [vmem:[#allocation2 + $0xaa] sm:$0xff] }
 0x542   : > { %3987 = vst.msk [vmem:[#allocation4 + $0x30] sm:$0xf] %vm3974_vm2, %v3903_v2  ;;  %v4246_v2 = vld [vmem:[#allocation2 + $0xda] sm:$0xff] }
 0x545   : > { %4143 = vrot.lane.b32.xlu2 %v4059_v0, %s7678_s28  ;;  %v4274_v0 = vpack.c.bf16 %v4242_v60, %v4242_v60 }
 0x546   : > { %4145 = vrot.lane.b32.xlu0 %v4060_v42, %s7678_s28  ;;  %v4278_v42 = vpack.c.bf16 %v4246_v2, %v4246_v2 }
 0x547   : > { %4153 = vrot.lane.b32.xlu1 %v4064_v1, %s7678_s28  ;;  %v3917_v4 = vpop.permute.xlu2 %3916  ;;  %v4244_v1 = vld [vmem:[#allocation2 + $0xc2] sm:$0xff] }
 0x548   : > { %3994 = vst.msk [vmem:[#allocation4 + $0x4c] sm:$0xf] %vm3974_vm2, %v3917_v4  ;;  %v3901_v5 = vpop.permute.xlu0 %3900  ;;  %v4276_v8 = vpack.c.bf16 %v4244_v1, %v4244_v1 }
 0x549   : > { %v3909_v6 = vpop.permute.xlu1 %3908  ;;  %3986 = vst.msk [vmem:[#allocation4 + $0x2c] sm:$0xf] %vm3974_vm2, %v3901_v5  ;;  %v4245_v5 = vld [vmem:[#allocation2 + $0xca] sm:$0xff] }
 0x54a   : > { %3990 = vst.msk [vmem:[#allocation4 + $0x3c] sm:$0xf] %vm3974_vm2, %v3909_v6  ;;  %v4249_v6 = vld [vmem:[#allocation2 + $0xfa] sm:$0xff] }
 0x54d   : > { %4149 = vrot.lane.b32.xlu2 %v4062_v63, %s7678_s28  ;;  %v4277_v63 = vpack.c.bf16 %v4245_v5, %v4245_v5 }
 0x54e   : > { %4151 = vrot.lane.b32.xlu0 %v4063_v10, %s7678_s28  ;;  %v4281_v10 = vpack.c.bf16 %v4249_v6, %v4249_v6  ;;  %v4463_v6 = vld [vmem:[#allocation3 + $0x7a] sm:$0xff] }
 0x54f   : > { %4159 = vrot.lane.b32.xlu1 %v4067_v38, %s7678_s28  ;;  %v3923_v11 = vpop.permute.xlu2 %3922  ;;  %v4247_v38 = vld [vmem:[#allocation2 + $0xe2] sm:$0xff] }
 0x550   : > { %3997 = vst.msk [vmem:[#allocation4 + $0x58] sm:$0xf] %vm3974_vm2, %v3923_v11  ;;  %v3907_v12 = vpop.permute.xlu0 %3906  ;;  %v4279_v3 = vpack.c.bf16 %v4247_v38, %v4247_v38 }
 0x551   : > { %v3915_v17 = vpop.permute.xlu1 %3914  ;;  %3989 = vst.msk [vmem:[#allocation4 + $0x38] sm:$0xf] %vm3974_vm2, %v3907_v12  ;;  %v4248_v12 = vld [vmem:[#allocation2 + $0xf2] sm:$0xff] }
 0x552   : > { %3993 = vst.msk [vmem:[#allocation4 + $0x48] sm:$0xf] %vm3974_vm2, %v3915_v17 }
 0x555   : > { %4155 = vrot.lane.b32.xlu2 %v4065_v18, %s7678_s28  ;;  %v4280_v18 = vpack.c.bf16 %v4248_v12, %v4248_v12 }
 0x556   : > { %4157 = vrot.lane.b32.xlu0 %v4066_v20, %s7678_s28  ;;  %v4250_v20 = vld [vmem:[#allocation2 + $0x10a] sm:$0xff] }
 0x557   : > { %4165 = vrot.lane.b32.xlu1 %v4070_v19, %s7678_s28  ;;  %v3929_v21 = vpop.permute.xlu2 %3928  ;;  %v4284_v19 = vpack.c.bf16 %v4252_v16, %v4252_v16  ;;  %v4466_v16 = vld [vmem:[#allocation3 + $0x9a] sm:$0xff] }
 0x558   : > { %4000 = vst.msk [vmem:[#allocation4 + $0x64] sm:$0xf] %vm3974_vm2, %v3929_v21  ;;  %v3913_v9 = vpop.permute.xlu0 %3912 }
 0x559   : > { %v3921_v26 = vpop.permute.xlu1 %3920  ;;  %3992 = vst.msk [vmem:[#allocation4 + $0x44] sm:$0xf] %vm3974_vm2, %v3913_v9 }
 0x55a   : > { %3996 = vst.msk [vmem:[#allocation4 + $0x54] sm:$0xf] %vm3974_vm2, %v3921_v26  ;;  %v4282_v26 = vpack.c.bf16 %v4250_v20, %v4250_v20 }
 0x55d   : > { %4161 = vrot.lane.b32.xlu2 %v4068_v28, %s7678_s28  ;;  %v4287_v28 = vpack.c.bf16 %v4255_v25, %v4255_v25  ;;  %v4469_v25 = vld [vmem:[#allocation3 + $0xc2] sm:$0xff] }
 0x55e   : > { %4163 = vrot.lane.b32.xlu0 %v4069_v27, %s7678_s28  ;;  %v4283_v27 = vpack.c.bf16 %v4251_v22, %v4251_v22  ;;  %s10304_s28 = scalar_lea.vmem %s10440_s8, %s7875_s14 }
 0x55f   : > { %4332 = vrot.lane.b32.xlu1 %v4266_v23, %s7679_s29  ;;  %v3935_v32 = vpop.permute.xlu2 %3934  ;;  %v4253_v23 = vld [vmem:[#allocation2 + $0x12a] sm:$0xff] }
 0x560   : > { %4003 = vst.msk [vmem:[#allocation4 + $0x70] sm:$0xf] %vm3974_vm2, %v3935_v32  ;;  %v3919_v31 = vpop.permute.xlu0 %3918  ;;  %v4254_v32 = vld [vmem:[#allocation2 + $0x13a] sm:$0xff] }
 0x561   : > { %v3927_v33 = vpop.permute.xlu1 %3926  ;;  %3995 = vst.msk [vmem:[#allocation4 + $0x50] sm:$0xf] %vm3974_vm2, %v3919_v31  ;;  %v4258_v31 = vld [vmem:[#allocation2 + $0x16a] sm:$0xff] }
 0x562   : > { %3999 = vst.msk [vmem:[#allocation4 + $0x60] sm:$0xf] %vm3974_vm2, %v3927_v33  ;;  %v4285_v33 = vpack.c.bf16 %v4253_v23, %v4253_v23 }
 0x565   : > { %4328 = vrot.lane.b32.xlu2 %v4264_v34, %s7679_s29  ;;  %v4286_v34 = vpack.c.bf16 %v4254_v32, %v4254_v32 }
 0x566   : > { %4330 = vrot.lane.b32.xlu0 %v4265_v35, %s7679_s29  ;;  %v4290_v35 = vpack.c.bf16 %v4258_v31, %v4258_v31  ;;  %v4472_v31 = vld [vmem:[#allocation3 + $0xe2] sm:$0xff] }
 0x567   : > { %4338 = vrot.lane.b32.xlu1 %v4269_v36, %s7679_s29  ;;  %v3941_v39 = vpop.permute.xlu2 %3940  ;;  %v4256_v36 = vld [vmem:[#allocation2 + $0x152] sm:$0xff] }
 0x568   : > { %4006 = vst.msk [vmem:[#allocation4 + $0x7c] sm:$0xf] %vm3974_vm2, %v3941_v39  ;;  %v3925_v43 = vpop.permute.xlu0 %3924  ;;  %v4257_v39 = vld [vmem:[#allocation2 + $0x15a] sm:$0xff] }
 0x569   : > { %v3933_v45 = vpop.permute.xlu1 %3932  ;;  %3998 = vst.msk [vmem:[#allocation4 + $0x5c] sm:$0xf] %vm3974_vm2, %v3925_v43  ;;  %v4261_v43 = vld [vmem:[#allocation2 + $0x18a] sm:$0xff] }
 0x56a   : > { %4002 = vst.msk [vmem:[#allocation4 + $0x6c] sm:$0xf] %vm3974_vm2, %v3933_v45  ;;  %v4288_v45 = vpack.c.bf16 %v4256_v36, %v4256_v36 }
 0x56d   : > { %4334 = vrot.lane.b32.xlu2 %v4267_v46, %s7679_s29  ;;  %v4289_v46 = vpack.c.bf16 %v4257_v39, %v4257_v39 }
 0x56e   : > { %4336 = vrot.lane.b32.xlu0 %v4268_v47, %s7679_s29  ;;  %v4293_v47 = vpack.c.bf16 %v4261_v43, %v4261_v43  ;;  %v4475_v43 = vld [vmem:[#allocation3 + $0x10a] sm:$0xff] }
 0x56f   : > { %4344 = vrot.lane.b32.xlu1 %v4272_v59, %s7679_s29  ;;  %v4108_v49 = vpop.permute.xlu2 %4107  ;;  %v4259_v59 = vld [vmem:[#allocation2 + $0x172] sm:$0xff] }
 0x570   : > { %4202 = vst.msk [vmem:[#allocation4 + $0x8] sm:$0xf] %vm4199_vm12, %v4108_v49  ;;  %v3931_v51 = vpop.permute.xlu0 %3930  ;;  %v4260_v49 = vld [vmem:[#allocation2 + $0x182] sm:$0xff]  ;;  %v4291_v52 = vpack.c.bf16 %v4259_v59, %v4259_v59 }
 0x571   : > { %v3939_v53 = vpop.permute.xlu1 %3938  ;;  %4001 = vst.msk [vmem:[#allocation4 + $0x68] sm:$0xf] %vm3974_vm2, %v3931_v51 }
 0x572   : > { %4005 = vst.msk [vmem:[#allocation4 + $0x78] sm:$0xf] %vm3974_vm2, %v3939_v53  ;;  %v4457_v53 = vld [vmem:[#allocation3 + $0x32] sm:$0xff] }
 0x575   : > { %4340 = vrot.lane.b32.xlu2 %v4270_v55, %s7679_s29  ;;  %v4292_v55 = vpack.c.bf16 %v4260_v49, %v4260_v49 }
 0x576   : > { %4342 = vrot.lane.b32.xlu0 %v4271_v56, %s7679_s29  ;;  %v4489_v56 = vpack.c.bf16 %v4457_v53, %v4457_v53 }
 0x577   : > { %4350 = vrot.lane.b32.xlu1 %v4275_v57, %s7679_s29  ;;  %v4114_v58 = vpop.permute.xlu2 %4113  ;;  %v4262_v57 = vld [vmem:[#allocation2 + $0x19a] sm:$0xff] }
 0x578   : > { %4205 = vst.msk [vmem:[#allocation4 + $0x14] sm:$0xf] %vm4199_vm12, %v4114_v58  ;;  %v3937_v61 = vpop.permute.xlu0 %3936  ;;  %v4263_v58 = vld [vmem:[#allocation2 + $0x1a2] sm:$0xff]  ;;  %v4294_v2 = vpack.c.bf16 %v4262_v57, %v4262_v57 }
 0x579   : > { %v4106_v15 = vpop.permute.xlu1 %4105  ;;  %4004 = vst.msk [vmem:[#allocation4 + $0x74] sm:$0xf] %vm3974_vm2, %v3937_v61 }
 0x57a   : > { %4201 = vst.msk [vmem:[#allocation4 + $0x4] sm:$0xf] %vm4199_vm12, %v4106_v15  ;;  %v4460_v15 = vld [vmem:[#allocation3 + $0x52] sm:$0xff] }
 0x57d   : > { %4346 = vrot.lane.b32.xlu2 %v4273_v62, %s7679_s29  ;;  %v4295_v62 = vpack.c.bf16 %v4263_v58, %v4263_v58 }
 0x57e   : > { %4348 = vrot.lane.b32.xlu0 %v4274_v0, %s7679_s29  ;;  %v4492_v0 = vpack.c.bf16 %v4460_v15, %v4460_v15 }
 0x57f   : > { %4356 = vrot.lane.b32.xlu1 %v4278_v42, %s7679_s29  ;;  %v4120_v4 = vpop.permute.xlu2 %4119 }
 0x580   : > { %4208 = vst.msk [vmem:[#allocation4 + $0x20] sm:$0xf] %vm4199_vm12, %v4120_v4  ;;  %v4104_v54 = vpop.permute.xlu0 %4103  ;;  %v4458_v4 = vld [vmem:[#allocation3 + $0x3a] sm:$0xff] }
 0x581   : > { %v4112_v7 = vpop.permute.xlu1 %4111  ;;  %4200 = vst.msk [vmem:[#allocation4] sm:$0xf] %vm4199_vm12, %v4104_v54  ;;  %v4459_v54 = vld [vmem:[#allocation3 + $0x4a] sm:$0xff] }
 0x582   : > { %4204 = vst.msk [vmem:[#allocation4 + $0x10] sm:$0xf] %vm4199_vm12, %v4112_v7  ;;  %v4490_v7 = vpack.c.bf16 %v4458_v4, %v4458_v4 }
 0x585   : > { %4352 = vrot.lane.b32.xlu2 %v4276_v8, %s7679_s29  ;;  %v4491_v8 = vpack.c.bf16 %v4459_v54, %v4459_v54  ;;  %v4484_v54 = vld [vmem:[#allocation3 + $0x172] sm:$0xff] }
 0x586   : > { %4354 = vrot.lane.b32.xlu0 %v4277_v63, %s7679_s29  ;;  %v4495_v63 = vpack.c.bf16 %v4463_v6, %v4463_v6  ;;  %v4722_v6 = vld [vmem:[%s10436_s4 + $0x20] sm:$0xf] }
 0x587   : > { %4362 = vrot.lane.b32.xlu1 %v4281_v10, %s7679_s29  ;;  %v4126_v11 = vpop.permute.xlu2 %4125 }
 0x588   : > { %4211 = vst.msk [vmem:[#allocation4 + $0x2c] sm:$0xf] %vm4199_vm12, %v4126_v11  ;;  %v4110_v13 = vpop.permute.xlu0 %4109  ;;  %v4461_v11 = vld [vmem:[#allocation3 + $0x62] sm:$0xff] }
 0x589   : > { %v4118_v17 = vpop.permute.xlu1 %4117  ;;  %4203 = vst.msk [vmem:[#allocation4 + $0xc] sm:$0xf] %vm4199_vm12, %v4110_v13  ;;  %v4462_v13 = vld [vmem:[#allocation3 + $0x6a] sm:$0xff] }
 0x58a   : > { %4207 = vst.msk [vmem:[#allocation4 + $0x1c] sm:$0xf] %vm4199_vm12, %v4118_v17  ;;  %v4493_v17 = vpack.c.bf16 %v4461_v11, %v4461_v11 }
 0x58d   : > { %4358 = vrot.lane.b32.xlu2 %v4279_v3, %s7679_s29  ;;  %v4494_v3 = vpack.c.bf16 %v4462_v13, %v4462_v13 }
 0x58e   : > { %4360 = vrot.lane.b32.xlu0 %v4280_v18, %s7679_s29  ;;  %v4498_v18 = vpack.c.bf16 %v4466_v16, %v4466_v16  ;;  %v4482_v16 = vld [vmem:[#allocation3 + $0x15a] sm:$0xff] }
 0x58f   : > { %4368 = vrot.lane.b32.xlu1 %v4284_v19, %s7679_s29  ;;  %v4132_v21 = vpop.permute.xlu2 %4131 }
 0x590   : > { %4214 = vst.msk [vmem:[#allocation4 + $0x38] sm:$0xf] %vm4199_vm12, %v4132_v21  ;;  %v4116_v9 = vpop.permute.xlu0 %4115  ;;  %v4464_v21 = vld [vmem:[#allocation3 + $0x82] sm:$0xff] }
 0x591   : > { %v4124_v14 = vpop.permute.xlu1 %4123  ;;  %4206 = vst.msk [vmem:[#allocation4 + $0x18] sm:$0xf] %vm4199_vm12, %v4116_v9  ;;  %v4465_v9 = vld [vmem:[#allocation3 + $0x92] sm:$0xff] }
 0x592   : > { %4210 = vst.msk [vmem:[#allocation4 + $0x28] sm:$0xf] %vm4199_vm12, %v4124_v14  ;;  %v4496_v14 = vpack.c.bf16 %v4464_v21, %v4464_v21 }
 0x595   : > { %4364 = vrot.lane.b32.xlu2 %v4282_v26, %s7679_s29  ;;  %v4497_v26 = vpack.c.bf16 %v4465_v9, %v4465_v9  ;;  %v7588_v9 = vld [vmem:[%s10436_s4 + $0x18] sm:$0xff] }
 0x596   : > { %4366 = vrot.lane.b32.xlu0 %v4283_v27, %s7679_s29  ;;  %v4501_v27 = vpack.c.bf16 %v4469_v25, %v4469_v25 }
 0x597   : > { %4374 = vrot.lane.b32.xlu1 %v4287_v28, %s7679_s29  ;;  %v4138_v29 = vpop.permute.xlu2 %4137 }
 0x598   : > { %4217 = vst.msk [vmem:[#allocation4 + $0x44] sm:$0xf] %vm4199_vm12, %v4138_v29  ;;  %v4122_v30 = vpop.permute.xlu0 %4121  ;;  %v4467_v29 = vld [vmem:[#allocation3 + $0xaa] sm:$0xff] }
 0x599   : > { %v4130_v41 = vpop.permute.xlu1 %4129  ;;  %4209 = vst.msk [vmem:[#allocation4 + $0x24] sm:$0xf] %vm4199_vm12, %v4122_v30  ;;  %v4468_v30 = vld [vmem:[#allocation3 + $0xb2] sm:$0xff] }
 0x59a   : > { %4213 = vst.msk [vmem:[#allocation4 + $0x34] sm:$0xf] %vm4199_vm12, %v4130_v41  ;;  %v4499_v41 = vpack.c.bf16 %v4467_v29, %v4467_v29 }
 0x59d   : > { %4370 = vrot.lane.b32.xlu2 %v4285_v33, %s7679_s29  ;;  %v4500_v33 = vpack.c.bf16 %v4468_v30, %v4468_v30  ;;  %v7586_v30 = vld [vmem:[%s10436_s4 + $0x8] sm:$0xff] }
 0x59e   : > { %4372 = vrot.lane.b32.xlu0 %v4286_v34, %s7679_s29  ;;  %v4504_v34 = vpack.c.bf16 %v4472_v31, %v4472_v31  ;;  %v7585_v31 = vld [vmem:[%s10436_s4] sm:$0xff] }
 0x59f   : > { %4380 = vrot.lane.b32.xlu1 %v4290_v35, %s7679_s29  ;;  %v4144_v37 = vpop.permute.xlu2 %4143 }
 0x5a0   : > { %4220 = vst.msk [vmem:[#allocation4 + $0x50] sm:$0xf] %vm4199_vm12, %v4144_v37  ;;  %v4128_v40 = vpop.permute.xlu0 %4127  ;;  %v4470_v37 = vld [vmem:[#allocation3 + $0xca] sm:$0xff] }
 0x5a1   : > { %v4136_v24 = vpop.permute.xlu1 %4135  ;;  %4212 = vst.msk [vmem:[#allocation4 + $0x30] sm:$0xf] %vm4199_vm12, %v4128_v40  ;;  %v4471_v40 = vld [vmem:[#allocation3 + $0xda] sm:$0xff] }
 0x5a2   : > { %4216 = vst.msk [vmem:[#allocation4 + $0x40] sm:$0xf] %vm4199_vm12, %v4136_v24  ;;  %v4502_v24 = vpack.c.bf16 %v4470_v37, %v4470_v37  ;;  %v5109_v37 = vld [vmem:[#allocation3 + $0x8] sm:$0xff] }
 0x5a5   : > { %4376 = vrot.lane.b32.xlu2 %v4288_v45, %s7679_s29  ;;  %v4503_v45 = vpack.c.bf16 %v4471_v40, %v4471_v40  ;;  %v5141_v40 = vpack.c.bf16 %v5109_v37, %v5109_v37 }
 0x5a6   : > { %4378 = vrot.lane.b32.xlu0 %v4289_v46, %s7679_s29  ;;  %v4507_v46 = vpack.c.bf16 %v4475_v43, %v4475_v43 }
 0x5a7   : > { %4386 = vrot.lane.b32.xlu1 %v4293_v47, %s7679_s29  ;;  %v4150_v48 = vpop.permute.xlu2 %4149 }
 0x5a8   : > { %4223 = vst.msk [vmem:[#allocation4 + $0x5c] sm:$0xf] %vm4199_vm12, %v4150_v48  ;;  %v4134_v50 = vpop.permute.xlu0 %4133  ;;  %v4473_v48 = vld [vmem:[#allocation3 + $0xf2] sm:$0xff] }
 0x5a9   : > { %v4142_v51 = vpop.permute.xlu1 %4141  ;;  %4215 = vst.msk [vmem:[#allocation4 + $0x3c] sm:$0xf] %vm4199_vm12, %v4134_v50  ;;  %v4474_v50 = vld [vmem:[#allocation3 + $0xfa] sm:$0xff] }
 0x5aa   : > { %4219 = vst.msk [vmem:[#allocation4 + $0x4c] sm:$0xf] %vm4199_vm12, %v4142_v51  ;;  %v4478_v51 = vld [vmem:[#allocation3 + $0x12a] sm:$0xff]  ;;  %v4506_v53 = vpack.c.bf16 %v4474_v50, %v4474_v50 }
 0x5ad   : > { %4382 = vrot.lane.b32.xlu2 %v4291_v52, %s7679_s29  ;;  %v4505_v52 = vpack.c.bf16 %v4473_v48, %v4473_v48 }
 0x5ae   : > { %4384 = vrot.lane.b32.xlu0 %v4292_v55, %s7679_s29  ;;  %v4510_v55 = vpack.c.bf16 %v4478_v51, %v4478_v51 }
 0x5af   : > { %4553 = vrot.lane.b32.xlu1 %v4489_v56, %s7680_s15  ;;  %v4156_v44 = vpop.permute.xlu2 %4155 }
 0x5b0   : > { %4226 = vst.msk [vmem:[#allocation4 + $0x68] sm:$0xf] %vm4199_vm12, %v4156_v44  ;;  %v4140_v60 = vpop.permute.xlu0 %4139  ;;  %v4476_v44 = vld [vmem:[#allocation3 + $0x112] sm:$0xff] }
 0x5b1   : > { %v4148_v61 = vpop.permute.xlu1 %4147  ;;  %4218 = vst.msk [vmem:[#allocation4 + $0x48] sm:$0xf] %vm4199_vm12, %v4140_v60  ;;  %v4477_v60 = vld [vmem:[#allocation3 + $0x122] sm:$0xff] }
 0x5b2   : > { %4222 = vst.msk [vmem:[#allocation4 + $0x58] sm:$0xf] %vm4199_vm12, %v4148_v61  ;;  %v4481_v61 = vld [vmem:[#allocation3 + $0x152] sm:$0xff]  ;;  %v4509_v15 = vpack.c.bf16 %v4477_v60, %v4477_v60 }
 0x5b5   : > { %4388 = vrot.lane.b32.xlu2 %v4294_v2, %s7679_s29  ;;  %v4508_v2 = vpack.c.bf16 %v4476_v44, %v4476_v44 }
 0x5b6   : > { %4390 = vrot.lane.b32.xlu0 %v4295_v62, %s7679_s29  ;;  %v4513_v62 = vpack.c.bf16 %v4481_v61, %v4481_v61 }
 0x5b7   : > { %4559 = vrot.lane.b32.xlu1 %v4492_v0, %s7680_s15  ;;  %v4162_v42 = vpop.permute.xlu2 %4161 }
 0x5b8   : > { %4229 = vst.msk [vmem:[#allocation4 + $0x74] sm:$0xf] %vm4199_vm12, %v4162_v42  ;;  %v4146_v1 = vpop.permute.xlu0 %4145 }
 0x5b9   : > { %v4154_v5 = vpop.permute.xlu1 %4153  ;;  %4221 = vst.msk [vmem:[#allocation4 + $0x54] sm:$0xf] %vm4199_vm12, %v4146_v1  ;;  %v4479_v1 = vld [vmem:[#allocation3 + $0x13a] sm:$0xff] }
 0x5ba   : > { %4225 = vst.msk [vmem:[#allocation4 + $0x64] sm:$0xf] %vm4199_vm12, %v4154_v5  ;;  %v4480_v5 = vld [vmem:[#allocation3 + $0x142] sm:$0xff] }
 0x5bd   : > { %4555 = vrot.lane.b32.xlu2 %v4490_v7, %s7680_s15  ;;  %v4511_v7 = vpack.c.bf16 %v4479_v1, %v4479_v1 }
 0x5be   : > { %4557 = vrot.lane.b32.xlu0 %v4491_v8, %s7680_s15  ;;  %v4820_v8 = vunpack.c.l.b16 %v4722_v6 }
 0x5bf   : > { %4565 = vrot.lane.b32.xlu1 %v4495_v63, %s7680_s15  ;;  %v4329_v10 = vpop.permute.xlu2 %4328  ;;  %v4512_v63 = vpack.c.bf16 %v4480_v5, %v4480_v5 }
 0x5c0   : > { %4425 = vst.msk [vmem:[#allocation4] sm:$0xf] %vm4424_vm13, %v4329_v10  ;;  %v4152_v38 = vpop.permute.xlu0 %4151  ;;  %v4516_v10 = vpack.c.bf16 %v4484_v54, %v4484_v54 }
 0x5c1   : > { %v4160_v12 = vpop.permute.xlu1 %4159  ;;  %4224 = vst.msk [vmem:[#allocation4 + $0x60] sm:$0xf] %vm4199_vm12, %v4152_v38  ;;  %v4825_v38 = vpack.c.b16 %v4820_v8, %v4820_v8 }
 0x5c2   : > { %4228 = vst.msk [vmem:[#allocation4 + $0x70] sm:$0xf] %vm4199_vm12, %v4160_v12 }
 0x5c3   : > { %v4881_v12 = vsel %vm4879_vm14, %v4825_v38, 0 }
 0x5c4   : > { %4886 = vmatpush.bf16.msra.mxu0 %v4881_v12  ;;  %7607 = vmatpush.bf16.msra.mxu2 %v4881_v12 }
 0x5c5   : > { %4561 = vrot.lane.b32.xlu2 %v4493_v17, %s7680_s15 }
 0x5c6   : > { %4563 = vrot.lane.b32.xlu0 %v4494_v3, %s7680_s15  ;;  %v4483_v3 = vld [vmem:[#allocation3 + $0x16a] sm:$0xff] }
 0x5c7   : > { %4571 = vrot.lane.b32.xlu1 %v4498_v18, %s7680_s15  ;;  %v4335_v19 = vpop.permute.xlu2 %4334  ;;  %v4514_v18 = vpack.c.bf16 %v4482_v16, %v4482_v16 }
 0x5c8   : > { %4428 = vst.msk [vmem:[#allocation4 + $0xc] sm:$0xf] %vm4424_vm13, %v4335_v19  ;;  %v4158_v20 = vpop.permute.xlu0 %4157  ;;  %v4515_v19 = vpack.c.bf16 %v4483_v3, %v4483_v3  ;;  %4887 = vmatpush.bf16.msra.mxu0 %v7588_v9  ;;  %7608 = vmatpush.bf16.msra.mxu2 %v7588_v9 }
 0x5c9   : > { %v4166_v22 = vpop.permute.xlu1 %4165  ;;  %4227 = vst.msk [vmem:[#allocation4 + $0x6c] sm:$0xf] %vm4199_vm12, %v4158_v20 }
 0x5ca   : > { %4231 = vst.msk [vmem:[#allocation4 + $0x7c] sm:$0xf] %vm4199_vm12, %v4166_v22  ;;  %v4485_v22 = vld [vmem:[#allocation3 + $0x182] sm:$0xff] }
 0x5cd   : > { %4567 = vrot.lane.b32.xlu2 %v4496_v14, %s7680_s15  ;;  %v4486_v14 = vld [vmem:[#allocation3 + $0x18a] sm:$0xff] }
 0x5ce   : > { %4569 = vrot.lane.b32.xlu0 %v4497_v26, %s7680_s15  ;;  %v7587_v26 = vld [vmem:[%s10436_s4 + $0x10] sm:$0xff] }
 0x5cf   : > { %4577 = vrot.lane.b32.xlu1 %v4501_v27, %s7680_s15  ;;  %v4341_v28 = vpop.permute.xlu2 %4340  ;;  %v4517_v27 = vpack.c.bf16 %v4485_v22, %v4485_v22  ;;  %4888 = vmatpush.bf16.msra.mxu0 %v7587_v26 }
 0x5d0   : > { %4431 = vst.msk [vmem:[#allocation4 + $0x18] sm:$0xf] %vm4424_vm13, %v4341_v28  ;;  %v4164_v23 = vpop.permute.xlu0 %4163  ;;  %v4518_v28 = vpack.c.bf16 %v4486_v14, %v4486_v14  ;;  %7609 = vmatpush.bf16.msra.mxu2 %v7587_v26 }
 0x5d1   : > { %v4333_v32 = vpop.permute.xlu1 %4332  ;;  %4230 = vst.msk [vmem:[#allocation4 + $0x78] sm:$0xf] %vm4199_vm12, %v4164_v23 }
 0x5d2   : > { %4427 = vst.msk [vmem:[#allocation4 + $0x8] sm:$0xf] %vm4424_vm13, %v4333_v32 }
 0x5d3   : > { %4889 = vmatpush.bf16.msra.mxu0 %v7586_v30 }
 0x5d4   : > { %7610 = vmatpush.bf16.msra.mxu2 %v7586_v30  ;;  %v9403_v30 = vld [vmem:[%s10437_s5] ss:$0 sm:$0xff] }
 0x5d5   : > { %4573 = vrot.lane.b32.xlu2 %v4499_v41, %s7680_s15 }
 0x5d6   : > { %4575 = vrot.lane.b32.xlu0 %v4500_v33, %s7680_s15 }
 0x5d7   : > { %4583 = vrot.lane.b32.xlu1 %v4504_v34, %s7680_s15  ;;  %v4347_v35 = vpop.permute.xlu2 %4346  ;;  %4890 = vmatpush.bf16.msra.mxu0 %v7585_v31 }
 0x5d8   : > { %4434 = vst.msk [vmem:[#allocation4 + $0x24] sm:$0xf] %vm4424_vm13, %v4347_v35  ;;  %v4331_v36 = vpop.permute.xlu0 %4330  ;;  %7611 = vmatpush.bf16.msra.mxu2 %v7585_v31  ;;  %v9408_v31 = vld [vmem:[%s10438_s6] ss:$0 sm:$0xff] }
 0x5d9   : > { %v4339_v39 = vpop.permute.xlu1 %4338  ;;  %4426 = vst.msk [vmem:[#allocation4 + $0x4] sm:$0xf] %vm4424_vm13, %v4331_v36 }
 0x5da   : > { %4430 = vst.msk [vmem:[#allocation4 + $0x14] sm:$0xf] %vm4424_vm13, %v4339_v39 }
 0x5dd   : > { %4579 = vrot.lane.b32.xlu2 %v4502_v24, %s7680_s15 }
 0x5de   : > { %4581 = vrot.lane.b32.xlu0 %v4503_v45, %s7680_s15 }
 0x5df   : > { %4589 = vrot.lane.b32.xlu1 %v4507_v46, %s7680_s15  ;;  %v4353_v47 = vpop.permute.xlu2 %4352 }
 0x5e0   : > { %4437 = vst.msk [vmem:[#allocation4 + $0x30] sm:$0xf] %vm4424_vm13, %v4353_v47  ;;  %v4337_v59 = vpop.permute.xlu0 %4336  ;;  %v5108_v47 = vld [vmem:[#allocation3] sm:$0xff] }
 0x5e1   : > { %v4345_v49 = vpop.permute.xlu1 %4344  ;;  %4429 = vst.msk [vmem:[#allocation4 + $0x10] sm:$0xf] %vm4424_vm13, %v4337_v59  ;;  %v5140_v59 = vpack.c.bf16 %v5108_v47, %v5108_v47 }
 0x5e2   : > { %4433 = vst.msk [vmem:[#allocation4 + $0x20] sm:$0xf] %vm4424_vm13, %v4345_v49 }
 0x5e5   : > { %4585 = vrot.lane.b32.xlu2 %v4505_v52, %s7680_s15 }
 0x5e6   : > { %4587 = vrot.lane.b32.xlu0 %v4506_v53, %s7680_s15 }
 0x5e7   : > { %4595 = vrot.lane.b32.xlu1 %v4510_v55, %s7680_s15  ;;  %v4359_v56 = vpop.permute.xlu2 %4358 }
 0x5e8   : > { %4440 = vst.msk [vmem:[#allocation4 + $0x3c] sm:$0xf] %vm4424_vm13, %v4359_v56  ;;  %v4343_v57 = vpop.permute.xlu0 %4342 }
 0x5e9   : > { %v4351_v58 = vpop.permute.xlu1 %4350  ;;  %4432 = vst.msk [vmem:[#allocation4 + $0x1c] sm:$0xf] %vm4424_vm13, %v4343_v57 }
 0x5ea   : > { %4436 = vst.msk [vmem:[#allocation4 + $0x2c] sm:$0xf] %vm4424_vm13, %v4351_v58 }
 0x5ed   : > { %4591 = vrot.lane.b32.xlu2 %v4508_v2, %s7680_s15 }
 0x5ee   : > { %4593 = vrot.lane.b32.xlu0 %v4509_v15, %s7680_s15 }
 0x5ef   : > { %4601 = vrot.lane.b32.xlu1 %v4513_v62, %s7680_s15  ;;  %v4365_v0 = vpop.permute.xlu2 %4364 }
 0x5f0   : > { %4443 = vst.msk [vmem:[#allocation4 + $0x48] sm:$0xf] %vm4424_vm13, %v4365_v0  ;;  %v4349_v42 = vpop.permute.xlu0 %4348 }
 0x5f1   : > { %v4357_v4 = vpop.permute.xlu1 %4356  ;;  %4435 = vst.msk [vmem:[#allocation4 + $0x28] sm:$0xf] %vm4424_vm13, %v4349_v42 }
 0x5f2   : > { %4439 = vst.msk [vmem:[#allocation4 + $0x38] sm:$0xf] %vm4424_vm13, %v4357_v4 }
 0x5f5   : > { %4597 = vrot.lane.b32.xlu2 %v4511_v7, %s7680_s15 }
 0x5f6   : > { %4599 = vrot.lane.b32.xlu0 %v4512_v63, %s7680_s15 }
 0x5f7   : > { %4607 = vrot.lane.b32.xlu1 %v4516_v10, %s7680_s15  ;;  %v4371_v11 = vpop.permute.xlu2 %4370 }
 0x5f8   : > { %4446 = vst.msk [vmem:[#allocation4 + $0x54] sm:$0xf] %vm4424_vm13, %v4371_v11  ;;  %v4355_v13 = vpop.permute.xlu0 %4354 }
 0x5f9   : > { %v4363_v17 = vpop.permute.xlu1 %4362  ;;  %4438 = vst.msk [vmem:[#allocation4 + $0x34] sm:$0xf] %vm4424_vm13, %v4355_v13 }
 0x5fa   : > { %4442 = vst.msk [vmem:[#allocation4 + $0x44] sm:$0xf] %vm4424_vm13, %v4363_v17 }
 0x5fd   : > { %4603 = vrot.lane.b32.xlu2 %v4514_v18, %s7680_s15 }
 0x5fe   : > { %4605 = vrot.lane.b32.xlu0 %v4515_v19, %s7680_s15 }
 0x5ff   : > { %v4377_v20 = vpop.permute.xlu2 %4376 }
 0x600   : > { %4449 = vst.msk [vmem:[#allocation4 + $0x60] sm:$0xf] %vm4424_vm13, %v4377_v20  ;;  %v4361_v21 = vpop.permute.xlu0 %4360 }
 0x601   : > { %v4369_v25 = vpop.permute.xlu1 %4368  ;;  %4441 = vst.msk [vmem:[#allocation4 + $0x40] sm:$0xf] %vm4424_vm13, %v4361_v21 }
 0x602   : > { %4445 = vst.msk [vmem:[#allocation4 + $0x50] sm:$0xf] %vm4424_vm13, %v4369_v25  ;;  %v4488_v25 = vld [vmem:[#allocation3 + $0x1a2] sm:$0xff] }
 0x603   : > { %v4520_v14 = vpack.c.bf16 %v4488_v25, %v4488_v25 }
 0x605   : > { %4609 = vrot.lane.b32.xlu2 %v4517_v27, %s7680_s15 }
 0x606   : > { %4611 = vrot.lane.b32.xlu0 %v4518_v28, %s7680_s15  ;;  %v4487_v28 = vld [vmem:[#allocation3 + $0x19a] sm:$0xff] }
 0x607   : > { %v4383_v23 = vpop.permute.xlu2 %4382 }
 0x608   : > { %4452 = vst.msk [vmem:[#allocation4 + $0x6c] sm:$0xf] %vm4424_vm13, %v4383_v23  ;;  %v4367_v29 = vpop.permute.xlu0 %4366  ;;  %v5204_v23 = vld [vmem:[#allocation3 + $0x1] sm:$0xff] }
 0x609   : > { %v4375_v32 = vpop.permute.xlu1 %4374  ;;  %4444 = vst.msk [vmem:[#allocation4 + $0x4c] sm:$0xf] %vm4424_vm13, %v4367_v29  ;;  %v4519_v29 = vpack.c.bf16 %v4487_v28, %v4487_v28 }
 0x60a   : > { %4448 = vst.msk [vmem:[#allocation4 + $0x5c] sm:$0xf] %vm4424_vm13, %v4375_v32  ;;  %v5236_v32 = vpack.c.bf16 %v5204_v23, %v5204_v23 }
 0x60b   : > { %4613 = vrot.lane.b32.xlu1 %v4519_v29, %s7680_s15 }
 0x60d   : > { %4615 = vrot.lane.b32.xlu2 %v4520_v14, %s7680_s15 }
 0x60e   : > { %5300 = vrot.lane.b32.xlu0 %v5236_v32, %s7664_s12 }
 0x60f   : > { %v4389_v41 = vpop.permute.xlu2 %4388 }
 0x610   : > { %4455 = vst.msk [vmem:[#allocation4 + $0x78] sm:$0xf] %vm4424_vm13, %v4389_v41  ;;  %v4373_v33 = vpop.permute.xlu0 %4372  ;;  %v5205_v41 = vld [vmem:[#allocation3 + $0x9] sm:$0xff] }
 0x611   : > { %v4381_v34 = vpop.permute.xlu1 %4380  ;;  %4447 = vst.msk [vmem:[#allocation4 + $0x58] sm:$0xf] %vm4424_vm13, %v4373_v33 }
 0x612   : > { %4451 = vst.msk [vmem:[#allocation4 + $0x68] sm:$0xf] %vm4424_vm13, %v4381_v34  ;;  %v5237_v34 = vpack.c.bf16 %v5205_v41, %v5205_v41 }
 0x614   : > { %5302 = vrot.lane.b32.xlu1 %v5237_v34, %s7664_s12 }
 0x617   : > { %v4556_v35 = vpop.permute.xlu2 %4555 }
 0x618   : > { %4651 = vst.msk [vmem:[#allocation4 + $0x4] sm:$0xf] %vm4649_vm15, %v4556_v35  ;;  %v4379_v36 = vpop.permute.xlu0 %4378 }
 0x619   : > { %v4387_v39 = vpop.permute.xlu1 %4386  ;;  %4450 = vst.msk [vmem:[#allocation4 + $0x64] sm:$0xf] %vm4424_vm13, %v4379_v36 }
 0x61a   : > { %4454 = vst.msk [vmem:[#allocation4 + $0x74] sm:$0xf] %vm4424_vm13, %v4387_v39 }
 0x61f   : > { %v7569_v43 = vld [vmem:[#allocation4] sm:$0xf0]  ;;  %v4562_v24 = vpop.permute.xlu2 %4561 }
 0x620   : > { %5173 = vst.msk [vmem:[#allocation4 + $0x4] sm:$0xf] %vm822_vm3, %v5141_v40  ;;  %v4385_v45 = vpop.permute.xlu0 %4384 }
 0x621   : > { %4654 = vst.msk [vmem:[#allocation4 + $0x10] sm:$0xf] %vm4649_vm15, %v4562_v24  ;;  %v4554_v46 = vpop.permute.xlu1 %4553 }
 0x622   : > { %4650 = vst.msk [vmem:[#allocation4] sm:$0xf] %vm4649_vm15, %v4554_v46 }
 0x623   : > { %4453 = vst.msk [vmem:[#allocation4 + $0x70] sm:$0xf] %vm4424_vm13, %v4385_v45 }
 0x627   : > { %v4568_v48 = vpop.permute.xlu2 %4567 }
 0x628   : > { %4657 = vst.msk [vmem:[#allocation4 + $0x1c] sm:$0xf] %vm4649_vm15, %v4568_v48  ;;  %v4391_v49 = vpop.permute.xlu0 %4390 }
 0x629   : > { %v7382_v50 = vld [vmem:[#allocation4] sm:$0xf]  ;;  %v4560_v51 = vpop.permute.xlu1 %4559  ;;  %4456 = vst.msk [vmem:[#allocation4 + $0x7c] sm:$0xf] %vm4424_vm13, %v4391_v49 }
 0x62a   : > { %5172 = vst.msk [vmem:[#allocation4] sm:$0xf] %vm822_vm3, %v5140_v59  ;;  %v7383_v52 = vor.u32 %v7569_v43, %v7382_v50 }
 0x62b   : > { %4653 = vst.msk [vmem:[#allocation4 + $0xc] sm:$0xf] %vm4649_vm15, %v4560_v51 }
 0x62c   : > { %7460 = vmatmul.msk.bf16.vlgmr.msra.gmra.mxu0 %vm4830_vm1, %v7383_v52 }
 0x62f   : > { %v4574_v53 = vpop.permute.xlu2 %4573 }
 0x630   : > { %4660 = vst.msk [vmem:[#allocation4 + $0x28] sm:$0xf] %vm4649_vm15, %v4574_v53  ;;  %v4558_v55 = vpop.permute.xlu0 %4557 }
 0x631   : > { %v4566_v56 = vpop.permute.xlu1 %4565  ;;  %4652 = vst.msk [vmem:[#allocation4 + $0x8] sm:$0xf] %vm4649_vm15, %v4558_v55 }
 0x632   : > { %4656 = vst.msk [vmem:[#allocation4 + $0x18] sm:$0xf] %vm4649_vm15, %v4566_v56 }
 0x637   : > { %v4580_v57 = vpop.permute.xlu2 %4579 }
 0x638   : > { %4663 = vst.msk [vmem:[#allocation4 + $0x34] sm:$0xf] %vm4649_vm15, %v4580_v57  ;;  %v4564_v44 = vpop.permute.xlu0 %4563  ;;  %v7570_v58 = vld [vmem:[#allocation4 + $0x8] sm:$0xff] }
 0x639   : > { %v4572_v60 = vpop.permute.xlu1 %4571  ;;  %4655 = vst.msk [vmem:[#allocation4 + $0x14] sm:$0xf] %vm4649_vm15, %v4564_v44  ;;  %v7572_v63 = vld [vmem:[#allocation4 + $0x18] sm:$0xff] }
 0x63a   : > { %4659 = vst.msk [vmem:[#allocation4 + $0x24] sm:$0xf] %vm4649_vm15, %v4572_v60 }
 0x63c   : > { %7461 = vmatmul.msk.bf16.gmra.mxu0 %vm4830_vm1, %v7570_v58 }
 0x63f   : > { %v4586_v61 = vpop.permute.xlu2 %4585 }
 0x640   : > { %4666 = vst.msk [vmem:[#allocation4 + $0x40] sm:$0xf] %vm4649_vm15, %v4586_v61  ;;  %v4570_v2 = vpop.permute.xlu0 %4569  ;;  %v7571_v1 = vld [vmem:[#allocation4 + $0x10] sm:$0xff] }
 0x641   : > { %v4578_v15 = vpop.permute.xlu1 %4577  ;;  %4658 = vst.msk [vmem:[#allocation4 + $0x20] sm:$0xf] %vm4649_vm15, %v4570_v2 }
 0x642   : > { %4662 = vst.msk [vmem:[#allocation4 + $0x30] sm:$0xf] %vm4649_vm15, %v4578_v15 }
 0x647   : > { %v4592_v62 = vpop.permute.xlu2 %4591 }
 0x648   : > { %4669 = vst.msk [vmem:[#allocation4 + $0x4c] sm:$0xf] %vm4649_vm15, %v4592_v62  ;;  %v4576_v0 = vpop.permute.xlu0 %4575  ;;  %v7573_v17 = vld [vmem:[#allocation4 + $0x20] sm:$0xff] }
 0x649   : > { %v4584_v42 = vpop.permute.xlu1 %4583  ;;  %4661 = vst.msk [vmem:[#allocation4 + $0x2c] sm:$0xf] %vm4649_vm15, %v4576_v0  ;;  %v7575_v22 = vld [vmem:[#allocation4 + $0x30] sm:$0xff] }
 0x64a   : > { %4665 = vst.msk [vmem:[#allocation4 + $0x3c] sm:$0xf] %vm4649_vm15, %v4584_v42 }
 0x64c   : > { %7462 = vmatmul.msk.bf16.gmra.mxu0 %vm4830_vm1, %v7571_v1 }
 0x64f   : > { %v4598_v4 = vpop.permute.xlu2 %4597 }
 0x650   : > { %4672 = vst.msk [vmem:[#allocation4 + $0x58] sm:$0xf] %vm4649_vm15, %v4598_v4  ;;  %v4582_v5 = vpop.permute.xlu0 %4581  ;;  %v7574_v20 = vld [vmem:[#allocation4 + $0x28] sm:$0xff] }
 0x651   : > { %v4590_v54 = vpop.permute.xlu1 %4589  ;;  %4664 = vst.msk [vmem:[#allocation4 + $0x38] sm:$0xf] %vm4649_vm15, %v4582_v5 }
 0x652   : > { %4668 = vst.msk [vmem:[#allocation4 + $0x48] sm:$0xf] %vm4649_vm15, %v4590_v54 }
 0x657   : > { %v4604_v6 = vpop.permute.xlu2 %4603 }
 0x658   : > { %4675 = vst.msk [vmem:[#allocation4 + $0x64] sm:$0xf] %vm4649_vm15, %v4604_v6  ;;  %v4588_v7 = vpop.permute.xlu0 %4587  ;;  %v7576_v26 = vld [vmem:[#allocation4 + $0x38] sm:$0xff] }
 0x659   : > { %v4596_v8 = vpop.permute.xlu1 %4595  ;;  %4667 = vst.msk [vmem:[#allocation4 + $0x44] sm:$0xf] %vm4649_vm15, %v4588_v7  ;;  %v7578_v18 = vld [vmem:[#allocation4 + $0x48] sm:$0xff] }
 0x65a   : > { %4671 = vst.msk [vmem:[#allocation4 + $0x54] sm:$0xf] %vm4649_vm15, %v4596_v8 }
 0x65c   : > { %7463 = vmatmul.msk.bf16.gmra.mxu0 %vm4830_vm1, %v7572_v63 }
 0x65f   : > { %v4610_v10 = vpop.permute.xlu2 %4609 }
 0x660   : > { %4678 = vst.msk [vmem:[#allocation4 + $0x70] sm:$0xf] %vm4649_vm15, %v4610_v10  ;;  %v4594_v38 = vpop.permute.xlu0 %4593  ;;  %v7577_v11 = vld [vmem:[#allocation4 + $0x40] sm:$0xff] }
 0x661   : > { %v4602_v12 = vpop.permute.xlu1 %4601  ;;  %4670 = vst.msk [vmem:[#allocation4 + $0x50] sm:$0xf] %vm4649_vm15, %v4594_v38  ;;  %7468 = vmatmul.msk.bf16.vlgmr.msra.gmra.mxu2 %vm4830_vm1, %v7577_v11 }
 0x662   : > { %4674 = vst.msk [vmem:[#allocation4 + $0x60] sm:$0xf] %vm4649_vm15, %v4602_v12 }
 0x668   : > { %v4600_v13 = vpop.permute.xlu0 %4599  ;;  %v7579_v21 = vld [vmem:[#allocation4 + $0x50] sm:$0xff] }
 0x669   : > { %v4608_v16 = vpop.permute.xlu1 %4607  ;;  %4673 = vst.msk [vmem:[#allocation4 + $0x5c] sm:$0xf] %vm4649_vm15, %v4600_v13  ;;  %v7581_v27 = vld [vmem:[#allocation4 + $0x60] sm:$0xff] }
 0x66a   : > { %4677 = vst.msk [vmem:[#allocation4 + $0x6c] sm:$0xf] %vm4649_vm15, %v4608_v16 }
 0x66c   : > { %7464 = vmatmul.msk.bf16.gmra.mxu0 %vm4830_vm1, %v7573_v17 }
 0x670   : > { %v4606_v3 = vpop.permute.xlu0 %4605  ;;  %v7580_v9 = vld [vmem:[#allocation4 + $0x58] sm:$0xff] }
 0x671   : > { %4676 = vst.msk [vmem:[#allocation4 + $0x68] sm:$0xf] %vm4649_vm15, %v4606_v3  ;;  %7469 = vmatmul.msk.bf16.gmra.mxu2 %vm4830_vm1, %v7578_v18 }
 0x678   : > { %v4612_v19 = vpop.permute.xlu0 %4611  ;;  %v7582_v39 = vld [vmem:[#allocation4 + $0x68] sm:$0xff] }
 0x679   : > { %4679 = vst.msk [vmem:[#allocation4 + $0x74] sm:$0xf] %vm4649_vm15, %v4612_v19 }
 0x67c   : > { %7465 = vmatmul.msk.bf16.gmra.mxu0 %vm4830_vm1, %v7574_v20 }
 0x680   : > { %v7583_v53 = vld [vmem:[#allocation4 + $0x70] sm:$0xff] }
 0x681   : > { %7470 = vmatmul.msk.bf16.gmra.mxu2 %vm4830_vm1, %v7579_v21 }
 0x68c   : > { %7466 = vmatmul.msk.bf16.gmra.mxu0 %vm4830_vm1, %v7575_v22 }
 0x691   : > { %7471 = vmatmul.msk.bf16.gmra.mxu2 %vm4830_vm1, %v7580_v9 }
 0x69c   : > { %7467 = vmatmul.msk.bf16.gmra.mxu0 %vm4830_vm1, %v7576_v26 }
 0x6a1   : > { %7472 = vmatmul.msk.bf16.gmra.mxu2 %vm4830_vm1, %v7581_v27 }
 0x6a9   : > { %v4892_v33 = vpop.f32.mrf.mxu0 }
 0x6aa   : > { %v4976_v35 = vmul.f32 %v9403_v30, %v4892_v33 }
 0x6ac   : > { %v5012_v36 = vadd.f32 %v9408_v31, %v4976_v35 }
 0x6ae   : > { %v5044_v37 = vmax.f32 %v5012_v36, 0.0 }
 0x6b0   : > { %5076 = vst.msk [vmem:[#allocation3 + $0x19] sm:$0xff] %vm327_vm0, %v5044_v37 }
 0x6b1   : > { %v4894_v40 = vpop.f32.mrf.mxu0  ;;  %7473 = vmatmul.msk.bf16.gmra.mxu2 %vm4830_vm1, %v7582_v39  ;;  %v4616_v39 = vpop.permute.xlu2 %4615 }
 0x6b2   : > { %v4977_v43 = vmul.f32 %v9403_v30, %v4894_v40  ;;  %4681 = vst.msk [vmem:[#allocation4 + $0x7c] sm:$0xf] %vm4649_vm15, %v4616_v39 }
 0x6b4   : > { %v5013_v24 = vadd.f32 %v9408_v31, %v4977_v43 }
 0x6b6   : > { %v5045_v45 = vmax.f32 %v5013_v24, 0.0 }
 0x6b7   : > { %v5206_v46 = vld [vmem:[#allocation3 + $0x19] sm:$0xff] }
 0x6b8   : > { %5077 = vst.msk [vmem:[#allocation3 + $0x21] sm:$0xff] %vm327_vm0, %v5045_v45  ;;  %v5238_v47 = vpack.c.bf16 %v5206_v46, %v5206_v46 }
 0x6b9   : > { %v4897_v59 = vpop.f32.mrf.mxu0 }
 0x6ba   : > { %v4978_v48 = vmul.f32 %v9403_v30, %v4897_v59  ;;  %5304 = vrot.lane.b32.xlu2 %v5238_v47, %s7664_s12  ;;  %v5110_v47 = vld [vmem:[#allocation3 + $0x18] sm:$0xff] }
 0x6bc   : > { %v5014_v49 = vadd.f32 %v9408_v31, %v4978_v48  ;;  %v9460_v48 = vpack.c.bf16 %v5110_v47, %v5110_v47 }
 0x6be   : > { %v5046_v50 = vmax.f32 %v5014_v49, 0.0  ;;  %5174 = vst.msk [vmem:[#allocation4 + $0x8] sm:$0xf] %vm822_vm3, %v9460_v48 }
 0x6bf   : > { %v5207_v51 = vld [vmem:[#allocation3 + $0x21] sm:$0xff] }
 0x6c0   : > { %5078 = vst.msk [vmem:[#allocation3 + $0x31] sm:$0xff] %vm327_vm0, %v5046_v50  ;;  %v5239_v52 = vpack.c.bf16 %v5207_v51, %v5207_v51 }
 0x6c1   : > { %v4899_v55 = vpop.f32.mrf.mxu0  ;;  %7474 = vmatmul.msk.bf16.gmra.mxu2 %vm4830_vm1, %v7583_v53 }
 0x6c2   : > { %v4979_v56 = vmul.f32 %v9403_v30, %v4899_v55  ;;  %5306 = vrot.lane.b32.xlu0 %v5239_v52, %s7664_s12 }
 0x6c4   : > { %v5015_v57 = vadd.f32 %v9408_v31, %v4979_v56 }
 0x6c6   : > { %v5047_v44 = vmax.f32 %v5015_v57, 0.0 }
 0x6c7   : > { %v5208_v58 = vld [vmem:[#allocation3 + $0x31] sm:$0xff] }
 0x6c8   : > { %5079 = vst.msk [vmem:[#allocation3 + $0x39] sm:$0xff] %vm327_vm0, %v5047_v44  ;;  %v5240_v60 = vpack.c.bf16 %v5208_v58, %v5208_v58 }
 0x6c9   : > { %v4902_v61 = vpop.f32.mrf.mxu0 }
 0x6ca   : > { %v4980_v2 = vmul.f32 %v9403_v30, %v4902_v61  ;;  %5308 = vrot.lane.b32.xlu1 %v5240_v60, %s7664_s12 }
 0x6cc   : > { %v5016_v15 = vadd.f32 %v9408_v31, %v4980_v2 }
 0x6ce   : > { %v5048_v62 = vmax.f32 %v5016_v15, 0.0 }
 0x6cf   : > { %v5209_v0 = vld [vmem:[#allocation3 + $0x39] sm:$0xff] }
 0x6d0   : > { %5080 = vst.msk [vmem:[#allocation3 + $0x49] sm:$0xff] %vm327_vm0, %v5048_v62  ;;  %v5241_v42 = vpack.c.bf16 %v5209_v0, %v5209_v0 }
 0x6d1   : > { %v4904_v1 = vpop.f32.mrf.mxu0 }
 0x6d2   : > { %v4981_v4 = vmul.f32 %v9403_v30, %v4904_v1  ;;  %5310 = vrot.lane.b32.xlu2 %v5241_v42, %s7664_s12 }
 0x6d4   : > { %v5017_v5 = vadd.f32 %v9408_v31, %v4981_v4 }
 0x6d6   : > { %v5049_v54 = vmax.f32 %v5017_v5, 0.0  ;;  %v5111_v5 = vld [vmem:[#allocation3 + $0x20] sm:$0xff] }
 0x6d7   : > { %v5210_v6 = vld [vmem:[#allocation3 + $0x49] sm:$0xff] }
 0x6d8   : > { %5081 = vst.msk [vmem:[#allocation3 + $0x51] sm:$0xff] %vm327_vm0, %v5049_v54  ;;  %v5242_v7 = vpack.c.bf16 %v5210_v6, %v5210_v6  ;;  %v9478_v6 = vpack.c.bf16 %v5111_v5, %v5111_v5  ;;  %v5114_v47 = vld [vmem:[#allocation3 + $0x48] sm:$0xff] }
 0x6d9   : > { %v4907_v8 = vpop.f32.mrf.mxu0 }
 0x6da   : > { %v4982_v63 = vmul.f32 %v9403_v30, %v4907_v8  ;;  %5312 = vrot.lane.b32.xlu0 %v5242_v7, %s7664_s12  ;;  %5175 = vst.msk [vmem:[#allocation4 + $0xc] sm:$0xf] %vm822_vm3, %v9478_v6 }
 0x6dc   : > { %v5018_v10 = vadd.f32 %v9408_v31, %v4982_v63 }
 0x6de   : > { %v5050_v38 = vmax.f32 %v5018_v10, 0.0  ;;  %v5113_v10 = vld [vmem:[#allocation3 + $0x38] sm:$0xff] }
 0x6df   : > { %v5211_v11 = vld [vmem:[#allocation3 + $0x51] sm:$0xff] }
 0x6e0   : > { %5082 = vst.msk [vmem:[#allocation3 + $0x61] sm:$0xff] %vm327_vm0, %v5050_v38  ;;  %v5243_v12 = vpack.c.bf16 %v5211_v11, %v5211_v11  ;;  %v9486_v11 = vpack.c.bf16 %v5113_v10, %v5113_v10 }
 0x6e1   : > { %v4909_v13 = vpop.f32.mrf.mxu0 }
 0x6e2   : > { %v4983_v16 = vmul.f32 %v9403_v30, %v4909_v13  ;;  %5314 = vrot.lane.b32.xlu1 %v5243_v12, %s7664_s12  ;;  %5177 = vst.msk [vmem:[#allocation4 + $0x14] sm:$0xf] %vm822_vm3, %v9486_v11 }
 0x6e4   : > { %v5019_v17 = vadd.f32 %v9408_v31, %v4983_v16  ;;  %v4932_v3 = vpop.f32.mrf.mxu2 }
 0x6e5   : > { %v4992_v19 = vmul.f32 %v9403_v30, %v4932_v3 }
 0x6e6   : > { %v5051_v18 = vmax.f32 %v5019_v17, 0.0 }
 0x6e7   : > { %v5212_v20 = vld [vmem:[#allocation3 + $0x61] sm:$0xff]  ;;  %v5028_v21 = vadd.f32 %v9408_v31, %v4992_v19 }
 0x6e8   : > { %5083 = vst.msk [vmem:[#allocation3 + $0x69] sm:$0xff] %vm327_vm0, %v5051_v18  ;;  %v5244_v22 = vpack.c.bf16 %v5212_v20, %v5212_v20  ;;  %v5112_v18 = vld [vmem:[#allocation3 + $0x30] sm:$0xff] }
 0x6e9   : > { %v4912_v9 = vpop.f32.mrf.mxu0  ;;  %v5060_v25 = vmax.f32 %v5028_v21, 0.0  ;;  %v9493_v20 = vpack.c.bf16 %v5112_v18, %v5112_v18 }
 0x6ea   : > { %v4984_v14 = vmul.f32 %v9403_v30, %v4912_v9  ;;  %5316 = vrot.lane.b32.xlu2 %v5244_v22, %s7664_s12 }
 0x6eb   : > { %5092 = vst.msk [vmem:[#allocation3 + $0xd9] sm:$0xff] %vm327_vm0, %v5060_v25 }
 0x6ec   : > { %v5020_v26 = vadd.f32 %v9408_v31, %v4984_v14  ;;  %v4934_v27 = vpop.f32.mrf.mxu2  ;;  %5176 = vst.msk [vmem:[#allocation4 + $0x10] sm:$0xf] %vm822_vm3, %v9493_v20 }
 0x6ed   : > { %v4993_v23 = vmul.f32 %v9403_v30, %v4934_v27 }
 0x6ee   : > { %v5052_v28 = vmax.f32 %v5020_v26, 0.0  ;;  %v4614_v26 = vpop.permute.xlu1 %4613 }
 0x6ef   : > { %v5213_v29 = vld [vmem:[#allocation3 + $0x69] sm:$0xff]  ;;  %v5029_v32 = vadd.f32 %v9408_v31, %v4993_v23  ;;  %4680 = vst.msk [vmem:[#allocation4 + $0x78] sm:$0xf] %vm4649_vm15, %v4614_v26  ;;  %v5301_v23 = vpop.permute.xlu0 %5300 }
 0x6f0   : > { %5084 = vst.msk [vmem:[#allocation3 + $0x79] sm:$0xff] %vm327_vm0, %v5052_v28  ;;  %v5245_v41 = vpack.c.bf16 %v5213_v29, %v5213_v29 }
 0x6f1   : > { %v4914_v33 = vpop.f32.mrf.mxu0  ;;  %v5061_v34 = vmax.f32 %v5029_v32, 0.0  ;;  %5396 = vst.msk [vmem:[#allocation4] sm:$0xf] %vm1047_vm4, %v5301_v23 }
 0x6f2   : > { %v4985_v35 = vmul.f32 %v9403_v30, %v4914_v33  ;;  %5318 = vrot.lane.b32.xlu0 %v5245_v41, %s7664_s12 }
 0x6f3   : > { %5093 = vst.msk [vmem:[#allocation3 + $0xe1] sm:$0xff] %vm327_vm0, %v5061_v34 }
 0x6f4   : > { %v5021_v36 = vadd.f32 %v9408_v31, %v4985_v35  ;;  %v4937_v37 = vpop.f32.mrf.mxu2 }
 0x6f5   : > { %v4994_v43 = vmul.f32 %v9403_v30, %v4937_v37 }
 0x6f6   : > { %v5053_v40 = vmax.f32 %v5021_v36, 0.0  ;;  %v5303_v39 = vpop.permute.xlu1 %5302 }
 0x6f7   : > { %v5214_v24 = vld [vmem:[#allocation3 + $0x79] sm:$0xff]  ;;  %v5030_v45 = vadd.f32 %v9408_v31, %v4994_v43  ;;  %5397 = vst.msk [vmem:[#allocation4 + $0x4] sm:$0xf] %vm1047_vm4, %v5303_v39 }
 0x6f8   : > { %5085 = vst.msk [vmem:[#allocation3 + $0x81] sm:$0xff] %vm327_vm0, %v5053_v40  ;;  %v5246_v46 = vpack.c.bf16 %v5214_v24, %v5214_v24 }
 0x6f9   : > { %v4917_v59 = vpop.f32.mrf.mxu0  ;;  %v5062_v49 = vmax.f32 %v5030_v45, 0.0 }
 0x6fa   : > { %v4986_v50 = vmul.f32 %v9403_v30, %v4917_v59  ;;  %5320 = vrot.lane.b32.xlu1 %v5246_v46, %s7664_s12 }
 0x6fb   : > { %5094 = vst.msk [vmem:[#allocation3 + $0xf1] sm:$0xff] %vm327_vm0, %v5062_v49  ;;  %v9515_v49 = vpack.c.bf16 %v5114_v47, %v5114_v47 }
 0x6fc   : > { %v5022_v51 = vadd.f32 %v9408_v31, %v4986_v50  ;;  %v4939_v52 = vpop.f32.mrf.mxu2 }
 0x6fd   : > { %v4995_v55 = vmul.f32 %v9403_v30, %v4939_v52  ;;  %5178 = vst.msk [vmem:[#allocation4 + $0x18] sm:$0xf] %vm822_vm3, %v9515_v49 }
 0x6fe   : > { %v5054_v53 = vmax.f32 %v5022_v51, 0.0 }
 0x6ff   : > { %v5215_v56 = vld [vmem:[#allocation3 + $0x81] sm:$0xff]  ;;  %v5031_v57 = vadd.f32 %v9408_v31, %v4995_v55 }
 0x700   : > { %5086 = vst.msk [vmem:[#allocation3 + $0x91] sm:$0xff] %vm327_vm0, %v5054_v53  ;;  %v5247_v44 = vpack.c.bf16 %v5215_v56, %v5215_v56  ;;  %v5116_v53 = vld [vmem:[#allocation3 + $0x60] sm:$0xff] }
 0x701   : > { %v4919_v58 = vpop.f32.mrf.mxu0  ;;  %v5063_v60 = vmax.f32 %v5031_v57, 0.0  ;;  %v5222_v56 = vld [vmem:[#allocation3 + $0xd9] sm:$0xff]  ;;  %v9523_v57 = vpack.c.bf16 %v5116_v53, %v5116_v53  ;;  %v7584_v53 = vld [vmem:[#allocation4 + $0x78] sm:$0xff] }
 0x702   : > { %v4987_v61 = vmul.f32 %v9403_v30, %v4919_v58  ;;  %5322 = vrot.lane.b32.xlu2 %v5247_v44, %s7664_s12  ;;  %7475 = vmatmul.msk.bf16.gmra.mxu2 %vm4830_vm1, %v7584_v53 }
 0x703   : > { %5095 = vst.msk [vmem:[#allocation3 + $0xf9] sm:$0xff] %vm327_vm0, %v5063_v60 }
 0x704   : > { %v5023_v2 = vadd.f32 %v9408_v31, %v4987_v61  ;;  %v4942_v15 = vpop.f32.mrf.mxu2  ;;  %5180 = vst.msk [vmem:[#allocation4 + $0x20] sm:$0xf] %vm822_vm3, %v9523_v57 }
 0x705   : > { %v4996_v0 = vmul.f32 %v9403_v30, %v4942_v15 }
 0x706   : > { %v5055_v62 = vmax.f32 %v5023_v2, 0.0  ;;  %v5254_v2 = vpack.c.bf16 %v5222_v56, %v5222_v56 }
 0x707   : > { %v5216_v42 = vld [vmem:[#allocation3 + $0x91] sm:$0xff]  ;;  %v5032_v1 = vadd.f32 %v9408_v31, %v4996_v0 }
 0x708   : > { %5087 = vst.msk [vmem:[#allocation3 + $0x99] sm:$0xff] %vm327_vm0, %v5055_v62  ;;  %v5248_v4 = vpack.c.bf16 %v5216_v42, %v5216_v42  ;;  %v5115_v62 = vld [vmem:[#allocation3 + $0x50] sm:$0xff] }
 0x709   : > { %v4922_v54 = vpop.f32.mrf.mxu0  ;;  %v5064_v7 = vmax.f32 %v5032_v1, 0.0  ;;  %v9530_v0 = vpack.c.bf16 %v5115_v62, %v5115_v62 }
 0x70a   : > { %v4988_v8 = vmul.f32 %v9403_v30, %v4922_v54  ;;  %5324 = vrot.lane.b32.xlu0 %v5248_v4, %s7664_s12  ;;  %v5225_v5 = vld [vmem:[#allocation3 + $0xf9] sm:$0xff]  ;;  %v5223_v54 = vld [vmem:[#allocation3 + $0xe1] sm:$0xff] }
 0x70b   : > { %5096 = vst.msk [vmem:[#allocation3 + $0x109] sm:$0xff] %vm327_vm0, %v5064_v7  ;;  %v5257_v10 = vpack.c.bf16 %v5225_v5, %v5225_v5 }
 0x70c   : > { %v5024_v63 = vadd.f32 %v9408_v31, %v4988_v8  ;;  %v4944_v38 = vpop.f32.mrf.mxu2  ;;  %5179 = vst.msk [vmem:[#allocation4 + $0x1c] sm:$0xf] %vm822_vm3, %v9530_v0 }
 0x70d   : > { %v4997_v13 = vmul.f32 %v9403_v30, %v4944_v38  ;;  %v5255_v38 = vpack.c.bf16 %v5223_v54, %v5223_v54 }
 0x70e   : > { %v5056_v12 = vmax.f32 %v5024_v63, 0.0 }
 0x70f   : > { %v5217_v16 = vld [vmem:[#allocation3 + $0x99] sm:$0xff]  ;;  %v5033_v17 = vadd.f32 %v9408_v31, %v4997_v13 }
 0x710   : > { %5088 = vst.msk [vmem:[#allocation3 + $0xa9] sm:$0xff] %vm327_vm0, %v5056_v12  ;;  %v5249_v3 = vpack.c.bf16 %v5217_v16, %v5217_v16 }
 0x711   : > { %v4924_v19 = vpop.f32.mrf.mxu0  ;;  %v5065_v21 = vmax.f32 %v5033_v17, 0.0 }
 0x712   : > { %v4989_v22 = vmul.f32 %v9403_v30, %v4924_v19  ;;  %5326 = vrot.lane.b32.xlu1 %v5249_v3, %s7664_s12  ;;  %v5226_v18 = vld [vmem:[#allocation3 + $0x109] sm:$0xff] }
 0x713   : > { %5097 = vst.msk [vmem:[#allocation3 + $0x111] sm:$0xff] %vm327_vm0, %v5065_v21  ;;  %v5224_v21 = vld [vmem:[#allocation3 + $0xf1] sm:$0xff] }
 0x714   : > { %v5025_v9 = vadd.f32 %v9408_v31, %v4989_v22  ;;  %v5305_v25 = vpop.permute.xlu2 %5304  ;;  %v4947_v14 = vpop.f32.mrf.mxu2  ;;  %v5256_v26 = vpack.c.bf16 %v5224_v21, %v5224_v21  ;;  %v5429_v21 = vld [vmem:[#allocation3 + $0xa] sm:$0xff] }
 0x715   : > { %5398 = vst.msk [vmem:[#allocation4 + $0x8] sm:$0xf] %vm1047_vm4, %v5305_v25  ;;  %v4998_v28 = vmul.f32 %v9403_v30, %v4947_v14  ;;  %v5258_v25 = vpack.c.bf16 %v5226_v18, %v5226_v18  ;;  %v5117_v14 = vld [vmem:[#allocation3 + $0x68] sm:$0xff] }
 0x716   : > { %v5057_v27 = vmax.f32 %v5025_v9, 0.0 }
 0x717   : > { %v5218_v29 = vld [vmem:[#allocation3 + $0xa9] sm:$0xff]  ;;  %v5034_v32 = vadd.f32 %v9408_v31, %v4998_v28 }
 0x718   : > { %5089 = vst.msk [vmem:[#allocation3 + $0xb1] sm:$0xff] %vm327_vm0, %v5057_v27  ;;  %v5250_v41 = vpack.c.bf16 %v5218_v29, %v5218_v29  ;;  %v9547_v27 = vpack.c.bf16 %v5117_v14, %v5117_v14  ;;  %v5119_v29 = vld [vmem:[#allocation3 + $0x80] sm:$0xff] }
 0x719   : > { %v4927_v33 = vpop.f32.mrf.mxu0  ;;  %v5066_v34 = vmax.f32 %v5034_v32, 0.0 }
 0x71a   : > { %v4990_v35 = vmul.f32 %v9403_v30, %v4927_v33  ;;  %5328 = vrot.lane.b32.xlu2 %v5250_v41, %s7664_s12  ;;  %5181 = vst.msk [vmem:[#allocation4 + $0x24] sm:$0xf] %vm822_vm3, %v9547_v27 }
 0x71b   : > { %5098 = vst.msk [vmem:[#allocation3 + $0x121] sm:$0xff] %vm327_vm0, %v5066_v34  ;;  %v9556_v34 = vpack.c.bf16 %v5119_v29, %v5119_v29  ;;  %v5431_v29 = vld [vmem:[#allocation3 + $0x22] sm:$0xff] }
 0x71c   : > { %v5026_v36 = vadd.f32 %v9408_v31, %v4990_v35  ;;  %v4949_v37 = vpop.f32.mrf.mxu2  ;;  %v5126_v35 = vld [vmem:[#allocation3 + $0xd8] sm:$0xff] }
 0x71d   : > { %v4999_v43 = vmul.f32 %v9403_v30, %v4949_v37  ;;  %v5227_v37 = vld [vmem:[#allocation3 + $0x111] sm:$0xff]  ;;  %v9559_v39 = vpack.c.bf16 %v5126_v35, %v5126_v35  ;;  %5183 = vst.msk [vmem:[#allocation4 + $0x2c] sm:$0xf] %vm822_vm3, %v9556_v34  ;;  %v5430_v35 = vld [vmem:[#allocation3 + $0x1a] sm:$0xff] }
 0x71e   : > { %v5058_v40 = vmax.f32 %v5026_v36, 0.0 }
 0x71f   : > { %v5219_v24 = vld [vmem:[#allocation3 + $0xb1] sm:$0xff]  ;;  %v5035_v45 = vadd.f32 %v9408_v31, %v4999_v43  ;;  %5190 = vst.msk [vmem:[#allocation4 + $0x48] sm:$0xf] %vm822_vm3, %v9559_v39 }
 0x720   : > { %5090 = vst.msk [vmem:[#allocation3 + $0xc1] sm:$0xff] %vm327_vm0, %v5058_v40  ;;  %v5251_v46 = vpack.c.bf16 %v5219_v24, %v5219_v24 }
 0x721   : > { %v4929_v59 = vpop.f32.mrf.mxu0  ;;  %v5067_v50 = vmax.f32 %v5035_v45, 0.0  ;;  %v5118_v45 = vld [vmem:[#allocation3 + $0x78] sm:$0xff] }
 0x722   : > { %v4991_v51 = vmul.f32 %v9403_v30, %v4929_v59  ;;  %5330 = vrot.lane.b32.xlu0 %v5251_v46, %s7664_s12  ;;  %v5228_v3 = vld [vmem:[#allocation3 + $0x121] sm:$0xff]  ;;  %v5259_v46 = vpack.c.bf16 %v5227_v37, %v5227_v37  ;;  %v9566_v47 = vpack.c.bf16 %v5118_v45, %v5118_v45 }
 0x723   : > { %5099 = vst.msk [vmem:[#allocation3 + $0x129] sm:$0xff] %vm327_vm0, %v5067_v50  ;;  %v5260_v9 = vpack.c.bf16 %v5228_v3, %v5228_v3  ;;  %v5129_v3 = vld [vmem:[#allocation3 + $0xf8] sm:$0xff] }
 0x724   : > { %v5027_v52 = vadd.f32 %v9408_v31, %v4991_v51  ;;  %v4952_v55 = vpop.f32.mrf.mxu2  ;;  %5182 = vst.msk [vmem:[#allocation4 + $0x28] sm:$0xf] %vm822_vm3, %v9566_v47  ;;  %v9602_v18 = vpack.c.bf16 %v5129_v3, %v5129_v3 }
 0x725   : > { %v5000_v58 = vmul.f32 %v9403_v30, %v4952_v55 }
 0x726   : > { %v5059_v44 = vmax.f32 %v5027_v52, 0.0  ;;  %5193 = vst.msk [vmem:[#allocation4 + $0x54] sm:$0xf] %vm822_vm3, %v9602_v18 }
 0x727   : > { %v5220_v60 = vld [vmem:[#allocation3 + $0xc1] sm:$0xff]  ;;  %v5036_v61 = vadd.f32 %v9408_v31, %v5000_v58 }
 0x728   : > { %5091 = vst.msk [vmem:[#allocation3 + $0xc9] sm:$0xff] %vm327_vm0, %v5059_v44  ;;  %v5252_v15 = vpack.c.bf16 %v5220_v60, %v5220_v60  ;;  %v5127_v44 = vld [vmem:[#allocation3 + $0xe0] sm:$0xff] }
 0x729   : > { %v5068_v42 = vmax.f32 %v5036_v61, 0.0  ;;  %v9577_v58 = vpack.c.bf16 %v5127_v44, %v5127_v44 }
 0x72a   : > { %5336 = vrot.lane.b32.xlu0 %v5254_v2, %s7664_s12  ;;  %5332 = vrot.lane.b32.xlu1 %v5252_v15, %s7664_s12  ;;  %v5229_v33 = vld [vmem:[#allocation3 + $0x129] sm:$0xff] }
 0x72b   : > { %5100 = vst.msk [vmem:[#allocation3 + $0x139] sm:$0xff] %vm327_vm0, %v5068_v42  ;;  %v5261_v24 = vpack.c.bf16 %v5229_v33, %v5229_v33  ;;  %v5432_v33 = vld [vmem:[#allocation3 + $0x32] sm:$0xff] }
 0x72c   : > { %v5311_v1 = vpop.permute.xlu2 %5310  ;;  %v4954_v4 = vpop.f32.mrf.mxu2  ;;  %5191 = vst.msk [vmem:[#allocation4 + $0x4c] sm:$0xf] %vm822_vm3, %v9577_v58  ;;  %v5464_v37 = vpack.c.bf16 %v5432_v33, %v5432_v33 }
 0x72d   : > { %5401 = vst.msk [vmem:[#allocation4 + $0x14] sm:$0xf] %vm1047_vm4, %v5311_v1  ;;  %v5001_v7 = vmul.f32 %v9403_v30, %v4954_v4  ;;  %v5128_v1 = vld [vmem:[#allocation3 + $0xf0] sm:$0xff] }
 0x72e   : > { %v9587_v54 = vpack.c.bf16 %v5128_v1, %v5128_v1  ;;  %v5438_v1 = vld [vmem:[#allocation3 + $0x7a] sm:$0xff] }
 0x72f   : > { %v5221_v8 = vld [vmem:[#allocation3 + $0xc9] sm:$0xff]  ;;  %v5037_v63 = vadd.f32 %v9408_v31, %v5001_v7 }
 0x730   : > { %v5253_v12 = vpack.c.bf16 %v5221_v8, %v5221_v8  ;;  %v5120_v8 = vld [vmem:[#allocation3 + $0x90] sm:$0xff]  ;;  %5192 = vst.msk [vmem:[#allocation4 + $0x50] sm:$0xf] %vm822_vm3, %v9587_v54  ;;  %v5125_v44 = vld [vmem:[#allocation3 + $0xc8] sm:$0xff] }
 0x731   : > { %v5069_v13 = vmax.f32 %v5037_v63, 0.0 }
 0x732   : > { %5342 = vrot.lane.b32.xlu0 %v5257_v10, %s7664_s12  ;;  %5338 = vrot.lane.b32.xlu1 %v5255_v38, %s7664_s12  ;;  %v5230_v56 = vld [vmem:[#allocation3 + $0x139] sm:$0xff]  ;;  %v9592_v10 = vpack.c.bf16 %v5120_v8, %v5120_v8  ;;  %v5470_v8 = vpack.c.bf16 %v5438_v1, %v5438_v1 }
 0x733   : > { %5334 = vrot.lane.b32.xlu2 %v5253_v12, %s7664_s12  ;;  %5101 = vst.msk [vmem:[#allocation3 + $0x141] sm:$0xff] %vm327_vm0, %v5069_v13  ;;  %v5262_v2 = vpack.c.bf16 %v5230_v56, %v5230_v56  ;;  %v5448_v1 = vld [vmem:[#allocation3 + $0xf2] sm:$0xff] }
 0x734   : > { %v5307_v16 = vpop.permute.xlu0 %5306  ;;  %v4957_v17 = vpop.f32.mrf.mxu2  ;;  %5184 = vst.msk [vmem:[#allocation4 + $0x30] sm:$0xf] %vm822_vm3, %v9592_v10 }
 0x735   : > { %5399 = vst.msk [vmem:[#allocation4 + $0xc] sm:$0xf] %vm1047_vm4, %v5307_v16  ;;  %v5002_v19 = vmul.f32 %v9403_v30, %v4957_v17  ;;  %v5428_v16 = vld [vmem:[#allocation3 + $0x2] sm:$0xff] }
 0x737   : > { %v5038_v22 = vadd.f32 %v9408_v31, %v5002_v19  ;;  %v5460_v19 = vpack.c.bf16 %v5428_v16, %v5428_v16  ;;  %v5441_v16 = vld [vmem:[#allocation3 + $0x9a] sm:$0xff] }
 0x739   : > { %v5070_v28 = vmax.f32 %v5038_v22, 0.0  ;;  %v5121_v22 = vld [vmem:[#allocation3 + $0x98] sm:$0xff] }
 0x73a   : > { %5348 = vrot.lane.b32.xlu0 %v5260_v9, %s7664_s12  ;;  %5344 = vrot.lane.b32.xlu1 %v5258_v25, %s7664_s12  ;;  %v5231_v41 = vld [vmem:[#allocation3 + $0x141] sm:$0xff]  ;;  %v9608_v9 = vpack.c.bf16 %v5121_v22, %v5121_v22  ;;  %v5461_v25 = vpack.c.bf16 %v5429_v21, %v5429_v21  ;;  %v5134_v22 = vld [vmem:[#allocation3 + $0x138] sm:$0xff] }
 0x73b   : > { %5340 = vrot.lane.b32.xlu2 %v5256_v26, %s7664_s12  ;;  %5102 = vst.msk [vmem:[#allocation3 + $0x151] sm:$0xff] %vm327_vm0, %v5070_v28  ;;  %v5263_v43 = vpack.c.bf16 %v5231_v41, %v5231_v41  ;;  %v5463_v41 = vpack.c.bf16 %v5431_v29, %v5431_v29  ;;  %v5444_v29 = vld [vmem:[#allocation3 + $0xc2] sm:$0xff] }
 0x73c   : > { %v5309_v23 = vpop.permute.xlu1 %5308  ;;  %v4959_v32 = vpop.f32.mrf.mxu2  ;;  %5185 = vst.msk [vmem:[#allocation4 + $0x34] sm:$0xf] %vm822_vm3, %v9608_v9 }
 0x73d   : > { %5400 = vst.msk [vmem:[#allocation4 + $0x10] sm:$0xf] %vm1047_vm4, %v5309_v23  ;;  %v5003_v36 = vmul.f32 %v9403_v30, %v4959_v32  ;;  %v5130_v23 = vld [vmem:[#allocation3 + $0x108] sm:$0xff] }
 0x73e   : > { %v9619_v32 = vpack.c.bf16 %v5130_v23, %v5130_v23  ;;  %v5442_v23 = vld [vmem:[#allocation3 + $0xaa] sm:$0xff] }
 0x73f   : > { %v5039_v40 = vadd.f32 %v9408_v31, %v5003_v36  ;;  %v9680_v33 = vpack.c.bf16 %v5442_v23, %v5442_v23 }
 0x740   : > { %5194 = vst.msk [vmem:[#allocation4 + $0x58] sm:$0xf] %vm822_vm3, %v9619_v32 }
 0x741   : > { %v5071_v59 = vmax.f32 %v5039_v40, 0.0  ;;  %v9624_v40 = vpack.c.bf16 %v5430_v35, %v5430_v35  ;;  %v5476_v35 = vpack.c.bf16 %v5444_v29, %v5444_v29 }
 0x742   : > { %5354 = vrot.lane.b32.xlu0 %v5263_v43, %s7664_s12  ;;  %5350 = vrot.lane.b32.xlu1 %v5261_v24, %s7664_s12  ;;  %v5232_v52 = vld [vmem:[#allocation3 + $0x151] sm:$0xff] }
 0x743   : > { %5346 = vrot.lane.b32.xlu2 %v5259_v46, %s7664_s12  ;;  %5103 = vst.msk [vmem:[#allocation3 + $0x159] sm:$0xff] %vm327_vm0, %v5071_v59  ;;  %v5264_v61 = vpack.c.bf16 %v5232_v52, %v5232_v52  ;;  %v5131_v43 = vld [vmem:[#allocation3 + $0x110] sm:$0xff] }
 0x744   : > { %v5317_v50 = vpop.permute.xlu2 %5316  ;;  %v4962_v51 = vpop.f32.mrf.mxu2  ;;  %v5434_v24 = vld [vmem:[#allocation3 + $0x4a] sm:$0xff]  ;;  %v9630_v45 = vpack.c.bf16 %v5131_v43, %v5131_v43 }
 0x745   : > { %5404 = vst.msk [vmem:[#allocation4 + $0x20] sm:$0xf] %vm1047_vm4, %v5317_v50  ;;  %v5004_v55 = vmul.f32 %v9403_v30, %v4962_v51  ;;  %v5123_v46 = vld [vmem:[#allocation3 + $0xb0] sm:$0xff]  ;;  %v5466_v59 = vpack.c.bf16 %v5434_v24, %v5434_v24  ;;  %v5433_v51 = vld [vmem:[#allocation3 + $0x3a] sm:$0xff] }
 0x746   : > { %5195 = vst.msk [vmem:[#allocation4 + $0x5c] sm:$0xf] %vm822_vm3, %v9630_v45  ;;  %v5435_v50 = vld [vmem:[#allocation3 + $0x52] sm:$0xff]  ;;  %v9634_v52 = vpack.c.bf16 %v5123_v46, %v5123_v46  ;;  %v9639_v56 = vpack.c.bf16 %v5433_v51, %v5433_v51  ;;  %v5445_v46 = vld [vmem:[#allocation3 + $0xca] sm:$0xff] }
 0x747   : > { %v5040_v60 = vadd.f32 %v9408_v31, %v5004_v55  ;;  %v5467_v55 = vpack.c.bf16 %v5435_v50, %v5435_v50  ;;  %v9691_v50 = vpack.c.bf16 %v5445_v46, %v5445_v46 }
 0x748   : > { %5187 = vst.msk [vmem:[#allocation4 + $0x3c] sm:$0xf] %vm822_vm3, %v9634_v52 }
 0x749   : > { %v5072_v15 = vmax.f32 %v5040_v60, 0.0  ;;  %v5132_v60 = vld [vmem:[#allocation3 + $0x120] sm:$0xff] }
 0x74a   : > { %5356 = vrot.lane.b32.xlu1 %v5264_v61, %s7664_s12  ;;  %v5233_v5 = vld [vmem:[#allocation3 + $0x159] sm:$0xff]  ;;  %v5437_v61 = vld [vmem:[#allocation3 + $0x6a] sm:$0xff] }
 0x74b   : > { %5352 = vrot.lane.b32.xlu2 %v5262_v2, %s7664_s12  ;;  %5104 = vst.msk [vmem:[#allocation3 + $0x169] sm:$0xff] %vm327_vm0, %v5072_v15  ;;  %v5265_v63 = vpack.c.bf16 %v5233_v5, %v5233_v5  ;;  %v9645_v2 = vpack.c.bf16 %v5125_v44, %v5125_v44  ;;  %v9647_v15 = vpack.c.bf16 %v5132_v60, %v5132_v60  ;;  %v5449_v44 = vld [vmem:[#allocation3 + $0xfa] sm:$0xff] }
 0x74c   : > { %v5313_v62 = vpop.permute.xlu0 %5312  ;;  %v4964_v42 = vpop.f32.mrf.mxu2  ;;  %v5137_v60 = vld [vmem:[#allocation3 + $0x158] sm:$0xff] }
 0x74d   : > { %5402 = vst.msk [vmem:[#allocation4 + $0x18] sm:$0xf] %vm1047_vm4, %v5313_v62  ;;  %v5005_v4 = vmul.f32 %v9403_v30, %v4964_v42  ;;  %v5124_v62 = vld [vmem:[#allocation3 + $0xc0] sm:$0xff]  ;;  %v5469_v42 = vpack.c.bf16 %v5437_v61, %v5437_v61 }
 0x74e   : > { %5189 = vst.msk [vmem:[#allocation4 + $0x44] sm:$0xf] %vm822_vm3, %v9645_v2  ;;  %v9651_v5 = vpack.c.bf16 %v5124_v62, %v5124_v62  ;;  %v9699_v62 = vpack.c.bf16 %v5137_v60, %v5137_v60 }
 0x74f   : > { %v5041_v7 = vadd.f32 %v9408_v31, %v5005_v4  ;;  %v5122_v31 = vld [vmem:[#allocation3 + $0xa8] sm:$0xff]  ;;  %5196 = vst.msk [vmem:[#allocation4 + $0x60] sm:$0xf] %vm822_vm3, %v9647_v15 }
 0x750   : > { %v9599_v17 = vpack.c.bf16 %v5122_v31, %v5122_v31  ;;  %v5436_v4 = vld [vmem:[#allocation3 + $0x62] sm:$0xff]  ;;  %5188 = vst.msk [vmem:[#allocation4 + $0x40] sm:$0xf] %vm822_vm3, %v9651_v5 }
 0x751   : > { %v5073_v38 = vmax.f32 %v5041_v7, 0.0  ;;  %v5439_v31 = vld [vmem:[#allocation3 + $0x82] sm:$0xff]  ;;  %5201 = vst.msk [vmem:[#allocation4 + $0x74] sm:$0xf] %vm822_vm3, %v9699_v62 }
 0x752   : > { %v5234_v12 = vld [vmem:[#allocation3 + $0x169] sm:$0xff]  ;;  %5186 = vst.msk [vmem:[#allocation4 + $0x38] sm:$0xf] %vm822_vm3, %v9599_v17  ;;  %v9669_v21 = vpack.c.bf16 %v5439_v31, %v5439_v31  ;;  %v5451_v31 = vld [vmem:[#allocation3 + $0x112] sm:$0xff] }
 0x753   : > { %5358 = vrot.lane.b32.xlu2 %v5265_v63, %s7664_s12  ;;  %5105 = vst.msk [vmem:[#allocation3 + $0x171] sm:$0xff] %vm327_vm0, %v5073_v38  ;;  %v5266_v13 = vpack.c.bf16 %v5234_v12, %v5234_v12  ;;  %v9658_v63 = vpack.c.bf16 %v5436_v4, %v5436_v4  ;;  %v5133_v38 = vld [vmem:[#allocation3 + $0x128] sm:$0xff]  ;;  %v5440_v12 = vld [vmem:[#allocation3 + $0x92] sm:$0xff] }
 0x754   : > { %v5315_v30 = vpop.permute.xlu1 %5314  ;;  %v5450_v4 = vld [vmem:[#allocation3 + $0x10a] sm:$0xff] }
 0x755   : > { %5403 = vst.msk [vmem:[#allocation4 + $0x1c] sm:$0xf] %vm1047_vm4, %v5315_v30  ;;  %5360 = vrot.lane.b32.xlu0 %v5266_v13, %s7664_s12  ;;  %v9664_v30 = vpack.c.bf16 %v5133_v38, %v5133_v38  ;;  %v5472_v13 = vpack.c.bf16 %v5440_v12, %v5440_v12  ;;  %v5482_v38 = vpack.c.bf16 %v5450_v4, %v5450_v4  ;;  %v5138_v29 = vld [vmem:[#allocation3 + $0x168] sm:$0xff]  ;;  %v5457_v4 = vld [vmem:[#allocation3 + $0x15a] sm:$0xff] }
 0x757   : > { %5197 = vst.msk [vmem:[#allocation4 + $0x64] sm:$0xf] %vm822_vm3, %v9664_v30 }
 0x75a   : > { %v5235_v14 = vld [vmem:[#allocation3 + $0x171] sm:$0xff] }
 0x75b   : > { %5524 = vrot.lane.b32.xlu2 %v5460_v19, %s7665_s13  ;;  %v9613_v28 = vpack.c.bf16 %v5235_v14, %v5235_v14  ;;  %v5473_v19 = vpack.c.bf16 %v5441_v16, %v5441_v16  ;;  %v9675_v14 = vpack.c.bf16 %v5134_v22, %v5134_v22  ;;  %v5458_v60 = vld [vmem:[#allocation3 + $0x16a] sm:$0xff] }
 0x75c   : > { %v5323_v26 = vpop.permute.xlu2 %5322 }
 0x75d   : > { %5407 = vst.msk [vmem:[#allocation4 + $0x2c] sm:$0xf] %vm1047_vm4, %v5323_v26  ;;  %5526 = vrot.lane.b32.xlu0 %v5461_v25, %s7665_s13  ;;  %5362 = vrot.lane.b32.xlu1 %v9613_v28, %s7664_s12  ;;  %v5443_v25 = vld [vmem:[#allocation3 + $0xb2] sm:$0xff] }
 0x75e   : > { %5198 = vst.msk [vmem:[#allocation4 + $0x68] sm:$0xf] %vm822_vm3, %v9675_v14  ;;  %v5475_v26 = vpack.c.bf16 %v5443_v25, %v5443_v25  ;;  %v9714_v25 = vpack.c.bf16 %v5451_v31, %v5451_v31 }
 0x763   : > { %5530 = vrot.lane.b32.xlu2 %v5463_v41, %s7665_s13 }
 0x764   : > { %v5319_v36 = vpop.permute.xlu0 %5318 }
 0x765   : > { %5405 = vst.msk [vmem:[#allocation4 + $0x24] sm:$0xf] %vm1047_vm4, %v5319_v36  ;;  %5532 = vrot.lane.b32.xlu0 %v5464_v37, %s7665_s13  ;;  %5528 = vrot.lane.b32.xlu1 %v9624_v40, %s7665_s13  ;;  %v5135_v36 = vld [vmem:[#allocation3 + $0x140] sm:$0xff] }
 0x766   : > { %v5446_v37 = vld [vmem:[#allocation3 + $0xda] sm:$0xff]  ;;  %v9686_v43 = vpack.c.bf16 %v5135_v36, %v5135_v36 }
 0x767   : > { %v5478_v24 = vpack.c.bf16 %v5446_v37, %v5446_v37  ;;  %v5454_v37 = vld [vmem:[#allocation3 + $0x13a] sm:$0xff] }
 0x768   : > { %5199 = vst.msk [vmem:[#allocation4 + $0x6c] sm:$0xf] %vm822_vm3, %v9686_v43 }
 0x76b   : > { %5536 = vrot.lane.b32.xlu2 %v5466_v59, %s7665_s13  ;;  %v5447_v59 = vld [vmem:[#allocation3 + $0xe2] sm:$0xff] }
 0x76c   : > { %v5321_v53 = vpop.permute.xlu1 %5320  ;;  %v5479_v51 = vpack.c.bf16 %v5447_v59, %v5447_v59 }
 0x76d   : > { %5406 = vst.msk [vmem:[#allocation4 + $0x28] sm:$0xf] %vm1047_vm4, %v5321_v53  ;;  %5538 = vrot.lane.b32.xlu0 %v5467_v55, %s7665_s13  ;;  %5534 = vrot.lane.b32.xlu1 %v9639_v56, %s7665_s13  ;;  %v5136_v55 = vld [vmem:[#allocation3 + $0x150] sm:$0xff] }
 0x76e   : > { %v9697_v61 = vpack.c.bf16 %v5136_v55, %v5136_v55 }
 0x770   : > { %5200 = vst.msk [vmem:[#allocation4 + $0x70] sm:$0xf] %vm822_vm3, %v9697_v61 }
 0x773   : > { %5542 = vrot.lane.b32.xlu2 %v5469_v42, %s7665_s13  ;;  %v5481_v42 = vpack.c.bf16 %v5449_v44, %v5449_v44  ;;  %v5139_v44 = vld [vmem:[#allocation3 + $0x170] sm:$0xff] }
 0x774   : > { %v5329_v7 = vpop.permute.xlu2 %5328 }
 0x775   : > { %5410 = vst.msk [vmem:[#allocation4 + $0x38] sm:$0xf] %vm1047_vm4, %v5329_v7  ;;  %5544 = vrot.lane.b32.xlu0 %v5470_v8, %s7665_s13  ;;  %5540 = vrot.lane.b32.xlu1 %v9658_v63, %s7665_s13  ;;  %v9706_v8 = vpack.c.bf16 %v5448_v1, %v5448_v1  ;;  %v5490_v1 = vpack.c.bf16 %v5458_v60, %v5458_v60 }
 0x77b   : > { %5548 = vrot.lane.b32.xlu2 %v5472_v13, %s7665_s13  ;;  %v5452_v13 = vld [vmem:[#allocation3 + $0x122] sm:$0xff] }
 0x77c   : > { %v5325_v3 = vpop.permute.xlu0 %5324  ;;  %v5484_v16 = vpack.c.bf16 %v5452_v13, %v5452_v13  ;;  %v5489_v13 = vpack.c.bf16 %v5457_v4, %v5457_v4 }
 0x77d   : > { %5408 = vst.msk [vmem:[#allocation4 + $0x30] sm:$0xf] %vm1047_vm4, %v5325_v3  ;;  %5550 = vrot.lane.b32.xlu0 %v5473_v19, %s7665_s13  ;;  %5546 = vrot.lane.b32.xlu1 %v9669_v21, %s7665_s13  ;;  %v5453_v3 = vld [vmem:[#allocation3 + $0x12a] sm:$0xff] }
 0x783   : > { %5554 = vrot.lane.b32.xlu2 %v5475_v26, %s7665_s13  ;;  %v9716_v26 = vpack.c.bf16 %v5453_v3, %v5453_v3 }
 0x784   : > { %v5327_v41 = vpop.permute.xlu1 %5326 }
 0x785   : > { %5409 = vst.msk [vmem:[#allocation4 + $0x34] sm:$0xf] %vm1047_vm4, %v5327_v41  ;;  %5552 = vrot.lane.b32.xlu1 %v9680_v33, %s7665_s13  ;;  %5556 = vrot.lane.b32.xlu0 %v5476_v35, %s7665_s13  ;;  %v5455_v41 = vld [vmem:[#allocation3 + $0x142] sm:$0xff]  ;;  %v9724_v35 = vpack.c.bf16 %v5138_v29, %v5138_v29 }
 0x786   : > { %v5487_v36 = vpack.c.bf16 %v5455_v41, %v5455_v41 }
 0x787   : > { %5202 = vst.msk [vmem:[#allocation4 + $0x78] sm:$0xf] %vm822_vm3, %v9724_v35 }
 0x78b   : > { %5560 = vrot.lane.b32.xlu2 %v5478_v24, %s7665_s13  ;;  %v5456_v24 = vld [vmem:[#allocation3 + $0x152] sm:$0xff] }
 0x78d   : > { %v5335_v53 = vpop.permute.xlu2 %5334  ;;  %5558 = vrot.lane.b32.xlu1 %v9691_v50, %s7665_s13  ;;  %5562 = vrot.lane.b32.xlu0 %v5479_v51, %s7665_s13  ;;  %v5486_v51 = vpack.c.bf16 %v5454_v37, %v5454_v37 }
 0x78e   : > { %5413 = vst.msk [vmem:[#allocation4 + $0x44] sm:$0xf] %vm1047_vm4, %v5335_v53  ;;  %v5488_v53 = vpack.c.bf16 %v5456_v24, %v5456_v24 }
 0x793   : > { %5566 = vrot.lane.b32.xlu2 %v5481_v42, %s7665_s13  ;;  %v9734_v42 = vpack.c.bf16 %v5139_v44, %v5139_v44  ;;  %v5876_v44 = vld [vmem:[#allocation3 + $0x19] sm:$0xff] }
 0x794   : > { %v5331_v7 = vpop.permute.xlu0 %5330  ;;  %v5908_v60 = vpack.c.bf16 %v5876_v44, %v5876_v44  ;;  %v5894_v44 = vld [vmem:[#allocation3 + $0xf1] sm:$0xff] }
 0x795   : > { %5411 = vst.msk [vmem:[#allocation4 + $0x3c] sm:$0xf] %vm1047_vm4, %v5331_v7  ;;  %v5341_v12 = vpop.permute.xlu2 %5340  ;;  %5564 = vrot.lane.b32.xlu1 %v9706_v8, %s7665_s13  ;;  %5568 = vrot.lane.b32.xlu0 %v5482_v38, %s7665_s13  ;;  %v5459_v7 = vld [vmem:[#allocation3 + $0x172] sm:$0xff] }
 0x796   : > { %5416 = vst.msk [vmem:[#allocation4 + $0x50] sm:$0xf] %vm1047_vm4, %v5341_v12 }
 0x797   : > { %5203 = vst.msk [vmem:[#allocation4 + $0x7c] sm:$0xf] %vm822_vm3, %v9734_v42  ;;  %vm7177_vm3 = vcmask 1041408  }
 0x79b   : > { %5572 = vrot.lane.b32.xlu2 %v5484_v16, %s7665_s13  ;;  %v5491_v16 = vpack.c.bf16 %v5459_v7, %v5459_v7 }
 0x79c   : > { %v5337_v19 = vpop.permute.xlu0 %5336  ;;  %v5333_v22 = vpop.permute.xlu1 %5332 }
 0x79d   : > { %5414 = vst.msk [vmem:[#allocation4 + $0x48] sm:$0xf] %vm1047_vm4, %v5337_v19  ;;  %v5347_v23 = vpop.permute.xlu2 %5346  ;;  %5570 = vrot.lane.b32.xlu1 %v9714_v25, %s7665_s13  ;;  %5574 = vrot.lane.b32.xlu0 %v9716_v26, %s7665_s13 }
 0x79e   : > { %5412 = vst.msk [vmem:[#allocation4 + $0x40] sm:$0xf] %vm1047_vm4, %v5333_v22 }
 0x79f   : > { %5419 = vst.msk [vmem:[#allocation4 + $0x5c] sm:$0xf] %vm1047_vm4, %v5347_v23 }
 0x7a3   : > { %5578 = vrot.lane.b32.xlu2 %v5487_v36, %s7665_s13 }
 0x7a4   : > { %v5343_v46 = vpop.permute.xlu0 %5342  ;;  %v5339_v59 = vpop.permute.xlu1 %5338 }
 0x7a5   : > { %5417 = vst.msk [vmem:[#allocation4 + $0x54] sm:$0xf] %vm1047_vm4, %v5343_v46  ;;  %v5353_v55 = vpop.permute.xlu2 %5352  ;;  %5576 = vrot.lane.b32.xlu1 %v5486_v51, %s7665_s13  ;;  %5580 = vrot.lane.b32.xlu0 %v5488_v53, %s7665_s13 }
 0x7a6   : > { %5415 = vst.msk [vmem:[#allocation4 + $0x4c] sm:$0xf] %vm1047_vm4, %v5339_v59 }
 0x7a7   : > { %5422 = vst.msk [vmem:[#allocation4 + $0x68] sm:$0xf] %vm1047_vm4, %v5353_v55 }
 0x7ab   : > { %5584 = vrot.lane.b32.xlu2 %v5490_v1, %s7665_s13 }
 0x7ac   : > { %v5349_v38 = vpop.permute.xlu0 %5348  ;;  %v5345_v12 = vpop.permute.xlu1 %5344 }
 0x7ad   : > { %5420 = vst.msk [vmem:[#allocation4 + $0x60] sm:$0xf] %vm1047_vm4, %v5349_v38  ;;  %v5359_v31 = vpop.permute.xlu2 %5358  ;;  %5582 = vrot.lane.b32.xlu1 %v5489_v13, %s7665_s13  ;;  %5586 = vrot.lane.b32.xlu0 %v5491_v16, %s7665_s13  ;;  %v5877_v38 = vld [vmem:[#allocation3 + $0x21] sm:$0xff] }
 0x7ae   : > { %5418 = vst.msk [vmem:[#allocation4 + $0x58] sm:$0xf] %vm1047_vm4, %v5345_v12  ;;  %v5879_v12 = vld [vmem:[#allocation3 + $0x39] sm:$0xff]  ;;  %v5909_v13 = vpack.c.bf16 %v5877_v38, %v5877_v38 }
 0x7af   : > { %5425 = vst.msk [vmem:[#allocation4 + $0x74] sm:$0xf] %vm1047_vm4, %v5359_v31  ;;  %v9851_v16 = vpack.c.bf16 %v5879_v12, %v5879_v12  ;;  %v5895_v12 = vld [vmem:[#allocation3 + $0xf9] sm:$0xff] }
 0x7b3   : > { %5750 = vrot.lane.b32.xlu2 %v9478_v6, %s7666_s30 }
 0x7b4   : > { %v5355_v3 = vpop.permute.xlu0 %5354  ;;  %v5351_v19 = vpop.permute.xlu1 %5350 }
 0x7b5   : > { %5423 = vst.msk [vmem:[#allocation4 + $0x6c] sm:$0xf] %vm1047_vm4, %v5355_v3  ;;  %v5525_v22 = vpop.permute.xlu2 %5524  ;;  %5748 = vrot.lane.b32.xlu1 %v9460_v48, %s7666_s30  ;;  %5752 = vrot.lane.b32.xlu0 %v9493_v20, %s7666_s30  ;;  %v5881_v3 = vld [vmem:[#allocation3 + $0x51] sm:$0xff] }
 0x7b6   : > { %5421 = vst.msk [vmem:[#allocation4 + $0x64] sm:$0xf] %vm1047_vm4, %v5351_v19 }
 0x7b7   : > { %5620 = vst.msk [vmem:[#allocation4] sm:$0xf] %vm1272_vm5, %v5525_v22 }
 0x7bb   : > { %5756 = vrot.lane.b32.xlu2 %v9515_v49, %s7666_s30  ;;  %v4967_v49 = vpop.f32.mrf.mxu2 }
 0x7bc   : > { %v5357_v23 = vpop.permute.xlu1 %5356 }
 0x7bd   : > { %5424 = vst.msk [vmem:[#allocation4 + $0x70] sm:$0xf] %vm1047_vm4, %v5357_v23  ;;  %v5531_v6 = vpop.permute.xlu2 %5530  ;;  %5754 = vrot.lane.b32.xlu1 %v9486_v11, %s7666_s30  ;;  %5758 = vrot.lane.b32.xlu0 %v9530_v0, %s7666_s30  ;;  %v7652_v11 = vld [vmem:[%s10437_s5] ss:$0 sm:$0xff]  ;;  %v9858_v23 = vpack.c.bf16 %v5881_v3, %v5881_v3 }
 0x7be   : > { %5623 = vst.msk [vmem:[#allocation4 + $0xc] sm:$0xf] %vm1272_vm5, %v5531_v6  ;;  %v5006_v0 = vmul.f32 %v7652_v11, %v4967_v49  ;;  %v5880_v6 = vld [vmem:[#allocation3 + $0x49] sm:$0xff] }
 0x7c3   : > { %5762 = vrot.lane.b32.xlu2 %v9547_v27, %s7666_s30  ;;  %v4969_v36 = vpop.f32.mrf.mxu2 }
 0x7c4   : > { %v5007_v37 = vmul.f32 %v7652_v11, %v4969_v36 }
 0x7c5   : > { %v5537_v48 = vpop.permute.xlu2 %5536  ;;  %5760 = vrot.lane.b32.xlu1 %v9523_v57, %s7666_s30  ;;  %5764 = vrot.lane.b32.xlu0 %v9566_v47, %s7666_s30  ;;  %v7653_v57 = vld [vmem:[%s10438_s6] ss:$0 sm:$0xff] }
 0x7c6   : > { %5626 = vst.msk [vmem:[#allocation4 + $0x18] sm:$0xf] %vm1272_vm5, %v5537_v48  ;;  %v5042_v29 = vadd.f32 %v7653_v57, %v5006_v0  ;;  %v5043_v46 = vadd.f32 %v7653_v57, %v5007_v37  ;;  %v5882_v48 = vld [vmem:[#allocation3 + $0x61] sm:$0xff]  ;;  %v5884_v0 = vld [vmem:[#allocation3 + $0x79] sm:$0xff] }
 0x7c7   : > { %v5361_v20 = vpop.permute.xlu0 %5360  ;;  %v9865_v49 = vpack.c.bf16 %v5882_v48, %v5882_v48 }
 0x7c8   : > { %5426 = vst.msk [vmem:[#allocation4 + $0x78] sm:$0xf] %vm1047_vm4, %v5361_v20  ;;  %v5074_v47 = vmax.f32 %v5042_v29, 0.0  ;;  %v9863_v20 = vpack.c.bf16 %v5880_v6, %v5880_v6  ;;  %v9873_v29 = vpack.c.bf16 %v5884_v0, %v5884_v0  ;;  %v5898_v0 = vld [vmem:[#allocation3 + $0x121] sm:$0xff] }
 0x7ca   : > { %5106 = vst.msk [vmem:[#allocation3 + $0x181] sm:$0xff] %vm327_vm0, %v5074_v47  ;;  %v5883_v47 = vld [vmem:[#allocation3 + $0x69] sm:$0xff] }
 0x7cb   : > { %5768 = vrot.lane.b32.xlu2 %v9592_v10, %s7666_s30 }
 0x7cd   : > { %v5543_v27 = vpop.permute.xlu2 %5542  ;;  %5766 = vrot.lane.b32.xlu1 %v9556_v34, %s7666_s30  ;;  %5770 = vrot.lane.b32.xlu0 %v9608_v9, %s7666_s30  ;;  %v5075_v34 = vmax.f32 %v5043_v46, 0.0 }
 0x7ce   : > { %5629 = vst.msk [vmem:[#allocation4 + $0x24] sm:$0xf] %vm1272_vm5, %v5543_v27 }
 0x7cf   : > { %v5527_v10 = vpop.permute.xlu0 %5526  ;;  %v5363_v41 = vpop.permute.xlu1 %5362  ;;  %5107 = vst.msk [vmem:[#allocation3 + $0x189] sm:$0xff] %vm327_vm0, %v5075_v34 }
 0x7d0   : > { %5621 = vst.msk [vmem:[#allocation4 + $0x4] sm:$0xf] %vm1272_vm5, %v5527_v10  ;;  %v5885_v10 = vld [vmem:[#allocation3 + $0x81] sm:$0xff] }
 0x7d1   : > { %5427 = vst.msk [vmem:[#allocation4 + $0x7c] sm:$0xf] %vm1047_vm4, %v5363_v41  ;;  %v9878_v41 = vpack.c.bf16 %v5883_v47, %v5883_v47  ;;  %v9880_v36 = vpack.c.bf16 %v5885_v10, %v5885_v10  ;;  %vm7128_vm4 = vcmask 293888  }
 0x7d3   : > { %5774 = vrot.lane.b32.xlu2 %v9634_v52, %s7666_s30 }
 0x7d5   : > { %v5549_v24 = vpop.permute.xlu2 %5548  ;;  %5772 = vrot.lane.b32.xlu1 %v9599_v17, %s7666_s30  ;;  %5776 = vrot.lane.b32.xlu0 %v9651_v5, %s7666_s30 }
 0x7d6   : > { %5632 = vst.msk [vmem:[#allocation4 + $0x30] sm:$0xf] %vm1272_vm5, %v5549_v24  ;;  %v5887_v24 = vld [vmem:[#allocation3 + $0x99] sm:$0xff] }
 0x7d7   : > { %v5533_v9 = vpop.permute.xlu0 %5532  ;;  %v5529_v59 = vpop.permute.xlu1 %5528 }
 0x7d8   : > { %5624 = vst.msk [vmem:[#allocation4 + $0x10] sm:$0xf] %vm1272_vm5, %v5533_v9  ;;  %v9888_v9 = vpack.c.bf16 %v5887_v24, %v5887_v24 }
 0x7d9   : > { %5622 = vst.msk [vmem:[#allocation4 + $0x8] sm:$0xf] %vm1272_vm5, %v5529_v59  ;;  %v5886_v59 = vld [vmem:[#allocation3 + $0x91] sm:$0xff] }
 0x7db   : > { %5780 = vrot.lane.b32.xlu2 %v9559_v39, %s7666_s30 }
 0x7dd   : > { %v5555_v52 = vpop.permute.xlu2 %5554  ;;  %5778 = vrot.lane.b32.xlu1 %v9645_v2, %s7666_s30  ;;  %5782 = vrot.lane.b32.xlu0 %v9577_v58, %s7666_s30 }
 0x7de   : > { %5635 = vst.msk [vmem:[#allocation4 + $0x3c] sm:$0xf] %vm1272_vm5, %v5555_v52  ;;  %v5888_v52 = vld [vmem:[#allocation3 + $0xa9] sm:$0xff] }
 0x7df   : > { %v5539_v17 = vpop.permute.xlu0 %5538  ;;  %v5535_v5 = vpop.permute.xlu1 %5534 }
 0x7e0   : > { %5627 = vst.msk [vmem:[#allocation4 + $0x1c] sm:$0xf] %vm1272_vm5, %v5539_v17  ;;  %v9893_v17 = vpack.c.bf16 %v5886_v59, %v5886_v59  ;;  %v5901_v59 = vld [vmem:[#allocation3 + $0x141] sm:$0xff] }
 0x7e1   : > { %5625 = vst.msk [vmem:[#allocation4 + $0x14] sm:$0xf] %vm1272_vm5, %v5535_v5  ;;  %v5920_v5 = vpack.c.bf16 %v5888_v52, %v5888_v52  ;;  %v5903_v52 = vld [vmem:[#allocation3 + $0x159] sm:$0xff] }
 0x7e3   : > { %5786 = vrot.lane.b32.xlu2 %v9602_v18, %s7666_s30 }
 0x7e5   : > { %v5561_v39 = vpop.permute.xlu2 %5560  ;;  %5784 = vrot.lane.b32.xlu1 %v9587_v54, %s7666_s30  ;;  %5788 = vrot.lane.b32.xlu0 %v9619_v32, %s7666_s30 }
 0x7e6   : > { %5638 = vst.msk [vmem:[#allocation4 + $0x48] sm:$0xf] %vm1272_vm5, %v5561_v39 }
 0x7e7   : > { %v5545_v2 = vpop.permute.xlu0 %5544  ;;  %v5541_v58 = vpop.permute.xlu1 %5540 }
 0x7e8   : > { %5630 = vst.msk [vmem:[#allocation4 + $0x28] sm:$0xf] %vm1272_vm5, %v5545_v2  ;;  %v5890_v2 = vld [vmem:[#allocation3 + $0xc1] sm:$0xff] }
 0x7e9   : > { %5628 = vst.msk [vmem:[#allocation4 + $0x20] sm:$0xf] %vm1272_vm5, %v5541_v58 }
 0x7eb   : > { %5792 = vrot.lane.b32.xlu2 %v9647_v15, %s7666_s30 }
 0x7ed   : > { %v5567_v51 = vpop.permute.xlu2 %5566  ;;  %5790 = vrot.lane.b32.xlu1 %v9630_v45, %s7666_s30  ;;  %5794 = vrot.lane.b32.xlu0 %v9664_v30, %s7666_s30  ;;  %v5683_v30 = vld [vmem:[#allocation3 + $0x188] sm:$0xff] }
 0x7ee   : > { %5641 = vst.msk [vmem:[#allocation4 + $0x54] sm:$0xf] %vm1272_vm5, %v5567_v51 }
 0x7ef   : > { %v5551_v54 = vpop.permute.xlu0 %5550  ;;  %v5547_v18 = vpop.permute.xlu1 %5546 }
 0x7f0   : > { %5633 = vst.msk [vmem:[#allocation4 + $0x34] sm:$0xf] %vm1272_vm5, %v5551_v54  ;;  %v5922_v54 = vpack.c.bf16 %v5890_v2, %v5890_v2 }
 0x7f1   : > { %5631 = vst.msk [vmem:[#allocation4 + $0x2c] sm:$0xf] %vm1272_vm5, %v5547_v18  ;;  %v5889_v18 = vld [vmem:[#allocation3 + $0xb1] sm:$0xff] }
 0x7f3   : > { %5798 = vrot.lane.b32.xlu2 %v9686_v43, %s7666_s30 }
 0x7f5   : > { %v5573_v32 = vpop.permute.xlu2 %5572  ;;  %5796 = vrot.lane.b32.xlu1 %v9675_v14, %s7666_s30  ;;  %5800 = vrot.lane.b32.xlu0 %v9697_v61, %s7666_s30  ;;  %v5715_v14 = vpack.c.bf16 %v5683_v30, %v5683_v30  ;;  %v5682_v61 = vld [vmem:[#allocation3 + $0x180] sm:$0xff] }
 0x7f6   : > { %5644 = vst.msk [vmem:[#allocation4 + $0x60] sm:$0xf] %vm1272_vm5, %v5573_v32  ;;  %v5891_v32 = vld [vmem:[#allocation3 + $0xc9] sm:$0xff] }
 0x7f7   : > { %v5553_v45 = vpop.permute.xlu1 %5552  ;;  %v5557_v15 = vpop.permute.xlu0 %5556 }
 0x7f8   : > { %5634 = vst.msk [vmem:[#allocation4 + $0x38] sm:$0xf] %vm1272_vm5, %v5553_v45  ;;  %v5921_v45 = vpack.c.bf16 %v5889_v18, %v5889_v18  ;;  %v5906_v18 = vld [vmem:[#allocation3 + $0x181] sm:$0xff] }
 0x7f9   : > { %5636 = vst.msk [vmem:[#allocation4 + $0x40] sm:$0xf] %vm1272_vm5, %v5557_v15  ;;  %v5923_v15 = vpack.c.bf16 %v5891_v32, %v5891_v32 }
 0x7fb   : > { %5804 = vrot.lane.b32.xlu2 %v9724_v35, %s7666_s30  ;;  %v5714_v35 = vpack.c.bf16 %v5682_v61, %v5682_v61 }
 0x7fd   : > { %v5579_v43 = vpop.permute.xlu2 %5578  ;;  %5802 = vrot.lane.b32.xlu1 %v9699_v62, %s7666_s30  ;;  %5806 = vrot.lane.b32.xlu0 %v9734_v42, %s7666_s30  ;;  %v5878_v62 = vld [vmem:[#allocation3 + $0x31] sm:$0xff] }
 0x7fe   : > { %5647 = vst.msk [vmem:[#allocation4 + $0x6c] sm:$0xf] %vm1272_vm5, %v5579_v43  ;;  %v9846_v7 = vpack.c.bf16 %v5878_v62, %v5878_v62  ;;  %v5893_v43 = vld [vmem:[#allocation3 + $0xe1] sm:$0xff]  ;;  %v5896_v62 = vld [vmem:[#allocation3 + $0x109] sm:$0xff] }
 0x7ff   : > { %v5559_v53 = vpop.permute.xlu1 %5558  ;;  %v5563_v55 = vpop.permute.xlu0 %5562  ;;  %v9912_v38 = vpack.c.bf16 %v5896_v62, %v5896_v62 }
 0x800   : > { %5637 = vst.msk [vmem:[#allocation4 + $0x44] sm:$0xf] %vm1272_vm5, %v5559_v53  ;;  %v5925_v53 = vpack.c.bf16 %v5893_v43, %v5893_v43 }
 0x801   : > { %5639 = vst.msk [vmem:[#allocation4 + $0x4c] sm:$0xf] %vm1272_vm5, %v5563_v55  ;;  %v5892_v55 = vld [vmem:[#allocation3 + $0xd9] sm:$0xff] }
 0x803   : > { %5810 = vrot.lane.b32.xlu2 %v5715_v14, %s7666_s30 }
 0x805   : > { %v5585_v1 = vpop.permute.xlu2 %5584  ;;  %5808 = vrot.lane.b32.xlu1 %v5714_v35, %s7666_s30  ;;  %5972 = vrot.lane.b32.xlu0 %v5908_v60, %s7667_s9  ;;  %v5924_v35 = vpack.c.bf16 %v5892_v55, %v5892_v55  ;;  %v5926_v60 = vpack.c.bf16 %v5894_v44, %v5894_v44 }
 0x806   : > { %5650 = vst.msk [vmem:[#allocation4 + $0x78] sm:$0xf] %vm1272_vm5, %v5585_v1 }
 0x807   : > { %v5565_v42 = vpop.permute.xlu1 %5564  ;;  %v5569_v4 = vpop.permute.xlu0 %5568 }
 0x808   : > { %5640 = vst.msk [vmem:[#allocation4 + $0x50] sm:$0xf] %vm1272_vm5, %v5565_v42 }
 0x809   : > { %5642 = vst.msk [vmem:[#allocation4 + $0x58] sm:$0xf] %vm1272_vm5, %v5569_v4 }
 0x80b   : > { %5976 = vrot.lane.b32.xlu2 %v9846_v7, %s7667_s9 }
 0x80d   : > { %v5751_v31 = vpop.permute.xlu2 %5750  ;;  %5974 = vrot.lane.b32.xlu1 %v5909_v13, %s7667_s9  ;;  %5978 = vrot.lane.b32.xlu0 %v9851_v16, %s7667_s9  ;;  %v5897_v13 = vld [vmem:[#allocation3 + $0x111] sm:$0xff] }
 0x80e   : > { %5845 = vst.msk [vmem:[#allocation4 + $0x4] sm:$0xf] %vm1497_vm6, %v5751_v31  ;;  %v5927_v31 = vpack.c.bf16 %v5895_v12, %v5895_v12  ;;  %v9917_v3 = vpack.c.bf16 %v5897_v13, %v5897_v13  ;;  %v6105_v13 = vld [vmem:[#allocation3 + $0x52] sm:$0xff] }
 0x80f   : > { %v5571_v19 = vpop.permute.xlu1 %5570  ;;  %v5575_v22 = vpop.permute.xlu0 %5574 }
 0x810   : > { %5643 = vst.msk [vmem:[#allocation4 + $0x5c] sm:$0xf] %vm1272_vm5, %v5571_v19 }
 0x811   : > { %5645 = vst.msk [vmem:[#allocation4 + $0x64] sm:$0xf] %vm1272_vm5, %v5575_v22  ;;  %v5899_v22 = vld [vmem:[#allocation3 + $0x129] sm:$0xff] }
 0x813   : > { %5982 = vrot.lane.b32.xlu2 %v9858_v23, %s7667_s9 }
 0x815   : > { %v5757_v11 = vpop.permute.xlu2 %5756  ;;  %5980 = vrot.lane.b32.xlu1 %v9863_v20, %s7667_s9  ;;  %5984 = vrot.lane.b32.xlu0 %v9865_v49, %s7667_s9 }
 0x816   : > { %5848 = vst.msk [vmem:[#allocation4 + $0x10] sm:$0xf] %vm1497_vm6, %v5757_v11  ;;  %v9924_v11 = vpack.c.bf16 %v5899_v22, %v5899_v22 }
 0x817   : > { %v5577_v27 = vpop.permute.xlu1 %5576  ;;  %v5581_v57 = vpop.permute.xlu0 %5580 }
 0x818   : > { %5646 = vst.msk [vmem:[#allocation4 + $0x68] sm:$0xf] %vm1272_vm5, %v5577_v27  ;;  %v5900_v27 = vld [vmem:[#allocation3 + $0x139] sm:$0xff] }
 0x819   : > { %5648 = vst.msk [vmem:[#allocation4 + $0x70] sm:$0xf] %vm1272_vm5, %v5581_v57  ;;  %v9929_v57 = vpack.c.bf16 %v5898_v0, %v5898_v0  ;;  %v9931_v47 = vpack.c.bf16 %v5900_v27, %v5900_v27  ;;  %v6108_v0 = vld [vmem:[#allocation3 + $0x7a] sm:$0xff]  ;;  %v6110_v27 = vld [vmem:[#allocation3 + $0x92] sm:$0xff] }
 0x81b   : > { %5988 = vrot.lane.b32.xlu2 %v9873_v29, %s7667_s9 }
 0x81d   : > { %v5763_v37 = vpop.permute.xlu2 %5762  ;;  %5986 = vrot.lane.b32.xlu1 %v9878_v41, %s7667_s9  ;;  %5990 = vrot.lane.b32.xlu0 %v9880_v36, %s7667_s9 }
 0x81e   : > { %5851 = vst.msk [vmem:[#allocation4 + $0x1c] sm:$0xf] %vm1497_vm6, %v5763_v37  ;;  %v5902_v37 = vld [vmem:[#allocation3 + $0x151] sm:$0xff] }
 0x81f   : > { %v5583_v46 = vpop.permute.xlu1 %5582  ;;  %v5587_v34 = vpop.permute.xlu0 %5586 }
 0x820   : > { %5649 = vst.msk [vmem:[#allocation4 + $0x74] sm:$0xf] %vm1272_vm5, %v5583_v46 }
 0x821   : > { %5651 = vst.msk [vmem:[#allocation4 + $0x7c] sm:$0xf] %vm1272_vm5, %v5587_v34  ;;  %v9939_v34 = vpack.c.bf16 %v5902_v37, %v5902_v37 }
 0x823   : > { %5994 = vrot.lane.b32.xlu2 %v9888_v9, %s7667_s9 }
 0x825   : > { %v5769_v39 = vpop.permute.xlu2 %5768  ;;  %5992 = vrot.lane.b32.xlu1 %v9893_v17, %s7667_s9  ;;  %5996 = vrot.lane.b32.xlu0 %v5920_v5, %s7667_s9  ;;  %v9944_v5 = vpack.c.bf16 %v5901_v59, %v5901_v59  ;;  %v6111_v59 = vld [vmem:[#allocation3 + $0x9a] sm:$0xff] }
 0x826   : > { %5854 = vst.msk [vmem:[#allocation4 + $0x28] sm:$0xf] %vm1497_vm6, %v5769_v39  ;;  %v9946_v39 = vpack.c.bf16 %v5903_v52, %v5903_v52  ;;  %v6113_v52 = vld [vmem:[#allocation3 + $0xb2] sm:$0xff] }
 0x827   : > { %v5749_v58 = vpop.permute.xlu1 %5748  ;;  %v5753_v51 = vpop.permute.xlu0 %5752 }
 0x828   : > { %5844 = vst.msk [vmem:[#allocation4] sm:$0xf] %vm1497_vm6, %v5749_v58 }
 0x829   : > { %5846 = vst.msk [vmem:[#allocation4 + $0x8] sm:$0xf] %vm1497_vm6, %v5753_v51 }
 0x82b   : > { %6000 = vrot.lane.b32.xlu2 %v5922_v54, %s7667_s9  ;;  %v5904_v54 = vld [vmem:[#allocation3 + $0x169] sm:$0xff] }
 0x82c   : > { %v9957_v32 = vpack.c.bf16 %v5904_v54, %v5904_v54 }
 0x82d   : > { %v5775_v30 = vpop.permute.xlu2 %5774  ;;  %5998 = vrot.lane.b32.xlu1 %v5921_v45, %s7667_s9  ;;  %6002 = vrot.lane.b32.xlu0 %v5923_v15, %s7667_s9  ;;  %v5938_v45 = vpack.c.bf16 %v5906_v18, %v5906_v18  ;;  %v6114_v18 = vld [vmem:[#allocation3 + $0xc2] sm:$0xff] }
 0x82e   : > { %5857 = vst.msk [vmem:[#allocation4 + $0x34] sm:$0xf] %vm1497_vm6, %v5775_v30 }
 0x82f   : > { %v5755_v14 = vpop.permute.xlu1 %5754  ;;  %v5759_v61 = vpop.permute.xlu0 %5758 }
 0x830   : > { %5847 = vst.msk [vmem:[#allocation4 + $0xc] sm:$0xf] %vm1497_vm6, %v5755_v14  ;;  %v5907_v14 = vld [vmem:[#allocation3 + $0x189] sm:$0xff] }
 0x831   : > { %5849 = vst.msk [vmem:[#allocation4 + $0x14] sm:$0xf] %vm1497_vm6, %v5759_v61  ;;  %v6101_v61 = vld [vmem:[#allocation3 + $0x22] sm:$0xff] }
 0x833   : > { %6006 = vrot.lane.b32.xlu2 %v5925_v53, %s7667_s9  ;;  %v6133_v53 = vpack.c.bf16 %v6101_v61, %v6101_v61  ;;  %v6117_v61 = vld [vmem:[#allocation3 + $0xe2] sm:$0xff] }
 0x835   : > { %v5781_v1 = vpop.permute.xlu2 %5780  ;;  %6004 = vrot.lane.b32.xlu1 %v5924_v35, %s7667_s9  ;;  %6008 = vrot.lane.b32.xlu0 %v5926_v60, %s7667_s9  ;;  %v6102_v60 = vld [vmem:[#allocation3 + $0x32] sm:$0xff] }
 0x836   : > { %5860 = vst.msk [vmem:[#allocation4 + $0x40] sm:$0xf] %vm1497_vm6, %v5781_v1  ;;  %v6104_v1 = vld [vmem:[#allocation3 + $0x4a] sm:$0xff] }
 0x837   : > { %v5761_v42 = vpop.permute.xlu1 %5760  ;;  %v5765_v4 = vpop.permute.xlu0 %5764  ;;  %v9976_v62 = vpack.c.bf16 %v6104_v1, %v6104_v1  ;;  %v6122_v1 = vld [vmem:[#allocation3 + $0x122] sm:$0xff] }
 0x838   : > { %5850 = vst.msk [vmem:[#allocation4 + $0x18] sm:$0xf] %vm1497_vm6, %v5761_v42 }
 0x839   : > { %5852 = vst.msk [vmem:[#allocation4 + $0x20] sm:$0xf] %vm1497_vm6, %v5765_v4 }
 0x83b   : > { %6012 = vrot.lane.b32.xlu2 %v9912_v38, %s7667_s9 }
 0x83d   : > { %v5787_v19 = vpop.permute.xlu2 %5786  ;;  %6010 = vrot.lane.b32.xlu1 %v5927_v31, %s7667_s9  ;;  %6014 = vrot.lane.b32.xlu0 %v9917_v3, %s7667_s9  ;;  %v6107_v31 = vld [vmem:[#allocation3 + $0x6a] sm:$0xff] }
 0x83e   : > { %5863 = vst.msk [vmem:[#allocation4 + $0x4c] sm:$0xf] %vm1497_vm6, %v5787_v19  ;;  %v9989_v19 = vpack.c.bf16 %v6107_v31, %v6107_v31 }
 0x83f   : > { %v5767_v6 = vpop.permute.xlu1 %5766  ;;  %v5771_v48 = vpop.permute.xlu0 %5770 }
 0x840   : > { %5853 = vst.msk [vmem:[#allocation4 + $0x24] sm:$0xf] %vm1497_vm6, %v5767_v6 }
 0x841   : > { %5855 = vst.msk [vmem:[#allocation4 + $0x2c] sm:$0xf] %vm1497_vm6, %v5771_v48 }
 0x843   : > { %6018 = vrot.lane.b32.xlu2 %v9924_v11, %s7667_s9 }
 0x845   : > { %v5793_v10 = vpop.permute.xlu2 %5792  ;;  %6016 = vrot.lane.b32.xlu1 %v9929_v57, %s7667_s9  ;;  %6020 = vrot.lane.b32.xlu0 %v9931_v47, %s7667_s9 }
 0x846   : > { %5866 = vst.msk [vmem:[#allocation4 + $0x58] sm:$0xf] %vm1497_vm6, %v5793_v10  ;;  %v10002_v10 = vpack.c.bf16 %v6110_v27, %v6110_v27 }
 0x847   : > { %v5773_v24 = vpop.permute.xlu1 %5772  ;;  %v5777_v46 = vpop.permute.xlu0 %5776 }
 0x848   : > { %5856 = vst.msk [vmem:[#allocation4 + $0x30] sm:$0xf] %vm1497_vm6, %v5773_v24 }
 0x849   : > { %5858 = vst.msk [vmem:[#allocation4 + $0x38] sm:$0xf] %vm1497_vm6, %v5777_v46 }
 0x84b   : > { %6024 = vrot.lane.b32.xlu2 %v9939_v34, %s7667_s9 }
 0x84d   : > { %v5799_v2 = vpop.permute.xlu2 %5798  ;;  %6022 = vrot.lane.b32.xlu1 %v9944_v5, %s7667_s9  ;;  %6026 = vrot.lane.b32.xlu0 %v9946_v39, %s7667_s9 }
 0x84e   : > { %5869 = vst.msk [vmem:[#allocation4 + $0x64] sm:$0xf] %vm1497_vm6, %v5799_v2  ;;  %v10015_v2 = vpack.c.bf16 %v6113_v52, %v6113_v52  ;;  %v6773_v52 = vld [vmem:[#allocation3 + $0x3a] sm:$0xff] }
 0x84f   : > { %v5779_v58 = vpop.permute.xlu1 %5778  ;;  %v5783_v51 = vpop.permute.xlu0 %5782 }
 0x850   : > { %5859 = vst.msk [vmem:[#allocation4 + $0x3c] sm:$0xf] %vm1497_vm6, %v5779_v58 }
 0x851   : > { %5861 = vst.msk [vmem:[#allocation4 + $0x44] sm:$0xf] %vm1497_vm6, %v5783_v51 }
 0x853   : > { %6030 = vrot.lane.b32.xlu2 %v9613_v28, %s7667_s9  ;;  %v5939_v28 = vpack.c.bf16 %v5907_v14, %v5907_v14 }
 0x855   : > { %v5805_v15 = vpop.permute.xlu2 %5804  ;;  %6028 = vrot.lane.b32.xlu1 %v9957_v32, %s7667_s9  ;;  %6032 = vrot.lane.b32.xlu0 %v5938_v45, %s7667_s9  ;;  %v6116_v45 = vld [vmem:[#allocation3 + $0xda] sm:$0xff] }
 0x856   : > { %5872 = vst.msk [vmem:[#allocation4 + $0x70] sm:$0xf] %vm1497_vm6, %v5805_v15  ;;  %v6148_v15 = vpack.c.bf16 %v6116_v45, %v6116_v45  ;;  %v6342_v45 = vld [vmem:[#allocation3 + $0x108] sm:$0xff] }
 0x857   : > { %v5785_v30 = vpop.permute.xlu1 %5784  ;;  %v5789_v43 = vpop.permute.xlu0 %5788 }
 0x858   : > { %5862 = vst.msk [vmem:[#allocation4 + $0x48] sm:$0xf] %vm1497_vm6, %v5785_v30 }
 0x859   : > { %5864 = vst.msk [vmem:[#allocation4 + $0x50] sm:$0xf] %vm1497_vm6, %v5789_v43 }
 0x85b   : > { %6196 = vrot.lane.b32.xlu2 %v9624_v40, %s7668_s10  ;;  %v9974_v40 = vpack.c.bf16 %v6102_v60, %v6102_v60  ;;  %v6120_v60 = vld [vmem:[#allocation3 + $0x10a] sm:$0xff] }
 0x85d   : > { %v5811_v55 = vpop.permute.xlu2 %5810  ;;  %6034 = vrot.lane.b32.xlu1 %v5939_v28, %s7667_s9  ;;  %6198 = vrot.lane.b32.xlu0 %v6133_v53, %s7668_s10  ;;  %v6119_v28 = vld [vmem:[#allocation3 + $0xfa] sm:$0xff] }
 0x85e   : > { %5875 = vst.msk [vmem:[#allocation4 + $0x7c] sm:$0xf] %vm1497_vm6, %v5811_v55  ;;  %v6151_v53 = vpack.c.bf16 %v6119_v28, %v6119_v28 }
 0x85f   : > { %v5791_v44 = vpop.permute.xlu1 %5790  ;;  %v5795_v35 = vpop.permute.xlu0 %5794 }
 0x860   : > { %5865 = vst.msk [vmem:[#allocation4 + $0x54] sm:$0xf] %vm1497_vm6, %v5791_v44 }
 0x861   : > { %5867 = vst.msk [vmem:[#allocation4 + $0x5c] sm:$0xf] %vm1497_vm6, %v5795_v35 }
 0x863   : > { %6202 = vrot.lane.b32.xlu2 %v9639_v56, %s7668_s10  ;;  %v9987_v56 = vpack.c.bf16 %v6105_v13, %v6105_v13 }
 0x865   : > { %v5977_v42 = vpop.permute.xlu2 %5976  ;;  %6200 = vrot.lane.b32.xlu1 %v9974_v40, %s7668_s10  ;;  %6204 = vrot.lane.b32.xlu0 %v9976_v62, %s7668_s10 }
 0x866   : > { %6070 = vst.msk [vmem:[#allocation4 + $0x8] sm:$0xf] %vm1722_vm7, %v5977_v42  ;;  %v10045_v42 = vpack.c.bf16 %v6122_v1, %v6122_v1 }
 0x867   : > { %v5797_v4 = vpop.permute.xlu1 %5796  ;;  %v5801_v12 = vpop.permute.xlu0 %5800 }
 0x868   : > { %5868 = vst.msk [vmem:[#allocation4 + $0x60] sm:$0xf] %vm1497_vm6, %v5797_v4 }
 0x869   : > { %5870 = vst.msk [vmem:[#allocation4 + $0x68] sm:$0xf] %vm1497_vm6, %v5801_v12  ;;  %v6324_v12 = vld [vmem:[#allocation3 + $0x30] sm:$0xff] }
 0x86b   : > { %6208 = vrot.lane.b32.xlu2 %v9658_v63, %s7668_s10  ;;  %v10000_v63 = vpack.c.bf16 %v6108_v0, %v6108_v0 }
 0x86d   : > { %v5983_v22 = vpop.permute.xlu2 %5982  ;;  %6206 = vrot.lane.b32.xlu1 %v9987_v56, %s7668_s10  ;;  %6210 = vrot.lane.b32.xlu0 %v9989_v19, %s7668_s10 }
 0x86e   : > { %6073 = vst.msk [vmem:[#allocation4 + $0x14] sm:$0xf] %vm1722_vm7, %v5983_v22  ;;  %v6356_v22 = vpack.c.bf16 %v6324_v12, %v6324_v12 }
 0x86f   : > { %v5803_v6 = vpop.permute.xlu1 %5802  ;;  %v5807_v48 = vpop.permute.xlu0 %5806 }
 0x870   : > { %5871 = vst.msk [vmem:[#allocation4 + $0x6c] sm:$0xf] %vm1497_vm6, %v5803_v6 }
 0x871   : > { %5873 = vst.msk [vmem:[#allocation4 + $0x74] sm:$0xf] %vm1497_vm6, %v5807_v48 }
 0x873   : > { %6214 = vrot.lane.b32.xlu2 %v9669_v21, %s7668_s10  ;;  %v10013_v21 = vpack.c.bf16 %v6111_v59, %v6111_v59 }
 0x875   : > { %v5989_v37 = vpop.permute.xlu2 %5988  ;;  %6212 = vrot.lane.b32.xlu1 %v10000_v63, %s7668_s10  ;;  %6216 = vrot.lane.b32.xlu0 %v10002_v10, %s7668_s10 }
 0x876   : > { %6076 = vst.msk [vmem:[#allocation4 + $0x20] sm:$0xf] %vm1722_vm7, %v5989_v37 }
 0x877   : > { %v5809_v24 = vpop.permute.xlu1 %5808  ;;  %v5973_v46 = vpop.permute.xlu0 %5972 }
 0x878   : > { %5874 = vst.msk [vmem:[#allocation4 + $0x78] sm:$0xf] %vm1497_vm6, %v5809_v24 }
 0x879   : > { %6068 = vst.msk [vmem:[#allocation4] sm:$0xf] %vm1722_vm7, %v5973_v46 }
 0x87b   : > { %6220 = vrot.lane.b32.xlu2 %v9680_v33, %s7668_s10  ;;  %v10026_v33 = vpack.c.bf16 %v6114_v18, %v6114_v18 }
 0x87d   : > { %v5995_v58 = vpop.permute.xlu2 %5994  ;;  %6218 = vrot.lane.b32.xlu1 %v10013_v21, %s7668_s10  ;;  %6222 = vrot.lane.b32.xlu0 %v10015_v2, %s7668_s10 }
 0x87e   : > { %6079 = vst.msk [vmem:[#allocation4 + $0x2c] sm:$0xf] %vm1722_vm7, %v5995_v58  ;;  %v6327_v58 = vld [vmem:[#allocation3 + $0x50] sm:$0xff] }
 0x87f   : > { %v5975_v51 = vpop.permute.xlu1 %5974  ;;  %v5979_v54 = vpop.permute.xlu0 %5978 }
 0x880   : > { %6069 = vst.msk [vmem:[#allocation4 + $0x4] sm:$0xf] %vm1722_vm7, %v5975_v51  ;;  %v6359_v51 = vpack.c.bf16 %v6327_v58, %v6327_v58 }
 0x881   : > { %6071 = vst.msk [vmem:[#allocation4 + $0xc] sm:$0xf] %vm1722_vm7, %v5979_v54 }
 0x883   : > { %6226 = vrot.lane.b32.xlu2 %v9691_v50, %s7668_s10  ;;  %v6149_v50 = vpack.c.bf16 %v6117_v61, %v6117_v61 }
 0x885   : > { %v6001_v30 = vpop.permute.xlu2 %6000  ;;  %6224 = vrot.lane.b32.xlu1 %v10026_v33, %s7668_s10  ;;  %6228 = vrot.lane.b32.xlu0 %v6148_v15, %s7668_s10 }
 0x886   : > { %6082 = vst.msk [vmem:[#allocation4 + $0x38] sm:$0xf] %vm1722_vm7, %v6001_v30 }
 0x887   : > { %v5981_v43 = vpop.permute.xlu1 %5980  ;;  %v5985_v14 = vpop.permute.xlu0 %5984 }
 0x888   : > { %6072 = vst.msk [vmem:[#allocation4 + $0x10] sm:$0xf] %vm1722_vm7, %v5981_v43  ;;  %v6374_v43 = vpack.c.bf16 %v6342_v45, %v6342_v45  ;;  %v6779_v45 = vld [vmem:[#allocation3 + $0x82] sm:$0xff] }
 0x889   : > { %6074 = vst.msk [vmem:[#allocation4 + $0x18] sm:$0xf] %vm1722_vm7, %v5985_v14  ;;  %v6343_v14 = vld [vmem:[#allocation3 + $0x110] sm:$0xff] }
 0x88b   : > { %6232 = vrot.lane.b32.xlu2 %v9706_v8, %s7668_s10  ;;  %v10043_v8 = vpack.c.bf16 %v6120_v60, %v6120_v60 }
 0x88d   : > { %v6007_v55 = vpop.permute.xlu2 %6006  ;;  %6230 = vrot.lane.b32.xlu1 %v6149_v50, %s7668_s10  ;;  %6234 = vrot.lane.b32.xlu0 %v6151_v53, %s7668_s10 }
 0x88e   : > { %6085 = vst.msk [vmem:[#allocation4 + $0x44] sm:$0xf] %vm1722_vm7, %v6007_v55 }
 0x88f   : > { %v5987_v44 = vpop.permute.xlu1 %5986  ;;  %v5991_v35 = vpop.permute.xlu0 %5990 }
 0x890   : > { %6075 = vst.msk [vmem:[#allocation4 + $0x1c] sm:$0xf] %vm1722_vm7, %v5987_v44  ;;  %v6791_v44 = vld [vmem:[#allocation3 + $0x112] sm:$0xff] }
 0x891   : > { %6077 = vst.msk [vmem:[#allocation4 + $0x24] sm:$0xf] %vm1722_vm7, %v5991_v35  ;;  %v6329_v35 = vld [vmem:[#allocation3 + $0x68] sm:$0xff] }
 0x892   : > { %v6361_v60 = vpack.c.bf16 %v6329_v35, %v6329_v35 }
 0x893   : > { %6238 = vrot.lane.b32.xlu2 %v9714_v25, %s7668_s10  ;;  %v6325_v25 = vld [vmem:[#allocation3 + $0x38] sm:$0xff] }
 0x894   : > { %v6357_v6 = vpack.c.bf16 %v6325_v25, %v6325_v25 }
 0x895   : > { %v6013_v4 = vpop.permute.xlu2 %6012  ;;  %6236 = vrot.lane.b32.xlu1 %v10043_v8, %s7668_s10  ;;  %6240 = vrot.lane.b32.xlu0 %v10045_v42, %s7668_s10 }
 0x896   : > { %6088 = vst.msk [vmem:[#allocation4 + $0x50] sm:$0xf] %vm1722_vm7, %v6013_v4  ;;  %v6776_v4 = vld [vmem:[#allocation3 + $0x62] sm:$0xff] }
 0x897   : > { %v5993_v13 = vpop.permute.xlu1 %5992  ;;  %v5997_v31 = vpop.permute.xlu0 %5996  ;;  %v6808_v12 = vpack.c.bf16 %v6776_v4, %v6776_v4 }
 0x898   : > { %6078 = vst.msk [vmem:[#allocation4 + $0x28] sm:$0xf] %vm1722_vm7, %v5993_v13 }
 0x899   : > { %6080 = vst.msk [vmem:[#allocation4 + $0x30] sm:$0xf] %vm1722_vm7, %v5997_v31  ;;  %v6344_v31 = vld [vmem:[#allocation3 + $0x120] sm:$0xff] }
 0x89b   : > { %6420 = vrot.lane.b32.xlu2 %v6356_v22, %s7669_s11 }
 0x89d   : > { %v6019_v48 = vpop.permute.xlu2 %6018  ;;  %6242 = vrot.lane.b32.xlu1 %v9716_v26, %s7668_s10  ;;  %6422 = vrot.lane.b32.xlu0 %v6357_v6, %s7669_s11  ;;  %v6326_v26 = vld [vmem:[#allocation3 + $0x48] sm:$0xff]  ;;  %v6376_v6 = vpack.c.bf16 %v6344_v31, %v6344_v31 }
 0x89e   : > { %6091 = vst.msk [vmem:[#allocation4 + $0x5c] sm:$0xf] %vm1722_vm7, %v6019_v48  ;;  %v6358_v59 = vpack.c.bf16 %v6326_v26, %v6326_v26  ;;  %v6345_v48 = vld [vmem:[#allocation3 + $0x128] sm:$0xff] }
 0x89f   : > { %v5999_v0 = vpop.permute.xlu1 %5998  ;;  %v6003_v27 = vpop.permute.xlu0 %6002 }
 0x8a0   : > { %6081 = vst.msk [vmem:[#allocation4 + $0x34] sm:$0xf] %vm1722_vm7, %v5999_v0 }
 0x8a1   : > { %6083 = vst.msk [vmem:[#allocation4 + $0x3c] sm:$0xf] %vm1722_vm7, %v6003_v27 }
 0x8a3   : > { %6646 = vrot.lane.b32.xlu2 %v9851_v16, %s7670_s17  ;;  %v6805_v16 = vpack.c.bf16 %v6773_v52, %v6773_v52  ;;  %v6331_v52 = vld [vmem:[#allocation3 + $0x80] sm:$0xff] }
 0x8a4   : > { %v6363_v58 = vpack.c.bf16 %v6331_v52, %v6331_v52 }
 0x8a5   : > { %v6025_v37 = vpop.permute.xlu2 %6024  ;;  %6644 = vrot.lane.b32.xlu1 %v9846_v7, %s7670_s17  ;;  %6868 = vrot.lane.b32.xlu0 %v9974_v40, %s7671_s20 }
 0x8a6   : > { %6094 = vst.msk [vmem:[#allocation4 + $0x68] sm:$0xf] %vm1722_vm7, %v6025_v37 }
 0x8a7   : > { %v6005_v24 = vpop.permute.xlu1 %6004  ;;  %v6009_v46 = vpop.permute.xlu0 %6008 }
 0x8a8   : > { %6084 = vst.msk [vmem:[#allocation4 + $0x40] sm:$0xf] %vm1722_vm7, %v6005_v24 }
 0x8a9   : > { %6086 = vst.msk [vmem:[#allocation4 + $0x48] sm:$0xf] %vm1722_vm7, %v6009_v46 }
 0x8ab   : > { %6424 = vrot.lane.b32.xlu2 %v6358_v59, %s7669_s11  ;;  %v6793_v59 = vld [vmem:[#allocation3 + $0x12a] sm:$0xff] }
 0x8ad   : > { %v6031_v54 = vpop.permute.xlu2 %6030  ;;  %6870 = vrot.lane.b32.xlu1 %v6805_v16, %s7671_s20  ;;  %6426 = vrot.lane.b32.xlu0 %v6359_v51, %s7669_s11 }
 0x8ae   : > { %6097 = vst.msk [vmem:[#allocation4 + $0x74] sm:$0xf] %vm1722_vm7, %v6031_v54  ;;  %v6346_v54 = vld [vmem:[#allocation3 + $0x138] sm:$0xff] }
 0x8af   : > { %v6011_v7 = vpop.permute.xlu1 %6010  ;;  %v6015_v40 = vpop.permute.xlu0 %6014 }
 0x8b0   : > { %6087 = vst.msk [vmem:[#allocation4 + $0x4c] sm:$0xf] %vm1722_vm7, %v6011_v7 }
 0x8b1   : > { %6089 = vst.msk [vmem:[#allocation4 + $0x54] sm:$0xf] %vm1722_vm7, %v6015_v40 }
 0x8b3   : > { %6650 = vrot.lane.b32.xlu2 %v9858_v23, %s7670_s17  ;;  %v6375_v23 = vpack.c.bf16 %v6343_v14, %v6343_v14 }
 0x8b5   : > { %v6197_v18 = vpop.permute.xlu2 %6196  ;;  %6648 = vrot.lane.b32.xlu1 %v9863_v20, %s7670_s17  ;;  %6872 = vrot.lane.b32.xlu0 %v9976_v62, %s7671_s20 }
 0x8b6   : > { %6292 = vst.msk [vmem:[#allocation4] sm:$0xf] %vm1947_vm8, %v6197_v18  ;;  %v6378_v18 = vpack.c.bf16 %v6346_v54, %v6346_v54 }
 0x8b7   : > { %v6017_v15 = vpop.permute.xlu1 %6016  ;;  %v6021_v30 = vpop.permute.xlu0 %6020 }
 0x8b8   : > { %6090 = vst.msk [vmem:[#allocation4 + $0x58] sm:$0xf] %vm1722_vm7, %v6017_v15  ;;  %v6347_v15 = vld [vmem:[#allocation3 + $0x140] sm:$0xff] }
 0x8b9   : > { %6092 = vst.msk [vmem:[#allocation4 + $0x60] sm:$0xf] %vm1722_vm7, %v6021_v30  ;;  %v6379_v30 = vpack.c.bf16 %v6347_v15, %v6347_v15 }
 0x8bb   : > { %6456 = vrot.lane.b32.xlu2 %v6374_v43, %s7669_s11 }
 0x8bd   : > { %v6203_v61 = vpop.permute.xlu2 %6202  ;;  %6874 = vrot.lane.b32.xlu1 %v9987_v56, %s7671_s20  ;;  %6458 = vrot.lane.b32.xlu0 %v6375_v23, %s7669_s11  ;;  %v6328_v56 = vld [vmem:[#allocation3 + $0x60] sm:$0xff] }
 0x8be   : > { %6295 = vst.msk [vmem:[#allocation4 + $0xc] sm:$0xf] %vm1947_vm8, %v6203_v61  ;;  %v6360_v55 = vpack.c.bf16 %v6328_v56, %v6328_v56  ;;  %v6794_v61 = vld [vmem:[#allocation3 + $0x13a] sm:$0xff] }
 0x8bf   : > { %v6023_v20 = vpop.permute.xlu1 %6022  ;;  %v6027_v62 = vpop.permute.xlu0 %6026 }
 0x8c0   : > { %6093 = vst.msk [vmem:[#allocation4 + $0x64] sm:$0xf] %vm1722_vm7, %v6023_v20 }
 0x8c1   : > { %6095 = vst.msk [vmem:[#allocation4 + $0x6c] sm:$0xf] %vm1722_vm7, %v6027_v62 }
 0x8c3   : > { %6682 = vrot.lane.b32.xlu2 %v9917_v3, %s7670_s17  ;;  %v6823_v3 = vpack.c.bf16 %v6791_v44, %v6791_v44 }
 0x8c5   : > { %v6209_v28 = vpop.permute.xlu2 %6208  ;;  %6680 = vrot.lane.b32.xlu1 %v9912_v38, %s7670_s17  ;;  %6904 = vrot.lane.b32.xlu0 %v10043_v8, %s7671_s20 }
 0x8c6   : > { %6298 = vst.msk [vmem:[#allocation4 + $0x18] sm:$0xf] %vm1947_vm8, %v6209_v28  ;;  %v6826_v28 = vpack.c.bf16 %v6794_v61, %v6794_v61  ;;  %v6351_v61 = vld [vmem:[#allocation3 + $0x170] sm:$0xff] }
 0x8c7   : > { %v6029_v50 = vpop.permute.xlu1 %6028  ;;  %v6033_v53 = vpop.permute.xlu0 %6032 }
 0x8c8   : > { %6096 = vst.msk [vmem:[#allocation4 + $0x70] sm:$0xf] %vm1722_vm7, %v6029_v50  ;;  %v6332_v50 = vld [vmem:[#allocation3 + $0x90] sm:$0xff] }
 0x8c9   : > { %6098 = vst.msk [vmem:[#allocation4 + $0x78] sm:$0xf] %vm1722_vm7, %v6033_v53  ;;  %v7606_v53 = vld [vmem:[%s10439_s7 + $0x8] sm:$0xff]  ;;  %v6364_v35 = vpack.c.bf16 %v6332_v50, %v6332_v50 }
 0x8ca   : > { %v6799_v50 = vld [vmem:[#allocation3 + $0x172] sm:$0xff] }
 0x8cb   : > { %6428 = vrot.lane.b32.xlu2 %v6360_v55, %s7669_s11 }
 0x8cd   : > { %v6215_v1 = vpop.permute.xlu2 %6214  ;;  %6906 = vrot.lane.b32.xlu1 %v6823_v3, %s7671_s20  ;;  %6430 = vrot.lane.b32.xlu0 %v6361_v60, %s7669_s11  ;;  %v6795_v3 = vld [vmem:[#allocation3 + $0x142] sm:$0xff] }
 0x8ce   : > { %6301 = vst.msk [vmem:[#allocation4 + $0x24] sm:$0xf] %vm1947_vm8, %v6215_v1  ;;  %v6827_v60 = vpack.c.bf16 %v6795_v3, %v6795_v3 }
 0x8cf   : > { %v6035_v38 = vpop.permute.xlu1 %6034  ;;  %v6199_v8 = vpop.permute.xlu0 %6198 }
 0x8d0   : > { %6099 = vst.msk [vmem:[#allocation4 + $0x7c] sm:$0xf] %vm1722_vm7, %v6035_v38 }
 0x8d1   : > { %6293 = vst.msk [vmem:[#allocation4 + $0x4] sm:$0xf] %vm1947_vm8, %v6199_v8 }
 0x8d3   : > { %6654 = vrot.lane.b32.xlu2 %v9878_v41, %s7670_s17  ;;  %v6377_v41 = vpack.c.bf16 %v6345_v48, %v6345_v48 }
 0x8d5   : > { %v6221_v13 = vpop.permute.xlu2 %6220  ;;  %6652 = vrot.lane.b32.xlu1 %v9865_v49, %s7670_s17  ;;  %6876 = vrot.lane.b32.xlu0 %v6808_v12, %s7671_s20 }
 0x8d6   : > { %6304 = vst.msk [vmem:[#allocation4 + $0x30] sm:$0xf] %vm1947_vm8, %v6221_v13 }
 0x8d7   : > { %v6201_v22 = vpop.permute.xlu1 %6200  ;;  %v6205_v25 = vpop.permute.xlu0 %6204 }
 0x8d8   : > { %6294 = vst.msk [vmem:[#allocation4 + $0x8] sm:$0xf] %vm1947_vm8, %v6201_v22 }
 0x8d9   : > { %6296 = vst.msk [vmem:[#allocation4 + $0x10] sm:$0xf] %vm1947_vm8, %v6205_v25 }
 0x8db   : > { %6460 = vrot.lane.b32.xlu2 %v6376_v6, %s7669_s11  ;;  %v6348_v6 = vld [vmem:[#allocation3 + $0x150] sm:$0xff] }
 0x8dc   : > { %v6380_v48 = vpack.c.bf16 %v6348_v6, %v6348_v6 }
 0x8dd   : > { %v6227_v0 = vpop.permute.xlu2 %6226  ;;  %6878 = vrot.lane.b32.xlu1 %v9989_v19, %s7671_s20  ;;  %6462 = vrot.lane.b32.xlu0 %v6377_v41, %s7669_s11  ;;  %v6330_v19 = vld [vmem:[#allocation3 + $0x78] sm:$0xff] }
 0x8de   : > { %6307 = vst.msk [vmem:[#allocation4 + $0x3c] sm:$0xf] %vm1947_vm8, %v6227_v0  ;;  %v6362_v46 = vpack.c.bf16 %v6330_v19, %v6330_v19  ;;  %v6797_v19 = vld [vmem:[#allocation3 + $0x15a] sm:$0xff] }
 0x8df   : > { %v6207_v49 = vpop.permute.xlu1 %6206  ;;  %v6211_v27 = vpop.permute.xlu0 %6210 }
 0x8e0   : > { %6297 = vst.msk [vmem:[#allocation4 + $0x14] sm:$0xf] %vm1947_vm8, %v6207_v49 }
 0x8e1   : > { %6299 = vst.msk [vmem:[#allocation4 + $0x1c] sm:$0xf] %vm1947_vm8, %v6211_v27 }
 0x8e3   : > { %6686 = vrot.lane.b32.xlu2 %v9924_v11, %s7670_s17  ;;  %v6825_v11 = vpack.c.bf16 %v6793_v59, %v6793_v59 }
 0x8e5   : > { %v6233_v37 = vpop.permute.xlu2 %6232  ;;  %6684 = vrot.lane.b32.xlu1 %v9929_v57, %s7670_s17  ;;  %6908 = vrot.lane.b32.xlu0 %v10045_v42, %s7671_s20 }
 0x8e6   : > { %6310 = vst.msk [vmem:[#allocation4 + $0x48] sm:$0xf] %vm1947_vm8, %v6233_v37 }
 0x8e7   : > { %v6213_v26 = vpop.permute.xlu1 %6212  ;;  %v6217_v24 = vpop.permute.xlu0 %6216 }
 0x8e8   : > { %6300 = vst.msk [vmem:[#allocation4 + $0x20] sm:$0xf] %vm1947_vm8, %v6213_v26  ;;  %v6829_v26 = vpack.c.bf16 %v6797_v19, %v6797_v19 }
 0x8e9   : > { %6302 = vst.msk [vmem:[#allocation4 + $0x28] sm:$0xf] %vm1947_vm8, %v6217_v24 }
 0x8eb   : > { %6432 = vrot.lane.b32.xlu2 %v6362_v46, %s7669_s11 }
 0x8ed   : > { %v6239_v16 = vpop.permute.xlu2 %6238  ;;  %6910 = vrot.lane.b32.xlu1 %v6825_v11, %s7671_s20  ;;  %6434 = vrot.lane.b32.xlu0 %v6363_v58, %s7669_s11  ;;  %v6334_v11 = vld [vmem:[#allocation3 + $0xa8] sm:$0xff] }
 0x8ee   : > { %6313 = vst.msk [vmem:[#allocation4 + $0x54] sm:$0xf] %vm1947_vm8, %v6239_v16  ;;  %v6558_v58 = vld [vmem:[#allocation3 + $0xa9] sm:$0xff]  ;;  %v6366_v16 = vpack.c.bf16 %v6334_v11, %v6334_v11 }
 0x8ef   : > { %v6219_v57 = vpop.permute.xlu1 %6218  ;;  %v6223_v42 = vpop.permute.xlu0 %6222 }
 0x8f0   : > { %6303 = vst.msk [vmem:[#allocation4 + $0x2c] sm:$0xf] %vm1947_vm8, %v6219_v57  ;;  %v6590_v57 = vpack.c.bf16 %v6558_v58, %v6558_v58 }
 0x8f1   : > { %6305 = vst.msk [vmem:[#allocation4 + $0x34] sm:$0xf] %vm1947_vm8, %v6223_v42 }
 0x8f3   : > { %6658 = vrot.lane.b32.xlu2 %v9880_v36, %s7670_s17  ;;  %v6811_v36 = vpack.c.bf16 %v6779_v45, %v6779_v45 }
 0x8f5   : > { %v6421_v51 = vpop.permute.xlu2 %6420  ;;  %6656 = vrot.lane.b32.xlu1 %v9873_v29, %s7670_s17  ;;  %6880 = vrot.lane.b32.xlu0 %v10000_v63, %s7671_s20  ;;  %v7032_v29 = vld [vmem:[%s10439_s7 + $0x10] sm:$0x3] }
 0x8f6   : > { %6516 = vst.msk [vmem:[#allocation4] sm:$0xf] %vm2172_vm9, %v6421_v51  ;;  %v7122_v63 = vunpack.c.l.b16 %v7032_v29 }
 0x8f7   : > { %v6225_v7 = vpop.permute.xlu1 %6224  ;;  %v6229_v40 = vpop.permute.xlu0 %6228 }
 0x8f8   : > { %6306 = vst.msk [vmem:[#allocation4 + $0x38] sm:$0xf] %vm1947_vm8, %v6225_v7  ;;  %v7125_v20 = vpack.c.b16 %v7122_v63, %v7122_v63 }
 0x8f9   : > { %6308 = vst.msk [vmem:[#allocation4 + $0x40] sm:$0xf] %vm1947_vm8, %v6229_v40 }
 0x8fa   : > { %v7179_v62 = vsel %vm7177_vm3, %v7125_v20, 0  ;;  %v6575_v20 = vld [vmem:[#allocation3 + $0x171] sm:$0xff] }
 0x8fb   : > { %6464 = vrot.lane.b32.xlu2 %v6378_v18, %s7669_s11  ;;  %7186 = vmatpush.bf16.msra.mxu1 %v7179_v62  ;;  %v6559_v18 = vld [vmem:[#allocation3 + $0xb1] sm:$0xff] }
 0x8fc   : > { %7612 = vmatpush.bf16.msra.mxu3 %v7179_v62  ;;  %v6591_v45 = vpack.c.bf16 %v6559_v18, %v6559_v18  ;;  %v6383_v62 = vpack.c.bf16 %v6351_v61, %v6351_v61 }
 0x8fd   : > { %v6647_v43 = vpop.permute.xlu2 %6646  ;;  %6882 = vrot.lane.b32.xlu1 %v6811_v36, %s7671_s20  ;;  %6466 = vrot.lane.b32.xlu0 %v6379_v30, %s7669_s11 }
 0x8ff   : > { %v6231_v14 = vpop.permute.xlu1 %6230  ;;  %v6235_v23 = vpop.permute.xlu0 %6234  ;;  %7187 = vmatpush.bf16.msra.mxu1 %v7606_v53 }
 0x900   : > { %6309 = vst.msk [vmem:[#allocation4 + $0x44] sm:$0xf] %vm1947_vm8, %v6231_v14  ;;  %7613 = vmatpush.bf16.msra.mxu3 %v7606_v53 }
 0x901   : > { %6311 = vst.msk [vmem:[#allocation4 + $0x4c] sm:$0xf] %vm1947_vm8, %v6235_v23 }
 0x903   : > { %6690 = vrot.lane.b32.xlu2 %v9944_v5, %s7670_s17  ;;  %v7605_v5 = vld [vmem:[%s10439_s7] sm:$0xff] }
 0x904   : > { %7188 = vmatpush.bf16.msra.mxu1 %v7605_v5  ;;  %7614 = vmatpush.bf16.msra.mxu3 %v7605_v5  ;;  %v6798_v5 = vld [vmem:[#allocation3 + $0x16a] sm:$0xff] }
 0x905   : > { %v6425_v56 = vpop.permute.xlu2 %6424  ;;  %6688 = vrot.lane.b32.xlu1 %v9931_v47, %s7670_s17  ;;  %6912 = vrot.lane.b32.xlu0 %v6826_v28, %s7671_s20  ;;  %v6333_v47 = vld [vmem:[#allocation3 + $0x98] sm:$0xff] }
 0x906   : > { %6518 = vst.msk [vmem:[#allocation4 + $0x8] sm:$0xf] %vm2172_vm9, %v6425_v56  ;;  %v6365_v1 = vpack.c.bf16 %v6333_v47, %v6333_v47 }
 0x907   : > { %v6237_v55 = vpop.permute.xlu1 %6236  ;;  %v6241_v44 = vpop.permute.xlu0 %6240 }
 0x908   : > { %6312 = vst.msk [vmem:[#allocation4 + $0x50] sm:$0xf] %vm1947_vm8, %v6237_v55 }
 0x909   : > { %6314 = vst.msk [vmem:[#allocation4 + $0x58] sm:$0xf] %vm1947_vm8, %v6241_v44  ;;  %v6831_v44 = vpack.c.bf16 %v6799_v50, %v6799_v50 }
 0x90b   : > { %6436 = vrot.lane.b32.xlu2 %v6364_v35, %s7669_s11  ;;  %v6336_v35 = vld [vmem:[#allocation3 + $0xc0] sm:$0xff] }
 0x90c   : > { %v6368_v3 = vpack.c.bf16 %v6336_v35, %v6336_v35  ;;  %v6578_v35 = vld [vmem:[#allocation3 + $0x199] sm:$0xff] }
 0x90d   : > { %v6651_v38 = vpop.permute.xlu2 %6650  ;;  %6914 = vrot.lane.b32.xlu1 %v6827_v60, %s7671_s20  ;;  %6438 = vrot.lane.b32.xlu0 %v6365_v1, %s7669_s11 }
 0x90f   : > { %v6243_v8 = vpop.permute.xlu1 %6242  ;;  %v6423_v4 = vpop.permute.xlu0 %6422 }
 0x910   : > { %6315 = vst.msk [vmem:[#allocation4 + $0x5c] sm:$0xf] %vm1947_vm8, %v6243_v8 }
 0x911   : > { %6517 = vst.msk [vmem:[#allocation4 + $0x4] sm:$0xf] %vm2172_vm9, %v6423_v4 }
 0x912   : > { %6741 = vst.msk [vmem:[#allocation4 + $0x4] sm:$0xf] %vm2397_vm10, %v6647_v43  ;;  %v6350_v43 = vld [vmem:[#allocation3 + $0x168] sm:$0xff] }
 0x913   : > { %6662 = vrot.lane.b32.xlu2 %v9888_v9, %s7670_s17  ;;  %v6349_v9 = vld [vmem:[#allocation3 + $0x158] sm:$0xff]  ;;  %v6382_v29 = vpack.c.bf16 %v6350_v43, %v6350_v43 }
 0x915   : > { %v6457_v12 = vpop.permute.xlu2 %6456  ;;  %6660 = vrot.lane.b32.xlu1 %v9893_v17, %s7670_s17  ;;  %6884 = vrot.lane.b32.xlu0 %v10002_v10, %s7671_s20  ;;  %v6381_v10 = vpack.c.bf16 %v6349_v9, %v6349_v9 }
 0x916   : > { %6534 = vst.msk [vmem:[#allocation4 + $0x48] sm:$0xf] %vm2172_vm9, %v6457_v12  ;;  %v6337_v12 = vld [vmem:[#allocation3 + $0xc8] sm:$0xff] }
 0x917   : > { %v6645_v13 = vpop.permute.xlu1 %6644  ;;  %v6869_v31 = vpop.permute.xlu0 %6868 }
 0x918   : > { %6740 = vst.msk [vmem:[#allocation4] sm:$0xf] %vm2397_vm10, %v6645_v13  ;;  %v6561_v13 = vld [vmem:[#allocation3 + $0xc9] sm:$0xff] }
 0x919   : > { %6964 = vst.msk [vmem:[#allocation4] sm:$0xf] %vm2622_vm11, %v6869_v31  ;;  %v6369_v31 = vpack.c.bf16 %v6337_v12, %v6337_v12  ;;  %v6803_v12 = vld [vmem:[#allocation3 + $0x1a2] sm:$0xff] }
 0x91b   : > { %6244 = vrot.lane.b32.xlu2 %v6826_v28, %s7668_s10  ;;  %v6607_v28 = vpack.c.bf16 %v6575_v20, %v6575_v20 }
 0x91d   : > { %v6683_v22 = vpop.permute.xlu2 %6682  ;;  %6886 = vrot.lane.b32.xlu1 %v10013_v21, %s7671_s20  ;;  %6246 = vrot.lane.b32.xlu0 %v6827_v60, %s7668_s10  ;;  %v6796_v21 = vld [vmem:[#allocation3 + $0x152] sm:$0xff]  ;;  %v6560_v60 = vld [vmem:[#allocation3 + $0xc1] sm:$0xff] }
 0x91e   : > { %v6828_v37 = vpack.c.bf16 %v6796_v21, %v6796_v21  ;;  %v6592_v4 = vpack.c.bf16 %v6560_v60, %v6560_v60  ;;  %v6610_v60 = vpack.c.bf16 %v6578_v35, %v6578_v35 }
 0x91f   : > { %v6871_v25 = vpop.permute.xlu1 %6870  ;;  %v6427_v17 = vpop.permute.xlu0 %6426 }
 0x920   : > { %6965 = vst.msk [vmem:[#allocation4 + $0x4] sm:$0xf] %vm2622_vm11, %v6871_v25  ;;  %v6785_v25 = vld [vmem:[#allocation3 + $0xca] sm:$0xff] }
 0x921   : > { %6519 = vst.msk [vmem:[#allocation4 + $0xc] sm:$0xf] %vm2172_vm9, %v6427_v17  ;;  %v6817_v6 = vpack.c.bf16 %v6785_v25, %v6785_v25  ;;  %v6835_v25 = vpack.c.bf16 %v6803_v12, %v6803_v12 }
 0x922   : > { %6743 = vst.msk [vmem:[#allocation4 + $0xc] sm:$0xf] %vm2397_vm10, %v6651_v38 }
 0x923   : > { %6470 = vrot.lane.b32.xlu2 %v6381_v10, %s7669_s11 }
 0x925   : > { %v6429_v41 = vpop.permute.xlu2 %6428  ;;  %6468 = vrot.lane.b32.xlu1 %v6380_v48, %s7669_s11  ;;  %6692 = vrot.lane.b32.xlu0 %v9939_v34, %s7670_s17  ;;  %v6335_v34 = vld [vmem:[#allocation3 + $0xb0] sm:$0xff] }
 0x926   : > { %6520 = vst.msk [vmem:[#allocation4 + $0x10] sm:$0xf] %vm2172_vm9, %v6429_v41  ;;  %v6367_v52 = vpack.c.bf16 %v6335_v34, %v6335_v34  ;;  %v6352_v41 = vld [vmem:[#allocation3 + $0x180] sm:$0xff] }
 0x927   : > { %v6649_v0 = vpop.permute.xlu1 %6648  ;;  %v6873_v49 = vpop.permute.xlu0 %6872  ;;  %v7589_v27 = vld [vmem:[#allocation4] sm:$0xff] }
 0x928   : > { %6742 = vst.msk [vmem:[#allocation4 + $0x8] sm:$0xf] %vm2397_vm10, %v6649_v0  ;;  %7548 = vmatmul.msk.bf16.vlgmr.msra.gmra.mxu1 %vm7128_vm4, %v7589_v27  ;;  %v6384_v27 = vpack.c.bf16 %v6352_v41, %v6352_v41 }
 0x929   : > { %6966 = vst.msk [vmem:[#allocation4 + $0x8] sm:$0xf] %vm2622_vm11, %v6873_v49 }
 0x92b   : > { %6916 = vrot.lane.b32.xlu2 %v6828_v37, %s7671_s20 }
 0x92d   : > { %v6655_v24 = vpop.permute.xlu2 %6654  ;;  %6694 = vrot.lane.b32.xlu1 %v9946_v39, %s7670_s17  ;;  %6918 = vrot.lane.b32.xlu0 %v6829_v26, %s7671_s20  ;;  %v6782_v39 = vld [vmem:[#allocation3 + $0xaa] sm:$0xff] }
 0x92e   : > { %v6814_v40 = vpack.c.bf16 %v6782_v39, %v6782_v39 }
 0x92f   : > { %v6875_v46 = vpop.permute.xlu1 %6874  ;;  %v6459_v59 = vpop.permute.xlu0 %6458 }
 0x930   : > { %6967 = vst.msk [vmem:[#allocation4 + $0xc] sm:$0xf] %vm2622_vm11, %v6875_v46 }
 0x931   : > { %6535 = vst.msk [vmem:[#allocation4 + $0x4c] sm:$0xf] %vm2172_vm9, %v6459_v59  ;;  %v6576_v59 = vld [vmem:[#allocation3 + $0x181] sm:$0xff] }
 0x932   : > { %6759 = vst.msk [vmem:[#allocation4 + $0x4c] sm:$0xf] %vm2397_vm10, %v6683_v22  ;;  %v6593_v22 = vpack.c.bf16 %v6561_v13, %v6561_v13  ;;  %v6608_v11 = vpack.c.bf16 %v6576_v59, %v6576_v59  ;;  %v6565_v59 = vld [vmem:[#allocation3 + $0xf9] sm:$0xff] }
 0x933   : > { %6442 = vrot.lane.b32.xlu2 %v6367_v52, %s7669_s11  ;;  %v6800_v52 = vld [vmem:[#allocation3 + $0x182] sm:$0xff] }
 0x934   : > { %v6832_v58 = vpack.c.bf16 %v6800_v52, %v6800_v52  ;;  %v6789_v52 = vld [vmem:[#allocation3 + $0xfa] sm:$0xff] }
 0x935   : > { %v6461_v42 = vpop.permute.xlu2 %6460  ;;  %6440 = vrot.lane.b32.xlu1 %v6366_v16, %s7669_s11  ;;  %6664 = vrot.lane.b32.xlu0 %v6590_v57, %s7670_s17  ;;  %v6338_v57 = vld [vmem:[#allocation3 + $0xd8] sm:$0xff] }
 0x936   : > { %6536 = vst.msk [vmem:[#allocation4 + $0x50] sm:$0xf] %vm2172_vm9, %v6461_v42 }
 0x937   : > { %v6681_v51 = vpop.permute.xlu1 %6680  ;;  %v6905_v54 = vpop.permute.xlu0 %6904  ;;  %v7590_v7 = vld [vmem:[#allocation4 + $0x8] sm:$0xff] }
 0x938   : > { %6758 = vst.msk [vmem:[#allocation4 + $0x48] sm:$0xf] %vm2397_vm10, %v6681_v51  ;;  %7549 = vmatmul.msk.bf16.gmra.mxu1 %vm7128_vm4, %v7590_v7  ;;  %v6801_v7 = vld [vmem:[#allocation3 + $0x18a] sm:$0xff] }
 0x939   : > { %6982 = vst.msk [vmem:[#allocation4 + $0x48] sm:$0xf] %vm2622_vm11, %v6905_v54  ;;  %v6370_v54 = vpack.c.bf16 %v6338_v57, %v6338_v57  ;;  %v6833_v18 = vpack.c.bf16 %v6801_v7, %v6801_v7 }
 0x93b   : > { %6888 = vrot.lane.b32.xlu2 %v6814_v40, %s7671_s20  ;;  %v6339_v40 = vld [vmem:[#allocation3 + $0xe0] sm:$0xff] }
 0x93d   : > { %v6687_v15 = vpop.permute.xlu2 %6686  ;;  %6666 = vrot.lane.b32.xlu1 %v6591_v45, %s7670_s17  ;;  %6890 = vrot.lane.b32.xlu0 %v10015_v2, %s7671_s20  ;;  %v6371_v45 = vpack.c.bf16 %v6339_v40, %v6339_v40 }
 0x93f   : > { %v6907_v36 = vpop.permute.xlu1 %6906  ;;  %v6431_v30 = vpop.permute.xlu0 %6430 }
 0x940   : > { %6983 = vst.msk [vmem:[#allocation4 + $0x4c] sm:$0xf] %vm2622_vm11, %v6907_v36  ;;  %v6563_v36 = vld [vmem:[#allocation3 + $0xe1] sm:$0xff] }
 0x941   : > { %6521 = vst.msk [vmem:[#allocation4 + $0x14] sm:$0xf] %vm2172_vm9, %v6431_v30 }
 0x942   : > { %6745 = vst.msk [vmem:[#allocation4 + $0x14] sm:$0xf] %vm2397_vm10, %v6655_v24 }
 0x943   : > { %6250 = vrot.lane.b32.xlu2 %v6829_v26, %s7668_s10 }
 0x945   : > { %v6433_v63 = vpop.permute.xlu2 %6432  ;;  %6248 = vrot.lane.b32.xlu1 %v6828_v37, %s7668_s10  ;;  %6472 = vrot.lane.b32.xlu0 %v6382_v29, %s7669_s11  ;;  %v6353_v37 = vld [vmem:[#allocation3 + $0x188] sm:$0xff]  ;;  %v6595_v29 = vpack.c.bf16 %v6563_v36, %v6563_v36 }
 0x946   : > { %6522 = vst.msk [vmem:[#allocation4 + $0x18] sm:$0xf] %vm2172_vm9, %v6433_v63  ;;  %v6385_v19 = vpack.c.bf16 %v6353_v37, %v6353_v37  ;;  %v6562_v63 = vld [vmem:[#allocation3 + $0xd9] sm:$0xff] }
 0x947   : > { %v6653_v2 = vpop.permute.xlu1 %6652  ;;  %v6877_v14 = vpop.permute.xlu0 %6876  ;;  %v7598_v23 = vld [vmem:[#allocation4 + $0x48] sm:$0xff] }
 0x948   : > { %6744 = vst.msk [vmem:[#allocation4 + $0x10] sm:$0xf] %vm2397_vm10, %v6653_v2  ;;  %7557 = vmatmul.msk.bf16.vlgmr.msra.gmra.mxu3 %vm7128_vm4, %v7598_v23  ;;  %v6786_v2 = vld [vmem:[#allocation3 + $0xda] sm:$0xff] }
 0x949   : > { %6968 = vst.msk [vmem:[#allocation4 + $0x10] sm:$0xf] %vm2622_vm11, %v6877_v14  ;;  %v6594_v14 = vpack.c.bf16 %v6562_v63, %v6562_v63  ;;  %v6818_v23 = vpack.c.bf16 %v6786_v2, %v6786_v2 }
 0x94b   : > { %6696 = vrot.lane.b32.xlu2 %v9957_v32, %s7670_s17  ;;  %v6830_v32 = vpack.c.bf16 %v6798_v5, %v6798_v5  ;;  %v6354_v5 = vld [vmem:[#allocation3 + $0x198] sm:$0xff] }
 0x94d   : > { %v6659_v56 = vpop.permute.xlu2 %6658  ;;  %6474 = vrot.lane.b32.xlu1 %v6383_v62, %s7669_s11  ;;  %6698 = vrot.lane.b32.xlu0 %v6607_v28, %s7670_s17 }
 0x94f   : > { %v6879_v53 = vpop.permute.xlu1 %6878  ;;  %v6463_v55 = vpop.permute.xlu0 %6462 }
 0x950   : > { %6969 = vst.msk [vmem:[#allocation4 + $0x14] sm:$0xf] %vm2622_vm11, %v6879_v53  ;;  %v6355_v53 = vld [vmem:[#allocation3 + $0x1a0] sm:$0xff] }
 0x951   : > { %6537 = vst.msk [vmem:[#allocation4 + $0x54] sm:$0xf] %vm2172_vm9, %v6463_v55 }
 0x952   : > { %6761 = vst.msk [vmem:[#allocation4 + $0x54] sm:$0xf] %vm2397_vm10, %v6687_v15 }
 0x953   : > { %6922 = vrot.lane.b32.xlu2 %v6831_v44, %s7671_s20 }
 0x955   : > { %v6465_v47 = vpop.permute.xlu2 %6464  ;;  %6920 = vrot.lane.b32.xlu1 %v6830_v32, %s7671_s20  ;;  %6444 = vrot.lane.b32.xlu0 %v6368_v3, %s7669_s11 }
 0x956   : > { %6538 = vst.msk [vmem:[#allocation4 + $0x58] sm:$0xf] %vm2172_vm9, %v6465_v47  ;;  %v6386_v47 = vpack.c.bf16 %v6354_v5, %v6354_v5 }
 0x957   : > { %v6685_v1 = vpop.permute.xlu1 %6684  ;;  %v6909_v38 = vpop.permute.xlu0 %6908  ;;  %v7591_v8 = vld [vmem:[#allocation4 + $0x10] sm:$0xff] }
 0x958   : > { %6760 = vst.msk [vmem:[#allocation4 + $0x50] sm:$0xf] %vm2397_vm10, %v6685_v1  ;;  %7550 = vmatmul.msk.bf16.gmra.mxu1 %vm7128_vm4, %v7591_v8  ;;  %v6802_v1 = vld [vmem:[#allocation3 + $0x19a] sm:$0xff] }
 0x959   : > { %6984 = vst.msk [vmem:[#allocation4 + $0x50] sm:$0xf] %vm2622_vm11, %v6909_v38  ;;  %v6834_v8 = vpack.c.bf16 %v6802_v1, %v6802_v1 }
 0x95b   : > { %6668 = vrot.lane.b32.xlu2 %v6592_v4, %s7670_s17  ;;  %v6579_v4 = vld [vmem:[#allocation3 + $0x1a1] sm:$0xff] }
 0x95d   : > { %v6691_v9 = vpop.permute.xlu2 %6690  ;;  %6446 = vrot.lane.b32.xlu1 %v6369_v31, %s7669_s11  ;;  %6670 = vrot.lane.b32.xlu0 %v6593_v22, %s7670_s17 }
 0x95f   : > { %v6911_v17 = vpop.permute.xlu1 %6910  ;;  %v6435_v10 = vpop.permute.xlu0 %6434 }
 0x960   : > { %6985 = vst.msk [vmem:[#allocation4 + $0x54] sm:$0xf] %vm2622_vm11, %v6911_v17 }
 0x961   : > { %6523 = vst.msk [vmem:[#allocation4 + $0x1c] sm:$0xf] %vm2172_vm9, %v6435_v10  ;;  %v6341_v10 = vld [vmem:[#allocation3 + $0xf8] sm:$0xff] }
 0x962   : > { %6747 = vst.msk [vmem:[#allocation4 + $0x1c] sm:$0xf] %vm2397_vm10, %v6659_v56  ;;  %v6787_v56 = vld [vmem:[#allocation3 + $0xe2] sm:$0xff]  ;;  %v6373_v41 = vpack.c.bf16 %v6341_v10, %v6341_v10 }
 0x963   : > { %6894 = vrot.lane.b32.xlu2 %v6817_v6, %s7671_s20  ;;  %v6819_v50 = vpack.c.bf16 %v6787_v56, %v6787_v56 }
 0x965   : > { %v6437_v48 = vpop.permute.xlu2 %6436  ;;  %6892 = vrot.lane.b32.xlu1 %v10026_v33, %s7671_s20  ;;  %6252 = vrot.lane.b32.xlu0 %v6830_v32, %s7668_s10  ;;  %v6577_v33 = vld [vmem:[#allocation3 + $0x189] sm:$0xff] }
 0x966   : > { %6524 = vst.msk [vmem:[#allocation4 + $0x20] sm:$0xf] %vm2172_vm9, %v6437_v48  ;;  %v6609_v46 = vpack.c.bf16 %v6577_v33, %v6577_v33 }
 0x967   : > { %v6657_v21 = vpop.permute.xlu1 %6656  ;;  %v6881_v0 = vpop.permute.xlu0 %6880  ;;  %v7599_v49 = vld [vmem:[#allocation4 + $0x50] sm:$0xff] }
 0x968   : > { %6746 = vst.msk [vmem:[#allocation4 + $0x18] sm:$0xf] %vm2397_vm10, %v6657_v21  ;;  %7558 = vmatmul.msk.bf16.gmra.mxu3 %vm7128_vm4, %v7599_v49  ;;  %v6340_v21 = vld [vmem:[#allocation3 + $0xf0] sm:$0xff] }
 0x969   : > { %6970 = vst.msk [vmem:[#allocation4 + $0x18] sm:$0xf] %vm2622_vm11, %v6881_v0  ;;  %v6564_v0 = vld [vmem:[#allocation3 + $0xf1] sm:$0xff]  ;;  %v6372_v49 = vpack.c.bf16 %v6340_v21, %v6340_v21 }
 0x96b   : > { %6476 = vrot.lane.b32.xlu2 %v6384_v27, %s7669_s11  ;;  %v6596_v27 = vpack.c.bf16 %v6564_v0, %v6564_v0 }
 0x96d   : > { %v6663_v26 = vpop.permute.xlu2 %6662  ;;  %6254 = vrot.lane.b32.xlu1 %v6831_v44, %s7668_s10  ;;  %6478 = vrot.lane.b32.xlu0 %v6385_v19, %s7669_s11  ;;  %v6387_v44 = vpack.c.bf16 %v6355_v53, %v6355_v53  ;;  %v6788_v19 = vld [vmem:[#allocation3 + $0xf2] sm:$0xff] }
 0x96f   : > { %v6883_v24 = vpop.permute.xlu1 %6882  ;;  %v6467_v34 = vpop.permute.xlu0 %6466 }
 0x970   : > { %6971 = vst.msk [vmem:[#allocation4 + $0x1c] sm:$0xf] %vm2622_vm11, %v6883_v24 }
 0x971   : > { %6539 = vst.msk [vmem:[#allocation4 + $0x5c] sm:$0xf] %vm2172_vm9, %v6467_v34  ;;  %v6820_v34 = vpack.c.bf16 %v6788_v19, %v6788_v19 }
 0x972   : > { %6763 = vst.msk [vmem:[#allocation4 + $0x5c] sm:$0xf] %vm2397_vm10, %v6691_v9  ;;  %v6611_v9 = vpack.c.bf16 %v6579_v4, %v6579_v4 }
 0x973   : > { %6702 = vrot.lane.b32.xlu2 %v6609_v46, %s7670_s17 }
 0x975   : > { %v6245_v16 = vpop.permute.xlu2 %6244  ;;  %6700 = vrot.lane.b32.xlu1 %v6608_v11, %s7670_s17  ;;  %6924 = vrot.lane.b32.xlu0 %v6832_v58, %s7671_s20  ;;  %v6597_v11 = vpack.c.bf16 %v6565_v59, %v6565_v59 }
 0x976   : > { %6316 = vst.msk [vmem:[#allocation4 + $0x60] sm:$0xf] %vm1947_vm8, %v6245_v16 }
 0x977   : > { %v6689_v42 = vpop.permute.xlu1 %6688  ;;  %v6913_v39 = vpop.permute.xlu0 %6912  ;;  %v7592_v51 = vld [vmem:[#allocation4 + $0x18] sm:$0xff] }
 0x978   : > { %6762 = vst.msk [vmem:[#allocation4 + $0x58] sm:$0xf] %vm2397_vm10, %v6689_v42  ;;  %7551 = vmatmul.msk.bf16.gmra.mxu1 %vm7128_vm4, %v7592_v51 }
 0x979   : > { %6986 = vst.msk [vmem:[#allocation4 + $0x58] sm:$0xf] %vm2622_vm11, %v6913_v39 }
 0x97b   : > { %6448 = vrot.lane.b32.xlu2 %v6370_v54, %s7669_s11 }
 0x97d   : > { %v6471_v15 = vpop.permute.xlu2 %6470  ;;  %6926 = vrot.lane.b32.xlu1 %v6833_v18, %s7671_s20  ;;  %6450 = vrot.lane.b32.xlu0 %v6371_v45, %s7669_s11 }
 0x97f   : > { %v6915_v30 = vpop.permute.xlu1 %6914  ;;  %v6439_v43 = vpop.permute.xlu0 %6438 }
 0x980   : > { %6987 = vst.msk [vmem:[#allocation4 + $0x5c] sm:$0xf] %vm2622_vm11, %v6915_v30 }
 0x981   : > { %6525 = vst.msk [vmem:[#allocation4 + $0x24] sm:$0xf] %vm2172_vm9, %v6439_v43 }
 0x982   : > { %6749 = vst.msk [vmem:[#allocation4 + $0x24] sm:$0xf] %vm2397_vm10, %v6663_v26 }
 0x983   : > { %6674 = vrot.lane.b32.xlu2 %v6595_v29, %s7670_s17 }
 0x985   : > { %v6917_v61 = vpop.permute.xlu2 %6916  ;;  %6672 = vrot.lane.b32.xlu1 %v6594_v14, %s7670_s17  ;;  %6896 = vrot.lane.b32.xlu0 %v6818_v23, %s7671_s20 }
 0x987   : > { %v6661_v20 = vpop.permute.xlu1 %6660  ;;  %v6885_v62 = vpop.permute.xlu0 %6884  ;;  %v7600_v28 = vld [vmem:[#allocation4 + $0x58] sm:$0xff] }
 0x988   : > { %6748 = vst.msk [vmem:[#allocation4 + $0x20] sm:$0xf] %vm2397_vm10, %v6661_v20  ;;  %7559 = vmatmul.msk.bf16.gmra.mxu3 %vm7128_vm4, %v7600_v28 }
 0x989   : > { %6972 = vst.msk [vmem:[#allocation4 + $0x20] sm:$0xf] %vm2622_vm11, %v6885_v62 }
 0x98b   : > { %6256 = vrot.lane.b32.xlu2 %v6832_v58, %s7668_s10  ;;  %v6821_v58 = vpack.c.bf16 %v6789_v52, %v6789_v52 }
 0x98d   : > { %v6443_v55 = vpop.permute.xlu2 %6442  ;;  %6898 = vrot.lane.b32.xlu1 %v6819_v50, %s7671_s20  ;;  %6258 = vrot.lane.b32.xlu0 %v6833_v18, %s7668_s10 }
 0x98e   : > { %6527 = vst.msk [vmem:[#allocation4 + $0x2c] sm:$0xf] %vm2172_vm9, %v6443_v55 }
 0x98f   : > { %v6887_v32 = vpop.permute.xlu1 %6886  ;;  %v6247_v3 = vpop.permute.xlu0 %6246 }
 0x990   : > { %6973 = vst.msk [vmem:[#allocation4 + $0x24] sm:$0xf] %vm2622_vm11, %v6887_v32 }
 0x991   : > { %6317 = vst.msk [vmem:[#allocation4 + $0x64] sm:$0xf] %vm1947_vm8, %v6247_v3 }
 0x992   : > { %6541 = vst.msk [vmem:[#allocation4 + $0x64] sm:$0xf] %vm2172_vm9, %v6471_v15 }
 0x993   : > { %6482 = vrot.lane.b32.xlu2 %v6387_v44, %s7669_s11 }
 0x995   : > { %v6889_v38 = vpop.permute.xlu2 %6888  ;;  %6480 = vrot.lane.b32.xlu1 %v6386_v47, %s7669_s11  ;;  %6704 = vrot.lane.b32.xlu0 %v6610_v60, %s7670_s17 }
 0x997   : > { %v6469_v13 = vpop.permute.xlu1 %6468  ;;  %v6693_v31 = vpop.permute.xlu0 %6692  ;;  %v7593_v22 = vld [vmem:[#allocation4 + $0x20] sm:$0xff] }
 0x998   : > { %6540 = vst.msk [vmem:[#allocation4 + $0x60] sm:$0xf] %vm2172_vm9, %v6469_v13  ;;  %7552 = vmatmul.msk.bf16.gmra.mxu1 %vm7128_vm4, %v7593_v22 }
 0x999   : > { %6764 = vst.msk [vmem:[#allocation4 + $0x60] sm:$0xf] %vm2397_vm10, %v6693_v31 }
 0x99a   : > { %6988 = vst.msk [vmem:[#allocation4 + $0x60] sm:$0xf] %vm2622_vm11, %v6917_v61 }
 0x99b   : > { %6928 = vrot.lane.b32.xlu2 %v6834_v8, %s7671_s20 }
 0x99d   : > { %v6251_v17 = vpop.permute.xlu2 %6250  ;;  %6706 = vrot.lane.b32.xlu1 %v6611_v9, %s7670_s17  ;;  %6930 = vrot.lane.b32.xlu0 %v6835_v25, %s7671_s20 }
 0x99e   : > { %6319 = vst.msk [vmem:[#allocation4 + $0x6c] sm:$0xf] %vm1947_vm8, %v6251_v17 }
 0x99f   : > { %v6695_v6 = vpop.permute.xlu1 %6694  ;;  %v6919_v48 = vpop.permute.xlu0 %6918 }
 0x9a0   : > { %6765 = vst.msk [vmem:[#allocation4 + $0x64] sm:$0xf] %vm2397_vm10, %v6695_v6 }
 0x9a1   : > { %6989 = vst.msk [vmem:[#allocation4 + $0x64] sm:$0xf] %vm2622_vm11, %v6919_v48 }
 0x9a3   : > { %6454 = vrot.lane.b32.xlu2 %v6373_v41, %s7669_s11 }
 0x9a5   : > { %v6697_v37 = vpop.permute.xlu2 %6696  ;;  %6452 = vrot.lane.b32.xlu1 %v6372_v49, %s7669_s11  ;;  %6676 = vrot.lane.b32.xlu0 %v6596_v27, %s7670_s17  ;;  %v7190_v26 = vpop.f32.mrf.mxu1 }
 0x9a6   : > { %7270 = vst.msk [vmem:[%s10304_s28] sm:$0xff] %vm327_vm0, %v7190_v26 }
 0x9a7   : > { %v6441_v33 = vpop.permute.xlu1 %6440  ;;  %v6665_v24 = vpop.permute.xlu0 %6664 }
 0x9a8   : > { %6526 = vst.msk [vmem:[#allocation4 + $0x28] sm:$0xf] %vm2172_vm9, %v6441_v33  ;;  %v7601_v46 = vld [vmem:[#allocation4 + $0x60] sm:$0xff] }
 0x9a9   : > { %6750 = vst.msk [vmem:[#allocation4 + $0x28] sm:$0xf] %vm2397_vm10, %v6665_v24  ;;  %7560 = vmatmul.msk.bf16.gmra.mxu3 %vm7128_vm4, %v7601_v46 }
 0x9aa   : > { %6974 = vst.msk [vmem:[#allocation4 + $0x28] sm:$0xf] %vm2622_vm11, %v6889_v38 }
 0x9ab   : > { %6900 = vrot.lane.b32.xlu2 %v6820_v34, %s7671_s20 }
 0x9ad   : > { %v6923_v16 = vpop.permute.xlu2 %6922  ;;  %6678 = vrot.lane.b32.xlu1 %v6597_v11, %s7670_s17  ;;  %6902 = vrot.lane.b32.xlu0 %v6821_v58, %s7671_s20  ;;  %v7192_v57 = vpop.f32.mrf.mxu1 }
 0x9ae   : > { %7271 = vst.msk [vmem:[%s10304_s28 + $0x8] sm:$0xff] %vm327_vm0, %v7192_v57 }
 0x9af   : > { %v6667_v42 = vpop.permute.xlu1 %6666  ;;  %v6891_v39 = vpop.permute.xlu0 %6890 }
 0x9b0   : > { %6751 = vst.msk [vmem:[#allocation4 + $0x2c] sm:$0xf] %vm2397_vm10, %v6667_v42 }
 0x9b1   : > { %6975 = vst.msk [vmem:[#allocation4 + $0x2c] sm:$0xf] %vm2622_vm11, %v6891_v39 }
 0x9b5   : > { %v6669_v51 = vpop.permute.xlu2 %6668  ;;  %v7195_v54 = vpop.f32.mrf.mxu1 }
 0x9b6   : > { %7272 = vst.msk [vmem:[%s10304_s28 + $0x10] sm:$0xff] %vm327_vm0, %v7195_v54 }
 0x9b7   : > { %v6249_v7 = vpop.permute.xlu1 %6248  ;;  %v6473_v40 = vpop.permute.xlu0 %6472 }
 0x9b8   : > { %6318 = vst.msk [vmem:[#allocation4 + $0x68] sm:$0xf] %vm1947_vm8, %v6249_v7  ;;  %v7594_v18 = vld [vmem:[#allocation4 + $0x28] sm:$0xff] }
 0x9b9   : > { %6542 = vst.msk [vmem:[#allocation4 + $0x68] sm:$0xf] %vm2172_vm9, %v6473_v40  ;;  %7553 = vmatmul.msk.bf16.gmra.mxu1 %vm7128_vm4, %v7594_v18 }
 0x9ba   : > { %6766 = vst.msk [vmem:[#allocation4 + $0x68] sm:$0xf] %vm2397_vm10, %v6697_v37 }
 0x9bd   : > { %v6895_v45 = vpop.permute.xlu2 %6894  ;;  %v7197_v15 = vpop.f32.mrf.mxu1 }
 0x9be   : > { %7273 = vst.msk [vmem:[%s10304_s28 + $0x18] sm:$0xff] %vm327_vm0, %v7197_v15 }
 0x9bf   : > { %v6475_v36 = vpop.permute.xlu1 %6474  ;;  %v6699_v30 = vpop.permute.xlu0 %6698 }
 0x9c0   : > { %6543 = vst.msk [vmem:[#allocation4 + $0x6c] sm:$0xf] %vm2172_vm9, %v6475_v36 }
 0x9c1   : > { %6767 = vst.msk [vmem:[#allocation4 + $0x6c] sm:$0xf] %vm2397_vm10, %v6699_v30 }
 0x9c2   : > { %6991 = vst.msk [vmem:[#allocation4 + $0x6c] sm:$0xf] %vm2622_vm11, %v6923_v16 }
 0x9c5   : > { %v6477_v43 = vpop.permute.xlu2 %6476 }
 0x9c7   : > { %v6921_v29 = vpop.permute.xlu1 %6920  ;;  %v6445_v63 = vpop.permute.xlu0 %6444 }
 0x9c8   : > { %6990 = vst.msk [vmem:[#allocation4 + $0x68] sm:$0xf] %vm2622_vm11, %v6921_v29 }
 0x9c9   : > { %6528 = vst.msk [vmem:[#allocation4 + $0x30] sm:$0xf] %vm2172_vm9, %v6445_v63 }
 0x9ca   : > { %6752 = vst.msk [vmem:[#allocation4 + $0x30] sm:$0xf] %vm2397_vm10, %v6669_v51 }
 0x9cb   : > { %v7235_v14 = vpop.f32.mrf.mxu3 }
 0x9cc   : > { %7288 = vst.msk [vmem:[%s10304_s28 + $0x90] sm:$0xff] %vm327_vm0, %v7235_v14 }
 0x9cd   : > { %v6703_v2 = vpop.permute.xlu2 %6702 }
 0x9cf   : > { %v6447_v23 = vpop.permute.xlu1 %6446  ;;  %v6671_v61 = vpop.permute.xlu0 %6670  ;;  %v7602_v20 = vld [vmem:[#allocation4 + $0x68] sm:$0xff] }
 0x9d0   : > { %6529 = vst.msk [vmem:[#allocation4 + $0x34] sm:$0xf] %vm2172_vm9, %v6447_v23  ;;  %7561 = vmatmul.msk.bf16.gmra.mxu3 %vm7128_vm4, %v7602_v20 }
 0x9d1   : > { %6753 = vst.msk [vmem:[#allocation4 + $0x34] sm:$0xf] %vm2397_vm10, %v6671_v61 }
 0x9d2   : > { %6977 = vst.msk [vmem:[#allocation4 + $0x34] sm:$0xf] %vm2622_vm11, %v6895_v45 }
 0x9d3   : > { %v7237_v28 = vpop.f32.mrf.mxu3 }
 0x9d4   : > { %7289 = vst.msk [vmem:[%s10304_s28 + $0x98] sm:$0xff] %vm327_vm0, %v7237_v28 }
 0x9d5   : > { %v6449_v62 = vpop.permute.xlu2 %6448  ;;  %v7200_v56 = vpop.f32.mrf.mxu1 }
 0x9d6   : > { %6530 = vst.msk [vmem:[#allocation4 + $0x38] sm:$0xf] %vm2172_vm9, %v6449_v62 }
 0x9d7   : > { %v6893_v50 = vpop.permute.xlu1 %6892  ;;  %v6253_v53 = vpop.permute.xlu0 %6252  ;;  %7274 = vst.msk [vmem:[%s10304_s28 + $0x20] sm:$0xff] %vm327_vm0, %v7200_v56 }
 0x9d8   : > { %6976 = vst.msk [vmem:[#allocation4 + $0x30] sm:$0xf] %vm2622_vm11, %v6893_v50 }
 0x9d9   : > { %6320 = vst.msk [vmem:[#allocation4 + $0x70] sm:$0xf] %vm1947_vm8, %v6253_v53 }
 0x9da   : > { %6544 = vst.msk [vmem:[#allocation4 + $0x70] sm:$0xf] %vm2172_vm9, %v6477_v43 }
 0x9dd   : > { %v6675_v55 = vpop.permute.xlu2 %6674  ;;  %v7202_v44 = vpop.f32.mrf.mxu1 }
 0x9de   : > { %7275 = vst.msk [vmem:[%s10304_s28 + $0x28] sm:$0xff] %vm327_vm0, %v7202_v44 }
 0x9df   : > { %v6255_v5 = vpop.permute.xlu1 %6254  ;;  %v6479_v35 = vpop.permute.xlu0 %6478  ;;  %v7595_v32 = vld [vmem:[#allocation4 + $0x30] sm:$0xff] }
 0x9e0   : > { %6321 = vst.msk [vmem:[#allocation4 + $0x74] sm:$0xf] %vm1947_vm8, %v6255_v5  ;;  %7554 = vmatmul.msk.bf16.gmra.mxu1 %vm7128_vm4, %v7595_v32 }
 0x9e1   : > { %6545 = vst.msk [vmem:[#allocation4 + $0x74] sm:$0xf] %vm2172_vm9, %v6479_v35 }
 0x9e2   : > { %6769 = vst.msk [vmem:[#allocation4 + $0x74] sm:$0xf] %vm2397_vm10, %v6703_v2 }
 0x9e5   : > { %v6257_v3 = vpop.permute.xlu2 %6256 }
 0x9e6   : > { %6322 = vst.msk [vmem:[#allocation4 + $0x78] sm:$0xf] %vm1947_vm8, %v6257_v3 }
 0x9e7   : > { %v6701_v47 = vpop.permute.xlu1 %6700  ;;  %v6925_v60 = vpop.permute.xlu0 %6924 }
 0x9e8   : > { %6768 = vst.msk [vmem:[#allocation4 + $0x70] sm:$0xf] %vm2397_vm10, %v6701_v47 }
 0x9e9   : > { %6992 = vst.msk [vmem:[#allocation4 + $0x70] sm:$0xf] %vm2622_vm11, %v6925_v60 }
 0x9eb   : > { %v7240_v38 = vpop.f32.mrf.mxu3 }
 0x9ec   : > { %7290 = vst.msk [vmem:[%s10304_s28 + $0xa0] sm:$0xff] %vm327_vm0, %v7240_v38 }
 0x9ed   : > { %v6483_v1 = vpop.permute.xlu2 %6482 }
 0x9ef   : > { %v6927_v8 = vpop.permute.xlu1 %6926  ;;  %v6451_v4 = vpop.permute.xlu0 %6450 }
 0x9f0   : > { %6993 = vst.msk [vmem:[#allocation4 + $0x74] sm:$0xf] %vm2622_vm11, %v6927_v8 }
 0x9f1   : > { %6531 = vst.msk [vmem:[#allocation4 + $0x3c] sm:$0xf] %vm2172_vm9, %v6451_v4 }
 0x9f2   : > { %6755 = vst.msk [vmem:[#allocation4 + $0x3c] sm:$0xf] %vm2397_vm10, %v6675_v55 }
 0x9f3   : > { %v7242_v13 = vpop.f32.mrf.mxu3 }
 0x9f4   : > { %7291 = vst.msk [vmem:[%s10304_s28 + $0xa8] sm:$0xff] %vm327_vm0, %v7242_v13 }
 0x9f5   : > { %v6929_v12 = vpop.permute.xlu2 %6928  ;;  %v7205_v31 = vpop.f32.mrf.mxu1 }
 0x9f6   : > { %7276 = vst.msk [vmem:[%s10304_s28 + $0x30] sm:$0xff] %vm327_vm0, %v7205_v31 }
 0x9f7   : > { %v6673_v22 = vpop.permute.xlu1 %6672  ;;  %v6897_v9 = vpop.permute.xlu0 %6896  ;;  %v7603_v25 = vld [vmem:[#allocation4 + $0x70] sm:$0xff] }
 0x9f8   : > { %6754 = vst.msk [vmem:[#allocation4 + $0x38] sm:$0xf] %vm2397_vm10, %v6673_v22  ;;  %7562 = vmatmul.msk.bf16.gmra.mxu3 %vm7128_vm4, %v7603_v25 }
 0x9f9   : > { %6978 = vst.msk [vmem:[#allocation4 + $0x38] sm:$0xf] %vm2622_vm11, %v6897_v9 }
 0x9fd   : > { %v6455_v17 = vpop.permute.xlu2 %6454  ;;  %v7207_v10 = vpop.f32.mrf.mxu1 }
 0x9fe   : > { %6533 = vst.msk [vmem:[#allocation4 + $0x44] sm:$0xf] %vm2172_vm9, %v6455_v17 }
 0x9ff   : > { %v6899_v6 = vpop.permute.xlu1 %6898  ;;  %v6259_v48 = vpop.permute.xlu0 %6258  ;;  %7277 = vst.msk [vmem:[%s10304_s28 + $0x38] sm:$0xff] %vm327_vm0, %v7207_v10 }
 0xa00   : > { %6979 = vst.msk [vmem:[#allocation4 + $0x3c] sm:$0xf] %vm2622_vm11, %v6899_v6 }
 0xa01   : > { %6323 = vst.msk [vmem:[#allocation4 + $0x7c] sm:$0xf] %vm1947_vm8, %v6259_v48 }
 0xa02   : > { %6547 = vst.msk [vmem:[#allocation4 + $0x7c] sm:$0xf] %vm2172_vm9, %v6483_v1 }
 0xa05   : > { %v6901_v46 = vpop.permute.xlu2 %6900 }
 0xa07   : > { %v6481_v41 = vpop.permute.xlu1 %6480  ;;  %v6705_v21 = vpop.permute.xlu0 %6704  ;;  %v7596_v0 = vld [vmem:[#allocation4 + $0x38] sm:$0xff] }
 0xa08   : > { %6546 = vst.msk [vmem:[#allocation4 + $0x78] sm:$0xf] %vm2172_vm9, %v6481_v41  ;;  %7555 = vmatmul.msk.bf16.gmra.mxu1 %vm7128_vm4, %v7596_v0 }
 0xa09   : > { %6770 = vst.msk [vmem:[#allocation4 + $0x78] sm:$0xf] %vm2397_vm10, %v6705_v21 }
 0xa0a   : > { %6994 = vst.msk [vmem:[#allocation4 + $0x78] sm:$0xf] %vm2622_vm11, %v6929_v12 }
 0xa0b   : > { %v7245_v49 = vpop.f32.mrf.mxu3 }
 0xa0c   : > { %7292 = vst.msk [vmem:[%s10304_s28 + $0xb0] sm:$0xff] %vm327_vm0, %v7245_v49 }
 0xa0f   : > { %v6707_v27 = vpop.permute.xlu1 %6706  ;;  %v6931_v37 = vpop.permute.xlu0 %6930 }
 0xa10   : > { %6771 = vst.msk [vmem:[#allocation4 + $0x7c] sm:$0xf] %vm2397_vm10, %v6707_v27 }
 0xa11   : > { %6995 = vst.msk [vmem:[#allocation4 + $0x7c] sm:$0xf] %vm2622_vm11, %v6931_v37 }
 0xa13   : > { %v7247_v19 = vpop.f32.mrf.mxu3 }
 0xa14   : > { %7293 = vst.msk [vmem:[%s10304_s28 + $0xb8] sm:$0xff] %vm327_vm0, %v7247_v19 }
 0xa15   : > { %v7210_v26 = vpop.f32.mrf.mxu1 }
 0xa16   : > { %7278 = vst.msk [vmem:[%s10304_s28 + $0x40] sm:$0xff] %vm327_vm0, %v7210_v26 }
 0xa17   : > { %v6453_v33 = vpop.permute.xlu1 %6452  ;;  %v6677_v24 = vpop.permute.xlu0 %6676 }
 0xa18   : > { %6532 = vst.msk [vmem:[#allocation4 + $0x40] sm:$0xf] %vm2172_vm9, %v6453_v33  ;;  %v7604_v34 = vld [vmem:[#allocation4 + $0x78] sm:$0xff] }
 0xa19   : > { %6756 = vst.msk [vmem:[#allocation4 + $0x40] sm:$0xf] %vm2397_vm10, %v6677_v24  ;;  %7563 = vmatmul.msk.bf16.gmra.mxu3 %vm7128_vm4, %v7604_v34 }
 0xa1a   : > { %6980 = vst.msk [vmem:[#allocation4 + $0x40] sm:$0xf] %vm2622_vm11, %v6901_v46 }
 0xa1d   : > { %v7212_v59 = vpop.f32.mrf.mxu1 }
 0xa1e   : > { %7279 = vst.msk [vmem:[%s10304_s28 + $0x48] sm:$0xff] %vm327_vm0, %v7212_v59 }
 0xa1f   : > { %v6679_v52 = vpop.permute.xlu1 %6678  ;;  %v6903_v11 = vpop.permute.xlu0 %6902 }
 0xa20   : > { %6757 = vst.msk [vmem:[#allocation4 + $0x44] sm:$0xf] %vm2397_vm10, %v6679_v52 }
 0xa21   : > { %6981 = vst.msk [vmem:[#allocation4 + $0x44] sm:$0xf] %vm2622_vm11, %v6903_v11 }
 0xa28   : > { %v7597_v58 = vld [vmem:[#allocation4 + $0x40] sm:$0xff] }
 0xa29   : > { %7556 = vmatmul.msk.bf16.gmra.mxu1 %vm7128_vm4, %v7597_v58 }
 0xa2c   : > { %v7250_v16 = vpop.f32.mrf.mxu3 }
 0xa2d   : > { %7294 = vst.msk [vmem:[%s10304_s28 + $0xc0] sm:$0xff] %vm327_vm0, %v7250_v16 }
 0xa34   : > { %v7252_v57 = vpop.f32.mrf.mxu3 }
 0xa35   : > { %7295 = vst.msk [vmem:[%s10304_s28 + $0xc8] sm:$0xff] %vm327_vm0, %v7252_v57 }
 0xa36   : > { %v7215_v42 = vpop.f32.mrf.mxu1 }
 0xa37   : > { %7280 = vst.msk [vmem:[%s10304_s28 + $0x50] sm:$0xff] %vm327_vm0, %v7215_v42 }
 0xa3e   : > { %v7217_v39 = vpop.f32.mrf.mxu1 }
 0xa3f   : > { %7281 = vst.msk [vmem:[%s10304_s28 + $0x58] sm:$0xff] %vm327_vm0, %v7217_v39 }
 0xa53   : > { %v7255_v51 = vpop.f32.mrf.mxu3 }
 0xa54   : > { %7296 = vst.msk [vmem:[%s10304_s28 + $0xd0] sm:$0xff] %vm327_vm0, %v7255_v51 }
 0xa5b   : > { %v7257_v54 = vpop.f32.mrf.mxu3 }
 0xa5c   : > { %7297 = vst.msk [vmem:[%s10304_s28 + $0xd8] sm:$0xff] %vm327_vm0, %v7257_v54 }
 0xa5d   : > { %v7220_v7 = vpop.f32.mrf.mxu1 }
 0xa5e   : > { %7282 = vst.msk [vmem:[%s10304_s28 + $0x60] sm:$0xff] %vm327_vm0, %v7220_v7 }
 0xa65   : > { %v7222_v40 = vpop.f32.mrf.mxu1 }
 0xa66   : > { %7283 = vst.msk [vmem:[%s10304_s28 + $0x68] sm:$0xff] %vm327_vm0, %v7222_v40 }
 0xa7b   : > { %v7260_v18 = vpop.f32.mrf.mxu3 }
 0xa7c   : > { %7298 = vst.msk [vmem:[%s10304_s28 + $0xe0] sm:$0xff] %vm327_vm0, %v7260_v18 }
 0xa83   : > { %v7262_v45 = vpop.f32.mrf.mxu3 }
 0xa84   : > { %7299 = vst.msk [vmem:[%s10304_s28 + $0xe8] sm:$0xff] %vm327_vm0, %v7262_v45 }
 0xa85   : > { %v7225_v15 = vpop.f32.mrf.mxu1 }
 0xa86   : > { %7284 = vst.msk [vmem:[%s10304_s28 + $0x70] sm:$0xff] %vm327_vm0, %v7225_v15 }
 0xa8d   : > { %v7227_v36 = vpop.f32.mrf.mxu1 }
 0xa8e   : > { %7285 = vst.msk [vmem:[%s10304_s28 + $0x78] sm:$0xff] %vm327_vm0, %v7227_v36 }
 0xa9c   : > { %v7265_v30 = vpop.f32.mrf.mxu3 }
 0xa9d   : > { %7300 = vst.msk [vmem:[%s10304_s28 + $0xf0] sm:$0xff] %vm327_vm0, %v7265_v30 }
 0xaa4   : > { %v7267_v43 = vpop.f32.mrf.mxu3 }
 0xaa5   : > { %7301 = vst.msk [vmem:[%s10304_s28 + $0xf8] sm:$0xff] %vm327_vm0, %v7267_v43 }
 0xaa6   : > { %v7230_v29 = vpop.f32.mrf.mxu1 }
 0xaa7   : > { %7286 = vst.msk [vmem:[%s10304_s28 + $0x80] sm:$0xff] %vm327_vm0, %v7230_v29 }
 0xaae   : > { %v7232_v63 = vpop.f32.mrf.mxu1 }
 0xaaf   : > { %7287 = vst.msk [vmem:[%s10304_s28 + $0x88] sm:$0xff] %vm327_vm0, %v7232_v63 }
 0xab0 PF: > { %s18_s27 = sadd.s32 1, %s7660_s27  }
 0xab1   : > { %p15_p4 = scmp.ge.s32.totalorder %s18_s27, 4  }
 0xab3   :  { %17 = sbr.rel (!%p15_p4) target bundleno = 1 (0x1), region = 91 }

</bundles_post_ra>
